<compile_context>
chip_gen: v5e
topology: v5e:2x2
jax: 0.10.0
libtpu: 0.0.40
codegen_flags: <defaults>
</compile_context>

<pallas_src>
import functools
import math

import jax
import jax.numpy as jnp
import numpy as np
from jax import lax
from jax.experimental import pallas as pl
from jax.experimental.pallas import tpu as pltpu


# --------------------------------------------------------------------------- #
# Host-side parameter folding: grouped-conv structure, the score scale and the
# torch view/transpose scramble all become small dense matrices.
# --------------------------------------------------------------------------- #
def _build_fused_params(params, num_heads, head_dim, seq_len):
    E = num_heads * head_dim
    S = seq_len
    ES = E * S
    scale = 1.0 / math.sqrt(head_dim)
    f32 = jnp.float32

    idx = np.arange(ES)
    # attention-slab order (projection output channels / kernel lanes):
    #   r = (g*S + s)*hd + d
    r_g = idx // (S * head_dim)
    r_s = (idx // head_dim) % S
    r_d = idx % head_dim
    # natural (E, S) channel order of x / y (projection input channels):
    #   c = (g*hd + i)*S + s
    c_g = idx // (head_dim * S)
    c_i = (idx // S) % head_dim
    c_s = idx % S

    same_gs = jnp.asarray(
        (r_g[:, None] == c_g[None, :]) & (r_s[:, None] == c_s[None, :]), dtype=f32)

    def expand(w):  # grouped-conv weight (nh, hd_out, hd_in) -> dense (ES, ES)
        return w[r_g[:, None], r_d[:, None], c_i[None, :]].astype(f32) * same_gs

    wq = expand(params["wq"]) * scale                  # score scale folded into Q
    wk = expand(params["wk"])
    wv = expand(params["wv"])
    bq = params["bq"][r_g, r_d, 0].astype(f32) * scale  # (ES,)
    bk = params["bk"][r_g, r_d, 0].astype(f32)
    bv = params["bv"][r_g, r_d, 0].astype(f32)

    # Single (3*(ES+1), ES) QKV weight: per projection [W^T ; bias-row]; the
    # bias row is picked up by a ones-column in the block-diagonal LHS, so the
    # whole projection incl. biases is ONE matmul per grid step.
    def wblock(w, b):
        return jnp.concatenate([w.T, b[None, :]], axis=0)            # (ES+1, ES)

    w_qkv = jnp.concatenate([wblock(wq, bq), wblock(wk, bk), wblock(wv, bv)],
                            axis=0)                                   # (3*(ES+1), ES)

    # fc_out folded with torch's
    #   out.transpose(2,3).contiguous().view(B, S, -1, H, W).transpose(1, 2)
    # rows ro = o*S + s' (natural (E,S) output order), cols = slab order r.
    ro_o = idx // S
    ro_s = idx % S
    flat_gds = r_g * (head_dim * S) + r_d * S + r_s   # torch-contig index of slab r
    e_mat = flat_gds[None, :] - ro_s[:, None] * E
    valid = (e_mat >= 0) & (e_mat < E)
    wo = params["wo"].astype(f32)
    wfc = jnp.where(jnp.asarray(valid),
                    wo[ro_o[:, None], np.clip(e_mat, 0, E - 1)], 0.0)  # (ES, ES)
    bfc = params["bo"][ro_o].astype(f32)                               # (ES, 1)
    return w_qkv, wfc, bfc


def _build_blockdiag_lhs(x, y):
    """Block-diagonal projection LHS so Q(x), K(y), V(y) are ONE matmul whose
    result splits along the (sublane) row axis -- no in-kernel lane splits.
    V uses the (w, h)-ordered copy of y so its rows land directly in the layout
    the attention PV product needs."""
    B, E, S, H, W = x.shape
    ES, HW = E * S, H * W
    dt = x.dtype
    x_t = x.reshape(B, ES, HW).transpose(0, 2, 1)                    # rows h*W + w
    y_t = y.reshape(B, ES, HW).transpose(0, 2, 1)                    # rows h*W + w
    y_wh = y.reshape(B, ES, H, W).transpose(0, 3, 2, 1).reshape(B, HW, ES)  # rows w*H + h
    one = jnp.ones((B, HW, 1), dt)
    z = jnp.zeros((B, HW, ES + 1), dt)

    def aug(t):                     # append ones column -> picks up the bias row
        return jnp.concatenate([t, one], axis=-1)

    row_q = jnp.concatenate([aug(x_t), z, z], axis=-1)
    row_k = jnp.concatenate([z, aug(y_t), z], axis=-1)
    row_v = jnp.concatenate([z, z, aug(y_wh)], axis=-1)
    return jnp.concatenate([row_q, row_k, row_v], axis=1)            # (B, 3*HW, 3*(ES+1))


# --------------------------------------------------------------------------- #
# Single fused kernel: QKV projection -> spatial attention -> fc_out -> +x.
# --------------------------------------------------------------------------- #
def _mha_kernel(lhs_ref, wqkv_ref, wfc_ref, bfc_ref, xres_ref,
                out_ref, attn_ref, val_ref, *, H, W):
    HW = H * W
    f32 = jnp.float32

    # (1) Fused Q/K/V projection (+biases via ones-columns): one MXU matmul.
    qkv = jnp.dot(lhs_ref[0], wqkv_ref[...], preferred_element_type=f32)  # (3*HW, ES)
    q_t = qkv[0:HW]               # rows h*W+w, lanes = slab r (scale already folded)
    k_flat = qkv[HW:2 * HW]       # rows g*W+w
    v_flat = qkv[2 * HW:3 * HW]   # rows w*H+g

    # Layout-preserving regroups via sublane-aligned slices + leading-dim stacks
    # (keeps everything on well-supported ops; no minor-dim value reshapes).
    k3 = jnp.stack([k_flat[g * W:(g + 1) * W] for g in range(H)], axis=0)  # (H, W, ES)
    v3 = jnp.stack([v_flat[w * H:(w + 1) * H] for w in range(W)], axis=0)  # (W, H, ES)

    # (2) Spatial attention per channel slab on the VPU (channels on lanes),
    #     unrolled over the H query rows to keep intermediates tiny.
    p_rows = []
    o_rows = []
    for h in range(H):
        q_h = q_t[h * W:(h + 1) * W]                         # (W, ES)
        s_h = jnp.sum(q_h[None] * k3, axis=1)                # (H, ES)  scores[h, :, :]
        m_h = jnp.max(s_h, axis=0, keepdims=True)
        e_h = jnp.exp(s_h - m_h)
        d_h = jnp.sum(e_h, axis=0, keepdims=True)
        # full-precision reciprocal keeps the 2e-4 parity check tight
        p_h = e_h * pl.reciprocal(d_h, approx=False)         # (H, ES)
        o_h = jnp.sum(p_h[None] * v3, axis=1)                # (W, ES)  out[h, :, :]
        p_rows.append(p_h)
        o_rows.append(o_h)

    attn_ref[0] = jnp.concatenate(p_rows, axis=0).astype(attn_ref.dtype)  # (H*H, ES)
    val_ref[0] = v_flat.astype(val_ref.dtype)                             # (W*H, ES)

    # (3) fc_out (torch view-scramble folded into wfc) + residual.  A @ B^T
    #     dot_general puts the spatial axis (HW) on the lanes -> lane-dense store.
    o_flat = jnp.concatenate(o_rows, axis=0)                              # (HW, ES)
    out = lax.dot_general(wfc_ref[...], o_flat,
                          (((1,), (1,)), ((), ())),
                          preferred_element_type=f32)                      # (ES, HW)
    out_ref[0] = (out + bfc_ref[...] + xres_ref[0]).astype(out_ref.dtype)


# --------------------------------------------------------------------------- #
# Full forward.
# --------------------------------------------------------------------------- #
@functools.partial(jax.jit, static_argnames=("num_heads",))
def multihead_attention_forward(x, y, params, num_heads):
    """x, y: (B, E, S, H, W). Returns (out, attention_weights, value)."""
    B, E, S, H, W = x.shape
    hd = E // num_heads
    ES, HW = E * S, H * W

    w_qkv, wfc, bfc = _build_fused_params(params, num_heads, hd, S)
    lhs = _build_blockdiag_lhs(x, y)                    # (B, 3*HW, 3*(ES+1))
    x_res = x.reshape(B, ES, HW)

    kern = functools.partial(_mha_kernel, H=H, W=W)
    out_rows, attn_raw, val_raw = pl.pallas_call(
        kern,
        out_shape=(
            jax.ShapeDtypeStruct((B, ES, HW), x.dtype),       # lane-dense main out
            jax.ShapeDtypeStruct((B, H * H, ES), jnp.float32),
            jax.ShapeDtypeStruct((B, HW, ES), x.dtype),
        ),
        grid=(B,),
        in_specs=[
            pl.BlockSpec((1, 3 * HW, 3 * (ES + 1)), lambda b: (b, 0, 0)),
            # constant-index weight blocks: ~25 KiB total, VMEM-resident
            pl.BlockSpec((3 * (ES + 1), ES), lambda b: (0, 0)),
            pl.BlockSpec((ES, ES), lambda b: (0, 0)),
            pl.BlockSpec((ES, 1), lambda b: (0, 0)),
            pl.BlockSpec((1, ES, HW), lambda b: (b, 0, 0)),
        ],
        out_specs=(
            pl.BlockSpec((1, ES, HW), lambda b: (b, 0, 0)),
            pl.BlockSpec((1, H * H, ES), lambda b: (b, 0, 0)),
            pl.BlockSpec((1, HW, ES), lambda b: (b, 0, 0)),
        ),
        # "parallel" lets v7x split the batch across its two TensorCores; on
        # single-core v5e/v6e the extra ~0.35us/step is accepted for simplicity.
        compiler_params=pltpu.CompilerParams(dimension_semantics=("parallel",)),
    )(lhs, w_qkv, wfc, bfc, x_res)

    out = out_rows.reshape(B, E, S, H, W)
    attn = (attn_raw.reshape(B, H, H, ES).transpose(0, 3, 1, 2)
            .reshape(B, num_heads, S, hd, H, H))
    value = (val_raw.reshape(B, W, H, ES).transpose(0, 3, 2, 1)
             .reshape(B, num_heads, S, hd, H, W))
    # TODO(synk): optional `mask` argument (masked_fill_) not implemented; this
    # matches the mask=None path only.
    return out, attn, value


# --------------------------------------------------------------------------- #
# Pure-JAX reference (mirrors the PyTorch forward, incl. the .view scramble).
# --------------------------------------------------------------------------- #
def reference(x, y, params, num_heads):
    B, E, S, H, W = x.shape
    hd = E // num_heads
    xg = x.reshape(B, num_heads, hd, S, H, W)
    yg = y.reshape(B, num_heads, hd, S, H, W)

    def proj(t, w, b):
        o = jnp.einsum("goi,bgishw->bgoshw", w, t) + b.reshape(1, num_heads, hd, 1, 1, 1)
        return o.transpose(0, 1, 3, 2, 4, 5)

    q = proj(xg, params["wq"], params["bq"])
    k = proj(yg, params["wk"], params["bk"])
    v = proj(yg, params["wv"], params["bv"])
    scores = jnp.einsum("...hw,...gw->...hg", q, k) / math.sqrt(hd)
    attn = jax.nn.softmax(scores, axis=-1)
    out = jnp.einsum("...hg,...gw->...hw", attn, v)
    out_view = out.transpose(0, 1, 3, 2, 4, 5).reshape(B, S, E, H, W)
    fc_in = out_view.transpose(0, 2, 1, 3, 4)
    o = (jnp.einsum("oi,bishw->boshw", params["wo"], fc_in)
         + params["bo"].reshape(1, E, 1, 1, 1) + x)
    return o, attn, v


def _make_params(key, embed_dim, num_heads):
    hd = embed_dim // num_heads
    ks = jax.random.split(key, 8)
    return {
        "wq": 0.2 * jax.random.normal(ks[0], (num_heads, hd, hd), jnp.float32),
        "bq": 0.1 * jax.random.normal(ks[1], (num_heads, hd, 1), jnp.float32),
        "wk": 0.2 * jax.random.normal(ks[2], (num_heads, hd, hd), jnp.float32),
        "bk": 0.1 * jax.random.normal(ks[3], (num_heads, hd, 1), jnp.float32),
        "wv": 0.2 * jax.random.normal(ks[4], (num_heads, hd, hd), jnp.float32),
        "bv": 0.1 * jax.random.normal(ks[5], (num_heads, hd, 1), jnp.float32),
        "wo": 0.2 * jax.random.normal(ks[6], (embed_dim, embed_dim), jnp.float32),
        "bo": 0.1 * jax.random.normal(ks[7], (embed_dim, 1), jnp.float32),
    }


def _run_case(key, B, E, nh, S, H, W):
    hd = E // nh
    ks = jax.random.split(key, 3)
    x = jax.random.normal(ks[0], (B, E, S, H, W), jnp.float32)
    y = jax.random.normal(ks[1], (B, E, S, H, W), jnp.float32)
    params = _make_params(ks[2], E, nh)

    out, attn, val = multihead_attention_forward(x, y, params, num_heads=nh)
    jax.block_until_ready((out, attn, val))

    out_r, attn_r, val_r = reference(x, y, params, nh)
    assert out.shape == (B, E, S, H, W)
    assert attn.shape == (B, nh, S, hd, H, H)
    assert val.shape == (B, nh, S, hd, H, W)
    np.testing.assert_allclose(np.asarray(out), np.asarray(out_r), rtol=2e-4, atol=2e-4)
    np.testing.assert_allclose(np.asarray(attn), np.asarray(attn_r), rtol=2e-4, atol=2e-4)
    np.testing.assert_allclose(np.asarray(val), np.asarray(val_r), rtol=2e-4, atol=2e-4)


if __name__ == "__main__":
    key = jax.random.PRNGKey(0)
    k1, k2 = jax.random.split(key)
    # Module-consistent toy shape: embed_dim=8, num_heads=2 (head_dim=4),
    # batch=2, seq_len=4, spatial 8x8.
    _run_case(k1, B=2, E=8, nh=2, S=4, H=8, W=8)
    # Non-square spatial, S != head_dim: validates the folded-index bookkeeping
    # beyond the square toy shape (per the correctness review).
    _run_case(k2, B=1, E=8, nh=2, S=2, H=8, W=16)
    print("KERNEL_OK")
</pallas_src>

<mosaic_0001>
module attributes {stable_mosaic.version = 11 : i64} {
  func.func @_mha_kernel(%arg0: i32, %arg1: memref<1x192x99xf32, #tpu.memory_space<vmem>>, %arg2: memref<99x32xf32, #tpu.memory_space<vmem>>, %arg3: memref<32x32xf32, #tpu.memory_space<vmem>>, %arg4: memref<32x1xf32, #tpu.memory_space<vmem>>, %arg5: memref<1x32x64xf32, #tpu.memory_space<vmem>>, %arg6: memref<1x32x64xf32, #tpu.memory_space<vmem>>, %arg7: memref<1x64x32xf32, #tpu.memory_space<vmem>>, %arg8: memref<1x64x32xf32, #tpu.memory_space<vmem>>) attributes {dimension_semantics = [#tpu.dimension_semantics<parallel>], iteration_bounds = array<i64: 2>, scalar_prefetch = 0 : i64, scratch_operands = 0 : i64, tpu.core_type = #tpu.core_type<tc>, window_params = [{transform_indices = @transform_0, window_bounds = array<i64: 1, 192, 99>}, {pipeline_mode = #tpu.pipeline_mode<synchronous>, transform_indices = @transform_1, window_bounds = array<i64: 99, 32>}, {pipeline_mode = #tpu.pipeline_mode<synchronous>, transform_indices = @transform_2, window_bounds = array<i64: 32, 32>}, {pipeline_mode = #tpu.pipeline_mode<synchronous>, transform_indices = @transform_3, window_bounds = array<i64: 32, 1>}, {transform_indices = @transform_4, window_bounds = array<i64: 1, 32, 64>}, {transform_indices = @transform_5, window_bounds = array<i64: 1, 32, 64>}, {transform_indices = @transform_6, window_bounds = array<i64: 1, 64, 32>}, {transform_indices = @transform_7, window_bounds = array<i64: 1, 64, 32>}]} {
    %c0 = arith.constant 0 : index
    %c0_0 = arith.constant 0 : index
    %c0_1 = arith.constant 0 : index
    %0 = vector.load %arg1[%c0, %c0_0, %c0_1] : memref<1x192x99xf32, #tpu.memory_space<vmem>>, vector<1x192x99xf32>
    %1 = vector.shape_cast %0 : vector<1x192x99xf32> to vector<192x99xf32>
    %c0_2 = arith.constant 0 : index
    %c0_3 = arith.constant 0 : index
    %2 = vector.load %arg2[%c0_2, %c0_3] : memref<99x32xf32, #tpu.memory_space<vmem>>, vector<99x32xf32>
    %cst = arith.constant dense<0.000000e+00> : vector<192x32xf32>
    %3 = tpu.matmul %1, %2, %cst {dimension_numbers = #tpu.dot_dimension_numbers<[1], [0], [0], [1], [0, 0, 1, 1], [], []>} : vector<192x99xf32>, vector<99x32xf32>, vector<192x32xf32> -> vector<192x32xf32>
    %4 = vector.extract_strided_slice %3 {offsets = [0, 0], sizes = [64, 32], strides = [1, 1]} : vector<192x32xf32> to vector<64x32xf32>
    %5 = vector.extract_strided_slice %3 {offsets = [64, 0], sizes = [64, 32], strides = [1, 1]} : vector<192x32xf32> to vector<64x32xf32>
    %6 = vector.extract_strided_slice %3 {offsets = [128, 0], sizes = [64, 32], strides = [1, 1]} : vector<192x32xf32> to vector<64x32xf32>
    %7 = vector.extract_strided_slice %5 {offsets = [0, 0], sizes = [8, 32], strides = [1, 1]} : vector<64x32xf32> to vector<8x32xf32>
    %8 = vector.extract_strided_slice %5 {offsets = [8, 0], sizes = [8, 32], strides = [1, 1]} : vector<64x32xf32> to vector<8x32xf32>
    %9 = vector.extract_strided_slice %5 {offsets = [16, 0], sizes = [8, 32], strides = [1, 1]} : vector<64x32xf32> to vector<8x32xf32>
    %10 = vector.extract_strided_slice %5 {offsets = [24, 0], sizes = [8, 32], strides = [1, 1]} : vector<64x32xf32> to vector<8x32xf32>
    %11 = vector.extract_strided_slice %5 {offsets = [32, 0], sizes = [8, 32], strides = [1, 1]} : vector<64x32xf32> to vector<8x32xf32>
    %12 = vector.extract_strided_slice %5 {offsets = [40, 0], sizes = [8, 32], strides = [1, 1]} : vector<64x32xf32> to vector<8x32xf32>
    %13 = vector.extract_strided_slice %5 {offsets = [48, 0], sizes = [8, 32], strides = [1, 1]} : vector<64x32xf32> to vector<8x32xf32>
    %14 = vector.extract_strided_slice %5 {offsets = [56, 0], sizes = [8, 32], strides = [1, 1]} : vector<64x32xf32> to vector<8x32xf32>
    %15 = vector.shape_cast %7 : vector<8x32xf32> to vector<1x8x32xf32>
    %16 = vector.shape_cast %8 : vector<8x32xf32> to vector<1x8x32xf32>
    %17 = vector.shape_cast %9 : vector<8x32xf32> to vector<1x8x32xf32>
    %18 = vector.shape_cast %10 : vector<8x32xf32> to vector<1x8x32xf32>
    %19 = vector.shape_cast %11 : vector<8x32xf32> to vector<1x8x32xf32>
    %20 = vector.shape_cast %12 : vector<8x32xf32> to vector<1x8x32xf32>
    %21 = vector.shape_cast %13 : vector<8x32xf32> to vector<1x8x32xf32>
    %22 = vector.shape_cast %14 : vector<8x32xf32> to vector<1x8x32xf32>
    %23 = tpu.concatenate %15, %16, %17, %18, %19, %20, %21, %22 in 0 : vector<1x8x32xf32>, vector<1x8x32xf32>, vector<1x8x32xf32>, vector<1x8x32xf32>, vector<1x8x32xf32>, vector<1x8x32xf32>, vector<1x8x32xf32>, vector<1x8x32xf32> -> vector<8x8x32xf32>
    %24 = vector.extract_strided_slice %6 {offsets = [0, 0], sizes = [8, 32], strides = [1, 1]} : vector<64x32xf32> to vector<8x32xf32>
    %25 = vector.extract_strided_slice %6 {offsets = [8, 0], sizes = [8, 32], strides = [1, 1]} : vector<64x32xf32> to vector<8x32xf32>
    %26 = vector.extract_strided_slice %6 {offsets = [16, 0], sizes = [8, 32], strides = [1, 1]} : vector<64x32xf32> to vector<8x32xf32>
    %27 = vector.extract_strided_slice %6 {offsets = [24, 0], sizes = [8, 32], strides = [1, 1]} : vector<64x32xf32> to vector<8x32xf32>
    %28 = vector.extract_strided_slice %6 {offsets = [32, 0], sizes = [8, 32], strides = [1, 1]} : vector<64x32xf32> to vector<8x32xf32>
    %29 = vector.extract_strided_slice %6 {offsets = [40, 0], sizes = [8, 32], strides = [1, 1]} : vector<64x32xf32> to vector<8x32xf32>
    %30 = vector.extract_strided_slice %6 {offsets = [48, 0], sizes = [8, 32], strides = [1, 1]} : vector<64x32xf32> to vector<8x32xf32>
    %31 = vector.extract_strided_slice %6 {offsets = [56, 0], sizes = [8, 32], strides = [1, 1]} : vector<64x32xf32> to vector<8x32xf32>
    %32 = vector.shape_cast %24 : vector<8x32xf32> to vector<1x8x32xf32>
    %33 = vector.shape_cast %25 : vector<8x32xf32> to vector<1x8x32xf32>
    %34 = vector.shape_cast %26 : vector<8x32xf32> to vector<1x8x32xf32>
    %35 = vector.shape_cast %27 : vector<8x32xf32> to vector<1x8x32xf32>
    %36 = vector.shape_cast %28 : vector<8x32xf32> to vector<1x8x32xf32>
    %37 = vector.shape_cast %29 : vector<8x32xf32> to vector<1x8x32xf32>
    %38 = vector.shape_cast %30 : vector<8x32xf32> to vector<1x8x32xf32>
    %39 = vector.shape_cast %31 : vector<8x32xf32> to vector<1x8x32xf32>
    %40 = tpu.concatenate %32, %33, %34, %35, %36, %37, %38, %39 in 0 : vector<1x8x32xf32>, vector<1x8x32xf32>, vector<1x8x32xf32>, vector<1x8x32xf32>, vector<1x8x32xf32>, vector<1x8x32xf32>, vector<1x8x32xf32>, vector<1x8x32xf32> -> vector<8x8x32xf32>
    %41 = vector.extract_strided_slice %4 {offsets = [0, 0], sizes = [8, 32], strides = [1, 1]} : vector<64x32xf32> to vector<8x32xf32>
    %42 = vector.shape_cast %41 : vector<8x32xf32> to vector<1x8x32xf32>
    %43 = vector.broadcast %42 : vector<1x8x32xf32> to vector<8x8x32xf32>
    %44 = arith.mulf %43, %23 : vector<8x8x32xf32>
    %cst_4 = arith.constant dense<0.000000e+00> : vector<8x32xf32>
    %45 = vector.multi_reduction <add>, %44, %cst_4 [1] : vector<8x8x32xf32> to vector<8x32xf32>
    %cst_5 = arith.constant dense<0xFF800000> : vector<32xf32>
    %46 = vector.multi_reduction <maximumf>, %45, %cst_5 [0] : vector<8x32xf32> to vector<32xf32>
    %47 = vector.shape_cast %46 : vector<32xf32> to vector<1x32xf32>
    %48 = vector.broadcast %47 : vector<1x32xf32> to vector<8x32xf32>
    %49 = arith.subf %45, %48 : vector<8x32xf32>
    %50 = math.exp %49 : vector<8x32xf32>
    %cst_6 = arith.constant dense<0.000000e+00> : vector<32xf32>
    %51 = vector.multi_reduction <add>, %50, %cst_6 [0] : vector<8x32xf32> to vector<32xf32>
    %52 = vector.shape_cast %51 : vector<32xf32> to vector<1x32xf32>
    %53 = tpu.reciprocal %52 : vector<1x32xf32> -> vector<1x32xf32>
    %54 = vector.broadcast %53 : vector<1x32xf32> to vector<8x32xf32>
    %55 = arith.mulf %50, %54 : vector<8x32xf32>
    %56 = vector.shape_cast %55 : vector<8x32xf32> to vector<1x8x32xf32>
    %57 = vector.broadcast %56 : vector<1x8x32xf32> to vector<8x8x32xf32>
    %58 = arith.mulf %57, %40 : vector<8x8x32xf32>
    %cst_7 = arith.constant dense<0.000000e+00> : vector<8x32xf32>
    %59 = vector.multi_reduction <add>, %58, %cst_7 [1] : vector<8x8x32xf32> to vector<8x32xf32>
    %60 = vector.extract_strided_slice %4 {offsets = [8, 0], sizes = [8, 32], strides = [1, 1]} : vector<64x32xf32> to vector<8x32xf32>
    %61 = vector.shape_cast %60 : vector<8x32xf32> to vector<1x8x32xf32>
    %62 = vector.broadcast %61 : vector<1x8x32xf32> to vector<8x8x32xf32>
    %63 = arith.mulf %62, %23 : vector<8x8x32xf32>
    %cst_8 = arith.constant dense<0.000000e+00> : vector<8x32xf32>
    %64 = vector.multi_reduction <add>, %63, %cst_8 [1] : vector<8x8x32xf32> to vector<8x32xf32>
    %cst_9 = arith.constant dense<0xFF800000> : vector<32xf32>
    %65 = vector.multi_reduction <maximumf>, %64, %cst_9 [0] : vector<8x32xf32> to vector<32xf32>
    %66 = vector.shape_cast %65 : vector<32xf32> to vector<1x32xf32>
    %67 = vector.broadcast %66 : vector<1x32xf32> to vector<8x32xf32>
    %68 = arith.subf %64, %67 : vector<8x32xf32>
    %69 = math.exp %68 : vector<8x32xf32>
    %cst_10 = arith.constant dense<0.000000e+00> : vector<32xf32>
    %70 = vector.multi_reduction <add>, %69, %cst_10 [0] : vector<8x32xf32> to vector<32xf32>
    %71 = vector.shape_cast %70 : vector<32xf32> to vector<1x32xf32>
    %72 = tpu.reciprocal %71 : vector<1x32xf32> -> vector<1x32xf32>
    %73 = vector.broadcast %72 : vector<1x32xf32> to vector<8x32xf32>
    %74 = arith.mulf %69, %73 : vector<8x32xf32>
    %75 = vector.shape_cast %74 : vector<8x32xf32> to vector<1x8x32xf32>
    %76 = vector.broadcast %75 : vector<1x8x32xf32> to vector<8x8x32xf32>
    %77 = arith.mulf %76, %40 : vector<8x8x32xf32>
    %cst_11 = arith.constant dense<0.000000e+00> : vector<8x32xf32>
    %78 = vector.multi_reduction <add>, %77, %cst_11 [1] : vector<8x8x32xf32> to vector<8x32xf32>
    %79 = vector.extract_strided_slice %4 {offsets = [16, 0], sizes = [8, 32], strides = [1, 1]} : vector<64x32xf32> to vector<8x32xf32>
    %80 = vector.shape_cast %79 : vector<8x32xf32> to vector<1x8x32xf32>
    %81 = vector.broadcast %80 : vector<1x8x32xf32> to vector<8x8x32xf32>
    %82 = arith.mulf %81, %23 : vector<8x8x32xf32>
    %cst_12 = arith.constant dense<0.000000e+00> : vector<8x32xf32>
    %83 = vector.multi_reduction <add>, %82, %cst_12 [1] : vector<8x8x32xf32> to vector<8x32xf32>
    %cst_13 = arith.constant dense<0xFF800000> : vector<32xf32>
    %84 = vector.multi_reduction <maximumf>, %83, %cst_13 [0] : vector<8x32xf32> to vector<32xf32>
    %85 = vector.shape_cast %84 : vector<32xf32> to vector<1x32xf32>
    %86 = vector.broadcast %85 : vector<1x32xf32> to vector<8x32xf32>
    %87 = arith.subf %83, %86 : vector<8x32xf32>
    %88 = math.exp %87 : vector<8x32xf32>
    %cst_14 = arith.constant dense<0.000000e+00> : vector<32xf32>
    %89 = vector.multi_reduction <add>, %88, %cst_14 [0] : vector<8x32xf32> to vector<32xf32>
    %90 = vector.shape_cast %89 : vector<32xf32> to vector<1x32xf32>
    %91 = tpu.reciprocal %90 : vector<1x32xf32> -> vector<1x32xf32>
    %92 = vector.broadcast %91 : vector<1x32xf32> to vector<8x32xf32>
    %93 = arith.mulf %88, %92 : vector<8x32xf32>
    %94 = vector.shape_cast %93 : vector<8x32xf32> to vector<1x8x32xf32>
    %95 = vector.broadcast %94 : vector<1x8x32xf32> to vector<8x8x32xf32>
    %96 = arith.mulf %95, %40 : vector<8x8x32xf32>
    %cst_15 = arith.constant dense<0.000000e+00> : vector<8x32xf32>
    %97 = vector.multi_reduction <add>, %96, %cst_15 [1] : vector<8x8x32xf32> to vector<8x32xf32>
    %98 = vector.extract_strided_slice %4 {offsets = [24, 0], sizes = [8, 32], strides = [1, 1]} : vector<64x32xf32> to vector<8x32xf32>
    %99 = vector.shape_cast %98 : vector<8x32xf32> to vector<1x8x32xf32>
    %100 = vector.broadcast %99 : vector<1x8x32xf32> to vector<8x8x32xf32>
    %101 = arith.mulf %100, %23 : vector<8x8x32xf32>
    %cst_16 = arith.constant dense<0.000000e+00> : vector<8x32xf32>
    %102 = vector.multi_reduction <add>, %101, %cst_16 [1] : vector<8x8x32xf32> to vector<8x32xf32>
    %cst_17 = arith.constant dense<0xFF800000> : vector<32xf32>
    %103 = vector.multi_reduction <maximumf>, %102, %cst_17 [0] : vector<8x32xf32> to vector<32xf32>
    %104 = vector.shape_cast %103 : vector<32xf32> to vector<1x32xf32>
    %105 = vector.broadcast %104 : vector<1x32xf32> to vector<8x32xf32>
    %106 = arith.subf %102, %105 : vector<8x32xf32>
    %107 = math.exp %106 : vector<8x32xf32>
    %cst_18 = arith.constant dense<0.000000e+00> : vector<32xf32>
    %108 = vector.multi_reduction <add>, %107, %cst_18 [0] : vector<8x32xf32> to vector<32xf32>
    %109 = vector.shape_cast %108 : vector<32xf32> to vector<1x32xf32>
    %110 = tpu.reciprocal %109 : vector<1x32xf32> -> vector<1x32xf32>
    %111 = vector.broadcast %110 : vector<1x32xf32> to vector<8x32xf32>
    %112 = arith.mulf %107, %111 : vector<8x32xf32>
    %113 = vector.shape_cast %112 : vector<8x32xf32> to vector<1x8x32xf32>
    %114 = vector.broadcast %113 : vector<1x8x32xf32> to vector<8x8x32xf32>
    %115 = arith.mulf %114, %40 : vector<8x8x32xf32>
    %cst_19 = arith.constant dense<0.000000e+00> : vector<8x32xf32>
    %116 = vector.multi_reduction <add>, %115, %cst_19 [1] : vector<8x8x32xf32> to vector<8x32xf32>
    %117 = vector.extract_strided_slice %4 {offsets = [32, 0], sizes = [8, 32], strides = [1, 1]} : vector<64x32xf32> to vector<8x32xf32>
    %118 = vector.shape_cast %117 : vector<8x32xf32> to vector<1x8x32xf32>
    %119 = vector.broadcast %118 : vector<1x8x32xf32> to vector<8x8x32xf32>
    %120 = arith.mulf %119, %23 : vector<8x8x32xf32>
    %cst_20 = arith.constant dense<0.000000e+00> : vector<8x32xf32>
    %121 = vector.multi_reduction <add>, %120, %cst_20 [1] : vector<8x8x32xf32> to vector<8x32xf32>
    %cst_21 = arith.constant dense<0xFF800000> : vector<32xf32>
    %122 = vector.multi_reduction <maximumf>, %121, %cst_21 [0] : vector<8x32xf32> to vector<32xf32>
    %123 = vector.shape_cast %122 : vector<32xf32> to vector<1x32xf32>
    %124 = vector.broadcast %123 : vector<1x32xf32> to vector<8x32xf32>
    %125 = arith.subf %121, %124 : vector<8x32xf32>
    %126 = math.exp %125 : vector<8x32xf32>
    %cst_22 = arith.constant dense<0.000000e+00> : vector<32xf32>
    %127 = vector.multi_reduction <add>, %126, %cst_22 [0] : vector<8x32xf32> to vector<32xf32>
    %128 = vector.shape_cast %127 : vector<32xf32> to vector<1x32xf32>
    %129 = tpu.reciprocal %128 : vector<1x32xf32> -> vector<1x32xf32>
    %130 = vector.broadcast %129 : vector<1x32xf32> to vector<8x32xf32>
    %131 = arith.mulf %126, %130 : vector<8x32xf32>
    %132 = vector.shape_cast %131 : vector<8x32xf32> to vector<1x8x32xf32>
    %133 = vector.broadcast %132 : vector<1x8x32xf32> to vector<8x8x32xf32>
    %134 = arith.mulf %133, %40 : vector<8x8x32xf32>
    %cst_23 = arith.constant dense<0.000000e+00> : vector<8x32xf32>
    %135 = vector.multi_reduction <add>, %134, %cst_23 [1] : vector<8x8x32xf32> to vector<8x32xf32>
    %136 = vector.extract_strided_slice %4 {offsets = [40, 0], sizes = [8, 32], strides = [1, 1]} : vector<64x32xf32> to vector<8x32xf32>
    %137 = vector.shape_cast %136 : vector<8x32xf32> to vector<1x8x32xf32>
    %138 = vector.broadcast %137 : vector<1x8x32xf32> to vector<8x8x32xf32>
    %139 = arith.mulf %138, %23 : vector<8x8x32xf32>
    %cst_24 = arith.constant dense<0.000000e+00> : vector<8x32xf32>
    %140 = vector.multi_reduction <add>, %139, %cst_24 [1] : vector<8x8x32xf32> to vector<8x32xf32>
    %cst_25 = arith.constant dense<0xFF800000> : vector<32xf32>
    %141 = vector.multi_reduction <maximumf>, %140, %cst_25 [0] : vector<8x32xf32> to vector<32xf32>
    %142 = vector.shape_cast %141 : vector<32xf32> to vector<1x32xf32>
    %143 = vector.broadcast %142 : vector<1x32xf32> to vector<8x32xf32>
    %144 = arith.subf %140, %143 : vector<8x32xf32>
    %145 = math.exp %144 : vector<8x32xf32>
    %cst_26 = arith.constant dense<0.000000e+00> : vector<32xf32>
    %146 = vector.multi_reduction <add>, %145, %cst_26 [0] : vector<8x32xf32> to vector<32xf32>
    %147 = vector.shape_cast %146 : vector<32xf32> to vector<1x32xf32>
    %148 = tpu.reciprocal %147 : vector<1x32xf32> -> vector<1x32xf32>
    %149 = vector.broadcast %148 : vector<1x32xf32> to vector<8x32xf32>
    %150 = arith.mulf %145, %149 : vector<8x32xf32>
    %151 = vector.shape_cast %150 : vector<8x32xf32> to vector<1x8x32xf32>
    %152 = vector.broadcast %151 : vector<1x8x32xf32> to vector<8x8x32xf32>
    %153 = arith.mulf %152, %40 : vector<8x8x32xf32>
    %cst_27 = arith.constant dense<0.000000e+00> : vector<8x32xf32>
    %154 = vector.multi_reduction <add>, %153, %cst_27 [1] : vector<8x8x32xf32> to vector<8x32xf32>
    %155 = vector.extract_strided_slice %4 {offsets = [48, 0], sizes = [8, 32], strides = [1, 1]} : vector<64x32xf32> to vector<8x32xf32>
    %156 = vector.shape_cast %155 : vector<8x32xf32> to vector<1x8x32xf32>
    %157 = vector.broadcast %156 : vector<1x8x32xf32> to vector<8x8x32xf32>
    %158 = arith.mulf %157, %23 : vector<8x8x32xf32>
    %cst_28 = arith.constant dense<0.000000e+00> : vector<8x32xf32>
    %159 = vector.multi_reduction <add>, %158, %cst_28 [1] : vector<8x8x32xf32> to vector<8x32xf32>
    %cst_29 = arith.constant dense<0xFF800000> : vector<32xf32>
    %160 = vector.multi_reduction <maximumf>, %159, %cst_29 [0] : vector<8x32xf32> to vector<32xf32>
    %161 = vector.shape_cast %160 : vector<32xf32> to vector<1x32xf32>
    %162 = vector.broadcast %161 : vector<1x32xf32> to vector<8x32xf32>
    %163 = arith.subf %159, %162 : vector<8x32xf32>
    %164 = math.exp %163 : vector<8x32xf32>
    %cst_30 = arith.constant dense<0.000000e+00> : vector<32xf32>
    %165 = vector.multi_reduction <add>, %164, %cst_30 [0] : vector<8x32xf32> to vector<32xf32>
    %166 = vector.shape_cast %165 : vector<32xf32> to vector<1x32xf32>
    %167 = tpu.reciprocal %166 : vector<1x32xf32> -> vector<1x32xf32>
    %168 = vector.broadcast %167 : vector<1x32xf32> to vector<8x32xf32>
    %169 = arith.mulf %164, %168 : vector<8x32xf32>
    %170 = vector.shape_cast %169 : vector<8x32xf32> to vector<1x8x32xf32>
    %171 = vector.broadcast %170 : vector<1x8x32xf32> to vector<8x8x32xf32>
    %172 = arith.mulf %171, %40 : vector<8x8x32xf32>
    %cst_31 = arith.constant dense<0.000000e+00> : vector<8x32xf32>
    %173 = vector.multi_reduction <add>, %172, %cst_31 [1] : vector<8x8x32xf32> to vector<8x32xf32>
    %174 = vector.extract_strided_slice %4 {offsets = [56, 0], sizes = [8, 32], strides = [1, 1]} : vector<64x32xf32> to vector<8x32xf32>
    %175 = vector.shape_cast %174 : vector<8x32xf32> to vector<1x8x32xf32>
    %176 = vector.broadcast %175 : vector<1x8x32xf32> to vector<8x8x32xf32>
    %177 = arith.mulf %176, %23 : vector<8x8x32xf32>
    %cst_32 = arith.constant dense<0.000000e+00> : vector<8x32xf32>
    %178 = vector.multi_reduction <add>, %177, %cst_32 [1] : vector<8x8x32xf32> to vector<8x32xf32>
    %cst_33 = arith.constant dense<0xFF800000> : vector<32xf32>
    %179 = vector.multi_reduction <maximumf>, %178, %cst_33 [0] : vector<8x32xf32> to vector<32xf32>
    %180 = vector.shape_cast %179 : vector<32xf32> to vector<1x32xf32>
    %181 = vector.broadcast %180 : vector<1x32xf32> to vector<8x32xf32>
    %182 = arith.subf %178, %181 : vector<8x32xf32>
    %183 = math.exp %182 : vector<8x32xf32>
    %cst_34 = arith.constant dense<0.000000e+00> : vector<32xf32>
    %184 = vector.multi_reduction <add>, %183, %cst_34 [0] : vector<8x32xf32> to vector<32xf32>
    %185 = vector.shape_cast %184 : vector<32xf32> to vector<1x32xf32>
    %186 = tpu.reciprocal %185 : vector<1x32xf32> -> vector<1x32xf32>
    %187 = vector.broadcast %186 : vector<1x32xf32> to vector<8x32xf32>
    %188 = arith.mulf %183, %187 : vector<8x32xf32>
    %189 = vector.shape_cast %188 : vector<8x32xf32> to vector<1x8x32xf32>
    %190 = vector.broadcast %189 : vector<1x8x32xf32> to vector<8x8x32xf32>
    %191 = arith.mulf %190, %40 : vector<8x8x32xf32>
    %cst_35 = arith.constant dense<0.000000e+00> : vector<8x32xf32>
    %192 = vector.multi_reduction <add>, %191, %cst_35 [1] : vector<8x8x32xf32> to vector<8x32xf32>
    %193 = tpu.concatenate %55, %74, %93, %112, %131, %150, %169, %188 in 0 : vector<8x32xf32>, vector<8x32xf32>, vector<8x32xf32>, vector<8x32xf32>, vector<8x32xf32>, vector<8x32xf32>, vector<8x32xf32>, vector<8x32xf32> -> vector<64x32xf32>
    %c0_36 = arith.constant 0 : index
    %c0_37 = arith.constant 0 : index
    %c0_38 = arith.constant 0 : index
    %194 = vector.load %arg7[%c0_36, %c0_37, %c0_38] : memref<1x64x32xf32, #tpu.memory_space<vmem>>, vector<1x64x32xf32>
    %195 = vector.shape_cast %194 : vector<1x64x32xf32> to vector<64x32xf32>
    %196 = vector.shape_cast %193 : vector<64x32xf32> to vector<1x64x32xf32>
    tpu.vector_store %arg7[%c0_36, %c0_37, %c0_38], %196 {strides = array<i32>} : memref<1x64x32xf32, #tpu.memory_space<vmem>>, vector<1x64x32xf32>,
    %c0_39 = arith.constant 0 : index
    %c0_40 = arith.constant 0 : index
    %c0_41 = arith.constant 0 : index
    %197 = vector.load %arg8[%c0_39, %c0_40, %c0_41] : memref<1x64x32xf32, #tpu.memory_space<vmem>>, vector<1x64x32xf32>
    %198 = vector.shape_cast %197 : vector<1x64x32xf32> to vector<64x32xf32>
    %199 = vector.shape_cast %6 : vector<64x32xf32> to vector<1x64x32xf32>
    tpu.vector_store %arg8[%c0_39, %c0_40, %c0_41], %199 {strides = array<i32>} : memref<1x64x32xf32, #tpu.memory_space<vmem>>, vector<1x64x32xf32>,
    %200 = tpu.concatenate %59, %78, %97, %116, %135, %154, %173, %192 in 0 : vector<8x32xf32>, vector<8x32xf32>, vector<8x32xf32>, vector<8x32xf32>, vector<8x32xf32>, vector<8x32xf32>, vector<8x32xf32>, vector<8x32xf32> -> vector<64x32xf32>
    %c0_42 = arith.constant 0 : index
    %c0_43 = arith.constant 0 : index
    %201 = vector.load %arg3[%c0_42, %c0_43] : memref<32x32xf32, #tpu.memory_space<vmem>>, vector<32x32xf32>
    %cst_44 = arith.constant dense<0.000000e+00> : vector<32x64xf32>
    %202 = tpu.matmul %201, %200, %cst_44 {dimension_numbers = #tpu.dot_dimension_numbers<[1], [1], [0], [0], [0, 0, 1, 0], [], []>} : vector<32x32xf32>, vector<64x32xf32>, vector<32x64xf32> -> vector<32x64xf32>
    %c0_45 = arith.constant 0 : index
    %c0_46 = arith.constant 0 : index
    %203 = vector.load %arg4[%c0_45, %c0_46] : memref<32x1xf32, #tpu.memory_space<vmem>>, vector<32x1xf32>
    %204 = vector.broadcast %203 : vector<32x1xf32> to vector<32x64xf32>
    %205 = arith.addf %202, %204 : vector<32x64xf32>
    %c0_47 = arith.constant 0 : index
    %c0_48 = arith.constant 0 : index
    %c0_49 = arith.constant 0 : index
    %206 = vector.load %arg5[%c0_47, %c0_48, %c0_49] : memref<1x32x64xf32, #tpu.memory_space<vmem>>, vector<1x32x64xf32>
    %207 = vector.shape_cast %206 : vector<1x32x64xf32> to vector<32x64xf32>
    %208 = arith.addf %205, %207 : vector<32x64xf32>
    %c0_50 = arith.constant 0 : index
    %c0_51 = arith.constant 0 : index
    %c0_52 = arith.constant 0 : index
    %209 = vector.load %arg6[%c0_50, %c0_51, %c0_52] : memref<1x32x64xf32, #tpu.memory_space<vmem>>, vector<1x32x64xf32>
    %210 = vector.shape_cast %209 : vector<1x32x64xf32> to vector<32x64xf32>
    %211 = vector.shape_cast %208 : vector<32x64xf32> to vector<1x32x64xf32>
    tpu.vector_store %arg6[%c0_50, %c0_51, %c0_52], %211 {strides = array<i32>} : memref<1x32x64xf32, #tpu.memory_space<vmem>>, vector<1x32x64xf32>,
    return
  }
  func.func @transform_0(%arg0: i32) -> (i32, i32, i32) {
    %c0_i32 = arith.constant 0 : i32
    %c0_i32_0 = arith.constant 0 : i32
    %c0_i32_1 = arith.constant 0 : i32
    return %arg0, %c0_i32, %c0_i32_0 : i32, i32, i32
  }
  func.func @transform_1(%arg0: i32) -> (i32, i32) {
    %c0_i32 = arith.constant 0 : i32
    %c0_i32_0 = arith.constant 0 : i32
    %c0_i32_1 = arith.constant 0 : i32
    return %c0_i32, %c0_i32_0 : i32, i32
  }
  func.func @transform_2(%arg0: i32) -> (i32, i32) {
    %c0_i32 = arith.constant 0 : i32
    %c0_i32_0 = arith.constant 0 : i32
    %c0_i32_1 = arith.constant 0 : i32
    return %c0_i32, %c0_i32_0 : i32, i32
  }
  func.func @transform_3(%arg0: i32) -> (i32, i32) {
    %c0_i32 = arith.constant 0 : i32
    %c0_i32_0 = arith.constant 0 : i32
    %c0_i32_1 = arith.constant 0 : i32
    return %c0_i32, %c0_i32_0 : i32, i32
  }
  func.func @transform_4(%arg0: i32) -> (i32, i32, i32) {
    %c0_i32 = arith.constant 0 : i32
    %c0_i32_0 = arith.constant 0 : i32
    %c0_i32_1 = arith.constant 0 : i32
    return %arg0, %c0_i32, %c0_i32_0 : i32, i32, i32
  }
  func.func @transform_5(%arg0: i32) -> (i32, i32, i32) {
    %c0_i32 = arith.constant 0 : i32
    %c0_i32_0 = arith.constant 0 : i32
    %c0_i32_1 = arith.constant 0 : i32
    return %arg0, %c0_i32, %c0_i32_0 : i32, i32, i32
  }
  func.func @transform_6(%arg0: i32) -> (i32, i32, i32) {
    %c0_i32 = arith.constant 0 : i32
    %c0_i32_0 = arith.constant 0 : i32
    %c0_i32_1 = arith.constant 0 : i32
    return %arg0, %c0_i32, %c0_i32_0 : i32, i32, i32
  }
  func.func @transform_7(%arg0: i32) -> (i32, i32, i32) {
    %c0_i32 = arith.constant 0 : i32
    %c0_i32_0 = arith.constant 0 : i32
    %c0_i32_1 = arith.constant 0 : i32
    return %arg0, %c0_i32, %c0_i32_0 : i32, i32, i32
  }
}

</mosaic_0001>

<bundles_post_ra>
// kernel: multihead_attention_forward.1
= control target key start
LH: loop header
LB: loop body
LE: loop exit
PB: predicated region body
PF: predicated region fallthrough
CT: control target
= control target key end

     0   :  { %s5238_s24 = smov 0   ;;  %s10350_s0 = inlined_call_operand.vmem [shape: f32[2,192,99], index: 0, kind: input, shape index: {}]   ;;  %s10351_s1 = inlined_call_operand.vmem [shape: f32[99,32], index: 1, kind: input, shape index: {}]   ;;  %s10352_s2 = inlined_call_operand.vmem [shape: f32[32,32], index: 2, kind: input, shape index: {}]   ;;  %s10353_s3 = inlined_call_operand.vmem [shape: f32[32,1], index: 3, kind: input, shape index: {}]   ;;  %s10354_s4 = inlined_call_operand.vmem [shape: f32[2,32,64], index: 4, kind: input, shape index: {}]   ;;  %s10355_s5 = inlined_call_operand.vmem [shape: f32[2,32,64], index: 5, kind: output, shape index: {0}]   ;;  %s10356_s6 = inlined_call_operand.vmem [shape: f32[2,64,32], index: 6, kind: output, shape index: {1}]   ;;  %s10357_s7 = inlined_call_operand.vmem [shape: f32[2,64,32], index: 7, kind: output, shape index: {2}]  }
   0x1 LB: > { %s4950_s25 = sadd.s32 4294967295, %s5195_s24   ;;  %p4954_p0 = scmp.ge.s32.totalorder %s5195_s24, 1  ;;  %s5195_s24 = sphi %s5238_s24, %s18_s24  }
   0x2   : > { %p252_p1 = scmp.lt.s32.totalorder %s5195_s24, 3 }
   0x4   : > { %p253_p2 = pnand %p4954_p0, %p252_p1 }
   0x6   : > { %256 = sbr.rel (%p253_p2) target bundleno = 1245 (0x4dd), region = 40 }
   0xb   : > { %v360_v0 = vld [vmem:[%s10351_s1 + $0x60] sm:$0x7]  ;;  %vm434_vm0 = vcmask 1042432   ;;  %v359_v1 = vld [vmem:[%s10351_s1 + $0x58] sm:$0xff]  ;;  %v358_v2 = vld [vmem:[%s10351_s1 + $0x50] sm:$0xff]  ;;  %p299_p3 = scmp.lt.s32.totalorder %s4950_s25, 1 }
   0xc   : > { %4964 = vmatpush.msk.msra.mxu0 %vm434_vm0, %v360_v0  ;;  %5007 = vmatpush.msk.msra.mxu2 %vm434_vm0, %v360_v0  ;;  %v357_v3 = vld [vmem:[%s10351_s1 + $0x48] sm:$0xff]  ;;  %v356_v4 = vld [vmem:[%s10351_s1 + $0x40] sm:$0xff]  ;;  %v355_v5 = vld [vmem:[%s10351_s1 + $0x38] sm:$0xff]  ;;  %vm361_vm1 = vcmask 809984   ;;  %vm535_vm2 = vcmask 261120   ;;  %vm640_vm3 = vcmask 1041409  }
   0xd   : > { %5008 = vmatpush.msk.msra.mxu3 %vm434_vm0, %v360_v0  ;;  %v354_v6 = vld [vmem:[%s10351_s1 + $0x30] sm:$0xff]  ;;  %v353_v7 = vld [vmem:[%s10351_s1 + $0x28] sm:$0xff]  ;;  %s11683_s25 = smov (!%p299_p3, %s4950_s25), 1  ;;  %v352_v8 = vld [vmem:[%s10351_s1 + $0x20] sm:$0xff]  ;;  %vm643_vm4 = vcmask 1042434   ;;  %vm646_vm5 = vcmask 1043459  }
   0xe   : > { %442 = vmatpush.msra.mxu0 %v359_v1  ;;  %5009 = vmatpush.msra.mxu2 %v359_v1  ;;  %v351_v9 = vld [vmem:[%s10351_s1 + $0x18] sm:$0xff]  ;;  %s5033_s23 = smul.u32 192, %s11683_s25  ;;  %v350_v10 = vld [vmem:[%s10351_s1 + $0x10] sm:$0xff]  ;;  %v349_v11 = vld [vmem:[%s10351_s1 + $0x8] sm:$0xff]  ;;  %vm649_vm6 = vcmask 1044484   ;;  %vm652_vm7 = vcmask 1045509  }
   0xf   : > { %5010 = vmatpush.msra.mxu3 %v359_v1  ;;  %v348_v12 = vld [vmem:[%s10351_s1] sm:$0xff]  ;;  %vm655_vm8 = vcmask 1046534   ;;  %vm658_vm9 = vcmask 1047559   ;;  %s5005_s12 = sshll.u32 %s11683_s25, 6  ;;  %s5003_s14 = sshll.u32 %s11683_s25, 5 }
  0x10   : > { %443 = vmatpush.msra.mxu0 %v358_v2  ;;  %5011 = vmatpush.msra.mxu2 %v358_v2  ;;  %s5292_s9 = scalar_lea.vmem %s10350_s0, %s5033_s23  ;;  %s6382_s15 = scalar_lea.vmem %s10357_s7, %s5005_s12 }
  0x11   : > { %5012 = vmatpush.msra.mxu3 %v358_v2  ;;  %v324_v13 = vld [vmem:[%s5292_s9] sm:$0xff]  ;;  %v331_v14 = vld [vmem:[%s5292_s9 + $0x38] sm:$0xff]  ;;  %v325_v16 = vld [vmem:[%s5292_s9 + $0x8] sm:$0xff]  ;;  %s6844_s18 = scalar_lea.vmem %s10356_s6, %s5005_s12  ;;  %s308_s17 = scalar_lea.vmem %s10354_s4, %s5003_s14 }
  0x12   : > { %444 = vmatpush.msra.mxu0 %v357_v3  ;;  %5013 = vmatpush.msra.mxu2 %v357_v3  ;;  %v339_v15 = vld [vmem:[%s5292_s9 + $0x78] sm:$0xff]  ;;  %v332_v17 = vld [vmem:[%s5292_s9 + $0x40] sm:$0xff]  ;;  %v326_v18 = vld [vmem:[%s5292_s9 + $0x10] sm:$0xff]  ;;  %s313_s20 = scalar_lea.vmem %s10355_s5, %s5003_s14 }
  0x13   : > { %5014 = vmatpush.msra.mxu3 %v357_v3  ;;  %v333_v19 = vld [vmem:[%s5292_s9 + $0x48] sm:$0xff]  ;;  %v327_v20 = vld [vmem:[%s5292_s9 + $0x18] sm:$0xff]  ;;  %v334_v21 = vld [vmem:[%s5292_s9 + $0x50] sm:$0xff] }
  0x14   : > { %445 = vmatpush.msra.mxu0 %v356_v4  ;;  %5015 = vmatpush.msra.mxu2 %v356_v4  ;;  %v340_v22 = vld [vmem:[%s5292_s9 + $0x80] sm:$0xff]  ;;  %v335_v24 = vld [vmem:[%s5292_s9 + $0x58] sm:$0xff]  ;;  %v341_v25 = vld [vmem:[%s5292_s9 + $0x88] sm:$0xff] }
  0x15   : > { %5016 = vmatpush.msra.mxu3 %v356_v4  ;;  %v328_v23 = vld [vmem:[%s5292_s9 + $0x20] sm:$0xff]  ;;  %v329_v26 = vld [vmem:[%s5292_s9 + $0x28] sm:$0xff]  ;;  %v342_v28 = vld [vmem:[%s5292_s9 + $0x90] sm:$0xff] }
  0x16   : > { %446 = vmatpush.msra.mxu0 %v355_v5  ;;  %5017 = vmatpush.msra.mxu2 %v355_v5  ;;  %v336_v27 = vld [vmem:[%s5292_s9 + $0x60] sm:$0xff]  ;;  %v330_v29 = vld [vmem:[%s5292_s9 + $0x30] sm:$0xff]  ;;  %v337_v30 = vld [vmem:[%s5292_s9 + $0x68] sm:$0xff] }
  0x17   : > { %5018 = vmatpush.msra.mxu3 %v355_v5  ;;  %v343_v31 = vld [vmem:[%s5292_s9 + $0x98] sm:$0xff]  ;;  %v338_v32 = vld [vmem:[%s5292_s9 + $0x70] sm:$0xff]  ;;  %v344_v33 = vld [vmem:[%s5292_s9 + $0xa0] sm:$0xff] }
  0x18   : > { %447 = vmatpush.msra.mxu0 %v354_v6  ;;  %5019 = vmatpush.msra.mxu2 %v354_v6  ;;  %v345_v34 = vld [vmem:[%s5292_s9 + $0xa8] sm:$0xff]  ;;  %v346_v35 = vld [vmem:[%s5292_s9 + $0xb0] sm:$0xff]  ;;  %v347_v36 = vld [vmem:[%s5292_s9 + $0xb8] sm:$0xff] }
  0x19   : > { %5020 = vmatpush.msra.mxu3 %v354_v6 }
  0x1a   : > { %448 = vmatpush.msra.mxu0 %v353_v7  ;;  %5021 = vmatpush.msra.mxu2 %v353_v7 }
  0x1b   : > { %5022 = vmatpush.msra.mxu3 %v353_v7 }
  0x1c   : > { %449 = vmatpush.msra.mxu0 %v352_v8  ;;  %5023 = vmatpush.msra.mxu2 %v352_v8 }
  0x1d   : > { %5024 = vmatpush.msra.mxu3 %v352_v8 }
  0x1e   : > { %450 = vmatpush.msra.mxu0 %v351_v9  ;;  %5025 = vmatpush.msra.mxu2 %v351_v9 }
  0x1f   : > { %5026 = vmatpush.msra.mxu3 %v351_v9 }
  0x20   : > { %451 = vmatpush.msra.mxu0 %v350_v10  ;;  %5027 = vmatpush.msra.mxu2 %v350_v10 }
  0x21   : > { %5028 = vmatpush.msra.mxu3 %v350_v10 }
  0x22   : > { %452 = vmatpush.msra.mxu0 %v349_v11  ;;  %5029 = vmatpush.msra.mxu2 %v349_v11 }
  0x23   : > { %5030 = vmatpush.msra.mxu3 %v349_v11 }
  0x24   : > { %453 = vmatpush.msra.mxu0 %v348_v12  ;;  %5031 = vmatpush.msra.mxu2 %v348_v12 }
  0x25   : > { %5032 = vmatpush.msra.mxu3 %v348_v12  ;;  %4965 = vmatmul.msk.f32.vlgmr.msra.gmra.mxu0 %vm361_vm1, %v324_v13 }
  0x26   : > { %4972 = vmatmul.msk.f32.vlgmr.msra.gmra.mxu2 %vm361_vm1, %v331_v14  ;;  %4980 = vmatmul.msk.f32.vlgmr.msra.gmra.mxu3 %vm361_vm1, %v339_v15 }
  0x2d   : > { %4966 = vmatmul.msk.f32.gmra.mxu0 %vm361_vm1, %v325_v16 }
  0x2e   : > { %4973 = vmatmul.msk.f32.gmra.mxu2 %vm361_vm1, %v332_v17  ;;  %4981 = vmatmul.msk.f32.gmra.mxu3 %vm361_vm1, %v340_v22 }
  0x35   : > { %4967 = vmatmul.msk.f32.gmra.mxu0 %vm361_vm1, %v326_v18 }
  0x36   : > { %4974 = vmatmul.msk.f32.gmra.mxu2 %vm361_vm1, %v333_v19  ;;  %4982 = vmatmul.msk.f32.gmra.mxu3 %vm361_vm1, %v341_v25 }
  0x3d   : > { %4968 = vmatmul.msk.f32.gmra.mxu0 %vm361_vm1, %v327_v20 }
  0x3e   : > { %4975 = vmatmul.msk.f32.gmra.mxu2 %vm361_vm1, %v334_v21  ;;  %4983 = vmatmul.msk.f32.gmra.mxu3 %vm361_vm1, %v342_v28 }
  0x45   : > { %4969 = vmatmul.msk.f32.gmra.mxu0 %vm361_vm1, %v328_v23 }
  0x46   : > { %4976 = vmatmul.msk.f32.gmra.mxu2 %vm361_vm1, %v335_v24  ;;  %4984 = vmatmul.msk.f32.gmra.mxu3 %vm361_vm1, %v343_v31 }
  0x4d   : > { %4970 = vmatmul.msk.f32.gmra.mxu0 %vm361_vm1, %v329_v26 }
  0x4e   : > { %4977 = vmatmul.msk.f32.gmra.mxu2 %vm361_vm1, %v336_v27  ;;  %4985 = vmatmul.msk.f32.gmra.mxu3 %vm361_vm1, %v344_v33 }
  0x55   : > { %4971 = vmatmul.msk.f32.gmra.mxu0 %vm361_vm1, %v330_v29 }
  0x56   : > { %4978 = vmatmul.msk.f32.gmra.mxu2 %vm361_vm1, %v337_v30  ;;  %4986 = vmatmul.msk.f32.gmra.mxu3 %vm361_vm1, %v345_v34 }
  0x5e   : > { %4979 = vmatmul.msk.f32.gmra.mxu2 %vm361_vm1, %v338_v32  ;;  %4987 = vmatmul.msk.f32.gmra.mxu3 %vm361_vm1, %v346_v35 }
  0x66   : > { %4988 = vmatmul.msk.f32.gmra.mxu3 %vm361_vm1, %v347_v36 }
  0xa2   : > { %v5345_v37 = vpop.f32.mrf.mxu0 }
  0xa9   : > { %v5347_v38 = vpop.f32.mrf.mxu2  ;;  %v5349_v39 = vpop.f32.mrf.mxu3 }
  0xaa   : > { %10624 = vst [vmem:[#allocation2_spill] sm:$0xff] %v5347_v38  ;;  %v5351_v40 = vpop.f32.mrf.mxu0  ;;  %v534_v41 = vmul.f32 %v5349_v39, %v5345_v37  ;;  %v3890_v42 = vmul.f32 %v5349_v39, %v5347_v38 }
  0xab   : > { %v1130_v45 = vmul.f32 %v5349_v39, %v5351_v40 }
  0xac   : > { %v585_v43 = vsel %vm535_vm2, %v534_v41, 0.0  ;;  %v3940_v44 = vsel %vm535_vm2, %v3890_v42, 0.0 }
  0xad   : > { %v586_v52 = vrot.slane %v585_v43, 4  ;;  %v3941_v53 = vrot.slane %v3940_v44, 4  ;;  %v1180_v55 = vsel %vm535_vm2, %v1130_v45, 0.0 }
  0xae   : > { %v1181_v62 = vrot.slane %v1180_v55, 4 }
  0xaf   : > { %v587_v60 = vadd.f32 %v586_v52, %v585_v43  ;;  %v3942_v61 = vadd.f32 %v3941_v53, %v3940_v44 }
  0xb0   : > { %v1182_v10 = vadd.f32 %v1181_v62, %v1180_v55 }
  0xb1   : > { %v5361_v46 = vpop.f32.mrf.mxu2  ;;  %v588_v8 = vrot.slane %v587_v60, 2  ;;  %v3943_v9 = vrot.slane %v3942_v61, 2 }
  0xb2   : > { %v527_v47 = vmul.f32 %v5361_v46, %v5345_v37  ;;  %v1123_v48 = vmul.f32 %v5361_v46, %v5351_v40  ;;  %v5367_v49 = vpop.f32.mrf.mxu0  ;;  %v3883_v50 = vmul.f32 %v5361_v46, %v5347_v38  ;;  %v1183_v23 = vrot.slane %v1182_v10, 2 }
  0xb3   : > { %v1583_v51 = vmul.f32 %v5361_v46, %v5367_v49  ;;  %v1590_v54 = vmul.f32 %v5349_v39, %v5367_v49  ;;  %v589_v22 = vadd.f32 %v588_v8, %v587_v60  ;;  %v3944_v24 = vadd.f32 %v3943_v9, %v3942_v61 }
  0xb4   : > { %v536_v56 = vsel %vm535_vm2, %v527_v47, 0.0  ;;  %v1131_v57 = vsel %vm535_vm2, %v1123_v48, 0.0  ;;  %v3891_v58 = vsel %vm535_vm2, %v3883_v50, 0.0  ;;  %v1184_v34 = vadd.f32 %v1183_v23, %v1182_v10 }
  0xb5   : > { %v1591_v59 = vsel %vm535_vm2, %v1583_v51, 0.0  ;;  %v1640_v63 = vsel %vm535_vm2, %v1590_v54, 0.0  ;;  %v537_v0 = vrot.slane %v536_v56, 4  ;;  %v1132_v1 = vrot.slane %v1131_v57, 4 }
  0xb6   : > { %v3892_v3 = vrot.slane %v3891_v58, 4  ;;  %v1592_v4 = vrot.slane %v1591_v59, 4  ;;  %v1641_v5 = vrot.slane %v1640_v63, 4  ;;  %v590_v33 = vrot.slane %v589_v22, 1 }
  0xb7   : > { %v538_v12 = vadd.f32 %v537_v0, %v536_v56  ;;  %v1133_v13 = vadd.f32 %v1132_v1, %v1131_v57  ;;  %v3945_v41 = vrot.slane %v3944_v24, 1  ;;  %v1185_v54 = vrot.slane %v1184_v34, 1 }
  0xb8   : > { %v3893_v16 = vadd.f32 %v3892_v3, %v3891_v58  ;;  %v1593_v17 = vadd.f32 %v1592_v4, %v1591_v59  ;;  %v1642_v19 = vadd.f32 %v1641_v5, %v1640_v63  ;;  %v5398_v53 = vadd.f32 %v590_v33, %v589_v22 }
  0xb9   : > { %v5381_v2 = vpop.f32.mrf.mxu2  ;;  %v539_v25 = vrot.slane %v538_v12, 2  ;;  %v1134_v26 = vrot.slane %v1133_v13, 2  ;;  %v5402_v57 = vadd.f32 %v3945_v41, %v3944_v24  ;;  %v5408_v5 = vadd.f32 %v1185_v54, %v1184_v34 }
  0xba   : > { %v528_v6 = vmul.f32 %v5381_v2, %v5345_v37  ;;  %v1124_v7 = vmul.f32 %v5381_v2, %v5351_v40  ;;  %v1584_v11 = vmul.f32 %v5381_v2, %v5367_v49  ;;  %v3894_v28 = vrot.slane %v3893_v16, 2  ;;  %v5392_v36 = vpop.f32.mrf.mxu0  ;;  %10625 = vst [vmem:[#allocation3_spill] sm:$0xff] %v5398_v53 }
  0xbb   : > { %v1594_v29 = vrot.slane %v1593_v17, 2  ;;  %v1643_v31 = vrot.slane %v1642_v19, 2  ;;  %v540_v42 = vadd.f32 %v539_v25, %v538_v12  ;;  %v1135_v43 = vadd.f32 %v1134_v26, %v1133_v13  ;;  %10626 = vst [vmem:[#allocation4_spill] sm:$0xff] %v5402_v57 }
  0xbc   : > { %v543_v14 = vsel %vm535_vm2, %v528_v6, 0.0  ;;  %v1138_v15 = vsel %vm535_vm2, %v1124_v7, 0.0  ;;  %v1598_v21 = vsel %vm535_vm2, %v1584_v11, 0.0  ;;  %v3884_v44 = vmul.f32 %v5381_v2, %v5347_v38  ;;  %10627 = vst [vmem:[#allocation5_spill] sm:$0xff] %v5408_v5 }
  0xbd   : > { %v544_v18 = vrot.slane %v543_v14, 4  ;;  %v1139_v20 = vrot.slane %v1138_v15, 4  ;;  %v1599_v27 = vrot.slane %v1598_v21, 4  ;;  %v3895_v45 = vadd.f32 %v3894_v28, %v3893_v16 }
  0xbe   : > { %v1595_v47 = vadd.f32 %v1594_v29, %v1593_v17  ;;  %v1644_v50 = vadd.f32 %v1643_v31, %v1642_v19  ;;  %v2043_v52 = vmul.f32 %v5361_v46, %v5392_v36  ;;  %v2044_v56 = vmul.f32 %v5381_v2, %v5392_v36 }
  0xbf   : > { %v545_v30 = vadd.f32 %v544_v18, %v543_v14  ;;  %v1140_v32 = vadd.f32 %v1139_v20, %v1138_v15  ;;  %v1600_v35 = vadd.f32 %v1599_v27, %v1598_v21  ;;  %v541_v58 = vrot.slane %v540_v42, 1 }
  0xc0   : > { %v1136_v59 = vrot.slane %v1135_v43, 1  ;;  %v3898_v60 = vsel %vm535_vm2, %v3884_v44, 0.0  ;;  %v3896_v61 = vrot.slane %v3895_v45, 1  ;;  %v1596_v62 = vrot.slane %v1595_v47, 1 }
  0xc1   : > { %v546_v48 = vrot.slane %v545_v30, 2  ;;  %v1141_v51 = vrot.slane %v1140_v32, 2  ;;  %v1601_v55 = vrot.slane %v1600_v35, 2  ;;  %v1645_v0 = vrot.slane %v1644_v50, 1  ;;  %v5423_v13 = vpop.f32.mrf.mxu2 }
  0xc2   : > { %v2050_v3 = vmul.f32 %v5349_v39, %v5392_v36  ;;  %v2051_v4 = vsel %vm535_vm2, %v2043_v52, 0.0  ;;  %v3899_v7 = vrot.slane %v3898_v60, 4  ;;  %v2058_v8 = vsel %vm535_vm2, %v2044_v56, 0.0  ;;  %v5456_v34 = vpop.f32.mrf.mxu0 }
  0xc3   : > { %v547_v63 = vadd.f32 %v546_v48, %v545_v30  ;;  %v1142_v1 = vadd.f32 %v1141_v51, %v1140_v32  ;;  %v1602_v6 = vadd.f32 %v1601_v55, %v1600_v35  ;;  %v5413_v9 = vsel %vm535_vm2, %v5398_v53, -inf }
  0xc4   : > { %10628 = vst [vmem:[#allocation6_spill] sm:$0xff] %v5413_v9  ;;  %v5417_v10 = vsel %vm535_vm2, %v5402_v57, -inf  ;;  %v5419_v11 = vadd.f32 %v541_v58, %v540_v42  ;;  %v5421_v12 = vadd.f32 %v1136_v59, %v1135_v43  ;;  %v5425_v14 = vadd.f32 %v3896_v61, %v3895_v45 }
  0xc5   : > { %10629 = vst [vmem:[#allocation7_spill] sm:$0xff] %v5417_v10  ;;  %v5427_v15 = vadd.f32 %v1596_v62, %v1595_v47  ;;  %v548_v16 = vrot.slane %v547_v63, 1  ;;  %v2052_v17 = vrot.slane %v2051_v4, 4  ;;  %v5429_v18 = vadd.f32 %v1645_v0, %v1644_v50 }
  0xc6   : > { %10630 = vst [vmem:[#allocation8_spill] sm:$0xff] %v5419_v11  ;;  %v1143_v19 = vrot.slane %v1142_v1, 1  ;;  %v2059_v20 = vrot.slane %v2058_v8, 4  ;;  %v2100_v21 = vsel %vm535_vm2, %v2050_v3, 0.0  ;;  %v1603_v22 = vrot.slane %v1602_v6, 1 }
  0xc7   : > { %10631 = vst [vmem:[#allocation9_spill] sm:$0xff] %v5421_v12  ;;  %v3900_v23 = vadd.f32 %v3899_v7, %v3898_v60  ;;  %v529_v24 = vmul.f32 %v5423_v13, %v5345_v37  ;;  %v1125_v25 = vmul.f32 %v5423_v13, %v5351_v40  ;;  %v5438_v26 = vsel %vm535_vm2, %v5408_v5, -inf }
  0xc8   : > { %10632 = vst [vmem:[#allocation10_spill] sm:$0xff] %v5425_v14  ;;  %v5442_v27 = vsel %vm535_vm2, %v5419_v11, -inf  ;;  %v5446_v28 = vsel %vm535_vm2, %v5421_v12, -inf  ;;  %v1585_v29 = vmul.f32 %v5423_v13, %v5367_v49  ;;  %v5452_v30 = vsel %vm535_vm2, %v5425_v14, -inf }
  0xc9   : > { %10633 = vst [vmem:[#allocation11_spill] sm:$0xff] %v5427_v15  ;;  %v5454_v31 = vadd.f32 %v548_v16, %v547_v63  ;;  %v2053_v32 = vadd.f32 %v2052_v17, %v2051_v4  ;;  %v2101_v33 = vrot.slane %v2100_v21, 4  ;;  %v5460_v35 = vsel %vm535_vm2, %v5427_v15, -inf }
  0xca   : > { %10634 = vst [vmem:[#allocation12_spill] sm:$0xff] %v5429_v18  ;;  %v5464_v41 = vsel %vm535_vm2, %v5429_v18, -inf  ;;  %v5466_v42 = vadd.f32 %v1143_v19, %v1142_v1  ;;  %v2060_v43 = vadd.f32 %v2059_v20, %v2058_v8  ;;  %v5468_v44 = vadd.f32 %v1603_v22, %v1602_v6  ;;  %v5494_v6 = vpop.f32.mrf.mxu2 }
  0xcb   : > { %10635 = vst [vmem:[#allocation13_spill] sm:$0xff] %v5438_v26  ;;  %v3901_v45 = vrot.slane %v3900_v23, 2  ;;  %v550_v47 = vsel %vm535_vm2, %v529_v24, 0.0  ;;  %v1145_v48 = vsel %vm535_vm2, %v1125_v25, 0.0  ;;  %v1605_v50 = vsel %vm535_vm2, %v1585_v29, 0.0 }
  0xcc   : > { %10636 = vst [vmem:[#allocation14_spill] sm:$0xff] %v5452_v30  ;;  %v2045_v51 = vmul.f32 %v5423_v13, %v5392_v36  ;;  %v2503_v52 = vmul.f32 %v5361_v46, %v5456_v34  ;;  %v2504_v54 = vmul.f32 %v5381_v2, %v5456_v34  ;;  %v5481_v55 = vsel %vm535_vm2, %v5454_v31, -inf }
  0xcd   : > { %10637 = vst [vmem:[#allocation15_spill] sm:$0xff] %v5454_v31  ;;  %v2054_v56 = vrot.slane %v2053_v32, 2  ;;  %v2102_v58 = vadd.f32 %v2101_v33, %v2100_v21  ;;  %v3885_v59 = vmul.f32 %v5423_v13, %v5347_v38  ;;  %v5487_v60 = vsel %vm535_vm2, %v5466_v42, -inf }
  0xce   : > { %10638 = vst [vmem:[#allocation16_spill] sm:$0xff] %v5464_v41  ;;  %v551_v61 = vrot.slane %v550_v47, 4  ;;  %v2505_v62 = vmul.f32 %v5423_v13, %v5456_v34  ;;  %v2510_v63 = vmul.f32 %v5349_v39, %v5456_v34  ;;  %v2061_v0 = vrot.slane %v2060_v43, 2 }
  0xcf   : > { %10639 = vst [vmem:[#allocation17_spill] sm:$0xff] %v5466_v42  ;;  %v1146_v1 = vrot.slane %v1145_v48, 4  ;;  %v1606_v3 = vrot.slane %v1605_v50, 4  ;;  %v2511_v4 = vsel %vm535_vm2, %v2503_v52, 0.0  ;;  %v5498_v7 = vsel %vm535_vm2, %v5468_v44, -inf }
  0xd0   : > { %10640 = vst [vmem:[#allocation18_spill] sm:$0xff] %v5468_v44  ;;  %v3902_v8 = vadd.f32 %v3901_v45, %v3900_v23  ;;  %v2065_v16 = vsel %vm535_vm2, %v2045_v51, 0.0  ;;  %v2518_v17 = vsel %vm535_vm2, %v2504_v54, 0.0  ;;  %v2055_v19 = vadd.f32 %v2054_v56, %v2053_v32 }
  0xd1   : > { %10641 = vst [vmem:[#allocation19_spill] sm:$0xff] %v5487_v60  ;;  %v2103_v20 = vrot.slane %v2102_v58, 2  ;;  %v3905_v21 = vsel %vm535_vm2, %v3885_v59, 0.0  ;;  %v2525_v22 = vsel %vm535_vm2, %v2505_v62, 0.0  ;;  %v552_v24 = vadd.f32 %v551_v61, %v550_v47 }
  0xd2   : > { %10642 = vst [vmem:[#allocation20_spill] sm:$0xff] %v5498_v7  ;;  %v2512_v25 = vrot.slane %v2511_v4, 4  ;;  %v2560_v29 = vsel %vm535_vm2, %v2510_v63, 0.0  ;;  %v530_v33 = vmul.f32 %v5494_v6, %v5345_v37  ;;  %v1147_v52 = vadd.f32 %v1146_v1, %v1145_v48 }
  0xd3   : > { %v1607_v57 = vadd.f32 %v1606_v3, %v1605_v50  ;;  %v2066_v23 = vrot.slane %v2065_v16, 4  ;;  %v2519_v45 = vrot.slane %v2518_v17, 4  ;;  %v3906_v51 = vrot.slane %v3905_v21, 4 }
  0xd4   : > { %v2526_v14 = vrot.slane %v2525_v22, 4  ;;  %v557_v32 = vsel %vm535_vm2, %v530_v33, 0.0  ;;  %v1126_v54 = vmul.f32 %v5494_v6, %v5351_v40  ;;  %v3903_v56 = vrot.slane %v3902_v8, 1 }
  0xd5   : > { %v2062_v59 = vadd.f32 %v2061_v0, %v2060_v43  ;;  %v2104_v47 = vadd.f32 %v2103_v20, %v2102_v58  ;;  %v2561_v61 = vrot.slane %v2560_v29, 4  ;;  %v553_v62 = vrot.slane %v552_v24, 2 }
  0xd6   : > { %v2513_v63 = vadd.f32 %v2512_v25, %v2511_v4  ;;  %v558_v10 = vrot.slane %v557_v32, 4  ;;  %v1152_v18 = vsel %vm535_vm2, %v1126_v54, 0.0  ;;  %v2056_v48 = vrot.slane %v2055_v19, 1 }
  0xd7   : > { %v1148_v50 = vrot.slane %v1147_v52, 2  ;;  %v2067_v1 = vadd.f32 %v2066_v23, %v2065_v16  ;;  %v2520_v3 = vadd.f32 %v2519_v45, %v2518_v17  ;;  %v1608_v44 = vrot.slane %v1607_v57, 2 }
  0xd8   : > { %v3907_v15 = vadd.f32 %v3906_v51, %v3905_v21  ;;  %v2527_v5 = vadd.f32 %v2526_v14, %v2525_v22  ;;  %v1153_v33 = vrot.slane %v1152_v18, 4  ;;  %v5511_v42 = vadd.f32 %v3903_v56, %v3902_v8 }
  0xd9   : > { %v2063_v12 = vrot.slane %v2062_v59, 1  ;;  %v2105_v41 = vrot.slane %v2104_v47, 1  ;;  %v2562_v43 = vadd.f32 %v2561_v61, %v2560_v29  ;;  %v554_v58 = vadd.f32 %v553_v62, %v552_v24 }
  0xda   : > { %10643 = vst [vmem:[#allocation21_spill] sm:$0xff] %v5511_v42  ;;  %v2514_v0 = vrot.slane %v2513_v63, 2  ;;  %v559_v20 = vadd.f32 %v558_v10, %v557_v32  ;;  %v1586_v4 = vmul.f32 %v5494_v6, %v5367_v49  ;;  %v5515_v25 = vadd.f32 %v2056_v48, %v2055_v19 }
  0xdb   : > { %v1149_v54 = vadd.f32 %v1148_v50, %v1147_v52  ;;  %v2068_v16 = vrot.slane %v2067_v1, 2  ;;  %v2521_v17 = vrot.slane %v2520_v3, 2  ;;  %v1609_v23 = vadd.f32 %v1608_v44, %v1607_v57 }
  0xdc   : > { %10644 = vst [vmem:[#allocation22_spill] sm:$0xff] %v5515_v25  ;;  %v3908_v21 = vrot.slane %v3907_v15, 2  ;;  %v2528_v14 = vrot.slane %v2527_v5, 2  ;;  %v1154_v22 = vadd.f32 %v1153_v33, %v1152_v18  ;;  %v5519_v8 = vsel %vm535_vm2, %v5511_v42, -inf }
  0xdd   : > { %10645 = vst [vmem:[#allocation23_spill] sm:$0xff] %v5519_v8  ;;  %v5521_v29 = vadd.f32 %v2063_v12, %v2062_v59  ;;  %v5523_v24 = vadd.f32 %v2105_v41, %v2104_v47  ;;  %v2563_v10 = vrot.slane %v2562_v43, 2  ;;  %v555_v45 = vrot.slane %v554_v58, 1 }
  0xde   : > { %v2515_v51 = vadd.f32 %v2514_v0, %v2513_v63  ;;  %v560_v19 = vrot.slane %v559_v20, 2  ;;  %v1612_v52 = vsel %vm535_vm2, %v1586_v4, 0.0  ;;  %v1150_v32 = vrot.slane %v1149_v54, 1  ;;  %v5545_v4 = vpop.f32.mrf.mxu0 }
  0xdf   : > { %10646 = vst [vmem:[#allocation24_spill] sm:$0xff] %v5521_v29  ;;  %v2069_v56 = vadd.f32 %v2068_v16, %v2067_v1  ;;  %v2522_v57 = vadd.f32 %v2521_v17, %v2520_v3  ;;  %v2046_v18 = vmul.f32 %v5494_v6, %v5392_v36  ;;  %v1610_v44 = vrot.slane %v1609_v23, 1 }
  0xe0   : > { %10647 = vst [vmem:[#allocation25_spill] sm:$0xff] %v5523_v24  ;;  %v3909_v61 = vadd.f32 %v3908_v21, %v3907_v15  ;;  %v2529_v62 = vadd.f32 %v2528_v14, %v2527_v5  ;;  %v1155_v48 = vrot.slane %v1154_v22, 2  ;;  %v5530_v12 = vsel %vm535_vm2, %v5515_v25, -inf }
  0xe1   : > { %v5534_v41 = vsel %vm535_vm2, %v5521_v29, -inf  ;;  %v2564_v59 = vadd.f32 %v2563_v10, %v2562_v43  ;;  %v1613_v47 = vrot.slane %v1612_v52, 4  ;;  %v5538_v63 = vsel %vm535_vm2, %v5523_v24, -inf }
  0xe2   : > { %10648 = vst [vmem:[#allocation26_spill] sm:$0xff] %v5534_v41  ;;  %v5540_v50 = vadd.f32 %v555_v45, %v554_v58  ;;  %v2516_v1 = vrot.slane %v2515_v51, 1  ;;  %v561_v15 = vadd.f32 %v560_v19, %v559_v20  ;;  %v5542_v5 = vadd.f32 %v1150_v32, %v1149_v54 }
  0xe3   : > { %10649 = vst [vmem:[#allocation27_spill] sm:$0xff] %v5538_v63  ;;  %v2070_v3 = vrot.slane %v2069_v56, 1  ;;  %v2523_v33 = vrot.slane %v2522_v57, 1  ;;  %v2072_v0 = vsel %vm535_vm2, %v2046_v18, 0.0  ;;  %v5547_v16 = vadd.f32 %v1610_v44, %v1609_v23 }
  0xe4   : > { %10650 = vst [vmem:[#allocation28_spill] sm:$0xff] %v5540_v50  ;;  %v3910_v43 = vrot.slane %v3909_v61, 1  ;;  %v2530_v17 = vrot.slane %v2529_v62, 1  ;;  %v1156_v21 = vadd.f32 %v1155_v48, %v1154_v22  ;;  %v2565_v14 = vrot.slane %v2564_v59, 1 }
  0xe5   : > { %10651 = vst [vmem:[#allocation29_spill] sm:$0xff] %v5542_v5  ;;  %v1614_v10 = vadd.f32 %v1613_v47, %v1612_v52  ;;  %v2506_v58 = vmul.f32 %v5494_v6, %v5456_v34  ;;  %v3886_v20 = vmul.f32 %v5494_v6, %v5347_v38  ;;  %v5553_v54 = vadd.f32 %v2516_v1, %v2515_v51 }
  0xe6   : > { %10652 = vst [vmem:[#allocation30_spill] sm:$0xff] %v5547_v16  ;;  %v562_v45 = vrot.slane %v561_v15, 1  ;;  %v2073_v19 = vrot.slane %v2072_v0, 4  ;;  %v2963_v32 = vmul.f32 %v5361_v46, %v5545_v4  ;;  %v5557_v23 = vadd.f32 %v2070_v3, %v2069_v56 }
  0xe7   : > { %10653 = vst [vmem:[#allocation31_spill] sm:$0xff] %v5553_v54  ;;  %v5559_v18 = vadd.f32 %v2523_v33, %v2522_v57  ;;  %v2964_v22 = vmul.f32 %v5381_v2, %v5545_v4  ;;  %v2966_v52 = vmul.f32 %v5494_v6, %v5545_v4  ;;  %v5565_v44 = vadd.f32 %v3910_v43, %v3909_v61  ;;  %v5582_v43 = vpop.f32.mrf.mxu2 }
  0xe8   : > { %10654 = vst [vmem:[#allocation32_spill] sm:$0xff] %v5557_v23  ;;  %v5567_v48 = vadd.f32 %v2530_v17, %v2529_v62  ;;  %v1157_v51 = vrot.slane %v1156_v21, 1  ;;  %v2970_v47 = vmul.f32 %v5349_v39, %v5545_v4  ;;  %v5571_v1 = vadd.f32 %v2565_v14, %v2564_v59 }
  0xe9   : > { %10655 = vst [vmem:[#allocation33_spill] sm:$0xff] %v5559_v18  ;;  %v1615_v56 = vrot.slane %v1614_v10, 2  ;;  %v2532_v57 = vsel %vm535_vm2, %v2506_v58, 0.0  ;;  %v3912_v3 = vsel %vm535_vm2, %v3886_v20, 0.0  ;;  %v5577_v33 = vsel %vm535_vm2, %v5553_v54, -inf }
  0xea   : > { %10656 = vst [vmem:[#allocation34_spill] sm:$0xff] %v5565_v44  ;;  %v5579_v42 = vadd.f32 %v562_v45, %v561_v15  ;;  %v2074_v61 = vadd.f32 %v2073_v19, %v2072_v0  ;;  %v2971_v62 = vsel %vm535_vm2, %v2963_v32, 0.0  ;;  %v5586_v59 = vsel %vm535_vm2, %v5559_v18, -inf }
  0xeb   : > { %10657 = vst [vmem:[#allocation35_spill] sm:$0xff] %v5567_v48  ;;  %v2965_v17 = vmul.f32 %v5423_v13, %v5545_v4  ;;  %v2978_v14 = vsel %vm535_vm2, %v2964_v22, 0.0  ;;  %v2992_v58 = vsel %vm535_vm2, %v2966_v52, 0.0  ;;  %v5592_v20 = vadd.f32 %v1157_v51, %v1156_v21 }
  0xec   : > { %10658 = vst [vmem:[#allocation36_spill] sm:$0xff] %v5571_v1  ;;  %v2533_v15 = vrot.slane %v2532_v57, 4  ;;  %v3913_v45 = vrot.slane %v3912_v3, 4  ;;  %v3020_v0 = vsel %vm535_vm2, %v2970_v47, 0.0  ;;  %v5597_v19 = vsel %vm535_vm2, %v5571_v1, -inf }
  0xed   : > { %10659 = vst [vmem:[#allocation37_spill] sm:$0xff] %v5577_v33  ;;  %v1616_v32 = vadd.f32 %v1615_v56, %v1614_v10  ;;  %v2972_v44 = vrot.slane %v2971_v62, 4  ;;  %v531_v18 = vmul.f32 %v5582_v43, %v5345_v37  ;;  %v5603_v22 = vsel %vm535_vm2, %v5579_v42, -inf }
  0xee   : > { %10660 = vst [vmem:[#allocation38_spill] sm:$0xff] %v5579_v42  ;;  %v2075_v52 = vrot.slane %v2074_v61, 2  ;;  %v2979_v21 = vrot.slane %v2978_v14, 4  ;;  %v2993_v51 = vrot.slane %v2992_v58, 4  ;;  %v2985_v54 = vsel %vm535_vm2, %v2965_v17, 0.0 }
  0xef   : > { %10661 = vst [vmem:[#allocation39_spill] sm:$0xff] %v5586_v59  ;;  %v3021_v8 = vrot.slane %v3020_v0, 4  ;;  %v564_v47 = vsel %vm535_vm2, %v531_v18, 0.0  ;;  %v1127_v1 = vmul.f32 %v5582_v43, %v5351_v40  ;;  %v5611_v10 = vsel %vm535_vm2, %v5592_v20, -inf }
  0xf0   : > { %10662 = vst [vmem:[#allocation40_spill] sm:$0xff] %v5592_v20  ;;  %v2534_v56 = vadd.f32 %v2533_v15, %v2532_v57  ;;  %v565_v48 = vrot.slane %v564_v47, 4  ;;  %v1617_v24 = vrot.slane %v1616_v32, 1  ;;  %v2973_v29 = vadd.f32 %v2972_v44, %v2971_v62 }
  0xf1   : > { %10663 = vst [vmem:[#allocation41_spill] sm:$0xff] %v5597_v19  ;;  %v3914_v19 = vadd.f32 %v3913_v45, %v3912_v3  ;;  %v1159_v25 = vsel %vm535_vm2, %v1127_v1, 0.0  ;;  %v1587_v17 = vmul.f32 %v5582_v43, %v5367_v49  ;;  %v2076_v63 = vadd.f32 %v2075_v52, %v2074_v61 }
  0xf2   : > { %10664 = vst [vmem:[#allocation42_spill] sm:$0xff] %v5603_v22  ;;  %v2980_v23 = vadd.f32 %v2979_v21, %v2978_v14  ;;  %v2986_v18 = vrot.slane %v2985_v54, 4  ;;  %v2994_v16 = vadd.f32 %v2993_v51, %v2992_v58  ;;  %v3022_v26 = vadd.f32 %v3021_v8, %v3020_v0 }
  0xf3   : > { %10665 = vst [vmem:[#allocation43_spill] sm:$0xff] %v5611_v10  ;;  %v1160_v5 = vrot.slane %v1159_v25, 4  ;;  %v1619_v53 = vsel %vm535_vm2, %v1587_v17, 0.0  ;;  %v2047_v57 = vmul.f32 %v5582_v43, %v5392_v36  ;;  %v2535_v3 = vrot.slane %v2534_v56, 2 }
  0xf4   : > { %v3915_v15 = vrot.slane %v3914_v19, 2  ;;  %v566_v45 = vadd.f32 %v565_v48, %v564_v47  ;;  %v1620_v44 = vrot.slane %v1619_v53, 4  ;;  %v2974_v62 = vrot.slane %v2973_v29, 2 }
  0xf5   : > { %v1161_v1 = vadd.f32 %v1160_v5, %v1159_v25  ;;  %v2079_v20 = vsel %vm535_vm2, %v2047_v57, 0.0  ;;  %v2507_v61 = vmul.f32 %v5582_v43, %v5456_v34  ;;  %v2981_v14 = vrot.slane %v2980_v23, 2 }
  0xf6   : > { %v2987_v58 = vadd.f32 %v2986_v18, %v2985_v54  ;;  %v2080_v8 = vrot.slane %v2079_v20, 4  ;;  %v2967_v0 = vmul.f32 %v5582_v43, %v5545_v4  ;;  %v2995_v52 = vrot.slane %v2994_v16, 2 }
  0xf7   : > { %v3023_v21 = vrot.slane %v3022_v26, 2  ;;  %v2539_v51 = vsel %vm535_vm2, %v2507_v61, 0.0  ;;  %v3887_v48 = vmul.f32 %v5582_v43, %v5347_v38  ;;  %v2536_v47 = vadd.f32 %v2535_v3, %v2534_v56 }
  0xf8   : > { %v567_v25 = vrot.slane %v566_v45, 2  ;;  %v1621_v5 = vadd.f32 %v1620_v44, %v1619_v53  ;;  %v2540_v17 = vrot.slane %v2539_v51, 4  ;;  %v3916_v57 = vadd.f32 %v3915_v15, %v3914_v19 }
  0xf9   : > { %v1162_v10 = vrot.slane %v1161_v1, 2  ;;  %v2999_v42 = vsel %vm535_vm2, %v2967_v0, 0.0  ;;  %v3919_v54 = vsel %vm535_vm2, %v3887_v48, 0.0  ;;  %v2975_v18 = vadd.f32 %v2974_v62, %v2973_v29 }
  0xfa   : > { %v2982_v31 = vadd.f32 %v2981_v14, %v2980_v23  ;;  %v2988_v11 = vrot.slane %v2987_v58, 2  ;;  %v2081_v59 = vadd.f32 %v2080_v8, %v2079_v20  ;;  %v2996_v41 = vadd.f32 %v2995_v52, %v2994_v16 }
  0xfb   : > { %v3024_v7 = vadd.f32 %v3023_v21, %v3022_v26  ;;  %v3000_v61 = vrot.slane %v2999_v42, 4  ;;  %v3920_v60 = vrot.slane %v3919_v54, 4  ;;  %v5629_v22 = vadd.f32 %v1617_v24, %v1616_v32 }
  0xfc   : > { %v568_v56 = vadd.f32 %v567_v25, %v566_v45  ;;  %v1622_v3 = vrot.slane %v1621_v5, 2  ;;  %v2541_v53 = vadd.f32 %v2540_v17, %v2539_v51  ;;  %v2077_v44 = vrot.slane %v2076_v63, 1 }
  0xfd   : > { %v2537_v19 = vrot.slane %v2536_v47, 1  ;;  %v1163_v15 = vadd.f32 %v1162_v10, %v1161_v1  ;;  %v3001_v9 = vadd.f32 %v3000_v61, %v2999_v42  ;;  %v3917_v0 = vrot.slane %v3916_v57, 1  ;;  %v5639_v1 = vpop.f32.mrf.mxu0 }
  0xfe   : > { %v2976_v50 = vrot.slane %v2975_v18, 1  ;;  %v2989_v48 = vadd.f32 %v2988_v11, %v2987_v58  ;;  %v2082_v29 = vrot.slane %v2081_v59, 2  ;;  %v2983_v23 = vrot.slane %v2982_v31, 1  ;;  %10667 = vst [vmem:[#allocation45_spill] sm:$0xff] %v5639_v1 }
  0xff   : > { %v2997_v62 = vrot.slane %v2996_v41, 1  ;;  %v3025_v20 = vrot.slane %v3024_v7, 1  ;;  %v3921_v16 = vadd.f32 %v3920_v60, %v3919_v54  ;;  %v5633_v26 = vsel %vm535_vm2, %v5629_v22, -inf }
 0x100   : > { %v569_v24 = vrot.slane %v568_v56, 1  ;;  %v1623_v32 = vadd.f32 %v1622_v3, %v1621_v5  ;;  %v2542_v45 = vrot.slane %v2541_v53, 2  ;;  %v5635_v14 = vadd.f32 %v2077_v44, %v2076_v63 }
 0x101   : > { %v5637_v8 = vadd.f32 %v2537_v19, %v2536_v47  ;;  %v1164_v42 = vrot.slane %v1163_v15, 1  ;;  %v3002_v10 = vrot.slane %v3001_v9, 2  ;;  %v5641_v11 = vadd.f32 %v3917_v0, %v3916_v57 }
 0x102   : > { %v5643_v58 = vadd.f32 %v2976_v50, %v2975_v18  ;;  %v2990_v60 = vrot.slane %v2989_v48, 1  ;;  %v2083_v52 = vadd.f32 %v2082_v29, %v2081_v59  ;;  %v5645_v21 = vadd.f32 %v2983_v23, %v2982_v31 }
 0x103   : > { %10666 = vst [vmem:[#allocation44_spill] sm:$0xff] %v5637_v8  ;;  %v5647_v51 = vadd.f32 %v2997_v62, %v2996_v41  ;;  %v5649_v25 = vadd.f32 %v3025_v20, %v3024_v7  ;;  %v3922_v63 = vrot.slane %v3921_v16, 2  ;;  %v5651_v5 = vadd.f32 %v569_v24, %v568_v56 }
 0x104   : > { %10668 = vst [vmem:[#allocation46_spill] sm:$0xff] %v5641_v11  ;;  %v1624_v47 = vrot.slane %v1623_v32, 1  ;;  %v2543_v17 = vadd.f32 %v2542_v45, %v2541_v53  ;;  %v3423_v54 = vmul.f32 %v5361_v46, %v5639_v1  ;;  %v5657_v50 = vsel %vm535_vm2, %v5635_v14, -inf  ;;  %v5687_v53 = vpop.f32.mrf.mxu2 }
 0x105   : > { %10669 = vst [vmem:[#allocation47_spill] sm:$0xff] %v5643_v58  ;;  %v5661_v31 = vsel %vm535_vm2, %v5637_v8, -inf  ;;  %v5663_v41 = vadd.f32 %v1164_v42, %v1163_v15  ;;  %v3003_v7 = vadd.f32 %v3002_v10, %v3001_v9  ;;  %v5667_v59 = vsel %vm535_vm2, %v5641_v11, -inf }
 0x106   : > { %10670 = vst [vmem:[#allocation48_spill] sm:$0xff] %v5645_v21  ;;  %v5669_v57 = vadd.f32 %v2990_v60, %v2989_v48  ;;  %v5673_v46 = vsel %vm535_vm2, %v5643_v58, -inf  ;;  %v2084_v18 = vrot.slane %v2083_v52, 1  ;;  %v5677_v61 = vsel %vm535_vm2, %v5645_v21, -inf }
 0x107   : > { %10671 = vst [vmem:[#allocation49_spill] sm:$0xff] %v5647_v51  ;;  %v5681_v56 = vsel %vm535_vm2, %v5647_v51, -inf  ;;  %v5685_v9 = vsel %vm535_vm2, %v5649_v25, -inf  ;;  %v3923_v3 = vadd.f32 %v3922_v63, %v3921_v16  ;;  %v5691_v44 = vsel %vm535_vm2, %v5651_v5, -inf }
 0x108   : > { %10672 = vst [vmem:[#allocation50_spill] sm:$0xff] %v5649_v25  ;;  %v5693_v19 = vadd.f32 %v1624_v47, %v1623_v32  ;;  %v2544_v15 = vrot.slane %v2543_v17, 1  ;;  %v3431_v0 = vsel %vm535_vm2, %v3423_v54, 0.0  ;;  %v5698_v48 = vsel %vm535_vm2, %v5663_v41, -inf }
 0x109   : > { %10673 = vst [vmem:[#allocation51_spill] sm:$0xff] %v5661_v31  ;;  %v3004_v29 = vrot.slane %v3003_v7, 1  ;;  %v3426_v23 = vmul.f32 %v5494_v6, %v5639_v1  ;;  %v3427_v62 = vmul.f32 %v5582_v43, %v5639_v1  ;;  %v5704_v20 = vadd.f32 %v2084_v18, %v2083_v52 }
 0x10a   : > { %10674 = vst [vmem:[#allocation52_spill] sm:$0xff] %v5667_v59  ;;  %v3424_v16 = vmul.f32 %v5381_v2, %v5639_v1  ;;  %v3430_v24 = vmul.f32 %v5349_v39, %v5639_v1  ;;  %v532_v32 = vmul.f32 %v5687_v53, %v5345_v37  ;;  %v3924_v45 = vrot.slane %v3923_v3, 1 }
 0x10b   : > { %10675 = vst [vmem:[#allocation53_spill] sm:$0xff] %v5669_v57  ;;  %v3425_v42 = vmul.f32 %v5423_v13, %v5639_v1  ;;  %v3432_v10 = vrot.slane %v3431_v0, 4  ;;  %v1128_v6 = vmul.f32 %v5687_v53, %v5351_v40  ;;  %v5720_v60 = vadd.f32 %v2544_v15, %v2543_v17 }
 0x10c   : > { %10676 = vst [vmem:[#allocation54_spill] sm:$0xff] %v5673_v46  ;;  %v571_v39 = vsel %vm535_vm2, %v532_v32, 0.0  ;;  %v5725_v52 = vsel %vm535_vm2, %v5693_v19, -inf  ;;  %v5727_v63 = vadd.f32 %v3004_v29, %v3003_v7  ;;  %v3452_v13 = vsel %vm535_vm2, %v3426_v23, 0.0 }
 0x10d   : > { %10677 = vst [vmem:[#allocation55_spill] sm:$0xff] %v5677_v61  ;;  %v3459_v47 = vsel %vm535_vm2, %v3427_v62, 0.0  ;;  %v5733_v54 = vsel %vm535_vm2, %v5704_v20, -inf  ;;  %v3480_v18 = vsel %vm535_vm2, %v3430_v24, 0.0  ;;  %v572_v17 = vrot.slane %v571_v39, 4 }
 0x10e   : > { %10678 = vst [vmem:[#allocation56_spill] sm:$0xff] %v5681_v56  ;;  %v1166_v15 = vsel %vm535_vm2, %v1128_v6, 0.0  ;;  %v5737_v32 = vadd.f32 %v3924_v45, %v3923_v3  ;;  %v3433_v2 = vadd.f32 %v3432_v10, %v3431_v0  ;;  %v3438_v43 = vsel %vm535_vm2, %v3424_v16, 0.0 }
 0x10f   : > { %10679 = vst [vmem:[#allocation57_spill] sm:$0xff] %v5685_v9  ;;  %v3445_v7 = vsel %vm535_vm2, %v3425_v42, 0.0  ;;  %v5745_v23 = vsel %vm535_vm2, %v5720_v60, -inf  ;;  %v3453_v62 = vrot.slane %v3452_v13, 4  ;;  %v3460_v11 = vrot.slane %v3459_v47, 4 }
 0x110   : > { %10680 = vst [vmem:[#allocation58_spill] sm:$0xff] %v5720_v60  ;;  %v5749_v24 = vsel %vm535_vm2, %v5727_v63, -inf  ;;  %v3481_v3 = vrot.slane %v3480_v18, 4  ;;  %v1167_v45 = vrot.slane %v1166_v15, 4  ;;  %v1588_v0 = vmul.f32 %v5687_v53, %v5367_v49 }
 0x111   : > { %10681 = vst [vmem:[#allocation59_spill] sm:$0xff] %v5727_v63  ;;  %v3439_v42 = vrot.slane %v3438_v43, 4  ;;  %v3446_v10 = vrot.slane %v3445_v7, 4  ;;  %v573_v6 = vadd.f32 %v572_v17, %v571_v39  ;;  %v5759_v59 = vsel %vm535_vm2, %v5737_v32, -inf }
 0x112   : > { %10682 = vst [vmem:[#allocation60_spill] sm:$0xff] %v5737_v32  ;;  %v3434_v25 = vrot.slane %v3433_v2, 2  ;;  %v1626_v63 = vsel %vm535_vm2, %v1588_v0, 0.0  ;;  %v3454_v21 = vadd.f32 %v3453_v62, %v3452_v13  ;;  %v3461_v58 = vadd.f32 %v3460_v11, %v3459_v47 }
 0x113   : > { %10683 = vst [vmem:[#allocation61_spill] sm:$0xff] %v5745_v23  ;;  %v1627_v56 = vrot.slane %v1626_v63, 4  ;;  %v3482_v16 = vadd.f32 %v3481_v3, %v3480_v18  ;;  %v1168_v9 = vadd.f32 %v1167_v45, %v1166_v15  ;;  %v2048_v39 = vmul.f32 %v5687_v53, %v5392_v36 }
 0x114   : > { %10684 = vst [vmem:[#allocation62_spill] sm:$0xff] %v5749_v24  ;;  %v2508_v17 = vmul.f32 %v5687_v53, %v5456_v34  ;;  %v3440_v29 = vadd.f32 %v3439_v42, %v3438_v43  ;;  %v3447_v32 = vadd.f32 %v3446_v10, %v3445_v7  ;;  %v574_v57 = vrot.slane %v573_v6, 2 }
 0x115   : > { %10685 = vst [vmem:[#allocation63_spill] sm:$0xff] %v5759_v59  ;;  %v2968_v0 = vmul.f32 %v5687_v53, %v5545_v4  ;;  %v1628_v60 = vadd.f32 %v1627_v56, %v1626_v63  ;;  %v2086_v51 = vsel %vm535_vm2, %v2048_v39, 0.0  ;;  %v3428_v13 = vmul.f32 %v5687_v53, %v5639_v1  ;;  %v5780_v1 = vpop.f32.mrf.mxu2 }
 0x116   : > { %v2546_v11 = vsel %vm535_vm2, %v2508_v17, 0.0  ;;  %v3455_v47 = vrot.slane %v3454_v21, 2  ;;  %v3462_v18 = vrot.slane %v3461_v58, 2  ;;  %v2087_v15 = vrot.slane %v2086_v51, 4 }
 0x117   : > { %v2547_v62 = vrot.slane %v2546_v11, 4  ;;  %v3435_v3 = vadd.f32 %v3434_v25, %v3433_v2  ;;  %v3483_v45 = vrot.slane %v3482_v16, 2  ;;  %v1169_v43 = vrot.slane %v1168_v9, 2 }
 0x118   : > { %v3888_v7 = vmul.f32 %v5687_v53, %v5347_v38  ;;  %v3441_v63 = vrot.slane %v3440_v29, 2  ;;  %v575_v42 = vadd.f32 %v574_v57, %v573_v6  ;;  %v3006_v10 = vsel %vm535_vm2, %v2968_v0, 0.0 }
 0x119   : > { %v3448_v39 = vrot.slane %v3447_v32, 2  ;;  %v1629_v17 = vrot.slane %v1628_v60, 2  ;;  %v2088_v24 = vadd.f32 %v2087_v15, %v2086_v51  ;;  %v3466_v46 = vsel %vm535_vm2, %v3428_v13, 0.0 }
 0x11a   : > { %v3456_v25 = vadd.f32 %v3455_v47, %v3454_v21  ;;  %v3463_v2 = vadd.f32 %v3462_v18, %v3461_v58  ;;  %v2548_v8 = vadd.f32 %v2547_v62, %v2546_v11  ;;  %v3926_v23 = vsel %vm535_vm2, %v3888_v7, 0.0 }
 0x11b   : > { %v3436_v53 = vrot.slane %v3435_v3, 1  ;;  %v3484_v38 = vadd.f32 %v3483_v45, %v3482_v16  ;;  %v1170_v33 = vadd.f32 %v1169_v43, %v1168_v9  ;;  %v3007_v56 = vrot.slane %v3006_v10, 4 }
 0x11c   : > { %v3442_v59 = vadd.f32 %v3441_v63, %v3440_v29  ;;  %v576_v57 = vrot.slane %v575_v42, 1  ;;  %v3467_v6 = vrot.slane %v3466_v46, 4  ;;  %v533_v0 = vmul.f32 %v5780_v1, %v5345_v37 }
 0x11d   : > { %v3449_v51 = vadd.f32 %v3448_v39, %v3447_v32  ;;  %v1630_v15 = vadd.f32 %v1629_v17, %v1628_v60  ;;  %v2089_v13 = vrot.slane %v2088_v24, 2  ;;  %v3927_v30 = vrot.slane %v3926_v23, 4 }
 0x11e   : > { %v3457_v31 = vrot.slane %v3456_v25, 1  ;;  %v3464_v21 = vrot.slane %v3463_v2, 1  ;;  %v2549_v58 = vrot.slane %v2548_v8, 2  ;;  %v578_v11 = vsel %vm535_vm2, %v533_v0, 0.0 }
 0x11f   : > { %v5786_v47 = vadd.f32 %v3436_v53, %v3435_v3  ;;  %v3485_v16 = vrot.slane %v3484_v38, 1  ;;  %v1171_v9 = vrot.slane %v1170_v33, 1  ;;  %v3008_v18 = vadd.f32 %v3007_v56, %v3006_v10 }
 0x120   : > { %v3443_v29 = vrot.slane %v3442_v59, 1  ;;  %v5788_v62 = vadd.f32 %v576_v57, %v575_v42  ;;  %v3468_v45 = vadd.f32 %v3467_v6, %v3466_v46  ;;  %v579_v43 = vrot.slane %v578_v11, 4 }
 0x121   : > { %10686 = vst [vmem:[#allocation64_spill] sm:$0xff] %v5786_v47  ;;  %v3450_v37 = vrot.slane %v3449_v51, 1  ;;  %v1631_v32 = vrot.slane %v1630_v15, 1  ;;  %v2090_v60 = vadd.f32 %v2089_v13, %v2088_v24  ;;  %v3928_v7 = vadd.f32 %v3927_v30, %v3926_v23 }
 0x122   : > { %v5790_v63 = vadd.f32 %v3457_v31, %v3456_v25  ;;  %v5792_v39 = vadd.f32 %v3464_v21, %v3463_v2  ;;  %v2550_v17 = vadd.f32 %v2549_v58, %v2548_v8  ;;  %v580_v0 = vadd.f32 %v579_v43, %v578_v11  ;;  %v10693_v58 = vld [vmem:[#allocation28_spill] sm:$0xff] }
 0x123   : > { %v5794_v3 = vadd.f32 %v3485_v16, %v3484_v38  ;;  %v5798_v56 = vsel %vm535_vm2, %v5786_v47, -inf  ;;  %v5800_v42 = vadd.f32 %v1171_v9, %v1170_v33  ;;  %v3009_v46 = vrot.slane %v3008_v18, 2  ;;  %v10700_v47 = vld [vmem:[#allocation26_spill] sm:$0xff] }
 0x124   : > { %10687 = vst [vmem:[#allocation65_spill] sm:$0xff] %v5790_v63  ;;  %v5802_v10 = vadd.f32 %v3443_v29, %v3442_v59  ;;  %v598_v30 = vsel %vm535_vm2, %v5788_v62, -inf  ;;  %v3469_v31 = vrot.slane %v3468_v45, 2  ;;  %v581_v23 = vrot.slane %v580_v0, 2 }
 0x125   : > { %10688 = vst [vmem:[#allocation66_spill] sm:$0xff] %v5792_v39  ;;  %v5806_v24 = vadd.f32 %v3450_v37, %v3449_v51  ;;  %v5808_v8 = vadd.f32 %v1631_v32, %v1630_v15  ;;  %v2091_v38 = vrot.slane %v2090_v60, 1  ;;  %v3929_v25 = vrot.slane %v3928_v7, 2 }
 0x126   : > { %10689 = vst [vmem:[#allocation67_spill] sm:$0xff] %v5794_v3  ;;  %v5812_v2 = vsel %vm535_vm2, %v5790_v63, -inf  ;;  %v5816_v33 = vsel %vm535_vm2, %v5792_v39, -inf  ;;  %v2551_v59 = vrot.slane %v2550_v17, 1  ;;  %v582_v53 = vadd.f32 %v581_v23, %v580_v0  ;;  %v10695_v0 = vld [vmem:[#allocation6_spill] sm:$0xff] }
 0x127   : > { %10690 = vst [vmem:[#allocation68_spill] sm:$0xff] %v5802_v10  ;;  %v5820_v57 = vsel %vm535_vm2, %v5794_v3, -inf  ;;  %v599_v6 = vmax.f32 %v5481_v55, %v598_v30  ;;  %v5825_v51 = vsel %vm535_vm2, %v5800_v42, -inf  ;;  %v3010_v15 = vadd.f32 %v3009_v46, %v3008_v18  ;;  %v10696_v46 = vld [vmem:[#allocation42_spill] sm:$0xff] }
 0x128   : > { %10691 = vst [vmem:[#allocation69_spill] sm:$0xff] %v5806_v24  ;;  %v3470_v13 = vadd.f32 %v3469_v31, %v3468_v45  ;;  %v583_v21 = vrot.slane %v582_v53, 1  ;;  %v594_v11 = vsel %vm535_vm2, %v10693_v58, -inf  ;;  %v1129_v16 = vmul.f32 %v5780_v1, %v5351_v40 }
 0x129   : > { %10692 = vst [vmem:[#allocation70_spill] sm:$0xff] %v5820_v57  ;;  %v5833_v9 = vsel %vm535_vm2, %v5808_v8, -inf  ;;  %v5835_v29 = vadd.f32 %v2091_v38, %v2090_v60  ;;  %v3930_v55 = vadd.f32 %v3929_v25, %v3928_v7  ;;  %v1589_v43 = vmul.f32 %v5780_v1, %v5367_v49 }
 0x12a   : > { %v5839_v37 = vadd.f32 %v2551_v59, %v2550_v17  ;;  %v5841_v18 = vadd.f32 %v583_v21, %v582_v53  ;;  %v1173_v45 = vsel %vm535_vm2, %v1129_v16, 0.0  ;;  %v2049_v32 = vmul.f32 %v5780_v1, %v5392_v36 }
 0x12b   : > { %v3011_v40 = vrot.slane %v3010_v15, 1  ;;  %v603_v30 = vmax.f32 %v10696_v46, %v10695_v0  ;;  %v1174_v31 = vrot.slane %v1173_v45, 4  ;;  %v1633_v60 = vsel %vm535_vm2, %v1589_v43, 0.0 }
 0x12c   : > { %10694 = vst [vmem:[#allocation28_spill] sm:$0xff] %v5839_v37  ;;  %v3471_v7 = vrot.slane %v3470_v13, 1  ;;  %v600_v49 = vsel %vm535_vm2, %v5841_v18, -inf  ;;  %v1634_v17 = vrot.slane %v1633_v60, 4  ;;  %v2093_v23 = vsel %vm535_vm2, %v2049_v32, 0.0 }
 0x12d   : > { %v601_v38 = vmax.f32 %v594_v11, %v600_v49  ;;  %v1175_v25 = vadd.f32 %v1174_v31, %v1173_v45  ;;  %v2094_v59 = vrot.slane %v2093_v23, 4  ;;  %v2509_v36 = vmul.f32 %v5780_v1, %v5456_v34  ;;  %v10698_v34 = vld [vmem:[#allocation19_spill] sm:$0xff]  ;;  %v10699_v49 = vld [vmem:[#allocation20_spill] sm:$0xff] }
 0x12e   : > { %v5856_v53 = vsel %vm535_vm2, %v5835_v29, -inf  ;;  %v5860_v21 = vsel %vm535_vm2, %v5839_v37, -inf  ;;  %v10697_v16 = vmax.f32 %v5442_v27, %v5691_v44  ;;  %v1635_v0 = vadd.f32 %v1634_v17, %v1633_v60 }
 0x12f   : > { %v605_v32 = vmax.f32 %v601_v38, %v603_v30  ;;  %v1176_v11 = vrot.slane %v1175_v25, 2  ;;  %v2095_v45 = vadd.f32 %v2094_v59, %v2093_v23  ;;  %v2553_v46 = vsel %vm535_vm2, %v2509_v36, 0.0  ;;  %v10705_v59 = vld [vmem:[#allocation15_spill] sm:$0xff] }
 0x130   : > { %v604_v43 = vmax.f32 %v10697_v16, %v599_v6  ;;  %v1194_v31 = vmax.f32 %v10698_v34, %v5825_v51  ;;  %v3931_v39 = vrot.slane %v3930_v55, 1  ;;  %v1636_v63 = vrot.slane %v1635_v0, 2  ;;  %v10702_v6 = vld [vmem:[#allocation39_spill] sm:$0xff]  ;;  %v10704_v51 = vld [vmem:[#allocation8_spill] sm:$0xff]  ;;  %v10706_v34 = vld [vmem:[#allocation38_spill] sm:$0xff] }
 0x131   : > { %v2114_v37 = vmax.f32 %v10700_v47, %v5856_v53  ;;  %v5872_v61 = vadd.f32 %v3011_v40, %v3010_v15  ;;  %v2096_v44 = vrot.slane %v2095_v45, 2  ;;  %v5876_v60 = vadd.f32 %v3471_v7, %v3470_v13  ;;  %v10720_v53 = vld [vmem:[#allocation9_spill] sm:$0xff] }
 0x132   : > { %v606_v27 = vmax.f32 %v604_v43, %v605_v32  ;;  %v1177_v17 = vadd.f32 %v1176_v11, %v1175_v25  ;;  %v2554_v23 = vrot.slane %v2553_v46, 4  ;;  %v1637_v32 = vadd.f32 %v1636_v63, %v1635_v0 }
 0x133   : > { %10701 = vst [vmem:[#allocation6_spill] sm:$0xff] %v5872_v61  ;;  %v2097_v25 = vadd.f32 %v2096_v44, %v2095_v45  ;;  %v5887_v11 = vsel %vm535_vm2, %v5872_v61, -inf }
 0x134   : > { %10703 = vst [vmem:[#allocation42_spill] sm:$0xff] %v5876_v60  ;;  %v607_v38 = vsub.f32 %v10704_v51, %v606_v27  ;;  %v608_v36 = vsub.f32 %v10705_v59, %v606_v27  ;;  %v609_v16 = vsub.f32 %v10693_v58, %v606_v27  ;;  %v610_v3 = vsub.f32 %v10706_v34, %v606_v27  ;;  %v10708_v58 = vld [vmem:[#allocation3_spill] sm:$0xff] }
 0x135   : > { %v611_v15 = vsub.f32 %v5651_v5, %v606_v27  ;;  %v612_v40 = vsub.f32 %v5788_v62, %v606_v27  ;;  %v613_v43 = vsub.f32 %v5841_v18, %v606_v27  ;;  %v5889_v51 = vadd.f32 %v3931_v39, %v3930_v55  ;;  %v10709_v39 = vld [vmem:[#allocation29_spill] sm:$0xff] }
 0x136   : > { %v615_v30 = vmul.f32 1.442695, %v607_v38  ;;  %v617_v13 = vmul.f32 1.442695, %v608_v36  ;;  %v619_v7 = vmul.f32 1.442695, %v609_v16  ;;  %v614_v59 = vsub.f32 %v10708_v58, %v606_v27 }
 0x137   : > { %10707 = vst [vmem:[#allocation19_spill] sm:$0xff] %v5889_v51  ;;  %v621_v34 = vmul.f32 1.442695, %v610_v3  ;;  %v623_v5 = vmul.f32 1.442695, %v611_v15  ;;  %v1178_v62 = vrot.slane %v1177_v17, 1  ;;  %v2555_v18 = vadd.f32 %v2554_v23, %v2553_v46 }
 0x138   : > { %5045 = vpow2.f32 %v615_v30  ;;  %v625_v63 = vmul.f32 1.442695, %v612_v40  ;;  %v1638_v0 = vrot.slane %v1637_v32, 1  ;;  %v2098_v45 = vrot.slane %v2097_v25, 1  ;;  %v10710_v23 = vld [vmem:[#allocation13_spill] sm:$0xff]  ;;  %v10711_v36 = vld [vmem:[#allocation43_spill] sm:$0xff] }
 0x139   : > { %5047 = vpow2.f32 %v617_v13  ;;  %v627_v44 = vmul.f32 1.442695, %v613_v43  ;;  %v5892_v38 = vadd.f32 %v1178_v62, %v1177_v17  ;;  %v1189_v55 = vsel %vm535_vm2, %v10709_v39, -inf  ;;  %v10712_v17 = vld [vmem:[#allocation30_spill] sm:$0xff] }
 0x13a   : > { %5049 = vpow2.f32 %v619_v7  ;;  %v629_v3 = vmul.f32 1.442695, %v614_v59  ;;  %v5896_v27 = vadd.f32 %v1638_v0, %v1637_v32  ;;  %v5898_v30 = vadd.f32 %v2098_v45, %v2097_v25 }
 0x13b   : > { %5051 = vpow2.f32 %v621_v34  ;;  %v1195_v46 = vsel %vm535_vm2, %v5892_v38, -inf  ;;  %v1198_v16 = vmax.f32 %v10711_v36, %v10710_v23  ;;  %v1649_v15 = vsel %vm535_vm2, %v10712_v17, -inf }
 0x13c   : > { %5053 = vpow2.f32 %v623_v5  ;;  %v1196_v40 = vmax.f32 %v1189_v55, %v1195_v46  ;;  %v1655_v43 = vsel %vm535_vm2, %v5896_v27, -inf  ;;  %v2556_v32 = vrot.slane %v2555_v18, 2  ;;  %v10714_v5 = vld [vmem:[#allocation16_spill] sm:$0xff] }
 0x13d   : > { %5055 = vpow2.f32 %v625_v63  ;;  %v10713_v7 = vmax.f32 %v5446_v28, %v5698_v48  ;;  %v1656_v58 = vmax.f32 %v1649_v15, %v1655_v43  ;;  %v1658_v62 = vmax.f32 %v5633_v26, %v10714_v5 }
 0x13e   : > { %v5908_v13 = vpop.eup %5045  ;;  %5057 = vpow2.f32 %v627_v44  ;;  %v1200_v34 = vmax.f32 %v1196_v40, %v1198_v16  ;;  %v2115_v63 = vsel %vm535_vm2, %v5898_v30, -inf  ;;  %v10715_v44 = vmax.f32 %v10699_v49, %v5833_v9 }
 0x13f   : > { %v1199_v25 = vmax.f32 %v10713_v7, %v1194_v31  ;;  %v5913_v59 = vpop.eup %5047  ;;  %5059 = vpow2.f32 %v629_v3  ;;  %v10716_v28 = vmax.f32 %v5460_v35, %v5725_v52  ;;  %v10717_v31 = vld [vmem:[#allocation32_spill] sm:$0xff]  ;;  %v10718_v3 = vld [vmem:[#allocation27_spill] sm:$0xff]  ;;  %v10719_v9 = vmax.f32 %v5530_v12, %v5733_v54  ;;  %v10721_v54 = vld [vmem:[#allocation17_spill] sm:$0xff] }
 0x140   : > { %v5919_v0 = vpop.eup %5049  ;;  %v639_v45 = vrot.slane %v5913_v59, 7  ;;  %v2109_v55 = vsel %vm535_vm2, %v10717_v31, -inf  ;;  %v2118_v26 = vmax.f32 %v5657_v50, %v10718_v3  ;;  %v2557_v35 = vadd.f32 %v2556_v32, %v2555_v18 }
 0x141   : > { %v1659_v48 = vmax.f32 %v10716_v28, %v10715_v44  ;;  %v5932_v46 = vpop.eup %5051  ;;  %v642_v23 = vrot.slane %v5919_v0, 6  ;;  %v1201_v36 = vmax.f32 %v1199_v25, %v1200_v34  ;;  %v5941_v49 = vmax.f32 %v10719_v9, %v2114_v37 }
 0x142   : > { %v5943_v52 = vpop.eup %5053  ;;  %v641_v16 = vsel %vm640_vm3, %v639_v45, %v5908_v13  ;;  %v645_v50 = vrot.slane %v5932_v46, 5  ;;  %v1660_v15 = vmax.f32 %v1656_v58, %v1658_v62  ;;  %v2116_v40 = vmax.f32 %v2109_v55, %v2115_v63  ;;  %v10722_v58 = vld [vmem:[#allocation40_spill] sm:$0xff] }
 0x143   : > { %v5948_v43 = vpop.eup %5055  ;;  %v644_v7 = vsel %vm643_vm4, %v642_v23, %v641_v16  ;;  %v648_v47 = vrot.slane %v5943_v52, 4  ;;  %v1202_v12 = vsub.f32 %v10720_v53, %v1201_v36  ;;  %v1203_v37 = vsub.f32 %v10721_v54, %v1201_v36  ;;  %v10723_v53 = vld [vmem:[#allocation5_spill] sm:$0xff] }
 0x144   : > { %v5954_v18 = vpop.eup %5057  ;;  %v647_v32 = vsel %vm646_vm5, %v645_v50, %v644_v7  ;;  %v651_v25 = vrot.slane %v5948_v43, 3  ;;  %v1204_v34 = vsub.f32 %v10709_v39, %v1201_v36  ;;  %v1205_v5 = vsub.f32 %v10722_v58, %v1201_v36 }
 0x145   : > { %v5960_v62 = vpop.eup %5059  ;;  %v650_v63 = vsel %vm649_vm6, %v648_v47, %v647_v32  ;;  %v654_v45 = vrot.slane %v5954_v18, 2  ;;  %v1206_v44 = vsub.f32 %v5663_v41, %v1201_v36  ;;  %v1207_v28 = vsub.f32 %v5800_v42, %v1201_v36 }
 0x146   : > { %v653_v55 = vsel %vm652_vm7, %v651_v25, %v650_v63  ;;  %v657_v3 = vrot.slane %v5960_v62, 1  ;;  %v1208_v23 = vsub.f32 %v5892_v38, %v1201_v36  ;;  %v1661_v9 = vmax.f32 %v1659_v48, %v1660_v15  ;;  %v10724_v38 = vld [vmem:[#allocation11_spill] sm:$0xff]  ;;  %v10725_v15 = vld [vmem:[#allocation18_spill] sm:$0xff] }
 0x147   : > { %v656_v39 = vsel %vm655_vm8, %v654_v45, %v653_v55  ;;  %v1210_v16 = vmul.f32 1.442695, %v1202_v12  ;;  %v1212_v50 = vmul.f32 1.442695, %v1203_v37  ;;  %v1214_v7 = vmul.f32 1.442695, %v1204_v34 }
 0x148   : > { %v659_v47 = vsel %vm658_vm9, %v657_v3, %v656_v39  ;;  %v1209_v54 = vsub.f32 %v10723_v53, %v1201_v36  ;;  %v1216_v32 = vmul.f32 1.442695, %v1205_v5  ;;  %v2558_v41 = vrot.slane %v2557_v35, 1 }
 0x149   : > { %v661_v42 = vsel %vm535_vm2, %v659_v47, 0.0  ;;  %5061 = vpow2.f32 %v1210_v16  ;;  %v1218_v25 = vmul.f32 1.442695, %v1206_v44  ;;  %v1220_v58 = vmul.f32 1.442695, %v1207_v28 }
 0x14a   : > { %v662_v63 = vrot.slane %v661_v42, 4  ;;  %5063 = vpow2.f32 %v1212_v50  ;;  %v1662_v48 = vsub.f32 %v10724_v38, %v1661_v9  ;;  %v1663_v45 = vsub.f32 %v10725_v15, %v1661_v9 }
 0x14b   : > { %5065 = vpow2.f32 %v1214_v7  ;;  %v1222_v12 = vmul.f32 1.442695, %v1208_v23  ;;  %v1664_v37 = vsub.f32 %v10712_v17, %v1661_v9  ;;  %v2120_v34 = vmax.f32 %v2116_v40, %v2118_v26  ;;  %v10726_v17 = vld [vmem:[#allocation12_spill] sm:$0xff] }
 0x14c   : > { %v663_v55 = vadd.f32 %v662_v63, %v661_v42  ;;  %5067 = vpow2.f32 %v1216_v32  ;;  %v1224_v36 = vmul.f32 1.442695, %v1209_v54  ;;  %v1665_v5 = vsub.f32 %v5629_v22, %v1661_v9 }
 0x14d   : > { %5069 = vpow2.f32 %v1218_v25  ;;  %v1666_v44 = vsub.f32 %v5693_v19, %v1661_v9  ;;  %v1667_v28 = vsub.f32 %v5808_v8, %v1661_v9  ;;  %v1670_v3 = vmul.f32 1.442695, %v1662_v48 }
 0x14e   : > { %v664_v39 = vrot.slane %v663_v55, 2  ;;  %5071 = vpow2.f32 %v1220_v58  ;;  %v1668_v16 = vsub.f32 %v5896_v27, %v1661_v9  ;;  %v1672_v50 = vmul.f32 1.442695, %v1663_v45  ;;  %v10727_v45 = vld [vmem:[#allocation22_spill] sm:$0xff] }
 0x14f   : > { %v5980_v23 = vpop.eup %5061  ;;  %5073 = vpow2.f32 %v1222_v12  ;;  %v1669_v26 = vsub.f32 %v10726_v17, %v1661_v9  ;;  %v1674_v40 = vmul.f32 1.442695, %v1664_v37  ;;  %v5983_v7 = vadd.f32 %v2558_v41, %v2557_v35 }
 0x150   : > { %v5985_v22 = vpop.eup %5063  ;;  %v665_v47 = vadd.f32 %v664_v39, %v663_v55  ;;  %5075 = vpow2.f32 %v1224_v36  ;;  %v1676_v19 = vmul.f32 1.442695, %v1665_v5  ;;  %v5988_v8 = vmax.f32 %v5941_v49, %v2120_v34  ;;  %v10728_v36 = vld [vmem:[#allocation24_spill] sm:$0xff] }
 0x151   : > { %v5990_v53 = vpop.eup %5065  ;;  %v1234_v27 = vrot.slane %v5985_v22, 7  ;;  %5077 = vpow2.f32 %v1670_v3  ;;  %v1678_v54 = vmul.f32 1.442695, %v1666_v44  ;;  %v1680_v32 = vmul.f32 1.442695, %v1667_v28 }
 0x152   : > { %v5993_v42 = vpop.eup %5067  ;;  %v666_v9 = vrot.slane %v665_v47, 1  ;;  %v1236_v35 = vrot.slane %v5990_v53, 6  ;;  %5079 = vpow2.f32 %v1672_v50  ;;  %v1682_v41 = vmul.f32 1.442695, %v1668_v16 }
 0x153   : > { %v5996_v25 = vpop.eup %5069  ;;  %v1235_v49 = vsel %vm640_vm3, %v1234_v27, %v5980_v23  ;;  %v1238_v58 = vrot.slane %v5993_v42, 5  ;;  %5081 = vpow2.f32 %v1674_v40  ;;  %v1684_v63 = vmul.f32 1.442695, %v1669_v26 }
 0x154   : > { %v6001_v38 = vpop.eup %5071  ;;  %v6003_v48 = vadd.f32 %v666_v9, %v665_v47  ;;  %v1237_v15 = vsel %vm643_vm4, %v1236_v35, %v1235_v49  ;;  %5083 = vpow2.f32 %v1676_v19  ;;  %v2122_v12 = vsub.f32 %v10727_v45, %v5988_v8 }
 0x155   : > { %v6008_v37 = vpop.eup %5073  ;;  %v1239_v34 = vsel %vm646_vm5, %v1238_v58, %v1237_v15  ;;  %v1240_v55 = vrot.slane %v5996_v25, 4  ;;  %5085 = vpow2.f32 %v1678_v54  ;;  %v2123_v5 = vsub.f32 %v10728_v36, %v5988_v8 }
 0x156   : > { %v6014_v44 = vpop.eup %5075  ;;  %5087 = vrcp.f32 %v6003_v48  ;;  %v1242_v28 = vrot.slane %v6001_v38, 3  ;;  %v2124_v3 = vsub.f32 %v10717_v31, %v5988_v8  ;;  %v2125_v39 = vsub.f32 %v5635_v14, %v5988_v8 }
 0x157   : > { %v6022_v16 = vpop.eup %5077  ;;  %v1241_v50 = vsel %vm649_vm6, %v1240_v55, %v1239_v34  ;;  %v1244_v17 = vrot.slane %v6008_v37, 2  ;;  %5089 = vpow2.f32 %v1680_v32  ;;  %v2126_v26 = vsub.f32 %v5704_v20, %v5988_v8 }
 0x158   : > { %v6028_v40 = vpop.eup %5079  ;;  %v1243_v47 = vsel %vm652_vm7, %v1242_v28, %v1241_v50  ;;  %v1246_v19 = vrot.slane %v6014_v44, 1  ;;  %5091 = vpow2.f32 %v1682_v41  ;;  %v2127_v14 = vsub.f32 %v5835_v29, %v5988_v8 }
 0x159   : > { %v6034_v31 = vpop.eup %5081  ;;  %v679_v27 = vand.u32 2147483648, %v6003_v48  ;;  %v1245_v54 = vsel %vm655_vm8, %v1244_v17, %v1243_v47  ;;  %5093 = vpow2.f32 %v1684_v63  ;;  %v1694_v32 = vrot.slane %v6028_v40, 7  ;;  %v10730_v17 = vld [vmem:[#allocation25_spill] sm:$0xff] }
 0x15a   : > { %v6039_v20 = vpop.eup %5083  ;;  %v1247_v9 = vsel %vm658_vm9, %v1246_v19, %v1245_v54  ;;  %v1696_v35 = vrot.slane %v6034_v31, 6  ;;  %v2128_v41 = vsub.f32 %v5898_v30, %v5988_v8  ;;  %v2130_v49 = vmul.f32 1.442695, %v2122_v12 }
 0x15b   : > { %v6045_v29 = vpop.eup %5085  ;;  %vm673_vm10 = vweird.f32 %v6003_v48  ;;  %v1249_v58 = vsel %vm535_vm2, %v1247_v9, 0.0  ;;  %v1695_v63 = vsel %vm640_vm3, %v1694_v32, %v6022_v16  ;;  %v1698_v15 = vrot.slane %v6039_v20, 5 }
 0x15c   : > { %10729 = vst [vmem:[#allocation20_spill] sm:$0xff] %v6045_v29  ;;  %v2132_v45 = vmul.f32 1.442695, %v2123_v5  ;;  %v5088_v34 = vpop.eup %5087  ;;  %v1250_v55 = vrot.slane %v1249_v58, 4  ;;  %v1697_v36 = vsel %vm643_vm4, %v1696_v35, %v1695_v63  ;;  %v1700_v28 = vrot.slane %v6045_v29, 4 }
 0x15d   : > { %5095 = vpow2.f32 %v2130_v49  ;;  %v6054_v30 = vpop.eup %5089  ;;  %v669_v12 = vmul.f32 %v5088_v34, %v6003_v48  ;;  %v1699_v50 = vsel %vm646_vm5, %v1698_v15, %v1697_v36  ;;  %v2129_v47 = vsub.f32 %v10730_v17, %v5988_v8 }
 0x15e   : > { %5097 = vpow2.f32 %v2132_v45  ;;  %v6060_v19 = vpop.eup %5091  ;;  %v1251_v5 = vadd.f32 %v1250_v55, %v1249_v58  ;;  %v1701_v54 = vsel %vm649_vm6, %v1700_v28, %v1699_v50  ;;  %v1702_v32 = vrot.slane %v6054_v30, 3 }
 0x15f   : > { %v2134_v9 = vmul.f32 1.442695, %v2124_v3  ;;  %v6064_v35 = vpop.eup %5093  ;;  %v670_v49 = vsub.f32 1.0, %v669_v12  ;;  %v1704_v63 = vrot.slane %v6060_v19, 2  ;;  %v2136_v61 = vmul.f32 1.442695, %v2125_v39 }
 0x160   : > { %v2138_v29 = vmul.f32 1.442695, %v2126_v26  ;;  %v1252_v15 = vrot.slane %v1251_v5, 2  ;;  %v1703_v36 = vsel %vm652_vm7, %v1702_v32, %v1701_v54  ;;  %v1706_v8 = vrot.slane %v6064_v35, 1 }
 0x161   : > { %5099 = vpow2.f32 %v2134_v9  ;;  %v671_v45 = vmul.f32 %v5088_v34, %v670_v49  ;;  %vm674_vm11 = vweird.f32 %v5088_v34  ;;  %v1705_v58 = vsel %vm655_vm8, %v1704_v63, %v1703_v36 }
 0x162   : > { %v2140_v55 = vmul.f32 1.442695, %v2127_v14  ;;  %v677_v3 = vand.u32 2147483647, %v6003_v48  ;;  %v1253_v12 = vadd.f32 %v1252_v15, %v1251_v5  ;;  %v1707_v50 = vsel %vm658_vm9, %v1706_v8, %v1705_v58  ;;  %vm675_vm12 = vmor %vm673_vm10, %vm674_vm11 }
 0x163   : > { %v6070_v28 = vpop.eup %5095  ;;  %v2142_v39 = vmul.f32 1.442695, %v2128_v41  ;;  %v672_v17 = vadd.f32 %v5088_v34, %v671_v45  ;;  %v1709_v54 = vsel %vm535_vm2, %v1707_v50, 0.0  ;;  %5101 = vpow2.f32 %v2136_v61 }
 0x164   : > { %v6074_v26 = vpop.eup %5097  ;;  %v2144_v32 = vmul.f32 1.442695, %v2129_v47  ;;  %v1254_v9 = vrot.slane %v1253_v12, 1  ;;  %v1710_v14 = vrot.slane %v1709_v54, 4  ;;  %5103 = vpow2.f32 %v2138_v29 }
 0x165   : > { %10731 = vst [vmem:[#allocation26_spill] sm:$0xff] %v6074_v26  ;;  %v2154_v49 = vrot.slane %v6074_v26, 7  ;;  %v6082_v5 = vsel %vm535_vm2, %v5876_v60, -inf  ;;  %v676_v41 = vsel %vm675_vm12, %v5088_v34, %v672_v17  ;;  %v680_v63 = vor.u32 1.1754944e-38, %v679_v27  ;;  %v10733_v34 = vld [vmem:[#allocation35_spill] sm:$0xff] }
 0x166   : > { %5105 = vpow2.f32 %v2140_v55  ;;  %vm678_vm13 = vcmp.eq.f32.partialorder %v677_v3, 8.507059e+37  ;;  %v6086_v61 = vadd.f32 %v1254_v9, %v1253_v12  ;;  %v2575_v48 = vsel %vm535_vm2, %v5983_v7, -inf }
 0x167   : > { %v6084_v15 = vpop.eup %5099  ;;  %5107 = vpow2.f32 %v2142_v39  ;;  %v681_v47 = vsel %vm678_vm13, %v680_v63, %v676_v41  ;;  %v1711_v29 = vadd.f32 %v1710_v14, %v1709_v54  ;;  %v2155_v27 = vsel %vm640_vm3, %v2154_v49, %v6070_v28  ;;  %v10735_v54 = vld [vmem:[#allocation55_spill] sm:$0xff] }
 0x168   : > { %10732 = vst [vmem:[#allocation39_spill] sm:$0xff] %v6084_v15  ;;  %5109 = vpow2.f32 %v2144_v32  ;;  %v2156_v36 = vrot.slane %v6084_v15, 6  ;;  %v2569_v8 = vsel %vm535_vm2, %v10733_v34, -inf  ;;  %v2969_v45 = vmul.f32 %v5780_v1, %v5545_v4  ;;  %v10738_v4 = vld [vmem:[#allocation23_spill] sm:$0xff]  ;;  %v10740_v32 = vld [vmem:[#allocation37_spill] sm:$0xff] }
 0x169   : > { %5111 = vrcp.f32 %v6086_v61  ;;  %v6098_v58 = vpop.eup %5101  ;;  %v6102_v55 = vsel %vm535_vm2, %v5802_v10, -inf  ;;  %v6106_v3 = vsel %vm535_vm2, %v5806_v24, -inf  ;;  %v6110_v12 = vsel %vm535_vm2, %v5889_v51, -inf  ;;  %v10741_v10 = vld [vmem:[#allocation61_spill] sm:$0xff] }
 0x16a   : > { %10734 = vst [vmem:[#allocation8_spill] sm:$0xff] %v6098_v58  ;;  %v2576_v50 = vmax.f32 %v2569_v8, %v2575_v48  ;;  %v6112_v39 = vpop.eup %5103  ;;  %v682_v9 = vperm.slane %v681_v47, 0  ;;  %v1712_v41 = vrot.slane %v1711_v29, 2  ;;  %v2157_v63 = vsel %vm643_vm4, %v2156_v36, %v2155_v27  ;;  %v10736_v48 = vld [vmem:[#allocation41_spill] sm:$0xff]  ;;  %v10737_v8 = vld [vmem:[#allocation51_spill] sm:$0xff] }
 0x16b   : > { %v2578_v51 = vmax.f32 %v10737_v8, %v10736_v48  ;;  %v2158_v24 = vrot.slane %v6098_v58, 5  ;;  %v10739_v47 = vmax.f32 %v10702_v6, %v5860_v21  ;;  %v10742_v15 = vmax.f32 %v10740_v32, %v10741_v10 }
 0x16c   : > { %v6120_v14 = vpop.eup %5105  ;;  %v3013_v26 = vsel %vm535_vm2, %v2969_v45, 0.0  ;;  %v1265_v27 = vand.u32 2147483647, %v6086_v61  ;;  %v1713_v48 = vadd.f32 %v1712_v41, %v1711_v29  ;;  %v2160_v8 = vrot.slane %v6112_v39, 4 }
 0x16d   : > { %v6127_v60 = vpop.eup %5107  ;;  %v2579_v49 = vmax.f32 %v10742_v15, %v10739_v47  ;;  %v2580_v57 = vmax.f32 %v2576_v50, %v2578_v51  ;;  %v6146_v58 = vmul.f32 %v5908_v13, %v682_v9  ;;  %v1267_v21 = vand.u32 2147483648, %v6086_v61 }
 0x16e   : > { %v6139_v36 = vpop.eup %5109  ;;  %v2159_v10 = vsel %vm646_vm5, %v2158_v24, %v2157_v63  ;;  %v2162_v6 = vrot.slane %v6120_v14, 3  ;;  %v1714_v45 = vrot.slane %v1713_v48, 1  ;;  %v2164_v32 = vrot.slane %v6127_v60, 2 }
 0x16f   : > { %v6143_v17 = vpop.eup %5111  ;;  %10743 = vst [vmem:[#allocation15_spill] sm:$0xff] %v6146_v58  ;;  %v2161_v29 = vsel %vm649_vm6, %v2160_v8, %v2159_v10  ;;  %v6156_v51 = vmul.f32 %v5913_v59, %v682_v9  ;;  %v2166_v50 = vrot.slane %v6139_v36, 1  ;;  %v2581_v41 = vmax.f32 %v2579_v49, %v2580_v57  ;;  %v10749_v49 = vld [vmem:[#allocation33_spill] sm:$0xff] }
 0x170   : > { %v1257_v15 = vmul.f32 %v6143_v17, %v6086_v61  ;;  %v2163_v13 = vsel %vm652_vm7, %v2162_v6, %v2161_v29  ;;  %v6161_v24 = vmul.f32 %v5919_v0, %v682_v9  ;;  %vm1261_vm14 = vweird.f32 %v6086_v61  ;;  %v10748_v29 = vld [vmem:[#allocation31_spill] sm:$0xff]  ;;  %v10764_v61 = vld [vmem:[#allocation56_spill] sm:$0xff] }
 0x171   : > { %10744 = vst [vmem:[#allocation38_spill] sm:$0xff] %v6156_v51  ;;  %v6164_v47 = vadd.f32 %v1714_v45, %v1713_v48  ;;  %v2165_v8 = vsel %vm655_vm8, %v2164_v32, %v2163_v13  ;;  %v6168_v10 = vmul.f32 %v5932_v46, %v682_v9  ;;  %v6171_v59 = vmul.f32 %v5943_v52, %v682_v9 }
 0x172   : > { %10745 = vst [vmem:[#allocation3_spill] sm:$0xff] %v6161_v24  ;;  %v1258_v63 = vsub.f32 1.0, %v1257_v15  ;;  %v2167_v6 = vsel %vm658_vm9, %v2166_v50, %v2165_v8  ;;  %v2582_v57 = vsub.f32 %v10748_v29, %v2581_v41  ;;  %v2583_v15 = vsub.f32 %v10749_v49, %v2581_v41  ;;  %v10755_v8 = vld [vmem:[#allocation44_spill] sm:$0xff] }
 0x173   : > { %10746 = vst [vmem:[#allocation29_spill] sm:$0xff] %v6168_v10  ;;  %5113 = vrcp.f32 %v6164_v47  ;;  %v2584_v48 = vsub.f32 %v10733_v34, %v2581_v41  ;;  %v6180_v45 = vmul.f32 %v5948_v43, %v682_v9  ;;  %v6183_v46 = vmul.f32 %v5954_v18, %v682_v9  ;;  %v10756_v43 = vld [vmem:[#allocation58_spill] sm:$0xff]  ;;  %v10757_v49 = vld [vmem:[#allocation28_spill] sm:$0xff] }
 0x174   : > { %10747 = vst [vmem:[#allocation13_spill] sm:$0xff] %v6171_v59  ;;  %v1259_v0 = vmul.f32 %v6143_v17, %v1258_v63  ;;  %v2169_v52 = vsel %vm535_vm2, %v2167_v6, 0.0  ;;  %v3014_v32 = vrot.slane %v3013_v26, 4  ;;  %v6187_v13 = vmul.f32 %v5960_v62, %v682_v9  ;;  %v10758_v59 = vld [vmem:[#allocation53_spill] sm:$0xff]  ;;  %v10759_v24 = vld [vmem:[#allocation36_spill] sm:$0xff] }
 0x175   : > { %10750 = vst [vmem:[#allocation43_spill] sm:$0xff] %v6180_v45  ;;  %vm6189_vm15 = vcmp.eq.f32.partialorder %v1265_v27, 8.507059e+37  ;;  %v2170_v63 = vrot.slane %v2169_v52, 4  ;;  %v2585_v29 = vsub.f32 %v10755_v8, %v2581_v41  ;;  %vm1262_vm0 = vweird.f32 %v6143_v17 }
 0x176   : > { %10751 = vst [vmem:[#allocation30_spill] sm:$0xff] %v6183_v46  ;;  %v1260_v34 = vadd.f32 %v6143_v17, %v1259_v0  ;;  %v2586_v18 = vsub.f32 %v10756_v43, %v2581_v41  ;;  %v2587_v46 = vsub.f32 %v10757_v49, %v2581_v41  ;;  %v2590_v45 = vmul.f32 1.442695, %v2582_v57  ;;  %vm6210_vm1 = vmor %vm1261_vm14, %vm1262_vm0  ;;  %v10762_v57 = vld [vmem:[#allocation45_spill] sm:$0xff] }
 0x177   : > { %10752 = vst [vmem:[#allocation16_spill] sm:$0xff] %v6187_v13  ;;  %v2171_v6 = vadd.f32 %v2170_v63, %v2169_v52  ;;  %v2592_v58 = vmul.f32 1.442695, %v2583_v15  ;;  %v2594_v62 = vmul.f32 1.442695, %v2584_v48  ;;  %v1268_v9 = vor.u32 1.1754944e-38, %v1267_v21 }
 0x178   : > { %v2588_v27 = vsub.f32 %v5983_v7, %v2581_v41  ;;  %v3015_v13 = vadd.f32 %v3014_v32, %v3013_v26  ;;  %v6201_v10 = vsel %vm535_vm2, %v10758_v59, -inf  ;;  %v2589_v51 = vsub.f32 %v10759_v24, %v2581_v41  ;;  %v10763_v24 = vld [vmem:[#allocation57_spill] sm:$0xff] }
 0x179   : > { %v6203_v8 = vpop.eup %5113  ;;  %v2172_v0 = vrot.slane %v2171_v6, 2  ;;  %5115 = vpow2.f32 %v2592_v58  ;;  %v2596_v43 = vmul.f32 1.442695, %v2585_v29  ;;  %v2598_v26 = vmul.f32 1.442695, %v2586_v18  ;;  %v10766_v29 = vld [vmem:[#allocation54_spill] sm:$0xff] }
 0x17a   : > { %v1717_v7 = vmul.f32 %v6203_v8, %v6164_v47  ;;  %5117 = vpow2.f32 %v2594_v62  ;;  %v3429_v15 = vmul.f32 %v5780_v1, %v10762_v57  ;;  %v1264_v58 = vsel %vm6210_vm1, %v6143_v17, %v1260_v34  ;;  %v10767_v18 = vld [vmem:[#allocation62_spill] sm:$0xff] }
 0x17b   : > { %5119 = vpow2.f32 %v2590_v45  ;;  %v2600_v41 = vmul.f32 1.442695, %v2587_v46  ;;  %v1725_v52 = vand.u32 2147483647, %v6164_v47  ;;  %v2602_v32 = vmul.f32 1.442695, %v2588_v27 }
 0x17c   : > { %v10765_v63 = vmax.f32 %v10735_v54, %v5887_v11  ;;  %v10768_v49 = vmax.f32 %v10766_v29, %v10767_v18  ;;  %v10769_v57 = vld [vmem:[#allocation2_spill] sm:$0xff]  ;;  %v1718_v17 = vsub.f32 1.0, %v1717_v7  ;;  %v2173_v45 = vadd.f32 %v2172_v0, %v2171_v6 }
 0x17d   : > { %v3889_v21 = vmul.f32 %v5780_v1, %v10769_v57  ;;  %5121 = vpow2.f32 %v2596_v43  ;;  %v2604_v46 = vmul.f32 1.442695, %v2589_v51  ;;  %v1269_v34 = vsel %vm6189_vm15, %v1268_v9, %v1264_v58 }
 0x17e   : > { %v6230_v62 = vmax.f32 %v10768_v49, %v10765_v63  ;;  %5123 = vpow2.f32 %v2598_v26  ;;  %v3016_v27 = vrot.slane %v3015_v13, 2  ;;  %v3473_v48 = vsel %vm535_vm2, %v3429_v15, 0.0 }
 0x17f   : > { %v6237_v11 = vpop.eup %5115  ;;  %v1719_v54 = vmul.f32 %v6203_v8, %v1718_v17  ;;  %v2174_v63 = vrot.slane %v2173_v45, 1  ;;  %5125 = vpow2.f32 %v2600_v41  ;;  %v3474_v29 = vrot.slane %v3473_v48, 4 }
 0x180   : > { %v6240_v18 = vpop.eup %5117  ;;  %v1727_v1 = vand.u32 2147483648, %v6164_v47  ;;  %5127 = vpow2.f32 %v2602_v32  ;;  %v2614_v51 = vrot.slane %v6237_v11, 7  ;;  %v3017_v50 = vadd.f32 %v3016_v27, %v3015_v13 }
 0x181   : > { %v6244_v6 = vpop.eup %5119  ;;  %v1270_v9 = vperm.slane %v1269_v34, 0  ;;  %v6246_v0 = vadd.f32 %v2174_v63, %v2173_v45  ;;  %5129 = vpow2.f32 %v2604_v46  ;;  %v2616_v43 = vrot.slane %v6240_v18, 6 }
 0x182   : > { %v1720_v7 = vadd.f32 %v6203_v8, %v1719_v54  ;;  %vm1722_vm10 = vweird.f32 %v6203_v8  ;;  %v2615_v26 = vsel %vm640_vm3, %v2614_v51, %v6244_v6  ;;  %v3018_v15 = vrot.slane %v3017_v50, 1 }
 0x183   : > { %v6253_v58 = vpop.eup %5121  ;;  %vm1721_vm11 = vweird.f32 %v6164_v47  ;;  %vm6256_vm12 = vcmp.eq.f32.partialorder %v1725_v52, 8.507059e+37  ;;  %5131 = vrcp.f32 %v6246_v0  ;;  %v3475_v41 = vadd.f32 %v3474_v29, %v3473_v48 }
 0x184   : > { %v6261_v32 = vpop.eup %5123  ;;  %v1728_v49 = vor.u32 1.1754944e-38, %v1727_v1  ;;  %v2617_v57 = vsel %vm643_vm4, %v2616_v43, %v2615_v26  ;;  %v2618_v17 = vrot.slane %v6253_v58, 5  ;;  %v3933_v45 = vsel %vm535_vm2, %v3889_v21, 0.0  ;;  %vm6279_vm13 = vmor %vm1721_vm11, %vm1722_vm10 }
 0x185   : > { %v6266_v46 = vpop.eup %5125  ;;  %v6269_v47 = vmul.f32 %v5980_v23, %v1270_v9  ;;  %v6272_v52 = vmul.f32 %v5985_v22, %v1270_v9  ;;  %v6275_v34 = vmul.f32 %v5990_v53, %v1270_v9  ;;  %v6283_v27 = vadd.f32 %v3018_v15, %v3017_v50 }
 0x186   : > { %v6285_v21 = vpop.eup %5127  ;;  %v6288_v54 = vmul.f32 %v5993_v42, %v1270_v9  ;;  %v6291_v23 = vmul.f32 %v5996_v25, %v1270_v9  ;;  %v1724_v22 = vsel %vm6279_vm13, %v6203_v8, %v1720_v7  ;;  %v2619_v53 = vsel %vm646_vm5, %v2618_v17, %v2617_v57 }
 0x187   : > { %10772 = vst [vmem:[#allocation32_spill] sm:$0xff] %v6269_v47  ;;  %v6297_v63 = vpop.eup %5129  ;;  %v6300_v29 = vmul.f32 %v6001_v38, %v1270_v9  ;;  %v2620_v1 = vrot.slane %v6261_v32, 4  ;;  %v3476_v51 = vrot.slane %v3475_v41, 2  ;;  %v3934_v50 = vrot.slane %v3933_v45, 4 }
 0x188   : > { %10773 = vst [vmem:[#allocation27_spill] sm:$0xff] %v6272_v52  ;;  %v6304_v42 = vmul.f32 %v6008_v37, %v1270_v9  ;;  %v6307_v25 = vmul.f32 %v6014_v44, %v1270_v9  ;;  %v2185_v43 = vand.u32 2147483647, %v6246_v0  ;;  %v2622_v8 = vrot.slane %v6266_v46, 3 }
 0x189   : > { %10774 = vst [vmem:[#allocation9_spill] sm:$0xff] %v6275_v34  ;;  %v5132_v7 = vpop.eup %5131  ;;  %v1729_v26 = vsel %vm6256_vm12, %v1728_v49, %v1724_v22  ;;  %v2621_v38 = vsel %vm649_vm6, %v2620_v1, %v2619_v53  ;;  %v2624_v15 = vrot.slane %v6285_v21, 2  ;;  %v3035_v57 = vsel %vm535_vm2, %v6283_v27, -inf }
 0x18a   : > { %10777 = vst [vmem:[#allocation17_spill] sm:$0xff] %v6288_v54  ;;  %v2177_v37 = vmul.f32 %v5132_v7, %v6246_v0  ;;  %v2623_v44 = vsel %vm652_vm7, %v2622_v8, %v2621_v38  ;;  %v2626_v9 = vrot.slane %v6297_v63, 1  ;;  %v3036_v17 = vmax.f32 %v6201_v10, %v3035_v57 }
 0x18b   : > { %10778 = vst [vmem:[#allocation40_spill] sm:$0xff] %v6291_v23  ;;  %v2187_v48 = vand.u32 2147483648, %v6246_v0  ;;  %v2625_v13 = vsel %vm655_vm8, %v2624_v15, %v2623_v44  ;;  %v3477_v49 = vadd.f32 %v3476_v51, %v3475_v41  ;;  %v3935_v22 = vadd.f32 %v3934_v50, %v3933_v45  ;;  %v10786_v51 = vld [vmem:[#allocation14_spill] sm:$0xff]  ;;  %v10787_v50 = vld [vmem:[#allocation63_spill] sm:$0xff] }
 0x18c   : > { %10779 = vst [vmem:[#allocation5_spill] sm:$0xff] %v6300_v29  ;;  %v2178_v53 = vsub.f32 1.0, %v2177_v37  ;;  %v2627_v1 = vsel %vm658_vm9, %v2626_v9, %v2625_v13  ;;  %v10783_v8 = vmax.f32 %v6102_v55, %v6082_v5  ;;  %v10784_v38 = vmax.f32 %v5798_v56, %v5816_v33  ;;  %v10792_v9 = vld [vmem:[#allocation48_spill] sm:$0xff] }
 0x18d   : > { %10780 = vst [vmem:[#allocation11_spill] sm:$0xff] %v6304_v42  ;;  %v1730_v57 = vperm.slane %v1729_v26, 0  ;;  %vm2181_vm14 = vweird.f32 %v6246_v0  ;;  %v2629_v41 = vsel %vm535_vm2, %v2627_v1, 0.0  ;;  %v10785_v45 = vmax.f32 %v10738_v4, %v6110_v12  ;;  %v10791_v4 = vld [vmem:[#allocation47_spill] sm:$0xff] }
 0x18e   : > { %10781 = vst [vmem:[#allocation18_spill] sm:$0xff] %v6307_v25  ;;  %v10782_v25 = vmax.f32 %v10764_v61, %v10763_v24  ;;  %v6333_v10 = vmax.f32 %v10784_v38, %v10783_v8  ;;  %v10788_v24 = vmax.f32 %v10786_v51, %v10787_v50  ;;  %vm2182_vm15 = vweird.f32 %v5132_v7  ;;  %v10798_v38 = vld [vmem:[#allocation20_spill] sm:$0xff] }
 0x18f   : > { %v2630_v5 = vrot.slane %v2629_v41, 4  ;;  %vm6346_vm0 = vcmp.eq.f32.partialorder %v2185_v43, 8.507059e+37  ;;  %v2188_v55 = vor.u32 1.1754944e-38, %v2187_v48  ;;  %v3478_v26 = vrot.slane %v3477_v49, 1  ;;  %vm2183_vm1 = vmor %vm2181_vm14, %vm2182_vm15 }
 0x190   : > { %v3040_v42 = vmax.f32 %v3036_v17, %v10782_v25  ;;  %v6343_v61 = vmax.f32 %v10788_v24, %v10785_v45  ;;  %v2179_v25 = vmul.f32 %v5132_v7, %v2178_v53  ;;  %v3936_v15 = vrot.slane %v3935_v22, 2 }
 0x191   : > { %v2631_v12 = vadd.f32 %v2630_v5, %v2629_v41  ;;  %v6353_v13 = vmul.f32 %v6022_v16, %v1730_v57  ;;  %v6356_v53 = vmul.f32 %v6028_v40, %v1730_v57  ;;  %v6366_v43 = vmul.f32 %v6039_v20, %v1730_v57  ;;  %v10797_v16 = vld [vmem:[#allocation49_spill] sm:$0xff]  ;;  %v10800_v41 = vld [vmem:[#allocation59_spill] sm:$0xff] }
 0x192   : > { %v3041_v56 = vmax.f32 %v6230_v62, %v3040_v42  ;;  %v2180_v37 = vadd.f32 %v5132_v7, %v2179_v25  ;;  %v6359_v62 = vmul.f32 %v6034_v31, %v1730_v57  ;;  %v6370_v40 = vmul.f32 %v10798_v38, %v1730_v57 }
 0x193   : > { %10793 = vst [vmem:[#allocation12_spill] sm:$0xff] %v6353_v13  ;;  %v2632_v1 = vrot.slane %v2631_v12, 2  ;;  %v6373_v51 = vadd.f32 %v3478_v26, %v3477_v49  ;;  %v3937_v24 = vadd.f32 %v3936_v15, %v3935_v22  ;;  %v6385_v20 = vmul.f32 %v6054_v30, %v1730_v57  ;;  %v10803_v49 = vld [vmem:[#allocation6_spill] sm:$0xff] }
 0x194   : > { %v3042_v44 = vsub.f32 %v10791_v4, %v3041_v56  ;;  %v3043_v17 = vsub.f32 %v10792_v9, %v3041_v56  ;;  %10794 = vst [vmem:[#allocation22_spill] sm:$0xff] %v6356_v53  ;;  %v3044_v42 = vsub.f32 %v10758_v59, %v3041_v56  ;;  %v2184_v48 = vsel %vm2183_vm1, %v5132_v7, %v2180_v37  ;;  %v10805_v26 = vld [vmem:[#allocation34_spill] sm:$0xff]  ;;  %v6399_v37 = vpop.f32.mrf.mxu3 }
 0x195   : > { %10795 = vst [vmem:[#allocation24_spill] sm:$0xff] %v6359_v62  ;;  %v3045_v8 = vsub.f32 %v10797_v16, %v3041_v56  ;;  %v3046_v31 = vsub.f32 %v10800_v41, %v3041_v56  ;;  %v2189_v0 = vsel %vm6346_vm0, %v2188_v55, %v2184_v48  ;;  %v2633_v59 = vadd.f32 %v2632_v1, %v2631_v12  ;;  %v10807_v12 = vld [vmem:[#allocation50_spill] sm:$0xff] }
 0x196   : > { %10796 = vst [vmem:[#allocation25_spill] sm:$0xff] %v6366_v43  ;;  %v3050_v45 = vmul.f32 1.442695, %v3042_v44  ;;  %v3052_v50 = vmul.f32 1.442695, %v3043_v17  ;;  %v6388_v7 = vmul.f32 %v6060_v19, %v1730_v57  ;;  %v3047_v25 = vsub.f32 %v10803_v49, %v3041_v56  ;;  %v10808_v17 = vld [vmem:[#allocation7_spill] sm:$0xff] }
 0x197   : > { %10799 = vst [vmem:[#allocation35_spill] sm:$0xff] %v6370_v40  ;;  %v3054_v5 = vmul.f32 1.442695, %v3044_v42  ;;  %v6392_v33 = vmul.f32 %v6064_v35, %v1730_v57  ;;  %v3048_v22 = vsub.f32 %v6283_v27, %v3041_v56  ;;  %v3056_v55 = vmul.f32 1.442695, %v3045_v8  ;;  %v10809_v42 = vld [vmem:[#allocation52_spill] sm:$0xff] }
 0x198   : > { %10801 = vst [vmem:[#allocation55_spill] sm:$0xff] %v6385_v20  ;;  %v6397_v15 = vsel %vm535_vm2, %v10805_v26, -inf  ;;  %v6401_v30 = vperm.slane %v2189_v0, 0  ;;  %v3049_v19 = vsub.f32 %v10807_v12, %v3041_v56  ;;  %5133 = vpow2.f32 %v3050_v45  ;;  %v10811_v41 = vld [vmem:[#allocation70_spill] sm:$0xff] }
 0x199   : > { %10802 = vst [vmem:[#allocation41_spill] sm:$0xff] %v6388_v7  ;;  %v3058_v4 = vmul.f32 1.442695, %v3046_v31  ;;  %v2634_v35 = vrot.slane %v2633_v59, 1  ;;  %5135 = vpow2.f32 %v3052_v50  ;;  %v3495_v27 = vsel %vm535_vm2, %v6373_v51, -inf }
 0x19a   : > { %10804 = vst [vmem:[#allocation51_spill] sm:$0xff] %v6392_v33  ;;  %v3938_v57 = vrot.slane %v3937_v24, 1  ;;  %5137 = vpow2.f32 %v3054_v5  ;;  %v3060_v44 = vmul.f32 1.442695, %v3047_v25  ;;  %v3496_v9 = vmax.f32 %v6106_v3, %v3495_v27  ;;  %v10813_v3 = vld [vmem:[#allocation26_spill] sm:$0xff] }
 0x19b   : > { %10806 = vst [vmem:[#allocation23_spill] sm:$0xff] %v6399_v37  ;;  %v6412_v1 = vadd.f32 %v2634_v35, %v2633_v59  ;;  %5139 = vpow2.f32 %v3056_v55  ;;  %v3062_v56 = vmul.f32 1.442695, %v3048_v22  ;;  %v6418_v8 = vmul.f32 %v6070_v28, %v6401_v30  ;;  %v10815_v59 = vld [vmem:[#allocation39_spill] sm:$0xff] }
 0x19c   : > { %4535 = vst.msk [vmem:[%s6382_s15] sm:$0xff] %vm535_vm2, %v6399_v37  ;;  %v6414_v16 = vadd.f32 %v3938_v57, %v3937_v24  ;;  %5141 = vpow2.f32 %v3058_v4  ;;  %v3064_v38 = vmul.f32 1.442695, %v3049_v19  ;;  %v10812_v31 = vmax.f32 %v5812_v2, %v10811_v41  ;;  %v10817_v24 = vld [vmem:[#allocation8_spill] sm:$0xff]  ;;  %v6450_v4 = vpop.f32.mrf.mxu3  ;;  %v10823_v41 = vld [vmem:[#allocation69_spill] sm:$0xff] }
 0x19d   : > { %10810 = vst [vmem:[#allocation37_spill] sm:$0xff] %v6418_v8  ;;  %v6425_v0 = vmul.f32 %v10813_v3, %v6401_v30  ;;  %v6429_v50 = vmul.f32 %v10815_v59, %v6401_v30  ;;  %v6433_v49 = vmul.f32 %v10817_v24, %v6401_v30  ;;  %5143 = vrcp.f32 %v6412_v1  ;;  %v10822_v57 = vld [vmem:[#allocation68_spill] sm:$0xff]  ;;  %v10825_v3 = vld [vmem:[#allocation66_spill] sm:$0xff]  ;;  %v10827_v8 = vld [vmem:[#allocation67_spill] sm:$0xff] }
 0x19e   : > { %v3500_v45 = vmax.f32 %v3496_v9, %v10812_v31  ;;  %v6436_v28 = vpop.eup %5133  ;;  %v6440_v2 = vmul.f32 %v6112_v39, %v6401_v30  ;;  %5145 = vpow2.f32 %v3060_v44  ;;  %v3955_v5 = vsel %vm535_vm2, %v6414_v16, -inf  ;;  %10820 = vst [vmem:[#allocation58_spill] sm:$0xff] %v6450_v4  ;;  %v10824_v31 = vld [vmem:[#allocation65_spill] sm:$0xff] }
 0x19f   : > { %10814 = vst [vmem:[#allocation61_spill] sm:$0xff] %v6425_v0  ;;  %v6445_v22 = vpop.eup %5135  ;;  %v2647_v12 = vand.u32 2147483648, %v6412_v1  ;;  %5147 = vpow2.f32 %v3062_v56  ;;  %v3956_v19 = vmax.f32 %v6397_v15, %v3955_v5  ;;  %vm2641_vm10 = vweird.f32 %v6412_v1 }
 0x1a0   : > { %10816 = vst [vmem:[#allocation31_spill] sm:$0xff] %v6429_v50  ;;  %v3501_v25 = vmax.f32 %v6333_v10, %v3500_v45  ;;  %v6452_v35 = vpop.eup %5137  ;;  %5149 = vpow2.f32 %v3064_v38  ;;  %v3074_v39 = vrot.slane %v6445_v22, 7  ;;  %v10821_v10 = vld [vmem:[#allocation64_spill] sm:$0xff] }
 0x1a1   : > { %10818 = vst [vmem:[#allocation33_spill] sm:$0xff] %v6433_v49  ;;  %v6460_v9 = vpop.eup %5139  ;;  %v3076_v56 = vrot.slane %v6452_v35, 6 }
 0x1a2   : > { %10819 = vst [vmem:[#allocation44_spill] sm:$0xff] %v6440_v2  ;;  %v3502_v27 = vsub.f32 %v10821_v10, %v3501_v25  ;;  %v3503_v44 = vsub.f32 %v10822_v57, %v3501_v25  ;;  %v3504_v15 = vsub.f32 %v10823_v41, %v3501_v25  ;;  %v3505_v45 = vsub.f32 %v10824_v31, %v3501_v25  ;;  %v6466_v38 = vpop.eup %5141  ;;  %v10826_v10 = vld [vmem:[#allocation42_spill] sm:$0xff] }
 0x1a3   : > { %4536 = vst.msk [vmem:[%s6382_s15 + $0x8] sm:$0xff] %vm535_vm2, %v6450_v4  ;;  %v3506_v59 = vsub.f32 %v10825_v3, %v3501_v25  ;;  %v3075_v24 = vsel %vm640_vm3, %v3074_v39, %v6436_v28  ;;  %v3078_v5 = vrot.slane %v6460_v9, 5  ;;  %v3507_v57 = vsub.f32 %v10826_v10, %v3501_v25  ;;  %v5144_v48 = vpop.eup %5143 }
 0x1a4   : > { %v3508_v55 = vsub.f32 %v6373_v51, %v3501_v25  ;;  %v3077_v41 = vsel %vm643_vm4, %v3076_v56, %v3075_v24  ;;  %v3080_v31 = vrot.slane %v6466_v38, 4  ;;  %v3509_v3 = vsub.f32 %v10827_v8, %v3501_v25  ;;  %v6477_v49 = vpop.eup %5145 }
 0x1a5   : > { %v3510_v2 = vmul.f32 1.442695, %v3502_v27  ;;  %v2637_v50 = vmul.f32 %v5144_v48, %v6412_v1  ;;  %vm2642_vm11 = vweird.f32 %v5144_v48  ;;  %v3079_v39 = vsel %vm646_vm5, %v3078_v5, %v3077_v41  ;;  %v6481_v33 = vpop.eup %5147  ;;  %v6490_v41 = vpop.f32.mrf.mxu3 }
 0x1a6   : > { %v3512_v0 = vmul.f32 1.442695, %v3503_v44  ;;  %v3081_v51 = vsel %vm649_vm6, %v3080_v31, %v3079_v39  ;;  %v3082_v10 = vrot.slane %v6477_v49, 3  ;;  %v3514_v56 = vmul.f32 1.442695, %v3504_v15  ;;  %v6485_v24 = vpop.eup %5149  ;;  %10828 = vst [vmem:[#allocation28_spill] sm:$0xff] %v6490_v41  ;;  %vm2643_vm12 = vmor %vm2641_vm10, %vm2642_vm11 }
 0x1a7   : > { %5151 = vpow2.f32 %v3510_v2  ;;  %v2638_v8 = vsub.f32 1.0, %v2637_v50  ;;  %v3084_v25 = vrot.slane %v6481_v33, 2  ;;  %v3516_v27 = vmul.f32 1.442695, %v3505_v45  ;;  %4537 = vst.msk [vmem:[%s6382_s15 + $0x10] sm:$0xff] %vm535_vm2, %v6490_v41 }
 0x1a8   : > { %5153 = vpow2.f32 %v3512_v0  ;;  %v3083_v7 = vsel %vm652_vm7, %v3082_v10, %v3081_v51  ;;  %v3086_v44 = vrot.slane %v6485_v24, 1  ;;  %v3518_v5 = vmul.f32 1.442695, %v3506_v59 }
 0x1a9   : > { %5155 = vpow2.f32 %v3514_v56  ;;  %v2639_v31 = vmul.f32 %v5144_v48, %v2638_v8  ;;  %v3085_v2 = vsel %vm655_vm8, %v3084_v25, %v3083_v7  ;;  %v3520_v15 = vmul.f32 1.442695, %v3507_v57 }
 0x1aa   : > { %5157 = vpow2.f32 %v3516_v27  ;;  %v3087_v50 = vsel %vm658_vm9, %v3086_v44, %v3085_v2  ;;  %v3522_v0 = vmul.f32 1.442695, %v3508_v55  ;;  %v3524_v45 = vmul.f32 1.442695, %v3509_v3 }
 0x1ab   : > { %5159 = vpow2.f32 %v3518_v5  ;;  %v2640_v39 = vadd.f32 %v5144_v48, %v2639_v31  ;;  %v3089_v51 = vsel %vm535_vm2, %v3087_v50, 0.0  ;;  %v10829_v59 = vmax.f32 %v10809_v42, %v10808_v17 }
 0x1ac   : > { %5161 = vpow2.f32 %v3520_v15  ;;  %v6505_v7 = vmul.f32 %v6120_v14, %v6401_v30  ;;  %v2648_v55 = vor.u32 1.1754944e-38, %v2647_v12  ;;  %v3090_v57 = vrot.slane %v3089_v51, 4 }
 0x1ad   : > { %v3960_v10 = vmax.f32 %v3956_v19, %v10829_v59  ;;  %v6501_v56 = vpop.eup %5151  ;;  %5163 = vpow2.f32 %v3522_v0  ;;  %v2644_v8 = vsel %vm2643_vm12, %v5144_v48, %v2640_v39  ;;  %v10831_v25 = vand.u32 2147483647, %v6412_v1  ;;  %v10837_v0 = vld [vmem:[#allocation10_spill] sm:$0xff] }
 0x1ae   : > { %10830 = vst [vmem:[#allocation53_spill] sm:$0xff] %v6505_v7  ;;  %v6510_v3 = vpop.eup %5153  ;;  %5165 = vpow2.f32 %v3524_v45  ;;  %v6521_v14 = vmul.f32 %v6127_v60, %v6401_v30  ;;  %v3091_v12 = vadd.f32 %v3090_v57, %v3089_v51  ;;  %v6528_v48 = vmul.f32 %v6139_v36, %v6401_v30  ;;  %v6545_v36 = vpop.f32.mrf.mxu3 }
 0x1af   : > { %vm2646_vm13 = vcmp.eq.f32.partialorder %v10831_v25, 8.507059e+37  ;;  %v6515_v17 = vmax.f32 %v6343_v61, %v3960_v10  ;;  %v6517_v42 = vpop.eup %5155  ;;  %v3534_v27 = vrot.slane %v6510_v3, 7  ;;  %v6534_v5 = vrot.slane %v6399_v37, 1  ;;  %10836 = vst [vmem:[#allocation54_spill] sm:$0xff] %v6545_v36 }
 0x1b0   : > { %10832 = vst [vmem:[#allocation36_spill] sm:$0xff] %v6521_v14  ;;  %v2649_v19 = vsel %vm2646_vm13, %v2648_v55, %v2644_v8  ;;  %v6524_v44 = vpop.eup %5157  ;;  %v3536_v61 = vrot.slane %v6517_v42, 6  ;;  %v3092_v31 = vrot.slane %v3091_v12, 2  ;;  %v6543_v50 = vrot.slane %v6399_v37, 2  ;;  %v10843_v8 = vld [vmem:[#allocation21_spill] sm:$0xff] }
 0x1b1   : > { %10833 = vst [vmem:[#allocation45_spill] sm:$0xff] %v6528_v48  ;;  %v6530_v1 = vperm.slane %v2649_v19, 0  ;;  %v6536_v60 = vpop.eup %5159  ;;  %v3535_v2 = vsel %vm640_vm3, %v3534_v27, %v6501_v56  ;;  %v3964_v15 = vsub.f32 %v10805_v26, %v6515_v17  ;;  %v3962_v45 = vsub.f32 %v10837_v0, %v6515_v17  ;;  %v10848_v48 = vld [vmem:[#allocation4_spill] sm:$0xff] }
 0x1b2   : > { %10834 = vst [vmem:[#allocation57_spill] sm:$0xff] %v6534_v5  ;;  %v6547_v30 = vpop.eup %5161  ;;  %v6552_v39 = vrot.slane %v6450_v4, 1  ;;  %v6555_v51 = vrot.slane %v6450_v4, 2  ;;  %v6561_v26 = vrot.slane %v6399_v37, 3  ;;  %v3538_v57 = vrot.slane %v6524_v44, 5 }
 0x1b3   : > { %10835 = vst [vmem:[#allocation56_spill] sm:$0xff] %v6543_v50  ;;  %v6563_v59 = vpop.eup %5163  ;;  %v6567_v10 = vmul.f32 %v6244_v6, %v6530_v1  ;;  %v6571_v55 = vmul.f32 %v6237_v11, %v6530_v1  ;;  %v3963_v25 = vsub.f32 %v10843_v8, %v6515_v17  ;;  %v6580_v27 = vmul.f32 %v6240_v18, %v6530_v1  ;;  %v10845_v50 = vld [vmem:[#allocation46_spill] sm:$0xff]  ;;  %v10846_v18 = vld [vmem:[#allocation60_spill] sm:$0xff] }
 0x1b4   : > { %10838 = vst [vmem:[#allocation62_spill] sm:$0xff] %v6552_v39  ;;  %v6576_v19 = vpop.eup %5165  ;;  %v3093_v0 = vadd.f32 %v3092_v31, %v3091_v12  ;;  %v3540_v6 = vrot.slane %v6536_v60, 4  ;;  %v3542_v11 = vrot.slane %v6547_v30, 3  ;;  %v3965_v8 = vsub.f32 %v10845_v50, %v6515_v17  ;;  %v10847_v12 = vld [vmem:[#allocation19_spill] sm:$0xff] }
 0x1b5   : > { %10839 = vst [vmem:[#allocation2_spill] sm:$0xff] %v6555_v51  ;;  %v3537_v51 = vsel %vm643_vm4, %v3536_v61, %v3535_v2  ;;  %v3967_v61 = vsub.f32 %v10847_v12, %v6515_v17  ;;  %v3546_v2 = vrot.slane %v6576_v19, 1  ;;  %v3969_v12 = vsub.f32 %v10848_v48, %v6515_v17 }
 0x1b6   : > { %4538 = vst.msk [vmem:[%s6382_s15 + $0x18] sm:$0xff] %vm535_vm2, %v6545_v36  ;;  %v3539_v39 = vsel %vm646_vm5, %v3538_v57, %v3537_v51  ;;  %v3094_v5 = vrot.slane %v3093_v0, 1  ;;  %v3968_v51 = vsub.f32 %v6414_v16, %v6515_v17  ;;  %v3970_v57 = vmul.f32 1.442695, %v3962_v45 }
 0x1b7   : > { %10840 = vst [vmem:[#allocation14_spill] sm:$0xff] %v6561_v26  ;;  %v3544_v26 = vrot.slane %v6563_v59, 2  ;;  %v6608_v14 = vmul.f32 %v6253_v58, %v6530_v1  ;;  %v3980_v48 = vmul.f32 1.442695, %v3967_v61  ;;  %v6622_v58 = vmul.f32 %v6266_v46, %v6530_v1 }
 0x1b8   : > { %10841 = vst [vmem:[#allocation63_spill] sm:$0xff] %v6567_v10  ;;  %v3541_v10 = vsel %vm649_vm6, %v3540_v6, %v3539_v39  ;;  %v3972_v39 = vmul.f32 1.442695, %v3963_v25  ;;  %v3974_v6 = vmul.f32 1.442695, %v3964_v15  ;;  %5167 = vpow2.f32 %v3970_v57 }
 0x1b9   : > { %10842 = vst [vmem:[#allocation47_spill] sm:$0xff] %v6571_v55  ;;  %v3543_v31 = vsel %vm652_vm7, %v3542_v11, %v3541_v10  ;;  %v6598_v55 = vadd.f32 %v3094_v5, %v3093_v0  ;;  %v3976_v10 = vmul.f32 1.442695, %v3965_v8  ;;  %v6604_v11 = vpop.f32.mrf.mxu3  ;;  %v6617_v15 = vmul.f32 %v6261_v32, %v6530_v1 }
 0x1ba   : > { %10844 = vst [vmem:[#allocation48_spill] sm:$0xff] %v6580_v27  ;;  %v3966_v27 = vsub.f32 %v10846_v18, %v6515_v17  ;;  %v3545_v50 = vsel %vm655_vm8, %v3544_v26, %v3543_v31  ;;  %v3982_v26 = vmul.f32 1.442695, %v3968_v51  ;;  %v6626_v25 = vmul.f32 %v6285_v21, %v6530_v1 }
 0x1bb   : > { %v3547_v18 = vsel %vm658_vm9, %v3546_v2, %v3545_v50  ;;  %10849 = vst [vmem:[#allocation49_spill] sm:$0xff] %v6604_v11  ;;  %5169 = vrcp.f32 %v6598_v55  ;;  %v3107_v16 = vand.u32 2147483648, %v6598_v55  ;;  %v3984_v32 = vmul.f32 1.442695, %v3969_v12 }
 0x1bc   : > { %10850 = vst [vmem:[#allocation20_spill] sm:$0xff] %v6608_v14  ;;  %v3978_v5 = vmul.f32 1.442695, %v3966_v27  ;;  %v3549_v17 = vsel %vm535_vm2, %v3547_v18, 0.0  ;;  %5171 = vpow2.f32 %v3972_v39  ;;  %v3105_v27 = vand.u32 2147483647, %v6598_v55 }
 0x1bd   : > { %4539 = vst.msk [vmem:[%s6382_s15 + $0x20] sm:$0xff] %vm535_vm2, %v6604_v11  ;;  %v3550_v45 = vrot.slane %v3549_v17, 4  ;;  %5173 = vpow2.f32 %v3974_v6  ;;  %v6631_v0 = vmul.f32 %v6297_v63, %v6530_v1  ;;  %v6633_v8 = vor.u32 1.1754944e-38, %v3107_v16 }
 0x1be   : > { %10851 = vst [vmem:[#allocation59_spill] sm:$0xff] %v6617_v15  ;;  %5175 = vpow2.f32 %v3976_v10  ;;  %v6635_v46 = vpop.eup %5167  ;;  %vm3101_vm14 = vweird.f32 %v6598_v55  ;;  %v6639_v21 = vrot.slane %v6490_v41, 1  ;;  %v6642_v31 = vrot.slane %v6399_v37, 4 }
 0x1bf   : > { %10852 = vst [vmem:[#allocation6_spill] sm:$0xff] %v6622_v58  ;;  %v3551_v61 = vadd.f32 %v3550_v45, %v3549_v17  ;;  %5177 = vpow2.f32 %v3978_v5  ;;  %v6645_v2 = vrot.slane %v6399_v37, 5  ;;  %v6648_v51 = vrot.slane %v6399_v37, 6 }
 0x1c0   : > { %10853 = vst [vmem:[#allocation34_spill] sm:$0xff] %v6626_v25  ;;  %5179 = vpow2.f32 %v3980_v48  ;;  %v6651_v57 = vrot.slane %v6399_v37, 7  ;;  %vm6656_vm15 = vcmp.eq.f32.partialorder %v3105_v27, 8.507059e+37  ;;  %v6663_v12 = vrot.slane %v6450_v4, 3 }
 0x1c1   : > { %10854 = vst [vmem:[#allocation50_spill] sm:$0xff] %v6631_v0  ;;  %v5170_v63 = vpop.eup %5169  ;;  %v3552_v1 = vrot.slane %v3551_v61, 2  ;;  %5181 = vpow2.f32 %v3982_v26  ;;  %v6660_v18 = vpop.f32.mrf.mxu3  ;;  %v6666_v10 = vrot.slane %v6450_v4, 4  ;;  %v6675_v48 = vrot.slane %v6450_v4, 5 }
 0x1c2   : > { %10855 = vst [vmem:[#allocation7_spill] sm:$0xff] %v6639_v21  ;;  %v6653_v50 = vpop.eup %5171  ;;  %v3097_v39 = vmul.f32 %v5170_v63, %v6598_v55  ;;  %5183 = vpow2.f32 %v3984_v32  ;;  %v6678_v45 = vrot.slane %v6450_v4, 6  ;;  %vm3102_vm0 = vweird.f32 %v5170_v63 }
 0x1c3   : > { %10856 = vst [vmem:[#allocation52_spill] sm:$0xff] %v6642_v31  ;;  %v6668_v16 = vpop.eup %5173  ;;  %v3553_v5 = vadd.f32 %v3552_v1, %v3551_v61  ;;  %v3994_v17 = vrot.slane %v6653_v50, 7  ;;  %v6684_v21 = vrot.slane %v6450_v4, 7  ;;  %v6707_v31 = vrot.slane %v6490_v41, 4  ;;  %vm3103_vm1 = vmor %vm3101_vm14, %vm3102_vm0 }
 0x1c4   : > { %10857 = vst [vmem:[#allocation70_spill] sm:$0xff] %v6645_v2  ;;  %v6680_v26 = vpop.eup %5175  ;;  %v3098_v27 = vsub.f32 1.0, %v3097_v39  ;;  %v3996_v32 = vrot.slane %v6668_v16, 6  ;;  %v6717_v37 = vrot.slane %v6490_v41, 6 }
 0x1c5   : > { %10858 = vst [vmem:[#allocation26_spill] sm:$0xff] %v6648_v51  ;;  %v6686_v61 = vpop.eup %5177  ;;  %v3554_v1 = vrot.slane %v3553_v5, 1 }
 0x1c6   : > { %10859 = vst [vmem:[#allocation39_spill] sm:$0xff] %v6651_v57  ;;  %v3099_v39 = vmul.f32 %v5170_v63, %v3098_v27  ;;  %v4000_v51 = vrot.slane %v6686_v61, 4 }
 0x1c7   : > { %10862 = vst [vmem:[#allocation8_spill] sm:$0xff] %v6660_v18  ;;  %v6703_v2 = vadd.f32 %v3554_v1, %v3553_v5 }
 0x1c8   : > { %10863 = vst [vmem:[#allocation64_spill] sm:$0xff] %v6663_v12  ;;  %v6692_v12 = vrot.slane %v6490_v41, 2 }
 0x1c9   : > { %10864 = vst [vmem:[#allocation68_spill] sm:$0xff] %v6666_v10  ;;  %v3995_v10 = vsel %vm640_vm3, %v3994_v17, %v6635_v46  ;;  %5185 = vrcp.f32 %v6703_v2  ;;  %vm3561_vm10 = vweird.f32 %v6703_v2 }
 0x1ca   : > { %4540 = vst.msk [vmem:[%s6382_s15 + $0x28] sm:$0xff] %vm535_vm2, %v6660_v18  ;;  %v3997_v57 = vsel %vm643_vm4, %v3996_v32, %v3995_v10  ;;  %v3100_v10 = vadd.f32 %v5170_v63, %v3099_v39  ;;  %v10908_v18 = vld [vmem:[#allocation30_spill] sm:$0xff] }
 0x1cb   : > { %10865 = vst [vmem:[#allocation69_spill] sm:$0xff] %v6675_v48  ;;  %v3998_v48 = vrot.slane %v6680_v26, 5 }
 0x1cc   : > { %10866 = vst [vmem:[#allocation65_spill] sm:$0xff] %v6678_v45  ;;  %v6694_v45 = vpop.eup %5179 }
 0x1cd   : > { %10867 = vst [vmem:[#allocation66_spill] sm:$0xff] %v6684_v21  ;;  %v6699_v21 = vrot.slane %v6490_v41, 3  ;;  %v6701_v4 = vpop.eup %5181  ;;  %v3999_v17 = vsel %vm646_vm5, %v3998_v48, %v3997_v57  ;;  %v3567_v57 = vand.u32 2147483648, %v6703_v2  ;;  %v6726_v48 = vrot.slane %v6490_v41, 7 }
 0x1ce   : > { %10868 = vst [vmem:[#allocation42_spill] sm:$0xff] %v6692_v12  ;;  %v6710_v12 = vrot.slane %v6490_v41, 5  ;;  %v6712_v27 = vpop.eup %5183  ;;  %v4001_v32 = vsel %vm649_vm6, %v4000_v51, %v3999_v17  ;;  %v4004_v5 = vrot.slane %v6701_v4, 2  ;;  %v3104_v51 = vsel %vm3103_vm1, %v5170_v63, %v3100_v10  ;;  %v6730_v17 = vpop.f32.mrf.mxu3 }
 0x1cf   : > { %10869 = vst [vmem:[#allocation67_spill] sm:$0xff] %v6694_v45  ;;  %v4006_v39 = vrot.slane %v6712_v27, 1  ;;  %v3109_v55 = vsel %vm6656_vm15, %v6633_v8, %v3104_v51  ;;  %v3568_v10 = vor.u32 1.1754944e-38, %v3567_v57  ;;  %v6752_v8 = vrot.slane %v6545_v36, 4 }
 0x1d0   : > { %10870 = vst [vmem:[#allocation10_spill] sm:$0xff] %v6699_v21  ;;  %v4002_v21 = vrot.slane %v6694_v45, 3  ;;  %v3110_v63 = vperm.slane %v3109_v55, 0  ;;  %v6758_v51 = vrot.slane %v6545_v36, 6  ;;  %v5186_v55 = vpop.eup %5185 }
 0x1d1   : > { %10871 = vst [vmem:[#allocation21_spill] sm:$0xff] %v6701_v4  ;;  %vm3562_vm12 = vweird.f32 %v5186_v55  ;;  %v4376_v4 = vrot.slane %v6275_v34, 6  ;;  %v10929_v34 = vld [vmem:[#allocation47_spill] sm:$0xff] }
 0x1d2   : > { %10872 = vst [vmem:[#allocation46_spill] sm:$0xff] %v6707_v31  ;;  %v4003_v1 = vsel %vm652_vm7, %v4002_v21, %v4001_v32  ;;  %v6744_v21 = vrot.slane %v6545_v36, 2  ;;  %v6764_v57 = vmul.f32 %v6445_v22, %v3110_v63  ;;  %v6783_v22 = vmul.f32 %v6477_v49, %v3110_v63  ;;  %vm3563_vm13 = vmor %vm3561_vm10, %vm3562_vm12 }
 0x1d3   : > { %10873 = vst [vmem:[#allocation60_spill] sm:$0xff] %v6710_v12  ;;  %v3565_v12 = vand.u32 2147483647, %v6703_v2  ;;  %v4005_v31 = vsel %vm655_vm8, %v4004_v5, %v4003_v1  ;;  %v6755_v5 = vrot.slane %v6545_v36, 5  ;;  %v6761_v1 = vmul.f32 %v6436_v28, %v3110_v63 }
 0x1d4   : > { %10874 = vst [vmem:[#allocation19_spill] sm:$0xff] %v6712_v27  ;;  %v4007_v32 = vsel %vm658_vm9, %v4006_v39, %v4005_v31  ;;  %v6768_v31 = vrot.slane %v6545_v36, 7  ;;  %v6771_v39 = vrot.slane %v6604_v11, 1  ;;  %v6780_v28 = vmul.f32 %v6466_v38, %v3110_v63  ;;  %v10903_v27 = vld [vmem:[#allocation13_spill] sm:$0xff] }
 0x1d5   : > { %10875 = vst [vmem:[#allocation4_spill] sm:$0xff] %v6717_v37  ;;  %v6733_v37 = vrot.slane %v6545_v36, 1  ;;  %v4009_v6 = vsel %vm535_vm2, %v4007_v32, 0.0  ;;  %v6774_v32 = vmul.f32 %v6452_v35, %v3110_v63  ;;  %vm6792_vm11 = vcmp.eq.f32.partialorder %v3565_v12, 8.507059e+37  ;;  %v10911_v35 = vld [vmem:[#allocation18_spill] sm:$0xff] }
 0x1d6   : > { %10876 = vst [vmem:[#allocation71_spill] sm:$0xff] %v6726_v48  ;;  %v6797_v38 = vrot.slane %v6604_v11, 2  ;;  %v6800_v49 = vrot.slane %v6604_v11, 3  ;;  %v10902_v48 = vld [vmem:[#allocation29_spill] sm:$0xff] }
 0x1d7   : > { %10877 = vst [vmem:[#allocation72_spill] sm:$0xff] %v6730_v17  ;;  %v4355_v41 = vrot.slane %v10902_v48, 5 }
 0x1d8   : > { %10878 = vst [vmem:[#allocation73_spill] sm:$0xff] %v6733_v37  ;;  %v6748_v37 = vrot.slane %v6545_v36, 3  ;;  %v6807_v36 = vpop.f32.mrf.mxu3 }
 0x1d9   : > { %4541 = vst.msk [vmem:[%s6382_s15 + $0x30] sm:$0xff] %vm535_vm2, %v6730_v17  ;;  %v4357_v17 = vrot.slane %v10903_v27, 4  ;;  %v4361_v27 = vrot.slane %v10908_v18, 2  ;;  %v4380_v18 = vrot.slane %v6291_v23, 4  ;;  %v10928_v23 = vld [vmem:[#allocation45_spill] sm:$0xff] }
 0x1da   : > { %10879 = vst [vmem:[#allocation74_spill] sm:$0xff] %v6744_v21  ;;  %v10900_v21 = vld [vmem:[#allocation3_spill] sm:$0xff] }
 0x1db   : > { %10880 = vst [vmem:[#allocation75_spill] sm:$0xff] %v6748_v37  ;;  %v4353_v12 = vrot.slane %v10900_v21, 6 }
 0x1dc   : > { %10881 = vst [vmem:[#allocation76_spill] sm:$0xff] %v6752_v8 }
 0x1dd   : > { %10882 = vst [vmem:[#allocation77_spill] sm:$0xff] %v6755_v5  ;;  %v6786_v5 = vmul.f32 %v6481_v33, %v3110_v63  ;;  %v6803_v33 = vrot.slane %v6604_v11, 4 }
 0x1de   : > { %10883 = vst [vmem:[#allocation78_spill] sm:$0xff] %v6758_v51  ;;  %v6777_v51 = vmul.f32 %v6460_v9, %v3110_v63  ;;  %v4010_v9 = vrot.slane %v4009_v6, 4 }
 0x1df   : > { %10884 = vst [vmem:[#allocation79_spill] sm:$0xff] %v6761_v1 }
 0x1e0   : > { %10885 = vst [vmem:[#allocation80_spill] sm:$0xff] %v6764_v57 }
 0x1e1   : > { %10886 = vst [vmem:[#allocation81_spill] sm:$0xff] %v6768_v31  ;;  %v6789_v31 = vmul.f32 %v6485_v24, %v3110_v63  ;;  %v4011_v24 = vadd.f32 %v4010_v9, %v4009_v6  ;;  %v10899_v63 = vld [vmem:[#allocation38_spill] sm:$0xff]  ;;  %v10906_v9 = vld [vmem:[#allocation15_spill] sm:$0xff] }
 0x1e2   : > { %10887 = vst [vmem:[#allocation82_spill] sm:$0xff] %v6771_v39  ;;  %v3557_v39 = vmul.f32 %v5186_v55, %v6703_v2  ;;  %v4351_v37 = vrot.slane %v10899_v63, 7  ;;  %v10907_v63 = vld [vmem:[#allocation43_spill] sm:$0xff] }
 0x1e3   : > { %10888 = vst [vmem:[#allocation83_spill] sm:$0xff] %v6774_v32 }
 0x1e4   : > { %10889 = vst [vmem:[#allocation84_spill] sm:$0xff] %v6777_v51  ;;  %v3558_v8 = vsub.f32 1.0, %v3557_v39  ;;  %v4012_v39 = vrot.slane %v4011_v24, 2  ;;  %v4352_v21 = vsel %vm640_vm3, %v4351_v37, %v10906_v9  ;;  %v10924_v9 = vld [vmem:[#allocation33_spill] sm:$0xff] }
 0x1e5   : > { %10890 = vst [vmem:[#allocation85_spill] sm:$0xff] %v6780_v28  ;;  %v4354_v48 = vsel %vm643_vm4, %v4353_v12, %v4352_v21  ;;  %v4378_v12 = vrot.slane %v6288_v54, 5  ;;  %v4432_v54 = vrot.slane %v10928_v23, 1 }
 0x1e6   : > { %10891 = vst [vmem:[#allocation86_spill] sm:$0xff] %v6783_v22  ;;  %v3559_v6 = vmul.f32 %v5186_v55, %v3558_v8  ;;  %v4013_v45 = vadd.f32 %v4012_v39, %v4011_v24  ;;  %v10909_v8 = vld [vmem:[#allocation16_spill] sm:$0xff]  ;;  %v10910_v39 = vld [vmem:[#allocation11_spill] sm:$0xff] }
 0x1e7   : > { %10892 = vst [vmem:[#allocation87_spill] sm:$0xff] %v6786_v5 }
 0x1e8   : > { %10893 = vst [vmem:[#allocation88_spill] sm:$0xff] %v6789_v31 }
 0x1e9   : > { %10896 = vst [vmem:[#allocation89_spill] sm:$0xff] %v6797_v38  ;;  %v4359_v38 = vrot.slane %v10907_v63, 3 }
 0x1ea   : > { %10897 = vst [vmem:[#allocation90_spill] sm:$0xff] %v6800_v49  ;;  %v6815_v49 = vrot.slane %v6604_v11, 5 }
 0x1eb   : > { %10898 = vst [vmem:[#allocation91_spill] sm:$0xff] %v6803_v33  ;;  %v6818_v33 = vrot.slane %v6604_v11, 6  ;;  %v4363_v11 = vrot.slane %v10909_v8, 1 }
 0x1ec   : > { %10901 = vst [vmem:[#allocation92_spill] sm:$0xff] %v6807_v36 }
 0x1ed   : > { %4542 = vst.msk [vmem:[%s6382_s15 + $0x38] sm:$0xff] %vm535_vm2, %v6807_v36  ;;  %v4374_v36 = vrot.slane %v6272_v52, 7  ;;  %v4443_v52 = vrot.slane %v10929_v34, 7 }
 0x1ee   : > { %10904 = vst [vmem:[#allocation93_spill] sm:$0xff] %v6815_v49  ;;  %v3560_v49 = vadd.f32 %v5186_v55, %v3559_v6  ;;  %v4014_v6 = vrot.slane %v4013_v45, 1 }
 0x1ef   : > { %10905 = vst [vmem:[#allocation94_spill] sm:$0xff] %v6818_v33  ;;  %v4356_v33 = vsel %vm646_vm5, %v4355_v41, %v4354_v48  ;;  %v4375_v21 = vsel %vm640_vm3, %v4374_v36, %v6269_v47 }
 0x1f0   : > { %v4358_v37 = vsel %vm649_vm6, %v4357_v17, %v4356_v33  ;;  %v3564_v63 = vsel %vm3563_vm13, %v5186_v55, %v3560_v49  ;;  %v4377_v41 = vsel %vm643_vm4, %v4376_v4, %v4375_v21  ;;  %v4382_v17 = vrot.slane %v6300_v29, 3 }
 0x1f1   : > { %v4360_v24 = vsel %vm652_vm7, %v4359_v38, %v4358_v37  ;;  %v3569_v36 = vsel %vm6792_vm11, %v3568_v10, %v3564_v63  ;;  %v4379_v48 = vsel %vm646_vm5, %v4378_v12, %v4377_v41  ;;  %v6851_v38 = vadd.f32 %v4014_v6, %v4013_v45 }
 0x1f2   : > { %v4362_v2 = vsel %vm655_vm8, %v4361_v27, %v4360_v24  ;;  %v3570_v55 = vperm.slane %v3569_v36, 0  ;;  %v4381_v49 = vsel %vm649_vm6, %v4380_v18, %v4379_v48  ;;  %v4384_v37 = vrot.slane %v10910_v39, 2  ;;  %v10927_v39 = vld [vmem:[#allocation36_spill] sm:$0xff] }
 0x1f3   : > { %v4364_v4 = vsel %vm658_vm9, %v4363_v11, %v4362_v2  ;;  %v4383_v33 = vsel %vm652_vm7, %v4382_v17, %v4381_v49  ;;  %v4386_v21 = vrot.slane %v10911_v35, 1  ;;  %v4397_v10 = vrot.slane %v6356_v53, 7  ;;  %v10920_v17 = vld [vmem:[#allocation41_spill] sm:$0xff] }
 0x1f4   : > { %4527 = vst.msk [vmem:[%s6844_s18] sm:$0xff] %vm535_vm2, %v4364_v4  ;;  %v6862_v27 = vmul.f32 %v6501_v56, %v3570_v55  ;;  %v6865_v45 = vmul.f32 %v6510_v3, %v3570_v55  ;;  %v4399_v11 = vrot.slane %v6359_v62, 6  ;;  %v4401_v18 = vrot.slane %v6366_v43, 5  ;;  %v10921_v4 = vld [vmem:[#allocation51_spill] sm:$0xff]  ;;  %v10955_v62 = vld [vmem:[#allocation92_spill] sm:$0xff] }
 0x1f5   : > { %v6870_v63 = vmul.f32 %v6517_v42, %v3570_v55  ;;  %v6873_v12 = vmul.f32 %v6524_v44, %v3570_v55  ;;  %v6876_v6 = vmul.f32 %v6536_v60, %v3570_v55  ;;  %v6879_v24 = vmul.f32 %v6547_v30, %v3570_v55 }
 0x1f6   : > { %10912 = vst [vmem:[#allocation95_spill] sm:$0xff] %v6862_v27  ;;  %v6882_v56 = vmul.f32 %v6563_v59, %v3570_v55  ;;  %v6885_v3 = vmul.f32 %v6576_v19, %v3570_v55  ;;  %5187 = vrcp.f32 %v6851_v38  ;;  %v4027_v42 = vand.u32 2147483648, %v6851_v38 }
 0x1f7   : > { %10913 = vst [vmem:[#allocation96_spill] sm:$0xff] %v6865_v45  ;;  %v4025_v44 = vand.u32 2147483647, %v6851_v38  ;;  %v4385_v41 = vsel %vm655_vm8, %v4384_v37, %v4383_v33  ;;  %v4398_v60 = vsel %vm640_vm3, %v4397_v10, %v6353_v13  ;;  %v4403_v30 = vrot.slane %v6370_v40, 4  ;;  %v10922_v33 = vld [vmem:[#allocation61_spill] sm:$0xff] }
 0x1f8   : > { %10914 = vst [vmem:[#allocation97_spill] sm:$0xff] %v6870_v63  ;;  %v6894_v36 = vor.u32 1.1754944e-38, %v4027_v42  ;;  %v4387_v59 = vsel %vm658_vm9, %v4386_v21, %v4385_v41  ;;  %v4400_v19 = vsel %vm643_vm4, %v4399_v11, %v4398_v60  ;;  %v4405_v2 = vrot.slane %v6385_v20, 3  ;;  %v10923_v42 = vld [vmem:[#allocation31_spill] sm:$0xff]  ;;  %v10925_v41 = vld [vmem:[#allocation44_spill] sm:$0xff]  ;;  %v10926_v60 = vld [vmem:[#allocation37_spill] sm:$0xff] }
 0x1f9   : > { %10915 = vst [vmem:[#allocation98_spill] sm:$0xff] %v6873_v12  ;;  %v4402_v48 = vsel %vm646_vm5, %v4401_v18, %v4400_v19  ;;  %v4407_v55 = vrot.slane %v10920_v17, 2  ;;  %v4409_v49 = vrot.slane %v10921_v4, 1  ;;  %v4420_v37 = vrot.slane %v10922_v33, 7 }
 0x1fa   : > { %10916 = vst [vmem:[#allocation99_spill] sm:$0xff] %v6876_v6  ;;  %v4404_v10 = vsel %vm649_vm6, %v4403_v30, %v4402_v48  ;;  %v4422_v8 = vrot.slane %v10923_v42, 6  ;;  %v4424_v21 = vrot.slane %v10924_v9, 5  ;;  %v4426_v11 = vrot.slane %v10925_v41, 4  ;;  %v10963_v41 = vld [vmem:[#allocation19_spill] sm:$0xff] }
 0x1fb   : > { %10917 = vst [vmem:[#allocation100_spill] sm:$0xff] %v6879_v24  ;;  %vm4021_vm14 = vweird.f32 %v6851_v38  ;;  %v4406_v18 = vsel %vm652_vm7, %v4405_v2, %v4404_v10  ;;  %v4421_v19 = vsel %vm640_vm3, %v4420_v37, %v10926_v60  ;;  %v4428_v35 = vrot.slane %v6505_v7, 3  ;;  %v10964_v42 = vld [vmem:[#allocation23_spill] sm:$0xff]  ;;  %v10965_v60 = vld [vmem:[#allocation57_spill] sm:$0xff] }
 0x1fc   : > { %10918 = vst [vmem:[#allocation101_spill] sm:$0xff] %v6882_v56  ;;  %v5188_v29 = vpop.eup %5187  ;;  %v4408_v30 = vsel %vm655_vm8, %v4407_v55, %v4406_v18  ;;  %v4423_v48 = vsel %vm643_vm4, %v4422_v8, %v4421_v19  ;;  %vm6920_vm0 = vcmp.eq.f32.partialorder %v4025_v44, 8.507059e+37  ;;  %v10932_v55 = vld [vmem:[#allocation63_spill] sm:$0xff]  ;;  %v10933_v18 = vld [vmem:[#allocation48_spill] sm:$0xff]  ;;  %v4447_v17 = vrot.slane %v6608_v14, 5 }
 0x1fd   : > { %10919 = vst [vmem:[#allocation102_spill] sm:$0xff] %v6885_v3  ;;  %v4017_v47 = vmul.f32 %v5188_v29, %v6851_v38  ;;  %vm4022_vm15 = vweird.f32 %v5188_v29  ;;  %v4410_v37 = vsel %vm658_vm9, %v4409_v49, %v4408_v30  ;;  %v4425_v10 = vsel %vm646_vm5, %v4424_v21, %v4423_v48 }
 0x1fe   : > { %4528 = vst.msk [vmem:[%s6844_s18 + $0x8] sm:$0xff] %vm535_vm2, %v4387_v59  ;;  %v4430_v59 = vrot.slane %v10927_v39, 2  ;;  %v4427_v4 = vsel %vm649_vm6, %v4426_v11, %v4425_v10  ;;  %v4444_v8 = vsel %vm640_vm3, %v4443_v52, %v10932_v55  ;;  %v4445_v19 = vrot.slane %v10933_v18, 6  ;;  %vm4023_vm1 = vmor %vm4021_vm14, %vm4022_vm15  ;;  %v10968_v18 = vld [vmem:[#allocation52_spill] sm:$0xff]  ;;  %v10970_v55 = vld [vmem:[#allocation26_spill] sm:$0xff] }
 0x1ff   : > { %4529 = vst.msk [vmem:[%s6844_s18 + $0x10] sm:$0xff] %vm535_vm2, %v4410_v37  ;;  %v4018_v20 = vsub.f32 1.0, %v4017_v47  ;;  %v4429_v44 = vsel %vm652_vm7, %v4428_v35, %v4427_v4  ;;  %v4449_v40 = vrot.slane %v6617_v15, 4  ;;  %v4451_v49 = vrot.slane %v6622_v58, 3  ;;  %v10967_v15 = vld [vmem:[#allocation14_spill] sm:$0xff] }
 0x200   : > { %v4431_v21 = vsel %vm655_vm8, %v4430_v59, %v4429_v44  ;;  %v4446_v11 = vsel %vm643_vm4, %v4445_v19, %v4444_v8  ;;  %v4453_v52 = vrot.slane %v6626_v25, 2  ;;  %v4455_v30 = vrot.slane %v6631_v0, 1  ;;  %v10966_v25 = vld [vmem:[#allocation56_spill] sm:$0xff] }
 0x201   : > { %v4019_v48 = vmul.f32 %v5188_v29, %v4018_v20  ;;  %v4433_v10 = vsel %vm658_vm9, %v4432_v54, %v4431_v21  ;;  %v4448_v47 = vsel %vm646_vm5, %v4447_v17, %v4446_v11  ;;  %v4466_v37 = vrot.slane %v6764_v57, 7 }
 0x202   : > { %v4450_v35 = vsel %vm649_vm6, %v4449_v40, %v4448_v47  ;;  %v4468_v4 = vrot.slane %v6774_v32, 6  ;;  %v4470_v43 = vrot.slane %v6777_v51, 5  ;;  %v4472_v59 = vrot.slane %v6780_v28, 4  ;;  %4530 = vst.msk [vmem:[%s6844_s18 + $0x18] sm:$0xff] %vm535_vm2, %v4433_v10  ;;  %v10972_v28 = vld [vmem:[#allocation58_spill] sm:$0xff] }
 0x203   : > { %v4020_v8 = vadd.f32 %v5188_v29, %v4019_v48  ;;  %v4452_v19 = vsel %vm652_vm7, %v4451_v49, %v4450_v35  ;;  %v4467_v54 = vsel %vm640_vm3, %v4466_v37, %v6761_v1  ;;  %v4474_v20 = vrot.slane %v6783_v22, 3  ;;  %v10973_v32 = vld [vmem:[#allocation62_spill] sm:$0xff] }
 0x204   : > { %v4454_v40 = vsel %vm655_vm8, %v4453_v52, %v4452_v19  ;;  %v4469_v17 = vsel %vm643_vm4, %v4468_v4, %v4467_v54  ;;  %v4476_v44 = vrot.slane %v6786_v5, 2  ;;  %v4478_v21 = vrot.slane %v6789_v31, 1  ;;  %v10971_v5 = vld [vmem:[#allocation39_spill] sm:$0xff]  ;;  %v10974_v1 = vld [vmem:[#allocation2_spill] sm:$0xff] }
 0x205   : > { %v4024_v11 = vsel %vm4023_vm1, %v5188_v29, %v4020_v8  ;;  %v4456_v49 = vsel %vm658_vm9, %v4455_v30, %v4454_v40  ;;  %v4471_v48 = vsel %vm646_vm5, %v4470_v43, %v4469_v17  ;;  %v4489_v10 = vrot.slane %v6865_v45, 7  ;;  %v10934_v17 = vld [vmem:[#allocation67_spill] sm:$0xff]  ;;  %v10985_v45 = vld [vmem:[#allocation46_spill] sm:$0xff] }
 0x206   : > { %v4029_v38 = vsel %vm6920_vm0, %v6894_v36, %v4024_v11  ;;  %v4473_v47 = vsel %vm649_vm6, %v4472_v59, %v4471_v48  ;;  %v4491_v52 = vrot.slane %v6870_v63, 6  ;;  %v4493_v37 = vrot.slane %v6873_v12, 5  ;;  %4531 = vst.msk [vmem:[%s6844_s18 + $0x20] sm:$0xff] %vm535_vm2, %v4456_v49  ;;  %v10935_v11 = vld [vmem:[#allocation21_spill] sm:$0xff]  ;;  %v10980_v12 = vld [vmem:[#allocation28_spill] sm:$0xff]  ;;  %v10983_v63 = vld [vmem:[#allocation42_spill] sm:$0xff] }
 0x207   : > { %v4030_v35 = vperm.slane %v4029_v38, 0  ;;  %v4475_v29 = vsel %vm652_vm7, %v4474_v20, %v4473_v47  ;;  %v4490_v43 = vsel %vm640_vm3, %v4489_v10, %v6862_v27  ;;  %v4495_v30 = vrot.slane %v6876_v6, 4  ;;  %v10978_v6 = vld [vmem:[#allocation65_spill] sm:$0xff]  ;;  %v10989_v27 = vld [vmem:[#allocation4_spill] sm:$0xff] }
 0x208   : > { %v4477_v4 = vsel %vm655_vm8, %v4476_v44, %v4475_v29  ;;  %v4492_v36 = vsel %vm643_vm4, %v4491_v52, %v4490_v43  ;;  %v4497_v2 = vrot.slane %v6879_v24, 3  ;;  %v4499_v59 = vrot.slane %v6882_v56, 2  ;;  %v10936_v29 = vld [vmem:[#allocation49_spill] sm:$0xff]  ;;  %v10975_v56 = vld [vmem:[#allocation64_spill] sm:$0xff] }
 0x209   : > { %v6980_v8 = vmul.f32 %v6635_v46, %v4030_v35  ;;  %v6983_v19 = vmul.f32 %v6653_v50, %v4030_v35  ;;  %v6986_v54 = vmul.f32 %v6668_v16, %v4030_v35  ;;  %v6989_v20 = vmul.f32 %v6680_v26, %v4030_v35  ;;  %v10976_v24 = vld [vmem:[#allocation68_spill] sm:$0xff] }
 0x20a   : > { %v6992_v40 = vmul.f32 %v6686_v61, %v4030_v35  ;;  %v6995_v44 = vmul.f32 %v10934_v17, %v4030_v35  ;;  %v6998_v49 = vmul.f32 %v10935_v11, %v4030_v35  ;;  %v4479_v46 = vsel %vm658_vm9, %v4478_v21, %v4477_v4 }
 0x20b   : > { %v4494_v50 = vsel %vm646_vm5, %v4493_v37, %v4492_v36  ;;  %v4501_v48 = vrot.slane %v6885_v3, 1  ;;  %v4512_v16 = vrot.slane %v6983_v19, 7  ;;  %v4514_v26 = vrot.slane %v6986_v54, 6  ;;  %4532 = vst.msk [vmem:[%s6844_s18 + $0x28] sm:$0xff] %vm535_vm2, %v4479_v46  ;;  %v10938_v36 = vld [vmem:[#allocation8_spill] sm:$0xff] }
 0x20c   : > { %v4496_v61 = vsel %vm649_vm6, %v4495_v30, %v4494_v50  ;;  %v4516_v10 = vrot.slane %v6989_v20, 5  ;;  %v4518_v38 = vrot.slane %v6992_v40, 4  ;;  %v4520_v47 = vrot.slane %v6995_v44, 3 }
 0x20d   : > { %v4498_v21 = vsel %vm652_vm7, %v4497_v2, %v4496_v61  ;;  %v4513_v52 = vsel %vm640_vm3, %v4512_v16, %v6980_v8  ;;  %v4522_v37 = vrot.slane %v6998_v49, 2  ;;  %v7016_v43 = vrot.slane %v10936_v29, 7 }
 0x20e   : > { %v4500_v4 = vsel %vm655_vm8, %v4499_v59, %v4498_v21  ;;  %v4515_v30 = vsel %vm643_vm4, %v4514_v26, %v4513_v52  ;;  %v7021_v17 = vrot.slane %v10938_v36, 1  ;;  %v7024_v11 = vrot.slane %v10938_v36, 2  ;;  %v10946_v21 = vld [vmem:[#allocation72_spill] sm:$0xff] }
 0x20f   : > { %10937 = vst [vmem:[#allocation67_spill] sm:$0xff] %v7016_v43  ;;  %v4502_v2 = vsel %vm658_vm9, %v4501_v48, %v4500_v4  ;;  %v4517_v46 = vsel %vm646_vm5, %v4516_v10, %v4515_v30  ;;  %v7029_v50 = vrot.slane %v10938_v36, 3  ;;  %v7032_v16 = vrot.slane %v10938_v36, 4 }
 0x210   : > { %10939 = vst [vmem:[#allocation21_spill] sm:$0xff] %v7021_v17  ;;  %v4519_v59 = vsel %vm649_vm6, %v4518_v38, %v4517_v46  ;;  %v7038_v26 = vrot.slane %v10938_v36, 5  ;;  %v7041_v61 = vrot.slane %v10938_v36, 6  ;;  %v7044_v48 = vrot.slane %v10938_v36, 7 }
 0x211   : > { %10940 = vst [vmem:[#allocation103_spill] sm:$0xff] %v7024_v11  ;;  %v4521_v10 = vsel %vm652_vm7, %v4520_v47, %v4519_v59  ;;  %v7048_v52 = vrot.slane %v10946_v21, 1  ;;  %v7051_v4 = vrot.slane %v10946_v21, 2  ;;  %v7054_v38 = vrot.slane %v10946_v21, 3 }
 0x212   : > { %10941 = vst [vmem:[#allocation104_spill] sm:$0xff] %v7029_v50  ;;  %v7057_v30 = vsel %vm655_vm8, %v4522_v37, %v4521_v10  ;;  %v7063_v46 = vrot.slane %v10946_v21, 5  ;;  %v7066_v47 = vrot.slane %v10946_v21, 6  ;;  %v7069_v59 = vrot.slane %v10946_v21, 7 }
 0x213   : > { %10942 = vst [vmem:[#allocation105_spill] sm:$0xff] %v7032_v16  ;;  %v7072_v53 = vrot.slane %v10955_v62, 1  ;;  %v7075_v13 = vrot.slane %v10955_v62, 2  ;;  %v7078_v37 = vrot.slane %v10955_v62, 3  ;;  %v7081_v10 = vrot.slane %v10955_v62, 4 }
 0x214   : > { %4533 = vst.msk [vmem:[%s6844_s18 + $0x30] sm:$0xff] %vm535_vm2, %v4502_v2  ;;  %v7060_v2 = vrot.slane %v10946_v21, 4  ;;  %v7084_v23 = vrot.slane %v10955_v62, 5  ;;  %v7087_v39 = vrot.slane %v10955_v62, 6  ;;  %v7090_v7 = vrot.slane %v10955_v62, 7 }
 0x215   : > { %10943 = vst [vmem:[#allocation106_spill] sm:$0xff] %v7038_v26  ;;  %v7093_v9 = vmul.f32 %v10963_v41, %v4030_v35  ;;  %v7097_v33 = vmul.f32 %v6980_v8, %v10964_v42  ;;  %v7101_v0 = vmul.f32 %v6983_v19, %v10965_v60  ;;  %v7105_v58 = vmul.f32 %v6986_v54, %v10966_v25  ;;  %v10969_v35 = vld [vmem:[#allocation70_spill] sm:$0xff]  ;;  %v10987_v60 = vld [vmem:[#allocation60_spill] sm:$0xff]  ;;  %v10991_v42 = vld [vmem:[#allocation71_spill] sm:$0xff] }
 0x216   : > { %10944 = vst [vmem:[#allocation107_spill] sm:$0xff] %v7041_v61  ;;  %v7109_v14 = vmul.f32 %v6989_v20, %v10967_v15  ;;  %v7113_v41 = vmul.f32 %v6992_v40, %v10968_v18  ;;  %v7117_v34 = vmul.f32 %v6995_v44, %v10969_v35  ;;  %v7121_v31 = vmul.f32 %v6998_v49, %v10970_v55  ;;  %v10977_v35 = vld [vmem:[#allocation69_spill] sm:$0xff]  ;;  %v10979_v18 = vld [vmem:[#allocation66_spill] sm:$0xff]  ;;  %v10982_v15 = vld [vmem:[#allocation7_spill] sm:$0xff] }
 0x217   : > { %10945 = vst [vmem:[#allocation108_spill] sm:$0xff] %v7044_v48  ;;  %v7125_v22 = vmul.f32 %v7093_v9, %v10971_v5  ;;  %v7129_v51 = vmul.f32 %v6980_v8, %v10972_v28  ;;  %v7133_v57 = vmul.f32 %v6983_v19, %v10973_v32  ;;  %v7137_v3 = vmul.f32 %v6986_v54, %v10974_v1  ;;  %v10984_v25 = vld [vmem:[#allocation10_spill] sm:$0xff] }
 0x218   : > { %10947 = vst [vmem:[#allocation109_spill] sm:$0xff] %v7048_v52  ;;  %v7141_v55 = vmul.f32 %v6989_v20, %v10975_v56  ;;  %v7145_v5 = vmul.f32 %v6992_v40, %v10976_v24  ;;  %v7149_v28 = vmul.f32 %v6995_v44, %v10977_v35  ;;  %v7153_v32 = vmul.f32 %v6998_v49, %v10978_v6 }
 0x219   : > { %10948 = vst [vmem:[#allocation110_spill] sm:$0xff] %v7051_v4  ;;  %v7157_v1 = vmul.f32 %v7093_v9, %v10979_v18  ;;  %v7161_v56 = vmul.f32 %v6980_v8, %v10980_v12  ;;  %v7165_v24 = vmul.f32 %v6983_v19, %v10982_v15  ;;  %v7169_v35 = vmul.f32 %v6986_v54, %v10983_v63 }
 0x21a   : > { %10949 = vst [vmem:[#allocation111_spill] sm:$0xff] %v7054_v38  ;;  %v7173_v6 = vmul.f32 %v6989_v20, %v10984_v25  ;;  %v7177_v18 = vmul.f32 %v6992_v40, %v10985_v45  ;;  %v7181_v12 = vmul.f32 %v6995_v44, %v10987_v60  ;;  %v7185_v15 = vmul.f32 %v6998_v49, %v10989_v27 }
 0x21b   : > { %10950 = vst [vmem:[#allocation112_spill] sm:$0xff] %v7057_v30  ;;  %v7189_v63 = vmul.f32 %v7093_v9, %v10991_v42  ;;  %v10993_v30 = vld [vmem:[#allocation54_spill] sm:$0xff] }
 0x21c   : > { %10951 = vst [vmem:[#allocation113_spill] sm:$0xff] %v7060_v2  ;;  %v7193_v25 = vmul.f32 %v6980_v8, %v10993_v30 }
 0x21d   : > { %10952 = vst [vmem:[#allocation114_spill] sm:$0xff] %v7063_v46 }
 0x21e   : > { %10953 = vst [vmem:[#allocation115_spill] sm:$0xff] %v7066_v47 }
 0x21f   : > { %10954 = vst [vmem:[#allocation116_spill] sm:$0xff] %v7069_v59 }
 0x220   : > { %10956 = vst [vmem:[#allocation117_spill] sm:$0xff] %v7072_v53 }
 0x221   : > { %10957 = vst [vmem:[#allocation118_spill] sm:$0xff] %v7075_v13 }
 0x222   : > { %10958 = vst [vmem:[#allocation119_spill] sm:$0xff] %v7078_v37 }
 0x223   : > { %10959 = vst [vmem:[#allocation120_spill] sm:$0xff] %v7081_v10 }
 0x224   : > { %10960 = vst [vmem:[#allocation121_spill] sm:$0xff] %v7084_v23 }
 0x225   : > { %10961 = vst [vmem:[#allocation122_spill] sm:$0xff] %v7087_v39 }
 0x226   : > { %10962 = vst [vmem:[#allocation123_spill] sm:$0xff] %v7090_v7 }
 0x227   : > { %10981 = vst [vmem:[#allocation19_spill] sm:$0xff] %v7161_v56  ;;  %v10995_v56 = vld [vmem:[#allocation73_spill] sm:$0xff] }
 0x228   : > { %10986 = vst [vmem:[#allocation124_spill] sm:$0xff] %v7177_v18  ;;  %v7197_v45 = vmul.f32 %v6983_v19, %v10995_v56  ;;  %v10997_v18 = vld [vmem:[#allocation74_spill] sm:$0xff] }
 0x229   : > { %10988 = vst [vmem:[#allocation125_spill] sm:$0xff] %v7181_v12  ;;  %v7201_v60 = vmul.f32 %v6986_v54, %v10997_v18  ;;  %v10998_v12 = vld [vmem:[#allocation75_spill] sm:$0xff] }
 0x22a   : > { %10990 = vst [vmem:[#allocation126_spill] sm:$0xff] %v7185_v15  ;;  %v7205_v27 = vmul.f32 %v6989_v20, %v10998_v12  ;;  %v11000_v15 = vld [vmem:[#allocation76_spill] sm:$0xff]  ;;  %v7225_v12 = vmul.f32 %v6980_v8, %v10936_v29 }
 0x22b   : > { %10992 = vst [vmem:[#allocation127_spill] sm:$0xff] %v7189_v63  ;;  %v7209_v42 = vmul.f32 %v6992_v40, %v11000_v15  ;;  %v11002_v63 = vld [vmem:[#allocation77_spill] sm:$0xff] }
 0x22c   : > { %10994 = vst [vmem:[#allocation128_spill] sm:$0xff] %v7193_v25  ;;  %v7213_v30 = vmul.f32 %v6995_v44, %v11002_v63  ;;  %v11004_v25 = vld [vmem:[#allocation78_spill] sm:$0xff] }
 0x22d   : > { %10996 = vst [vmem:[#allocation129_spill] sm:$0xff] %v7197_v45  ;;  %v7217_v56 = vmul.f32 %v6998_v49, %v11004_v25  ;;  %v11006_v45 = vld [vmem:[#allocation81_spill] sm:$0xff] }
 0x22e   : > { %10999 = vst [vmem:[#allocation130_spill] sm:$0xff] %v7205_v27  ;;  %v7221_v18 = vmul.f32 %v7093_v9, %v11006_v45  ;;  %v11009_v27 = vld [vmem:[#allocation82_spill] sm:$0xff] }
 0x22f   : > { %11001 = vst [vmem:[#allocation131_spill] sm:$0xff] %v7209_v42  ;;  %v7229_v15 = vmul.f32 %v6983_v19, %v11009_v27  ;;  %v11010_v42 = vld [vmem:[#allocation89_spill] sm:$0xff] }
 0x230   : > { %11003 = vst [vmem:[#allocation132_spill] sm:$0xff] %v7213_v30  ;;  %v7233_v63 = vmul.f32 %v6986_v54, %v11010_v42  ;;  %v11011_v30 = vld [vmem:[#allocation90_spill] sm:$0xff]  ;;  %v7253_v42 = vmul.f32 %v7093_v9, %v7016_v43  ;;  %v7273_v43 = vmul.f32 %v6992_v40, %v7032_v16  ;;  %v7293_v16 = vmul.f32 %v6983_v19, %v7048_v52 }
 0x231   : > { %11005 = vst [vmem:[#allocation133_spill] sm:$0xff] %v7217_v56  ;;  %v7237_v25 = vmul.f32 %v6989_v20, %v11011_v30  ;;  %v11012_v56 = vld [vmem:[#allocation91_spill] sm:$0xff]  ;;  %v7257_v30 = vmul.f32 %v6980_v8, %v10938_v36  ;;  %v7277_v36 = vmul.f32 %v6995_v44, %v7038_v26  ;;  %v7297_v26 = vmul.f32 %v6986_v54, %v7051_v4 }
 0x232   : > { %11007 = vst [vmem:[#allocation134_spill] sm:$0xff] %v7221_v18  ;;  %v7241_v45 = vmul.f32 %v6992_v40, %v11012_v56  ;;  %v11013_v18 = vld [vmem:[#allocation93_spill] sm:$0xff]  ;;  %v7261_v56 = vmul.f32 %v6983_v19, %v7021_v17  ;;  %v7281_v17 = vmul.f32 %v6998_v49, %v7041_v61  ;;  %v7301_v61 = vmul.f32 %v6989_v20, %v7054_v38 }
 0x233   : > { %11008 = vst [vmem:[#allocation135_spill] sm:$0xff] %v7225_v12  ;;  %v7245_v29 = vmul.f32 %v6995_v44, %v11013_v18  ;;  %v11014_v12 = vld [vmem:[#allocation94_spill] sm:$0xff]  ;;  %v7265_v18 = vmul.f32 %v6986_v54, %v7024_v11  ;;  %v7285_v11 = vmul.f32 %v7093_v9, %v7044_v48  ;;  %v7305_v48 = vmul.f32 %v6992_v40, %v7060_v2 }
 0x234   : > { %v7249_v27 = vmul.f32 %v6998_v49, %v11014_v12  ;;  %v7269_v12 = vmul.f32 %v6989_v20, %v7029_v50  ;;  %v7289_v50 = vmul.f32 %v6980_v8, %v10946_v21  ;;  %v7309_v21 = vmul.f32 %v6995_v44, %v7063_v46 }
 0x235   : > { %v7313_v52 = vmul.f32 %v6998_v49, %v7066_v47  ;;  %v7317_v4 = vmul.f32 %v7093_v9, %v7069_v59  ;;  %v7321_v38 = vmul.f32 %v6980_v8, %v10955_v62  ;;  %v7325_v2 = vmul.f32 %v6983_v19, %v7072_v53 }
 0x236   : > { %v7329_v46 = vmul.f32 %v6986_v54, %v7075_v13  ;;  %v7333_v47 = vmul.f32 %v6989_v20, %v7078_v37  ;;  %v7337_v59 = vmul.f32 %v6992_v40, %v7081_v10  ;;  %v7341_v8 = vmul.f32 %v6995_v44, %v7084_v23 }
 0x237   : > { %v7345_v19 = vmul.f32 %v6998_v49, %v7087_v39  ;;  %v7349_v54 = vmul.f32 %v7093_v9, %v7090_v7  ;;  %v4167_v13 = vrot.slane %v7101_v0, 7  ;;  %v4169_v20 = vrot.slane %v7105_v58, 6 }
 0x238   : > { %v4171_v37 = vrot.slane %v7109_v14, 5  ;;  %v4173_v40 = vrot.slane %v7113_v41, 4  ;;  %v4175_v10 = vrot.slane %v7117_v34, 3  ;;  %v4177_v44 = vrot.slane %v7121_v31, 2 }
 0x239   : > { %v4179_v23 = vrot.slane %v7125_v22, 1  ;;  %v4168_v49 = vsel %vm640_vm3, %v4167_v13, %v7097_v33  ;;  %v4181_v7 = vrot.slane %v7133_v57, 7  ;;  %v4183_v39 = vrot.slane %v7137_v3, 6 }
 0x23a   : > { %v4185_v0 = vrot.slane %v7141_v55, 5  ;;  %v4170_v58 = vsel %vm643_vm4, %v4169_v20, %v4168_v49  ;;  %v4187_v14 = vrot.slane %v7145_v5, 4  ;;  %v4189_v41 = vrot.slane %v7149_v28, 3 }
 0x23b   : > { %v4191_v34 = vrot.slane %v7153_v32, 2  ;;  %v4172_v31 = vsel %vm646_vm5, %v4171_v37, %v4170_v58  ;;  %v4182_v22 = vsel %vm640_vm3, %v4181_v7, %v7129_v51  ;;  %v4193_v13 = vrot.slane %v7157_v1, 1  ;;  %v11015_v37 = vld [vmem:[#allocation19_spill] sm:$0xff]  ;;  %v11016_v7 = vld [vmem:[#allocation124_spill] sm:$0xff] }
 0x23c   : > { %v4195_v57 = vrot.slane %v7165_v24, 7  ;;  %v4174_v3 = vsel %vm649_vm6, %v4173_v40, %v4172_v31  ;;  %v4184_v33 = vsel %vm643_vm4, %v4183_v39, %v4182_v22  ;;  %v4197_v55 = vrot.slane %v7169_v35, 6  ;;  %v11017_v39 = vld [vmem:[#allocation125_spill] sm:$0xff] }
 0x23d   : > { %v4199_v5 = vrot.slane %v7173_v6, 5  ;;  %v4176_v28 = vsel %vm652_vm7, %v4175_v10, %v4174_v3  ;;  %v4186_v32 = vsel %vm646_vm5, %v4185_v0, %v4184_v33  ;;  %v4201_v51 = vrot.slane %v11016_v7, 4  ;;  %v11018_v0 = vld [vmem:[#allocation126_spill] sm:$0xff]  ;;  %v11024_v7 = vld [vmem:[#allocation132_spill] sm:$0xff] }
 0x23e   : > { %v4196_v20 = vsel %vm640_vm3, %v4195_v57, %v11015_v37  ;;  %v4178_v1 = vsel %vm655_vm8, %v4177_v44, %v4176_v28  ;;  %v4188_v24 = vsel %vm649_vm6, %v4187_v14, %v4186_v32  ;;  %v4203_v49 = vrot.slane %v11017_v39, 3  ;;  %v11019_v44 = vld [vmem:[#allocation127_spill] sm:$0xff]  ;;  %v11020_v14 = vld [vmem:[#allocation129_spill] sm:$0xff]  ;;  %v11022_v32 = vld [vmem:[#allocation128_spill] sm:$0xff] }
 0x23f   : > { %v4198_v40 = vsel %vm643_vm4, %v4197_v55, %v4196_v20  ;;  %v7386_v35 = vsel %vm658_vm9, %v4179_v23, %v4178_v1  ;;  %v4190_v6 = vsel %vm652_vm7, %v4189_v41, %v4188_v24  ;;  %v4205_v58 = vrot.slane %v11018_v0, 2  ;;  %v11021_v41 = vld [vmem:[#allocation130_spill] sm:$0xff]  ;;  %v11023_v37 = vld [vmem:[#allocation131_spill] sm:$0xff]  ;;  %v11025_v24 = vld [vmem:[#allocation133_spill] sm:$0xff] }
 0x240   : > { %v4200_v10 = vsel %vm646_vm5, %v4199_v5, %v4198_v40  ;;  %v4192_v31 = vsel %vm655_vm8, %v4191_v34, %v4190_v6  ;;  %v4207_v57 = vrot.slane %v11019_v44, 1  ;;  %v4209_v3 = vrot.slane %v11020_v14, 7  ;;  %v11026_v39 = vld [vmem:[#allocation134_spill] sm:$0xff]  ;;  %v11027_v14 = vld [vmem:[#allocation135_spill] sm:$0xff] }
 0x241   : > { %v4202_v22 = vsel %vm649_vm6, %v4201_v51, %v4200_v10  ;;  %v7396_v33 = vsel %vm658_vm9, %v4193_v13, %v4192_v31  ;;  %v4211_v55 = vrot.slane %v7201_v60, 6  ;;  %v4213_v28 = vrot.slane %v11021_v41, 5 }
 0x242   : > { %v4204_v23 = vsel %vm652_vm7, %v4203_v49, %v4202_v22  ;;  %v4210_v34 = vsel %vm640_vm3, %v4209_v3, %v11022_v32  ;;  %v4215_v20 = vrot.slane %v11023_v37, 4  ;;  %v4217_v51 = vrot.slane %v11024_v7, 3 }
 0x243   : > { %v4206_v5 = vsel %vm655_vm8, %v4205_v58, %v4204_v23  ;;  %v4212_v13 = vsel %vm643_vm4, %v4211_v55, %v4210_v34  ;;  %v4219_v40 = vrot.slane %v11025_v24, 2  ;;  %v4221_v60 = vrot.slane %v11026_v39, 1 }
 0x244   : > { %v7407_v1 = vsel %vm658_vm9, %v4207_v57, %v4206_v5  ;;  %v4214_v49 = vsel %vm646_vm5, %v4213_v28, %v4212_v13  ;;  %v4223_v6 = vrot.slane %v7229_v15, 7  ;;  %v4225_v10 = vrot.slane %v7233_v63, 6 }
 0x245   : > { %v4227_v0 = vrot.slane %v7237_v25, 5  ;;  %v4216_v58 = vsel %vm649_vm6, %v4215_v20, %v4214_v49  ;;  %v4229_v31 = vrot.slane %v7241_v45, 4  ;;  %v4231_v22 = vrot.slane %v7245_v29, 3 }
 0x246   : > { %v4233_v44 = vrot.slane %v7249_v27, 2  ;;  %v4218_v57 = vsel %vm652_vm7, %v4217_v51, %v4216_v58  ;;  %v4224_v3 = vsel %vm640_vm3, %v4223_v6, %v11027_v14  ;;  %v4235_v23 = vrot.slane %v7253_v42, 1 }
 0x247   : > { %v4237_v15 = vrot.slane %v7261_v56, 7  ;;  %v4220_v63 = vsel %vm655_vm8, %v4219_v40, %v4218_v57  ;;  %v4226_v25 = vsel %vm643_vm4, %v4225_v10, %v4224_v3  ;;  %v4239_v55 = vrot.slane %v7265_v18, 6 }
 0x248   : > { %v4241_v45 = vrot.slane %v7269_v12, 5  ;;  %v4222_v29 = vsel %vm658_vm9, %v4221_v60, %v4220_v63  ;;  %v4228_v27 = vsel %vm646_vm5, %v4227_v0, %v4226_v25  ;;  %v4243_v28 = vrot.slane %v7273_v43, 4 }
 0x249   : > { %v4238_v41 = vsel %vm640_vm3, %v4237_v15, %v7257_v30  ;;  %v4230_v42 = vsel %vm649_vm6, %v4229_v31, %v4228_v27  ;;  %v4245_v5 = vrot.slane %v7277_v36, 3  ;;  %v4247_v32 = vrot.slane %v7281_v17, 2 }
 0x24a   : > { %v4240_v56 = vsel %vm643_vm4, %v4239_v55, %v4238_v41  ;;  %v4232_v18 = vsel %vm652_vm7, %v4231_v22, %v4230_v42  ;;  %v4249_v34 = vrot.slane %v7285_v11, 1  ;;  %v4251_v37 = vrot.slane %v7293_v16, 7 }
 0x24b   : > { %v4242_v12 = vsel %vm646_vm5, %v4241_v45, %v4240_v56  ;;  %v4234_v30 = vsel %vm655_vm8, %v4233_v44, %v4232_v18  ;;  %v4253_v20 = vrot.slane %v7297_v26, 6  ;;  %v4255_v7 = vrot.slane %v7301_v61, 5 }
 0x24c   : > { %v4244_v43 = vsel %vm649_vm6, %v4243_v28, %v4242_v12  ;;  %v4236_v36 = vsel %vm658_vm9, %v4235_v23, %v4234_v30  ;;  %v4252_v51 = vsel %vm640_vm3, %v4251_v37, %v7289_v50  ;;  %v4257_v13 = vrot.slane %v7305_v48, 4 }
 0x24d   : > { %v4246_v17 = vsel %vm652_vm7, %v4245_v5, %v4244_v43  ;;  %v4254_v16 = vsel %vm643_vm4, %v4253_v20, %v4252_v51  ;;  %v4259_v24 = vrot.slane %v7309_v21, 3  ;;  %v4261_v40 = vrot.slane %v7313_v52, 2 }
 0x24e   : > { %v4248_v11 = vsel %vm655_vm8, %v4247_v32, %v4246_v17  ;;  %v4256_v61 = vsel %vm646_vm5, %v4255_v7, %v4254_v16  ;;  %v4263_v39 = vrot.slane %v7317_v4, 1  ;;  %v4265_v60 = vrot.slane %v7325_v2, 7 }
 0x24f   : > { %v4250_v26 = vsel %vm658_vm9, %v4249_v34, %v4248_v11  ;;  %v4258_v50 = vsel %vm649_vm6, %v4257_v13, %v4256_v61  ;;  %v4267_v48 = vrot.slane %v7329_v46, 6  ;;  %v4269_v49 = vrot.slane %v7333_v47, 5 }
 0x250   : > { %v4271_v6 = vrot.slane %v7337_v59, 4  ;;  %v4260_v21 = vsel %vm652_vm7, %v4259_v24, %v4258_v50  ;;  %v4266_v52 = vsel %vm640_vm3, %v4265_v60, %v7321_v38  ;;  %v4273_v10 = vrot.slane %v7341_v8, 3 }
 0x251   : > { %v4275_v0 = vrot.slane %v7345_v19, 2  ;;  %v4262_v4 = vsel %vm655_vm8, %v4261_v40, %v4260_v21  ;;  %v4268_v2 = vsel %vm643_vm4, %v4267_v48, %v4266_v52  ;;  %v4277_v58 = vrot.slane %v7349_v54, 1 }
 0x252   : > { %v4287_v46 = vsel %vm535_vm2, %v7386_v35, 0.0  ;;  %v4264_v47 = vsel %vm658_vm9, %v4263_v39, %v4262_v4  ;;  %v4270_v59 = vsel %vm646_vm5, %v4269_v49, %v4268_v2  ;;  %v4294_v38 = vsel %vm535_vm2, %v7396_v33, 0.0  ;;  %v11028_v4 = vld [vmem:[#allocation112_spill] sm:$0xff] }
 0x253   : > { %v4288_v31 = vrot.slane %v4287_v46, 4  ;;  %v4272_v8 = vsel %vm649_vm6, %v4271_v6, %v4270_v59  ;;  %v4295_v19 = vrot.slane %v4294_v38, 4  ;;  %v4301_v22 = vsel %vm535_vm2, %v7407_v1, 0.0 }
 0x254   : > { %v4308_v44 = vsel %vm535_vm2, %v4222_v29, 0.0  ;;  %v4274_v54 = vsel %vm652_vm7, %v4273_v10, %v4272_v8  ;;  %v4302_v35 = vrot.slane %v4301_v22, 4  ;;  %v4315_v15 = vsel %vm535_vm2, %v4236_v36, 0.0 }
 0x255   : > { %v4289_v57 = vadd.f32 %v4288_v31, %v4287_v46  ;;  %v4309_v14 = vrot.slane %v4308_v44, 4  ;;  %v4276_v3 = vsel %vm655_vm8, %v4275_v0, %v4274_v54  ;;  %v4296_v23 = vadd.f32 %v4295_v19, %v4294_v38  ;;  %v11029_v19 = vld [vmem:[#allocation23_spill] sm:$0xff]  ;;  %v11031_v54 = vld [vmem:[#allocation57_spill] sm:$0xff] }
 0x256   : > { %v4322_v33 = vsel %vm535_vm2, %v4250_v26, 0.0  ;;  %v4278_v63 = vsel %vm658_vm9, %v4277_v58, %v4276_v3  ;;  %v4303_v55 = vadd.f32 %v4302_v35, %v4301_v22  ;;  %v4316_v27 = vrot.slane %v4315_v15, 4  ;;  %v11030_v22 = vld [vmem:[#allocation95_spill] sm:$0xff] }
 0x257   : > { %v4290_v25 = vrot.slane %v4289_v57, 2  ;;  %v4310_v45 = vadd.f32 %v4309_v14, %v4308_v44  ;;  %v4297_v1 = vrot.slane %v4296_v23, 2  ;;  %v4323_v29 = vrot.slane %v4322_v33, 4 }
 0x258   : > { %v4329_v41 = vsel %vm535_vm2, %v4264_v47, 0.0  ;;  %v4304_v42 = vrot.slane %v4303_v55, 2  ;;  %v4317_v18 = vadd.f32 %v4316_v27, %v4315_v15  ;;  %v4336_v34 = vsel %vm535_vm2, %v4278_v63, 0.0  ;;  %v11033_v63 = vld [vmem:[#allocation56_spill] sm:$0xff] }
 0x259   : > { %v4291_v28 = vadd.f32 %v4290_v25, %v4289_v57  ;;  %v4311_v56 = vrot.slane %v4310_v45, 2  ;;  %v4330_v5 = vrot.slane %v4329_v41, 4  ;;  %v4298_v32 = vadd.f32 %v4297_v1, %v4296_v23  ;;  %v11032_v57 = vld [vmem:[#allocation96_spill] sm:$0xff]  ;;  %v11034_v25 = vld [vmem:[#allocation97_spill] sm:$0xff]  ;;  %v11036_v1 = vld [vmem:[#allocation98_spill] sm:$0xff] }
 0x25a   : > { %v4324_v12 = vadd.f32 %v4323_v29, %v4322_v33  ;;  %v4305_v30 = vadd.f32 %v4304_v42, %v4303_v55  ;;  %v4318_v36 = vrot.slane %v4317_v18, 2  ;;  %v4337_v51 = vrot.slane %v4336_v34, 4  ;;  %v11037_v29 = vld [vmem:[#allocation52_spill] sm:$0xff] }
 0x25b   : > { %v4292_v37 = vrot.slane %v4291_v28, 1  ;;  %v4312_v43 = vadd.f32 %v4311_v56, %v4310_v45  ;;  %v4331_v20 = vadd.f32 %v4330_v5, %v4329_v41  ;;  %v4299_v7 = vrot.slane %v4298_v32, 1  ;;  %v11035_v45 = vld [vmem:[#allocation14_spill] sm:$0xff]  ;;  %v11038_v41 = vld [vmem:[#allocation99_spill] sm:$0xff] }
 0x25c   : > { %v4325_v17 = vrot.slane %v4324_v12, 2  ;;  %v4306_v11 = vrot.slane %v4305_v30, 1  ;;  %v4319_v26 = vadd.f32 %v4318_v36, %v4317_v18  ;;  %v4338_v39 = vadd.f32 %v4337_v51, %v4336_v34  ;;  %v11039_v5 = vld [vmem:[#allocation70_spill] sm:$0xff]  ;;  %v11042_v34 = vld [vmem:[#allocation101_spill] sm:$0xff] }
 0x25d   : > { %v4293_v13 = vadd.f32 %v4292_v37, %v4291_v28  ;;  %v4313_v16 = vrot.slane %v4312_v43, 1  ;;  %v4332_v24 = vrot.slane %v4331_v20, 2  ;;  %v4300_v40 = vadd.f32 %v4299_v7, %v4298_v32  ;;  %v11040_v32 = vld [vmem:[#allocation100_spill] sm:$0xff]  ;;  %v11045_v36 = vld [vmem:[#allocation58_spill] sm:$0xff] }
 0x25e   : > { %v4326_v61 = vadd.f32 %v4325_v17, %v4324_v12  ;;  %v4307_v60 = vadd.f32 %v4306_v11, %v4305_v30  ;;  %v4524_v49 = vrot.slane %v7093_v9, 1  ;;  %v4320_v6 = vrot.slane %v4319_v26, 1  ;;  %v11041_v12 = vld [vmem:[#allocation26_spill] sm:$0xff] }
 0x25f   : > { %v4314_v50 = vadd.f32 %v4313_v16, %v4312_v43  ;;  %v4333_v48 = vadd.f32 %v4332_v24, %v4331_v20  ;;  %v4339_v52 = vrot.slane %v4338_v39, 2  ;;  %v4705_v10 = vrot.slane %v4300_v40, 7  ;;  %v11043_v43 = vld [vmem:[#allocation39_spill] sm:$0xff]  ;;  %v11044_v20 = vld [vmem:[#allocation102_spill] sm:$0xff] }
 0x260   : > { %v4327_v21 = vrot.slane %v4326_v61, 1  ;;  %v4525_v2 = vsel %vm658_vm9, %v4524_v49, %v11028_v4  ;;  %v4707_v58 = vrot.slane %v4307_v60, 6  ;;  %v4321_v47 = vadd.f32 %v4320_v6, %v4319_v26  ;;  %v11046_v51 = vld [vmem:[#allocation62_spill] sm:$0xff]  ;;  %v11048_v26 = vld [vmem:[#allocation64_spill] sm:$0xff]  ;;  %v11051_v49 = vld [vmem:[#allocation65_spill] sm:$0xff] }
 0x261   : > { %v4334_v0 = vrot.slane %v4333_v48, 1  ;;  %v4709_v46 = vrot.slane %v4314_v50, 5  ;;  %v4340_v31 = vadd.f32 %v4339_v52, %v4338_v39  ;;  %4534 = vst.msk [vmem:[%s6844_s18 + $0x38] sm:$0xff] %vm535_vm2, %v4525_v2  ;;  %v4706_v38 = vsel %vm640_vm3, %v4705_v10, %v4293_v13  ;;  %v11047_v24 = vld [vmem:[#allocation2_spill] sm:$0xff]  ;;  %v11049_v39 = vld [vmem:[#allocation68_spill] sm:$0xff]  ;;  %v11050_v50 = vld [vmem:[#allocation69_spill] sm:$0xff] }
 0x262   : > { %v4328_v59 = vadd.f32 %v4327_v21, %v4326_v61  ;;  %v4708_v9 = vsel %vm643_vm4, %v4707_v58, %v4706_v38  ;;  %v7497_v44 = vmul.f32 %v11030_v22, %v11029_v19  ;;  %v7501_v35 = vmul.f32 %v11032_v57, %v11031_v54  ;;  %v11052_v21 = vld [vmem:[#allocation66_spill] sm:$0xff]  ;;  %v11054_v2 = vld [vmem:[#allocation7_spill] sm:$0xff]  ;;  %v11088_v54 = vld [vmem:[#allocation108_spill] sm:$0xff] }
 0x263   : > { %v4335_v8 = vadd.f32 %v4334_v0, %v4333_v48  ;;  %v4341_v14 = vrot.slane %v4340_v31, 1  ;;  %v4710_v3 = vsel %vm646_vm5, %v4709_v46, %v4708_v9  ;;  %v4711_v23 = vrot.slane %v4321_v47, 4  ;;  %v11053_v0 = vld [vmem:[#allocation28_spill] sm:$0xff]  ;;  %v11055_v46 = vld [vmem:[#allocation42_spill] sm:$0xff] }
 0x264   : > { %v4713_v15 = vrot.slane %v4328_v59, 3  ;;  %v7506_v55 = vmul.f32 %v11034_v25, %v11033_v63  ;;  %v7510_v27 = vmul.f32 %v11036_v1, %v11035_v45  ;;  %v7514_v28 = vmul.f32 %v11038_v41, %v11037_v29  ;;  %v11056_v59 = vld [vmem:[#allocation10_spill] sm:$0xff]  ;;  %v11058_v9 = vld [vmem:[#allocation60_spill] sm:$0xff]  ;;  %v11082_v29 = vld [vmem:[#allocation105_spill] sm:$0xff] }
 0x265   : > { %v4715_v33 = vrot.slane %v4335_v8, 2  ;;  %v4342_v42 = vadd.f32 %v4341_v14, %v4340_v31  ;;  %v4712_v56 = vsel %vm649_vm6, %v4711_v23, %v4710_v3  ;;  %v7519_v18 = vmul.f32 %v11040_v32, %v11039_v5  ;;  %v11057_v38 = vld [vmem:[#allocation46_spill] sm:$0xff]  ;;  %v11059_v3 = vld [vmem:[#allocation4_spill] sm:$0xff]  ;;  %v11086_v63 = vld [vmem:[#allocation107_spill] sm:$0xff] }
 0x266   : > { %v7523_v37 = vmul.f32 %v11042_v34, %v11041_v12  ;;  %v4714_v30 = vsel %vm652_vm7, %v4713_v15, %v4712_v56  ;;  %v7528_v7 = vmul.f32 %v11044_v20, %v11043_v43  ;;  %v7532_v17 = vmul.f32 %v11030_v22, %v11045_v36  ;;  %v11060_v15 = vld [vmem:[#allocation71_spill] sm:$0xff]  ;;  %v11077_v36 = vld [vmem:[#allocation8_spill] sm:$0xff]  ;;  %v11079_v43 = vld [vmem:[#allocation21_spill] sm:$0xff] }
 0x267   : > { %v7536_v13 = vmul.f32 %v11032_v57, %v11046_v51  ;;  %v4716_v11 = vsel %vm655_vm8, %v4715_v33, %v4714_v30  ;;  %v4717_v16 = vrot.slane %v4342_v42, 1  ;;  %v7541_v40 = vmul.f32 %v11034_v25, %v11047_v24  ;;  %v11061_v42 = vld [vmem:[#allocation54_spill] sm:$0xff]  ;;  %v11062_v30 = vld [vmem:[#allocation73_spill] sm:$0xff]  ;;  %v11076_v51 = vld [vmem:[#allocation67_spill] sm:$0xff] }
 0x268   : > { %v7545_v61 = vmul.f32 %v11036_v1, %v11048_v26  ;;  %v7549_v60 = vmul.f32 %v11038_v41, %v11049_v39  ;;  %v7553_v48 = vmul.f32 %v11040_v32, %v11050_v50  ;;  %v7557_v6 = vmul.f32 %v11042_v34, %v11051_v49  ;;  %v11071_v49 = vld [vmem:[#allocation89_spill] sm:$0xff]  ;;  %v11072_v50 = vld [vmem:[#allocation90_spill] sm:$0xff]  ;;  %v11073_v39 = vld [vmem:[#allocation91_spill] sm:$0xff] }
 0x269   : > { %v7561_v52 = vmul.f32 %v11044_v20, %v11052_v21  ;;  %v4718_v10 = vsel %vm658_vm9, %v4717_v16, %v4716_v11  ;;  %v7566_v4 = vmul.f32 %v11030_v22, %v11053_v0  ;;  %v7570_v58 = vmul.f32 %v11032_v57, %v11054_v2  ;;  %v11063_v16 = vld [vmem:[#allocation74_spill] sm:$0xff]  ;;  %v11068_v2 = vld [vmem:[#allocation81_spill] sm:$0xff]  ;;  %v11080_v12 = vld [vmem:[#allocation103_spill] sm:$0xff] }
 0x26a   : > { %v7574_v47 = vmul.f32 %v11034_v25, %v11055_v46  ;;  %4989 = vmatpush.xpose.msk.msra.mxu1 %vm535_vm2, %v4718_v10  ;;  %v7579_v31 = vmul.f32 %v11036_v1, %v11056_v59  ;;  %v7583_v8 = vmul.f32 %v11038_v41, %v11057_v38  ;;  %v7587_v14 = vmul.f32 %v11040_v32, %v11058_v9  ;;  %v11064_v9 = vld [vmem:[#allocation75_spill] sm:$0xff]  ;;  %v11065_v38 = vld [vmem:[#allocation76_spill] sm:$0xff]  ;;  %v11066_v59 = vld [vmem:[#allocation77_spill] sm:$0xff] }
 0x26b   : > { %v7591_v23 = vmul.f32 %v11042_v34, %v11059_v3  ;;  %v7595_v33 = vmul.f32 %v11044_v20, %v11060_v15  ;;  %v7599_v56 = vmul.f32 %v11030_v22, %v11061_v42  ;;  %v7603_v11 = vmul.f32 %v11032_v57, %v11062_v30  ;;  %v11067_v46 = vld [vmem:[#allocation78_spill] sm:$0xff]  ;;  %v11069_v0 = vld [vmem:[#allocation49_spill] sm:$0xff]  ;;  %v11081_v5 = vld [vmem:[#allocation104_spill] sm:$0xff] }
 0x26c   : > { %v7607_v10 = vmul.f32 %v11034_v25, %v11063_v16  ;;  %v7611_v3 = vmul.f32 %v11036_v1, %v11064_v9  ;;  %v7615_v15 = vmul.f32 %v11038_v41, %v11065_v38  ;;  %v7619_v42 = vmul.f32 %v11040_v32, %v11066_v59  ;;  %v11070_v21 = vld [vmem:[#allocation82_spill] sm:$0xff]  ;;  %v11074_v26 = vld [vmem:[#allocation93_spill] sm:$0xff]  ;;  %v11090_v19 = vld [vmem:[#allocation72_spill] sm:$0xff] }
 0x26d   : > { %v7623_v30 = vmul.f32 %v11042_v34, %v11067_v46  ;;  %v7627_v16 = vmul.f32 %v11044_v20, %v11068_v2  ;;  %v7631_v9 = vmul.f32 %v11030_v22, %v11069_v0  ;;  %v7635_v38 = vmul.f32 %v11032_v57, %v11070_v21  ;;  %v11075_v24 = vld [vmem:[#allocation94_spill] sm:$0xff] }
 0x26e   : > { %v7639_v59 = vmul.f32 %v11034_v25, %v11071_v49  ;;  %v7643_v46 = vmul.f32 %v11036_v1, %v11072_v50  ;;  %v7647_v2 = vmul.f32 %v11038_v41, %v11073_v39  ;;  %v7651_v0 = vmul.f32 %v11040_v32, %v11074_v26  ;;  %v11084_v45 = vld [vmem:[#allocation106_spill] sm:$0xff] }
 0x26f   : > { %v7655_v21 = vmul.f32 %v11042_v34, %v11075_v24  ;;  %v7659_v49 = vmul.f32 %v11044_v20, %v11076_v51  ;;  %v7663_v50 = vmul.f32 %v11030_v22, %v11077_v36  ;;  %v7667_v39 = vmul.f32 %v11032_v57, %v11079_v43 }
 0x270   : > { %v7671_v26 = vmul.f32 %v11034_v25, %v11080_v12  ;;  %v7675_v24 = vmul.f32 %v11036_v1, %v11081_v5  ;;  %v7679_v51 = vmul.f32 %v11038_v41, %v11082_v29  ;;  %v7683_v36 = vmul.f32 %v11040_v32, %v11084_v45 }
 0x271   : > { %11078 = vst [vmem:[#allocation19_spill] sm:$0xff] %v7663_v50  ;;  %v7687_v43 = vmul.f32 %v11042_v34, %v11086_v63  ;;  %v7691_v12 = vmul.f32 %v11044_v20, %v11088_v54  ;;  %v7695_v5 = vmul.f32 %v11030_v22, %v11090_v19  ;;  %v11092_v50 = vld [vmem:[#allocation109_spill] sm:$0xff] }
 0x272   : > { %11083 = vst [vmem:[#allocation124_spill] sm:$0xff] %v7679_v51  ;;  %v7699_v29 = vmul.f32 %v11032_v57, %v11092_v50  ;;  %v11094_v51 = vld [vmem:[#allocation110_spill] sm:$0xff] }
 0x273   : > { %11085 = vst [vmem:[#allocation125_spill] sm:$0xff] %v7683_v36  ;;  %v7703_v45 = vmul.f32 %v11034_v25, %v11094_v51  ;;  %v11095_v36 = vld [vmem:[#allocation111_spill] sm:$0xff] }
 0x274   : > { %11087 = vst [vmem:[#allocation126_spill] sm:$0xff] %v7687_v43  ;;  %v7707_v63 = vmul.f32 %v11036_v1, %v11095_v36  ;;  %v11096_v43 = vld [vmem:[#allocation113_spill] sm:$0xff]  ;;  %v7727_v36 = vmul.f32 %v11030_v22, %v10955_v62  ;;  %v11108_v62 = vld [vmem:[#allocation122_spill] sm:$0xff] }
 0x275   : > { %11089 = vst [vmem:[#allocation127_spill] sm:$0xff] %v7691_v12  ;;  %v7711_v54 = vmul.f32 %v11038_v41, %v11096_v43  ;;  %v11098_v12 = vld [vmem:[#allocation114_spill] sm:$0xff]  ;;  %v7731_v43 = vmul.f32 %v11032_v57, %v7072_v53  ;;  %v7751_v57 = vmul.f32 %v11042_v34, %v11108_v62  ;;  %v11109_v53 = vld [vmem:[#allocation123_spill] sm:$0xff] }
 0x276   : > { %11091 = vst [vmem:[#allocation129_spill] sm:$0xff] %v7695_v5  ;;  %v7715_v19 = vmul.f32 %v11040_v32, %v11098_v12  ;;  %v11100_v5 = vld [vmem:[#allocation115_spill] sm:$0xff] }
 0x277   : > { %11093 = vst [vmem:[#allocation130_spill] sm:$0xff] %v7699_v29  ;;  %v7719_v50 = vmul.f32 %v11042_v34, %v11100_v5  ;;  %v11102_v29 = vld [vmem:[#allocation116_spill] sm:$0xff] }
 0x278   : > { %11097 = vst [vmem:[#allocation128_spill] sm:$0xff] %v7711_v54  ;;  %v7723_v51 = vmul.f32 %v11044_v20, %v11102_v29  ;;  %v11104_v54 = vld [vmem:[#allocation118_spill] sm:$0xff] }
 0x279   : > { %11099 = vst [vmem:[#allocation131_spill] sm:$0xff] %v7715_v19  ;;  %v7735_v12 = vmul.f32 %v11034_v25, %v11104_v54  ;;  %v11105_v19 = vld [vmem:[#allocation119_spill] sm:$0xff]  ;;  %v7755_v25 = vmul.f32 %v11044_v20, %v11109_v53  ;;  %v3707_v54 = vrot.slane %v7501_v35, 7  ;;  %v3721_v20 = vrot.slane %v7536_v13, 7 }
 0x27a   : > { %11101 = vst [vmem:[#allocation132_spill] sm:$0xff] %v7719_v50  ;;  %v7739_v5 = vmul.f32 %v11036_v1, %v11105_v19  ;;  %v11106_v50 = vld [vmem:[#allocation120_spill] sm:$0xff]  ;;  %v3709_v1 = vrot.slane %v7506_v55, 6  ;;  %v3711_v19 = vrot.slane %v7510_v27, 5  ;;  %v3723_v53 = vrot.slane %v7541_v40, 6 }
 0x27b   : > { %11103 = vst [vmem:[#allocation133_spill] sm:$0xff] %v7723_v51  ;;  %v7743_v29 = vmul.f32 %v11038_v41, %v11106_v50  ;;  %v11107_v51 = vld [vmem:[#allocation121_spill] sm:$0xff]  ;;  %v3713_v41 = vrot.slane %v7514_v28, 4  ;;  %v3715_v50 = vrot.slane %v7519_v18, 3  ;;  %v3708_v34 = vsel %vm640_vm3, %v3707_v54, %v7497_v44 }
 0x27c   : > { %v7747_v22 = vmul.f32 %v11040_v32, %v11107_v51  ;;  %v3717_v32 = vrot.slane %v7523_v37, 2  ;;  %v3719_v51 = vrot.slane %v7528_v7, 1  ;;  %v3725_v35 = vrot.slane %v7545_v61, 5 }
 0x27d   : > { %v3710_v55 = vsel %vm643_vm4, %v3709_v1, %v3708_v34  ;;  %v3727_v27 = vrot.slane %v7549_v60, 4  ;;  %v3729_v28 = vrot.slane %v7553_v48, 3  ;;  %v3731_v18 = vrot.slane %v7557_v6, 2 }
 0x27e   : > { %v3712_v37 = vsel %vm646_vm5, %v3711_v19, %v3710_v55  ;;  %v3722_v7 = vsel %vm640_vm3, %v3721_v20, %v7532_v17  ;;  %v3733_v44 = vrot.slane %v7561_v52, 1  ;;  %v3735_v54 = vrot.slane %v7570_v58, 7 }
 0x27f   : > { %v3714_v13 = vsel %vm649_vm6, %v3713_v41, %v3712_v37  ;;  %v3724_v40 = vsel %vm643_vm4, %v3723_v53, %v3722_v7  ;;  %v3737_v61 = vrot.slane %v7574_v47, 6  ;;  %v3739_v60 = vrot.slane %v7579_v31, 5 }
 0x280   : > { %v3716_v48 = vsel %vm652_vm7, %v3715_v50, %v3714_v13  ;;  %v3726_v6 = vsel %vm646_vm5, %v3725_v35, %v3724_v40  ;;  %v3736_v19 = vsel %vm640_vm3, %v3735_v54, %v7566_v4  ;;  %v3741_v17 = vrot.slane %v7583_v8, 4 }
 0x281   : > { %v3718_v52 = vsel %vm655_vm8, %v3717_v32, %v3716_v48  ;;  %v3728_v58 = vsel %vm649_vm6, %v3727_v27, %v3726_v6  ;;  %v3738_v1 = vsel %vm643_vm4, %v3737_v61, %v3736_v19  ;;  %v3743_v53 = vrot.slane %v7587_v14, 3  ;;  %v11110_v61 = vld [vmem:[#allocation19_spill] sm:$0xff]  ;;  %v11112_v6 = vld [vmem:[#allocation125_spill] sm:$0xff] }
 0x282   : > { %v7792_v47 = vsel %vm658_vm9, %v3719_v51, %v3718_v52  ;;  %v3730_v50 = vsel %vm652_vm7, %v3729_v28, %v3728_v58  ;;  %v3740_v31 = vsel %vm646_vm5, %v3739_v60, %v3738_v1  ;;  %v3745_v41 = vrot.slane %v7591_v23, 2  ;;  %v11114_v58 = vld [vmem:[#allocation127_spill] sm:$0xff] }
 0x283   : > { %v3732_v4 = vsel %vm655_vm8, %v3731_v18, %v3730_v50  ;;  %v3742_v8 = vsel %vm649_vm6, %v3741_v17, %v3740_v31  ;;  %v3747_v32 = vrot.slane %v7595_v33, 1  ;;  %v3749_v34 = vrot.slane %v7603_v11, 7  ;;  %v11113_v17 = vld [vmem:[#allocation126_spill] sm:$0xff] }
 0x284   : > { %v7802_v20 = vsel %vm658_vm9, %v3733_v44, %v3732_v4  ;;  %v3744_v51 = vsel %vm652_vm7, %v3743_v53, %v3742_v8  ;;  %v3751_v14 = vrot.slane %v7607_v10, 6  ;;  %v3753_v35 = vrot.slane %v7611_v3, 5  ;;  %v11115_v53 = vld [vmem:[#allocation130_spill] sm:$0xff] }
 0x285   : > { %v3746_v55 = vsel %vm655_vm8, %v3745_v41, %v3744_v51  ;;  %v3750_v23 = vsel %vm640_vm3, %v3749_v34, %v7599_v56  ;;  %v3755_v27 = vrot.slane %v7615_v15, 4  ;;  %v3757_v33 = vrot.slane %v7619_v42, 3  ;;  %v11116_v51 = vld [vmem:[#allocation129_spill] sm:$0xff] }
 0x286   : > { %v7813_v11 = vsel %vm658_vm9, %v3747_v32, %v3746_v55  ;;  %v3752_v28 = vsel %vm643_vm4, %v3751_v14, %v3750_v23  ;;  %v3759_v18 = vrot.slane %v7623_v30, 2  ;;  %v3761_v10 = vrot.slane %v7627_v16, 1 }
 0x287   : > { %v3754_v3 = vsel %vm646_vm5, %v3753_v35, %v3752_v28  ;;  %v3763_v37 = vrot.slane %v7635_v38, 7  ;;  %v3765_v7 = vrot.slane %v7639_v59, 6  ;;  %v3767_v56 = vrot.slane %v7643_v46, 5  ;;  %v11117_v35 = vld [vmem:[#allocation128_spill] sm:$0xff] }
 0x288   : > { %v3756_v15 = vsel %vm649_vm6, %v3755_v27, %v3754_v3  ;;  %v3769_v42 = vrot.slane %v7647_v2, 4  ;;  %v3771_v44 = vrot.slane %v7651_v0, 3  ;;  %v3773_v54 = vrot.slane %v7655_v21, 2  ;;  %v11120_v3 = vld [vmem:[#allocation133_spill] sm:$0xff] }
 0x289   : > { %v3758_v30 = vsel %vm652_vm7, %v3757_v33, %v3756_v15  ;;  %v3764_v16 = vsel %vm640_vm3, %v3763_v37, %v7631_v9  ;;  %v3775_v13 = vrot.slane %v7659_v49, 1  ;;  %v3777_v38 = vrot.slane %v7667_v39, 7  ;;  %v11111_v9 = vld [vmem:[#allocation124_spill] sm:$0xff]  ;;  %v11118_v33 = vld [vmem:[#allocation131_spill] sm:$0xff] }
 0x28a   : > { %v3760_v59 = vsel %vm655_vm8, %v3759_v18, %v3758_v30  ;;  %v3766_v46 = vsel %vm643_vm4, %v3765_v7, %v3764_v16  ;;  %v3779_v40 = vrot.slane %v7671_v26, 6  ;;  %v3781_v2 = vrot.slane %v7675_v24, 5  ;;  %v11119_v18 = vld [vmem:[#allocation132_spill] sm:$0xff] }
 0x28b   : > { %v3762_v0 = vsel %vm658_vm9, %v3761_v10, %v3760_v59  ;;  %v3768_v21 = vsel %vm646_vm5, %v3767_v56, %v3766_v46  ;;  %v3778_v60 = vsel %vm640_vm3, %v3777_v38, %v11110_v61  ;;  %v3783_v48 = vrot.slane %v11111_v9, 4 }
 0x28c   : > { %v3770_v49 = vsel %vm649_vm6, %v3769_v42, %v3768_v21  ;;  %v3780_v39 = vsel %vm643_vm4, %v3779_v40, %v3778_v60  ;;  %v3785_v19 = vrot.slane %v11112_v6, 3  ;;  %v3787_v52 = vrot.slane %v11113_v17, 2 }
 0x28d   : > { %v3772_v26 = vsel %vm652_vm7, %v3771_v44, %v3770_v49  ;;  %v3782_v24 = vsel %vm646_vm5, %v3781_v2, %v3780_v39  ;;  %v3789_v1 = vrot.slane %v11114_v58, 1  ;;  %v3791_v50 = vrot.slane %v11115_v53, 7 }
 0x28e   : > { %v3774_v31 = vsel %vm655_vm8, %v3773_v54, %v3772_v26  ;;  %v3784_v41 = vsel %vm649_vm6, %v3783_v48, %v3782_v24  ;;  %v3793_v4 = vrot.slane %v7703_v45, 6  ;;  %v3795_v8 = vrot.slane %v7707_v63, 5 }
 0x28f   : > { %v3776_v32 = vsel %vm658_vm9, %v3775_v13, %v3774_v31  ;;  %v3786_v34 = vsel %vm652_vm7, %v3785_v19, %v3784_v41  ;;  %v3792_v14 = vsel %vm640_vm3, %v3791_v50, %v11116_v51  ;;  %v3797_v55 = vrot.slane %v11117_v35, 4 }
 0x290   : > { %v3788_v23 = vsel %vm655_vm8, %v3787_v52, %v3786_v34  ;;  %v3794_v27 = vsel %vm643_vm4, %v3793_v4, %v3792_v14  ;;  %v3799_v28 = vrot.slane %v11118_v33, 3  ;;  %v3801_v10 = vrot.slane %v11119_v18, 2 }
 0x291   : > { %v3790_v45 = vsel %vm658_vm9, %v3789_v1, %v3788_v23  ;;  %v3796_v63 = vsel %vm646_vm5, %v3795_v8, %v3794_v27  ;;  %v3803_v37 = vrot.slane %v11120_v3, 1  ;;  %v3805_v7 = vrot.slane %v7731_v43, 7 }
 0x292   : > { %v3798_v56 = vsel %vm649_vm6, %v3797_v55, %v3796_v63  ;;  %v3807_v15 = vrot.slane %v7735_v12, 6  ;;  %v3809_v42 = vrot.slane %v7739_v5, 5  ;;  %v3811_v44 = vrot.slane %v7743_v29, 4 }
 0x293   : > { %v3800_v54 = vsel %vm652_vm7, %v3799_v28, %v3798_v56  ;;  %v3806_v30 = vsel %vm640_vm3, %v3805_v7, %v7727_v36  ;;  %v3813_v16 = vrot.slane %v7747_v22, 3  ;;  %v3815_v13 = vrot.slane %v7751_v57, 2  ;;  %v11121_v56 = vld [vmem:[#allocation23_spill] sm:$0xff] }
 0x294   : > { %v3802_v38 = vsel %vm655_vm8, %v3801_v10, %v3800_v54  ;;  %v3808_v43 = vsel %vm643_vm4, %v3807_v15, %v3806_v30  ;;  %v3817_v59 = vrot.slane %v7755_v25, 1  ;;  %v3827_v5 = vsel %vm535_vm2, %v7792_v47, 0.0  ;;  %v11122_v15 = vld [vmem:[#allocation79_spill] sm:$0xff] }
 0x295   : > { %v3804_v29 = vsel %vm658_vm9, %v3803_v37, %v3802_v38  ;;  %v3810_v12 = vsel %vm646_vm5, %v3809_v42, %v3808_v43  ;;  %v3828_v46 = vrot.slane %v3827_v5, 4  ;;  %v3834_v36 = vsel %vm535_vm2, %v7802_v20, 0.0 }
 0x296   : > { %v3812_v22 = vsel %vm649_vm6, %v3811_v44, %v3810_v12  ;;  %v3835_v57 = vrot.slane %v3834_v36, 4  ;;  %v3841_v40 = vsel %vm535_vm2, %v7813_v11, 0.0  ;;  %v3848_v2 = vsel %vm535_vm2, %v3762_v0, 0.0 }
 0x297   : > { %v3814_v25 = vsel %vm652_vm7, %v3813_v16, %v3812_v22  ;;  %v3829_v21 = vadd.f32 %v3828_v46, %v3827_v5  ;;  %v3842_v47 = vrot.slane %v3841_v40, 4  ;;  %v3849_v61 = vrot.slane %v3848_v2, 4  ;;  %v11124_v5 = vld [vmem:[#allocation80_spill] sm:$0xff] }
 0x298   : > { %v3816_v60 = vsel %vm655_vm8, %v3815_v13, %v3814_v25  ;;  %v3836_v9 = vadd.f32 %v3835_v57, %v3834_v36  ;;  %v3855_v48 = vsel %vm535_vm2, %v3776_v32, 0.0  ;;  %v3862_v20 = vsel %vm535_vm2, %v3790_v45, 0.0  ;;  %v11126_v25 = vld [vmem:[#allocation83_spill] sm:$0xff] }
 0x299   : > { %v3818_v49 = vsel %vm658_vm9, %v3817_v59, %v3816_v60  ;;  %v3830_v39 = vrot.slane %v3829_v21, 2  ;;  %v3843_v6 = vadd.f32 %v3842_v47, %v3841_v40  ;;  %v3850_v19 = vadd.f32 %v3849_v61, %v3848_v2  ;;  %v11123_v59 = vld [vmem:[#allocation57_spill] sm:$0xff]  ;;  %v11125_v2 = vld [vmem:[#allocation56_spill] sm:$0xff]  ;;  %v11127_v47 = vld [vmem:[#allocation14_spill] sm:$0xff] }
 0x29a   : > { %v3837_v11 = vrot.slane %v3836_v9, 2  ;;  %v3856_v17 = vrot.slane %v3855_v48, 4  ;;  %v3863_v0 = vrot.slane %v3862_v20, 4  ;;  %v3869_v52 = vsel %vm535_vm2, %v3804_v29, 0.0  ;;  %v11128_v61 = vld [vmem:[#allocation84_spill] sm:$0xff] }
 0x29b   : > { %v3831_v26 = vadd.f32 %v3830_v39, %v3829_v21  ;;  %v3844_v24 = vrot.slane %v3843_v6, 2  ;;  %v3851_v58 = vrot.slane %v3850_v19, 2  ;;  %v3870_v1 = vrot.slane %v3869_v52, 4 }
 0x29c   : > { %v3838_v53 = vadd.f32 %v3837_v11, %v3836_v9  ;;  %v3857_v50 = vadd.f32 %v3856_v17, %v3855_v48  ;;  %v3864_v31 = vadd.f32 %v3863_v0, %v3862_v20  ;;  %v3876_v41 = vsel %vm535_vm2, %v3818_v49, 0.0  ;;  %v11131_v17 = vld [vmem:[#allocation70_spill] sm:$0xff] }
 0x29d   : > { %v3832_v4 = vrot.slane %v3831_v26, 1  ;;  %v3845_v8 = vadd.f32 %v3844_v24, %v3843_v6  ;;  %v3852_v32 = vadd.f32 %v3851_v58, %v3850_v19  ;;  %v3871_v34 = vadd.f32 %v3870_v1, %v3869_v52  ;;  %v11129_v6 = vld [vmem:[#allocation52_spill] sm:$0xff]  ;;  %v11130_v19 = vld [vmem:[#allocation85_spill] sm:$0xff]  ;;  %v11132_v0 = vld [vmem:[#allocation86_spill] sm:$0xff] }
 0x29e   : > { %v3839_v51 = vrot.slane %v3838_v53, 1  ;;  %v3858_v14 = vrot.slane %v3857_v50, 2  ;;  %v3865_v35 = vrot.slane %v3864_v31, 2  ;;  %v3877_v55 = vrot.slane %v3876_v41, 4  ;;  %v11134_v24 = vld [vmem:[#allocation87_spill] sm:$0xff] }
 0x29f   : > { %v3833_v23 = vadd.f32 %v3832_v4, %v3831_v26  ;;  %v3846_v27 = vrot.slane %v3845_v8, 1  ;;  %v3853_v33 = vrot.slane %v3852_v32, 1  ;;  %v3872_v28 = vrot.slane %v3871_v34, 2  ;;  %v11133_v26 = vld [vmem:[#allocation26_spill] sm:$0xff] }
 0x2a0   : > { %v3840_v18 = vadd.f32 %v3839_v51, %v3838_v53  ;;  %v3859_v10 = vadd.f32 %v3858_v14, %v3857_v50  ;;  %v3866_v45 = vadd.f32 %v3865_v35, %v3864_v31  ;;  %v3878_v63 = vadd.f32 %v3877_v55, %v3876_v41  ;;  %v11135_v50 = vld [vmem:[#allocation39_spill] sm:$0xff]  ;;  %v11136_v31 = vld [vmem:[#allocation88_spill] sm:$0xff]  ;;  %v11137_v4 = vld [vmem:[#allocation58_spill] sm:$0xff] }
 0x2a1   : > { %v3847_v3 = vadd.f32 %v3846_v27, %v3845_v8  ;;  %v3854_v37 = vadd.f32 %v3853_v33, %v3852_v32  ;;  %v3873_v7 = vadd.f32 %v3872_v28, %v3871_v34  ;;  %v7896_v42 = vmul.f32 %v11122_v15, %v11121_v56  ;;  %v11138_v34 = vld [vmem:[#allocation62_spill] sm:$0xff]  ;;  %v11140_v55 = vld [vmem:[#allocation64_spill] sm:$0xff]  ;;  %v11183_v56 = vld [vmem:[#allocation109_spill] sm:$0xff] }
 0x2a2   : > { %v3860_v44 = vrot.slane %v3859_v10, 1  ;;  %v3867_v54 = vrot.slane %v3866_v45, 1  ;;  %v3879_v30 = vrot.slane %v3878_v63, 2  ;;  %v4683_v16 = vrot.slane %v3840_v18, 7  ;;  %v11139_v14 = vld [vmem:[#allocation2_spill] sm:$0xff]  ;;  %v11141_v28 = vld [vmem:[#allocation68_spill] sm:$0xff] }
 0x2a3   : > { %v3874_v13 = vrot.slane %v3873_v7, 1  ;;  %v4685_v38 = vrot.slane %v3847_v3, 6  ;;  %v4687_v43 = vrot.slane %v3854_v37, 5  ;;  %v7900_v29 = vmul.f32 %v11124_v5, %v11123_v59  ;;  %v11144_v37 = vld [vmem:[#allocation66_spill] sm:$0xff]  ;;  %v11181_v59 = vld [vmem:[#allocation72_spill] sm:$0xff] }
 0x2a4   : > { %v3861_v12 = vadd.f32 %v3860_v44, %v3859_v10  ;;  %v3868_v46 = vadd.f32 %v3867_v54, %v3866_v45  ;;  %v3880_v36 = vadd.f32 %v3879_v30, %v3878_v63  ;;  %v4684_v22 = vsel %vm640_vm3, %v4683_v16, %v3833_v23  ;;  %v11142_v10 = vld [vmem:[#allocation69_spill] sm:$0xff]  ;;  %v11145_v44 = vld [vmem:[#allocation28_spill] sm:$0xff]  ;;  %v11146_v30 = vld [vmem:[#allocation7_spill] sm:$0xff] }
 0x2a5   : > { %v3875_v57 = vadd.f32 %v3874_v13, %v3873_v7  ;;  %v4686_v40 = vsel %vm643_vm4, %v4685_v38, %v4684_v22  ;;  %v7906_v21 = vmul.f32 %v11126_v25, %v11125_v2  ;;  %v7910_v60 = vmul.f32 %v11128_v61, %v11127_v47  ;;  %v11143_v63 = vld [vmem:[#allocation65_spill] sm:$0xff]  ;;  %v11147_v38 = vld [vmem:[#allocation42_spill] sm:$0xff]  ;;  %v11177_v47 = vld [vmem:[#allocation107_spill] sm:$0xff] }
 0x2a6   : > { %v3881_v9 = vrot.slane %v3880_v36, 1  ;;  %v4688_v48 = vsel %vm646_vm5, %v4687_v43, %v4686_v40  ;;  %v4689_v20 = vrot.slane %v3861_v12, 4  ;;  %v4691_v49 = vrot.slane %v3868_v46, 3  ;;  %v11148_v12 = vld [vmem:[#allocation10_spill] sm:$0xff]  ;;  %v11179_v2 = vld [vmem:[#allocation108_spill] sm:$0xff] }
 0x2a7   : > { %v4693_v39 = vrot.slane %v3875_v57, 2  ;;  %v7915_v11 = vmul.f32 %v11130_v19, %v11129_v6  ;;  %v7919_v52 = vmul.f32 %v11132_v0, %v11131_v17  ;;  %v7923_v58 = vmul.f32 %v11134_v24, %v11133_v26  ;;  %v11150_v57 = vld [vmem:[#allocation60_spill] sm:$0xff]  ;;  %v11174_v17 = vld [vmem:[#allocation105_spill] sm:$0xff]  ;;  %v11175_v6 = vld [vmem:[#allocation106_spill] sm:$0xff] }
 0x2a8   : > { %v3882_v1 = vadd.f32 %v3881_v9, %v3880_v36  ;;  %v4690_v53 = vsel %vm649_vm6, %v4689_v20, %v4688_v48  ;;  %v7928_v41 = vmul.f32 %v11136_v31, %v11135_v50  ;;  %v7932_v8 = vmul.f32 %v11122_v15, %v11137_v4  ;;  %v11149_v36 = vld [vmem:[#allocation46_spill] sm:$0xff]  ;;  %v11151_v9 = vld [vmem:[#allocation4_spill] sm:$0xff]  ;;  %v11152_v20 = vld [vmem:[#allocation71_spill] sm:$0xff] }
 0x2a9   : > { %v4692_v32 = vsel %vm652_vm7, %v4691_v49, %v4690_v53  ;;  %v7937_v51 = vmul.f32 %v11124_v5, %v11138_v34  ;;  %v7941_v35 = vmul.f32 %v11126_v25, %v11139_v14  ;;  %v7945_v23 = vmul.f32 %v11128_v61, %v11140_v55  ;;  %v11154_v53 = vld [vmem:[#allocation73_spill] sm:$0xff]  ;;  %v11167_v55 = vld [vmem:[#allocation94_spill] sm:$0xff]  ;;  %v11168_v14 = vld [vmem:[#allocation67_spill] sm:$0xff] }
 0x2aa   : > { %v4694_v27 = vsel %vm655_vm8, %v4693_v39, %v4692_v32  ;;  %v4695_v33 = vrot.slane %v3882_v1, 1  ;;  %v7950_v18 = vmul.f32 %v11130_v19, %v11141_v28  ;;  %v7954_v45 = vmul.f32 %v11132_v0, %v11142_v10  ;;  %v11153_v39 = vld [vmem:[#allocation54_spill] sm:$0xff]  ;;  %v11165_v10 = vld [vmem:[#allocation91_spill] sm:$0xff]  ;;  %v11166_v28 = vld [vmem:[#allocation93_spill] sm:$0xff] }
 0x2ab   : > { %v7958_v3 = vmul.f32 %v11134_v24, %v11143_v63  ;;  %v7962_v7 = vmul.f32 %v11136_v31, %v11144_v37  ;;  %v7966_v54 = vmul.f32 %v11122_v15, %v11145_v44  ;;  %v7970_v16 = vmul.f32 %v11124_v5, %v11146_v30  ;;  %v11161_v30 = vld [vmem:[#allocation49_spill] sm:$0xff]  ;;  %v11162_v44 = vld [vmem:[#allocation82_spill] sm:$0xff]  ;;  %v11169_v34 = vld [vmem:[#allocation8_spill] sm:$0xff] }
 0x2ac   : > { %v4696_v13 = vsel %vm658_vm9, %v4695_v33, %v4694_v27  ;;  %v7975_v43 = vmul.f32 %v11126_v25, %v11147_v38  ;;  %v7979_v46 = vmul.f32 %v11128_v61, %v11148_v12  ;;  %v7983_v22 = vmul.f32 %v11130_v19, %v11149_v36  ;;  %v11155_v27 = vld [vmem:[#allocation74_spill] sm:$0xff]  ;;  %v11158_v36 = vld [vmem:[#allocation77_spill] sm:$0xff]  ;;  %v11172_v50 = vld [vmem:[#allocation103_spill] sm:$0xff] }
 0x2ad   : > { %4990 = vmatpush.xpose.msk.msra.mxu1 %vm535_vm2, %v4696_v13  ;;  %v7988_v40 = vmul.f32 %v11132_v0, %v11150_v57  ;;  %v7992_v48 = vmul.f32 %v11134_v24, %v11151_v9  ;;  %v7996_v49 = vmul.f32 %v11136_v31, %v11152_v20  ;;  %v8000_v1 = vmul.f32 %v11122_v15, %v11153_v39  ;;  %v11156_v13 = vld [vmem:[#allocation75_spill] sm:$0xff]  ;;  %v11157_v57 = vld [vmem:[#allocation76_spill] sm:$0xff]  ;;  %v11159_v12 = vld [vmem:[#allocation78_spill] sm:$0xff] }
 0x2ae   : > { %v8004_v32 = vmul.f32 %v11124_v5, %v11154_v53  ;;  %v8008_v33 = vmul.f32 %v11126_v25, %v11155_v27  ;;  %v8012_v9 = vmul.f32 %v11128_v61, %v11156_v13  ;;  %v8016_v20 = vmul.f32 %v11130_v19, %v11157_v57  ;;  %v11160_v38 = vld [vmem:[#allocation81_spill] sm:$0xff]  ;;  %v11164_v63 = vld [vmem:[#allocation90_spill] sm:$0xff]  ;;  %v11173_v26 = vld [vmem:[#allocation104_spill] sm:$0xff] }
 0x2af   : > { %v8020_v39 = vmul.f32 %v11132_v0, %v11158_v36  ;;  %v8024_v53 = vmul.f32 %v11134_v24, %v11159_v12  ;;  %v8028_v27 = vmul.f32 %v11136_v31, %v11160_v38  ;;  %v8032_v13 = vmul.f32 %v11122_v15, %v11161_v30  ;;  %v11163_v37 = vld [vmem:[#allocation89_spill] sm:$0xff] }
 0x2b0   : > { %v8036_v57 = vmul.f32 %v11124_v5, %v11162_v44  ;;  %v8040_v36 = vmul.f32 %v11126_v25, %v11163_v37  ;;  %v8044_v12 = vmul.f32 %v11128_v61, %v11164_v63  ;;  %v8048_v38 = vmul.f32 %v11130_v19, %v11165_v10  ;;  %v11171_v4 = vld [vmem:[#allocation21_spill] sm:$0xff] }
 0x2b1   : > { %v8052_v30 = vmul.f32 %v11132_v0, %v11166_v28  ;;  %v8056_v44 = vmul.f32 %v11134_v24, %v11167_v55  ;;  %v8060_v37 = vmul.f32 %v11136_v31, %v11168_v14  ;;  %v8064_v63 = vmul.f32 %v11122_v15, %v11169_v34 }
 0x2b2   : > { %v8068_v10 = vmul.f32 %v11124_v5, %v11171_v4  ;;  %v8072_v28 = vmul.f32 %v11126_v25, %v11172_v50  ;;  %v8076_v55 = vmul.f32 %v11128_v61, %v11173_v26  ;;  %v8080_v14 = vmul.f32 %v11130_v19, %v11174_v17 }
 0x2b3   : > { %11170 = vst [vmem:[#allocation134_spill] sm:$0xff] %v8064_v63  ;;  %v8084_v34 = vmul.f32 %v11132_v0, %v11175_v6  ;;  %v8088_v4 = vmul.f32 %v11134_v24, %v11177_v47  ;;  %v8092_v50 = vmul.f32 %v11136_v31, %v11179_v2  ;;  %v8096_v26 = vmul.f32 %v11122_v15, %v11181_v59  ;;  %v11185_v63 = vld [vmem:[#allocation110_spill] sm:$0xff] }
 0x2b4   : > { %v8100_v17 = vmul.f32 %v11124_v5, %v11183_v56  ;;  %v8104_v6 = vmul.f32 %v11126_v25, %v11185_v63 }
 0x2b5   : > { %11176 = vst [vmem:[#allocation135_spill] sm:$0xff] %v8084_v34  ;;  %v11187_v34 = vld [vmem:[#allocation111_spill] sm:$0xff] }
 0x2b6   : > { %11178 = vst [vmem:[#allocation112_spill] sm:$0xff] %v8088_v4  ;;  %v8108_v47 = vmul.f32 %v11128_v61, %v11187_v34  ;;  %v11189_v4 = vld [vmem:[#allocation113_spill] sm:$0xff] }
 0x2b7   : > { %11180 = vst [vmem:[#allocation95_spill] sm:$0xff] %v8092_v50  ;;  %v8112_v2 = vmul.f32 %v11130_v19, %v11189_v4  ;;  %v11191_v50 = vld [vmem:[#allocation114_spill] sm:$0xff] }
 0x2b8   : > { %11182 = vst [vmem:[#allocation96_spill] sm:$0xff] %v8096_v26  ;;  %v8116_v59 = vmul.f32 %v11132_v0, %v11191_v50  ;;  %v11193_v26 = vld [vmem:[#allocation115_spill] sm:$0xff] }
 0x2b9   : > { %11184 = vst [vmem:[#allocation97_spill] sm:$0xff] %v8100_v17  ;;  %v8120_v56 = vmul.f32 %v11134_v24, %v11193_v26  ;;  %v11195_v17 = vld [vmem:[#allocation116_spill] sm:$0xff] }
 0x2ba   : > { %11186 = vst [vmem:[#allocation98_spill] sm:$0xff] %v8104_v6  ;;  %v8124_v63 = vmul.f32 %v11136_v31, %v11195_v17  ;;  %v11197_v6 = vld [vmem:[#allocation92_spill] sm:$0xff] }
 0x2bb   : > { %11188 = vst [vmem:[#allocation99_spill] sm:$0xff] %v8108_v47  ;;  %v8128_v34 = vmul.f32 %v11122_v15, %v11197_v6  ;;  %v11198_v47 = vld [vmem:[#allocation117_spill] sm:$0xff] }
 0x2bc   : > { %11190 = vst [vmem:[#allocation100_spill] sm:$0xff] %v8112_v2  ;;  %v8132_v4 = vmul.f32 %v11124_v5, %v11198_v47  ;;  %v11199_v2 = vld [vmem:[#allocation118_spill] sm:$0xff]  ;;  %v8152_v5 = vmul.f32 %v11134_v24, %v11108_v62  ;;  %v11203_v47 = vld [vmem:[#allocation123_spill] sm:$0xff]  ;;  %v3257_v24 = vrot.slane %v7923_v58, 2  ;;  %v3259_v62 = vrot.slane %v7928_v41, 1 }
 0x2bd   : > { %11192 = vst [vmem:[#allocation101_spill] sm:$0xff] %v8116_v59  ;;  %v8136_v50 = vmul.f32 %v11126_v25, %v11199_v2  ;;  %v11200_v59 = vld [vmem:[#allocation119_spill] sm:$0xff]  ;;  %v8156_v25 = vmul.f32 %v11136_v31, %v11203_v47  ;;  %v3247_v2 = vrot.slane %v7900_v29, 7  ;;  %v3261_v31 = vrot.slane %v7937_v51, 7 }
 0x2be   : > { %11194 = vst [vmem:[#allocation102_spill] sm:$0xff] %v8120_v56  ;;  %v8140_v26 = vmul.f32 %v11128_v61, %v11200_v59  ;;  %v11201_v56 = vld [vmem:[#allocation120_spill] sm:$0xff]  ;;  %v3249_v61 = vrot.slane %v7906_v21, 6  ;;  %v3251_v59 = vrot.slane %v7910_v60, 5  ;;  %v3263_v29 = vrot.slane %v7941_v35, 6 }
 0x2bf   : > { %11196 = vst [vmem:[#allocation19_spill] sm:$0xff] %v8124_v63  ;;  %v8144_v17 = vmul.f32 %v11130_v19, %v11201_v56  ;;  %v11202_v63 = vld [vmem:[#allocation121_spill] sm:$0xff]  ;;  %v3253_v19 = vrot.slane %v7915_v11, 4  ;;  %v3255_v56 = vrot.slane %v7919_v52, 3  ;;  %v3265_v21 = vrot.slane %v7945_v23, 5 }
 0x2c0   : > { %v8148_v15 = vmul.f32 %v11132_v0, %v11202_v63  ;;  %v3248_v0 = vsel %vm640_vm3, %v3247_v2, %v7896_v42  ;;  %v3267_v60 = vrot.slane %v7950_v18, 4  ;;  %v3262_v52 = vsel %vm640_vm3, %v3261_v31, %v7932_v8 }
 0x2c1   : > { %v3250_v47 = vsel %vm643_vm4, %v3249_v61, %v3248_v0  ;;  %v3269_v42 = vrot.slane %v7954_v45, 3  ;;  %v3271_v2 = vrot.slane %v7958_v3, 2  ;;  %v3264_v41 = vsel %vm643_vm4, %v3263_v29, %v3262_v52 }
 0x2c2   : > { %v3252_v11 = vsel %vm646_vm5, %v3251_v59, %v3250_v47  ;;  %v3273_v51 = vrot.slane %v7962_v7, 1  ;;  %v3275_v35 = vrot.slane %v7970_v16, 7  ;;  %v3266_v18 = vsel %vm646_vm5, %v3265_v21, %v3264_v41 }
 0x2c3   : > { %v3254_v58 = vsel %vm649_vm6, %v3253_v19, %v3252_v11  ;;  %v3277_v59 = vrot.slane %v7975_v43, 6  ;;  %v3279_v47 = vrot.slane %v7979_v46, 5  ;;  %v3268_v45 = vsel %vm649_vm6, %v3267_v60, %v3266_v18 }
 0x2c4   : > { %v3256_v23 = vsel %vm652_vm7, %v3255_v56, %v3254_v58  ;;  %v3276_v3 = vsel %vm640_vm3, %v3275_v35, %v7966_v54  ;;  %v3281_v61 = vrot.slane %v7983_v22, 4  ;;  %v3270_v56 = vsel %vm652_vm7, %v3269_v42, %v3268_v45 }
 0x2c5   : > { %v3258_v8 = vsel %vm655_vm8, %v3257_v24, %v3256_v23  ;;  %v3278_v16 = vsel %vm643_vm4, %v3277_v59, %v3276_v3  ;;  %v3283_v43 = vrot.slane %v7988_v40, 3  ;;  %v3272_v46 = vsel %vm655_vm8, %v3271_v2, %v3270_v56  ;;  %v11204_v23 = vld [vmem:[#allocation134_spill] sm:$0xff]  ;;  %v11205_v59 = vld [vmem:[#allocation135_spill] sm:$0xff]  ;;  %v11208_v56 = vld [vmem:[#allocation97_spill] sm:$0xff] }
 0x2c6   : > { %v8191_v7 = vsel %vm658_vm9, %v3259_v62, %v3258_v8  ;;  %v3280_v19 = vsel %vm646_vm5, %v3279_v47, %v3278_v16  ;;  %v3285_v0 = vrot.slane %v7992_v48, 2  ;;  %v3287_v24 = vrot.slane %v7996_v49, 1  ;;  %v11206_v8 = vld [vmem:[#allocation112_spill] sm:$0xff]  ;;  %v11207_v3 = vld [vmem:[#allocation95_spill] sm:$0xff] }
 0x2c7   : > { %v8201_v54 = vsel %vm658_vm9, %v3273_v51, %v3272_v46  ;;  %v3282_v62 = vsel %vm649_vm6, %v3281_v61, %v3280_v19  ;;  %v3289_v22 = vrot.slane %v8004_v32, 7  ;;  %v3291_v31 = vrot.slane %v8008_v33, 6 }
 0x2c8   : > { %v3284_v29 = vsel %vm652_vm7, %v3283_v43, %v3282_v62  ;;  %v3293_v40 = vrot.slane %v8012_v9, 5  ;;  %v3295_v21 = vrot.slane %v8016_v20, 4  ;;  %v3297_v60 = vrot.slane %v8020_v39, 3  ;;  %v11209_v43 = vld [vmem:[#allocation98_spill] sm:$0xff] }
 0x2c9   : > { %v3286_v48 = vsel %vm655_vm8, %v3285_v0, %v3284_v29  ;;  %v3290_v49 = vsel %vm640_vm3, %v3289_v22, %v8000_v1  ;;  %v3299_v11 = vrot.slane %v8024_v53, 2  ;;  %v3301_v52 = vrot.slane %v8028_v27, 1  ;;  %v11211_v22 = vld [vmem:[#allocation100_spill] sm:$0xff] }
 0x2ca   : > { %v8216_v32 = vsel %vm658_vm9, %v3287_v24, %v3286_v48  ;;  %v3292_v33 = vsel %vm643_vm4, %v3291_v31, %v3290_v49  ;;  %v3303_v9 = vrot.slane %v8036_v57, 7  ;;  %v3305_v20 = vrot.slane %v8040_v36, 6  ;;  %v11210_v24 = vld [vmem:[#allocation99_spill] sm:$0xff]  ;;  %v11214_v49 = vld [vmem:[#allocation102_spill] sm:$0xff] }
 0x2cb   : > { %v3294_v39 = vsel %vm646_vm5, %v3293_v40, %v3292_v33  ;;  %v3307_v42 = vrot.slane %v8044_v12, 5  ;;  %v3309_v2 = vrot.slane %v8048_v38, 4  ;;  %v3311_v1 = vrot.slane %v8052_v30, 3  ;;  %v11212_v40 = vld [vmem:[#allocation96_spill] sm:$0xff] }
 0x2cc   : > { %v3296_v53 = vsel %vm649_vm6, %v3295_v21, %v3294_v39  ;;  %v3304_v27 = vsel %vm640_vm3, %v3303_v9, %v8032_v13  ;;  %v3313_v58 = vrot.slane %v8056_v44, 2  ;;  %v3315_v41 = vrot.slane %v8060_v37, 1  ;;  %v11215_v9 = vld [vmem:[#allocation19_spill] sm:$0xff] }
 0x2cd   : > { %v3298_v57 = vsel %vm652_vm7, %v3297_v60, %v3296_v53  ;;  %v3306_v36 = vsel %vm643_vm4, %v3305_v20, %v3304_v27  ;;  %v3317_v51 = vrot.slane %v8068_v10, 7  ;;  %v3319_v12 = vrot.slane %v8072_v28, 6  ;;  %v11213_v60 = vld [vmem:[#allocation101_spill] sm:$0xff] }
 0x2ce   : > { %v3300_v38 = vsel %vm655_vm8, %v3299_v11, %v3298_v57  ;;  %v3308_v30 = vsel %vm646_vm5, %v3307_v42, %v3306_v36  ;;  %v3321_v35 = vrot.slane %v8076_v55, 5  ;;  %v3323_v13 = vrot.slane %v8080_v14, 4 }
 0x2cf   : > { %v3302_v44 = vsel %vm658_vm9, %v3301_v52, %v3300_v38  ;;  %v3310_v37 = vsel %vm649_vm6, %v3309_v2, %v3308_v30  ;;  %v3318_v18 = vsel %vm640_vm3, %v3317_v51, %v11204_v23  ;;  %v3325_v47 = vrot.slane %v11205_v59, 3 }
 0x2d0   : > { %v3312_v10 = vsel %vm652_vm7, %v3311_v1, %v3310_v37  ;;  %v3320_v28 = vsel %vm643_vm4, %v3319_v12, %v3318_v18  ;;  %v3327_v45 = vrot.slane %v11206_v8, 2  ;;  %v3329_v61 = vrot.slane %v11207_v3, 1 }
 0x2d1   : > { %v3314_v55 = vsel %vm655_vm8, %v3313_v58, %v3312_v10  ;;  %v3322_v14 = vsel %vm646_vm5, %v3321_v35, %v3320_v28  ;;  %v3331_v16 = vrot.slane %v11208_v56, 7  ;;  %v3333_v46 = vrot.slane %v11209_v43, 6 }
 0x2d2   : > { %v3316_v19 = vsel %vm658_vm9, %v3315_v41, %v3314_v55  ;;  %v3324_v0 = vsel %vm649_vm6, %v3323_v13, %v3322_v14  ;;  %v3335_v62 = vrot.slane %v11210_v24, 5  ;;  %v3337_v31 = vrot.slane %v11211_v22, 4 }
 0x2d3   : > { %v3326_v29 = vsel %vm652_vm7, %v3325_v47, %v3324_v0  ;;  %v3332_v21 = vsel %vm640_vm3, %v3331_v16, %v11212_v40  ;;  %v3339_v48 = vrot.slane %v11213_v60, 3  ;;  %v3341_v11 = vrot.slane %v11214_v49, 2 }
 0x2d4   : > { %v3328_v52 = vsel %vm655_vm8, %v3327_v45, %v3326_v29  ;;  %v3334_v33 = vsel %vm643_vm4, %v3333_v46, %v3332_v21  ;;  %v3343_v20 = vrot.slane %v11215_v9, 1  ;;  %v3345_v39 = vrot.slane %v8132_v4, 7 }
 0x2d5   : > { %v3330_v42 = vsel %vm658_vm9, %v3329_v61, %v3328_v52  ;;  %v3336_v2 = vsel %vm646_vm5, %v3335_v62, %v3334_v33  ;;  %v3347_v1 = vrot.slane %v8136_v50, 6  ;;  %v3349_v53 = vrot.slane %v8140_v26, 5 }
 0x2d6   : > { %v3338_v27 = vsel %vm649_vm6, %v3337_v31, %v3336_v2  ;;  %v3346_v58 = vsel %vm640_vm3, %v3345_v39, %v8128_v34  ;;  %v3351_v41 = vrot.slane %v8144_v17, 4  ;;  %v3353_v57 = vrot.slane %v8148_v15, 3 }
 0x2d7   : > { %v3340_v36 = vsel %vm652_vm7, %v3339_v48, %v3338_v27  ;;  %v3348_v4 = vsel %vm643_vm4, %v3347_v1, %v3346_v58  ;;  %v3355_v51 = vrot.slane %v8152_v5, 2  ;;  %v3357_v12 = vrot.slane %v8156_v25, 1  ;;  %v11216_v58 = vld [vmem:[#allocation23_spill] sm:$0xff] }
 0x2d8   : > { %v3342_v50 = vsel %vm655_vm8, %v3341_v11, %v3340_v36  ;;  %v3350_v26 = vsel %vm646_vm5, %v3349_v53, %v3348_v4  ;;  %v3367_v38 = vsel %vm535_vm2, %v8191_v7, 0.0  ;;  %v3374_v17 = vsel %vm535_vm2, %v8201_v54, 0.0 }
 0x2d9   : > { %v3344_v34 = vsel %vm658_vm9, %v3343_v20, %v3342_v50  ;;  %v3352_v15 = vsel %vm649_vm6, %v3351_v41, %v3350_v26  ;;  %v3368_v30 = vrot.slane %v3367_v38, 4  ;;  %v3375_v35 = vrot.slane %v3374_v17, 4  ;;  %v11217_v41 = vld [vmem:[#allocation63_spill] sm:$0xff] }
 0x2da   : > { %v3354_v5 = vsel %vm652_vm7, %v3353_v57, %v3352_v15  ;;  %v3381_v25 = vsel %vm535_vm2, %v8216_v32, 0.0  ;;  %v3388_v13 = vsel %vm535_vm2, %v3302_v44, 0.0  ;;  %v3395_v37 = vsel %vm535_vm2, %v3316_v19, 0.0 }
 0x2db   : > { %v3356_v7 = vsel %vm655_vm8, %v3355_v51, %v3354_v5  ;;  %v3369_v23 = vadd.f32 %v3368_v30, %v3367_v38  ;;  %v3376_v18 = vadd.f32 %v3375_v35, %v3374_v17  ;;  %v3382_v54 = vrot.slane %v3381_v25, 4  ;;  %v11218_v17 = vld [vmem:[#allocation57_spill] sm:$0xff] }
 0x2dc   : > { %v3358_v59 = vsel %vm658_vm9, %v3357_v12, %v3356_v7  ;;  %v3389_v47 = vrot.slane %v3388_v13, 4  ;;  %v3396_v10 = vrot.slane %v3395_v37, 4  ;;  %v3402_v28 = vsel %vm535_vm2, %v3330_v42, 0.0  ;;  %v11220_v7 = vld [vmem:[#allocation56_spill] sm:$0xff] }
 0x2dd   : > { %v3370_v8 = vrot.slane %v3369_v23, 2  ;;  %v3377_v45 = vrot.slane %v3376_v18, 2  ;;  %v3383_v3 = vadd.f32 %v3382_v54, %v3381_v25  ;;  %v3403_v61 = vrot.slane %v3402_v28, 4  ;;  %v11222_v54 = vld [vmem:[#allocation14_spill] sm:$0xff] }
 0x2de   : > { %v3390_v32 = vadd.f32 %v3389_v47, %v3388_v13  ;;  %v3397_v55 = vadd.f32 %v3396_v10, %v3395_v37  ;;  %v3409_v44 = vsel %vm535_vm2, %v3344_v34, 0.0  ;;  %v3416_v14 = vsel %vm535_vm2, %v3358_v59, 0.0  ;;  %v11219_v34 = vld [vmem:[#allocation47_spill] sm:$0xff]  ;;  %v11223_v59 = vld [vmem:[#allocation20_spill] sm:$0xff] }
 0x2df   : > { %v3371_v56 = vadd.f32 %v3370_v8, %v3369_v23  ;;  %v3378_v16 = vadd.f32 %v3377_v45, %v3376_v18  ;;  %v3384_v43 = vrot.slane %v3383_v3, 2  ;;  %v3404_v46 = vadd.f32 %v3403_v61, %v3402_v28  ;;  %v11221_v23 = vld [vmem:[#allocation48_spill] sm:$0xff] }
 0x2e0   : > { %v3391_v19 = vrot.slane %v3390_v32, 2  ;;  %v3398_v0 = vrot.slane %v3397_v55, 2  ;;  %v3410_v24 = vrot.slane %v3409_v44, 4  ;;  %v3417_v62 = vrot.slane %v3416_v14, 4  ;;  %v11224_v45 = vld [vmem:[#allocation52_spill] sm:$0xff] }
 0x2e1   : > { %v3372_v22 = vrot.slane %v3371_v56, 1  ;;  %v3379_v31 = vrot.slane %v3378_v16, 1  ;;  %v3385_v29 = vadd.f32 %v3384_v43, %v3383_v3  ;;  %v3405_v40 = vrot.slane %v3404_v46, 2  ;;  %v11225_v3 = vld [vmem:[#allocation59_spill] sm:$0xff] }
 0x2e2   : > { %v3392_v21 = vadd.f32 %v3391_v19, %v3390_v32  ;;  %v3399_v60 = vadd.f32 %v3398_v0, %v3397_v55  ;;  %v3411_v48 = vadd.f32 %v3410_v24, %v3409_v44  ;;  %v3418_v49 = vadd.f32 %v3417_v62, %v3416_v14  ;;  %v11226_v55 = vld [vmem:[#allocation70_spill] sm:$0xff] }
 0x2e3   : > { %v3373_v11 = vadd.f32 %v3372_v22, %v3371_v56  ;;  %v3380_v52 = vadd.f32 %v3379_v31, %v3378_v16  ;;  %v3386_v33 = vrot.slane %v3385_v29, 1  ;;  %v3406_v9 = vadd.f32 %v3405_v40, %v3404_v46  ;;  %v11227_v44 = vld [vmem:[#allocation6_spill] sm:$0xff]  ;;  %v11230_v46 = vld [vmem:[#allocation39_spill] sm:$0xff] }
 0x2e4   : > { %v3393_v20 = vrot.slane %v3392_v21, 1  ;;  %v3400_v39 = vrot.slane %v3399_v60, 1  ;;  %v3412_v42 = vrot.slane %v3411_v48, 2  ;;  %v3419_v2 = vrot.slane %v3418_v49, 2  ;;  %v11228_v56 = vld [vmem:[#allocation26_spill] sm:$0xff] }
 0x2e5   : > { %v3387_v1 = vadd.f32 %v3386_v33, %v3385_v29  ;;  %v3407_v53 = vrot.slane %v3406_v9, 1  ;;  %v4661_v27 = vrot.slane %v3380_v52, 7  ;;  %v8297_v57 = vmul.f32 %v11217_v41, %v11216_v58  ;;  %v11229_v16 = vld [vmem:[#allocation34_spill] sm:$0xff]  ;;  %v11236_v52 = vld [vmem:[#allocation68_spill] sm:$0xff] }
 0x2e6   : > { %v3394_v36 = vadd.f32 %v3393_v20, %v3392_v21  ;;  %v3401_v4 = vadd.f32 %v3400_v39, %v3399_v60  ;;  %v3413_v51 = vadd.f32 %v3412_v42, %v3411_v48  ;;  %v3420_v12 = vadd.f32 %v3419_v2, %v3418_v49  ;;  %v11231_v19 = vld [vmem:[#allocation50_spill] sm:$0xff]  ;;  %v11235_v49 = vld [vmem:[#allocation64_spill] sm:$0xff]  ;;  %v11237_v20 = vld [vmem:[#allocation69_spill] sm:$0xff] }
 0x2e7   : > { %v3408_v50 = vadd.f32 %v3407_v53, %v3406_v9  ;;  %v4662_v26 = vsel %vm640_vm3, %v4661_v27, %v3373_v11  ;;  %v4663_v38 = vrot.slane %v3387_v1, 6  ;;  %v8302_v15 = vmul.f32 %v11219_v34, %v11218_v17  ;;  %v11232_v31 = vld [vmem:[#allocation58_spill] sm:$0xff]  ;;  %v11238_v42 = vld [vmem:[#allocation65_spill] sm:$0xff]  ;;  %v11275_v17 = vld [vmem:[#allocation108_spill] sm:$0xff] }
 0x2e8   : > { %v3414_v30 = vrot.slane %v3413_v51, 1  ;;  %v3421_v35 = vrot.slane %v3420_v12, 1  ;;  %v4665_v5 = vrot.slane %v3394_v36, 5  ;;  %v4667_v25 = vrot.slane %v3401_v4, 4  ;;  %v11233_v40 = vld [vmem:[#allocation62_spill] sm:$0xff]  ;;  %v11240_v36 = vld [vmem:[#allocation28_spill] sm:$0xff] }
 0x2e9   : > { %v4664_v13 = vsel %vm643_vm4, %v4663_v38, %v4662_v26  ;;  %v4669_v37 = vrot.slane %v3408_v50, 3  ;;  %v8307_v18 = vmul.f32 %v11221_v23, %v11220_v7  ;;  %v8311_v47 = vmul.f32 %v11223_v59, %v11222_v54  ;;  %v11234_v60 = vld [vmem:[#allocation2_spill] sm:$0xff]  ;;  %v11273_v7 = vld [vmem:[#allocation107_spill] sm:$0xff]  ;;  %v11277_v58 = vld [vmem:[#allocation72_spill] sm:$0xff] }
 0x2ea   : > { %v3415_v10 = vadd.f32 %v3414_v30, %v3413_v51  ;;  %v3422_v28 = vadd.f32 %v3421_v35, %v3420_v12  ;;  %v4666_v8 = vsel %vm646_vm5, %v4665_v5, %v4664_v13  ;;  %v8316_v61 = vmul.f32 %v11225_v3, %v11224_v45  ;;  %v11239_v1 = vld [vmem:[#allocation66_spill] sm:$0xff]  ;;  %v11241_v51 = vld [vmem:[#allocation7_spill] sm:$0xff]  ;;  %v11269_v45 = vld [vmem:[#allocation105_spill] sm:$0xff] }
 0x2eb   : > { %v4668_v32 = vsel %vm649_vm6, %v4667_v25, %v4666_v8  ;;  %v8321_v14 = vmul.f32 %v11227_v44, %v11226_v55  ;;  %v8325_v43 = vmul.f32 %v11229_v16, %v11228_v56  ;;  %v8329_v0 = vmul.f32 %v11231_v19, %v11230_v46  ;;  %v11242_v50 = vld [vmem:[#allocation42_spill] sm:$0xff]  ;;  %v11245_v25 = vld [vmem:[#allocation60_spill] sm:$0xff]  ;;  %v11266_v46 = vld [vmem:[#allocation21_spill] sm:$0xff] }
 0x2ec   : > { %v4670_v24 = vsel %vm652_vm7, %v4669_v37, %v4668_v32  ;;  %v4671_v62 = vrot.slane %v3415_v10, 2  ;;  %v4673_v22 = vrot.slane %v3422_v28, 1  ;;  %v8334_v29 = vmul.f32 %v11217_v41, %v11232_v31  ;;  %v11243_v38 = vld [vmem:[#allocation10_spill] sm:$0xff]  ;;  %v11246_v37 = vld [vmem:[#allocation4_spill] sm:$0xff]  ;;  %v11247_v28 = vld [vmem:[#allocation71_spill] sm:$0xff] }
 0x2ed   : > { %v8338_v21 = vmul.f32 %v11219_v34, %v11233_v40  ;;  %v8342_v48 = vmul.f32 %v11221_v23, %v11234_v60  ;;  %v8346_v11 = vmul.f32 %v11223_v59, %v11235_v49  ;;  %v8350_v33 = vmul.f32 %v11225_v3, %v11236_v52  ;;  %v11244_v35 = vld [vmem:[#allocation46_spill] sm:$0xff]  ;;  %v11260_v52 = vld [vmem:[#allocation91_spill] sm:$0xff]  ;;  %v11261_v49 = vld [vmem:[#allocation93_spill] sm:$0xff] }
 0x2ee   : > { %v4672_v9 = vsel %vm655_vm8, %v4671_v62, %v4670_v24  ;;  %v8355_v39 = vmul.f32 %v11227_v44, %v11237_v20  ;;  %v8359_v2 = vmul.f32 %v11229_v16, %v11238_v42  ;;  %v8363_v53 = vmul.f32 %v11231_v19, %v11239_v1  ;;  %v11248_v32 = vld [vmem:[#allocation54_spill] sm:$0xff]  ;;  %v11249_v62 = vld [vmem:[#allocation73_spill] sm:$0xff]  ;;  %v11263_v40 = vld [vmem:[#allocation67_spill] sm:$0xff] }
 0x2ef   : > { %v4674_v27 = vsel %vm658_vm9, %v4673_v22, %v4672_v9  ;;  %v8368_v4 = vmul.f32 %v11217_v41, %v11240_v36  ;;  %v8372_v12 = vmul.f32 %v11219_v34, %v11241_v51  ;;  %v8376_v26 = vmul.f32 %v11221_v23, %v11242_v50  ;;  %v11250_v9 = vld [vmem:[#allocation74_spill] sm:$0xff]  ;;  %v11255_v51 = vld [vmem:[#allocation81_spill] sm:$0xff]  ;;  %v11264_v31 = vld [vmem:[#allocation8_spill] sm:$0xff] }
 0x2f0   : > { %4991 = vmatpush.xpose.msk.msra.mxu1 %vm535_vm2, %v4674_v27  ;;  %v8381_v30 = vmul.f32 %v11223_v59, %v11243_v38  ;;  %v8385_v5 = vmul.f32 %v11225_v3, %v11244_v35  ;;  %v8389_v13 = vmul.f32 %v11227_v44, %v11245_v25  ;;  %v8393_v10 = vmul.f32 %v11229_v16, %v11246_v37  ;;  %v11251_v25 = vld [vmem:[#allocation75_spill] sm:$0xff]  ;;  %v11252_v35 = vld [vmem:[#allocation76_spill] sm:$0xff]  ;;  %v11253_v38 = vld [vmem:[#allocation77_spill] sm:$0xff] }
 0x2f1   : > { %v8397_v8 = vmul.f32 %v11231_v19, %v11247_v28  ;;  %v8401_v24 = vmul.f32 %v11217_v41, %v11248_v32  ;;  %v8405_v22 = vmul.f32 %v11219_v34, %v11249_v62  ;;  %v8409_v27 = vmul.f32 %v11221_v23, %v11250_v9  ;;  %v11254_v50 = vld [vmem:[#allocation78_spill] sm:$0xff]  ;;  %v11256_v36 = vld [vmem:[#allocation49_spill] sm:$0xff]  ;;  %v11267_v56 = vld [vmem:[#allocation103_spill] sm:$0xff] }
 0x2f2   : > { %v8413_v37 = vmul.f32 %v11223_v59, %v11251_v25  ;;  %v8417_v28 = vmul.f32 %v11225_v3, %v11252_v35  ;;  %v8421_v32 = vmul.f32 %v11227_v44, %v11253_v38  ;;  %v8425_v62 = vmul.f32 %v11229_v16, %v11254_v50  ;;  %v11257_v1 = vld [vmem:[#allocation82_spill] sm:$0xff]  ;;  %v11258_v42 = vld [vmem:[#allocation89_spill] sm:$0xff]  ;;  %v11268_v55 = vld [vmem:[#allocation104_spill] sm:$0xff] }
 0x2f3   : > { %v8429_v9 = vmul.f32 %v11231_v19, %v11255_v51  ;;  %v8433_v25 = vmul.f32 %v11217_v41, %v11256_v36  ;;  %v8437_v35 = vmul.f32 %v11219_v34, %v11257_v1  ;;  %v8441_v38 = vmul.f32 %v11221_v23, %v11258_v42  ;;  %v11259_v20 = vld [vmem:[#allocation90_spill] sm:$0xff] }
 0x2f4   : > { %v8445_v50 = vmul.f32 %v11223_v59, %v11259_v20  ;;  %v8449_v51 = vmul.f32 %v11225_v3, %v11260_v52  ;;  %v8453_v36 = vmul.f32 %v11227_v44, %v11261_v49  ;;  %v11262_v60 = vld [vmem:[#allocation94_spill] sm:$0xff]  ;;  %v8461_v42 = vmul.f32 %v11231_v19, %v11263_v40 }
 0x2f5   : > { %v8457_v1 = vmul.f32 %v11229_v16, %v11262_v60  ;;  %v8465_v20 = vmul.f32 %v11217_v41, %v11264_v31  ;;  %v8469_v52 = vmul.f32 %v11219_v34, %v11266_v46  ;;  %v8473_v49 = vmul.f32 %v11221_v23, %v11267_v56  ;;  %v11271_v54 = vld [vmem:[#allocation106_spill] sm:$0xff] }
 0x2f6   : > { %v8477_v60 = vmul.f32 %v11223_v59, %v11268_v55  ;;  %v8481_v40 = vmul.f32 %v11225_v3, %v11269_v45  ;;  %v8485_v31 = vmul.f32 %v11227_v44, %v11271_v54  ;;  %v8489_v46 = vmul.f32 %v11229_v16, %v11273_v7 }
 0x2f7   : > { %11265 = vst [vmem:[#allocation124_spill] sm:$0xff] %v8465_v20  ;;  %v8493_v56 = vmul.f32 %v11231_v19, %v11275_v17  ;;  %v8497_v55 = vmul.f32 %v11217_v41, %v11277_v58  ;;  %v11279_v20 = vld [vmem:[#allocation109_spill] sm:$0xff] }
 0x2f8   : > { %11270 = vst [vmem:[#allocation125_spill] sm:$0xff] %v8481_v40  ;;  %v8501_v45 = vmul.f32 %v11219_v34, %v11279_v20  ;;  %v11281_v40 = vld [vmem:[#allocation110_spill] sm:$0xff] }
 0x2f9   : > { %11272 = vst [vmem:[#allocation126_spill] sm:$0xff] %v8485_v31  ;;  %v8505_v54 = vmul.f32 %v11221_v23, %v11281_v40  ;;  %v11282_v31 = vld [vmem:[#allocation111_spill] sm:$0xff] }
 0x2fa   : > { %11274 = vst [vmem:[#allocation127_spill] sm:$0xff] %v8489_v46  ;;  %v8509_v7 = vmul.f32 %v11223_v59, %v11282_v31  ;;  %v11284_v46 = vld [vmem:[#allocation113_spill] sm:$0xff]  ;;  %v8529_v31 = vmul.f32 %v11217_v41, %v11197_v6  ;;  %v8549_v41 = vmul.f32 %v11227_v44, %v11202_v63  ;;  %v11295_v6 = vld [vmem:[#allocation122_spill] sm:$0xff]  ;;  %v2799_v63 = vrot.slane %v8329_v0, 1 }
 0x2fb   : > { %11276 = vst [vmem:[#allocation130_spill] sm:$0xff] %v8493_v56  ;;  %v8513_v17 = vmul.f32 %v11225_v3, %v11284_v46  ;;  %v11286_v56 = vld [vmem:[#allocation114_spill] sm:$0xff] }
 0x2fc   : > { %11278 = vst [vmem:[#allocation129_spill] sm:$0xff] %v8497_v55  ;;  %v8517_v58 = vmul.f32 %v11227_v44, %v11286_v56  ;;  %v11288_v55 = vld [vmem:[#allocation115_spill] sm:$0xff]  ;;  %v2797_v44 = vrot.slane %v8325_v43, 2 }
 0x2fd   : > { %11280 = vst [vmem:[#allocation128_spill] sm:$0xff] %v8501_v45  ;;  %v8521_v20 = vmul.f32 %v11229_v16, %v11288_v55  ;;  %v11290_v45 = vld [vmem:[#allocation116_spill] sm:$0xff] }
 0x2fe   : > { %11283 = vst [vmem:[#allocation131_spill] sm:$0xff] %v8509_v7  ;;  %v8525_v40 = vmul.f32 %v11231_v19, %v11290_v45  ;;  %v11291_v7 = vld [vmem:[#allocation117_spill] sm:$0xff] }
 0x2ff   : > { %11285 = vst [vmem:[#allocation132_spill] sm:$0xff] %v8513_v17  ;;  %v8533_v46 = vmul.f32 %v11219_v34, %v11291_v7  ;;  %v11292_v17 = vld [vmem:[#allocation118_spill] sm:$0xff]  ;;  %v8553_v34 = vmul.f32 %v11229_v16, %v11295_v6  ;;  %v11296_v7 = vld [vmem:[#allocation123_spill] sm:$0xff] }
 0x300   : > { %11287 = vst [vmem:[#allocation133_spill] sm:$0xff] %v8517_v58  ;;  %v8537_v56 = vmul.f32 %v11221_v23, %v11292_v17  ;;  %v11293_v58 = vld [vmem:[#allocation119_spill] sm:$0xff]  ;;  %v8557_v23 = vmul.f32 %v11231_v19, %v11296_v7  ;;  %v2787_v17 = vrot.slane %v8302_v15, 7  ;;  %v2801_v19 = vrot.slane %v8338_v21, 7 }
 0x301   : > { %11289 = vst [vmem:[#allocation79_spill] sm:$0xff] %v8521_v20  ;;  %v8541_v55 = vmul.f32 %v11223_v59, %v11293_v58  ;;  %v11294_v20 = vld [vmem:[#allocation120_spill] sm:$0xff]  ;;  %v2789_v59 = vrot.slane %v8307_v18, 6  ;;  %v2791_v58 = vrot.slane %v8311_v47, 5  ;;  %v2803_v7 = vrot.slane %v8342_v48, 6 }
 0x302   : > { %v8545_v45 = vmul.f32 %v11225_v3, %v11294_v20  ;;  %v2793_v3 = vrot.slane %v8316_v61, 4  ;;  %v2795_v20 = vrot.slane %v8321_v14, 3  ;;  %v2788_v16 = vsel %vm640_vm3, %v2787_v17, %v8297_v57 }
 0x303   : > { %v2805_v15 = vrot.slane %v8346_v11, 5  ;;  %v2790_v18 = vsel %vm643_vm4, %v2789_v59, %v2788_v16  ;;  %v2807_v47 = vrot.slane %v8350_v33, 4  ;;  %v2809_v61 = vrot.slane %v8355_v39, 3 }
 0x304   : > { %v2811_v14 = vrot.slane %v8359_v2, 2  ;;  %v2792_v43 = vsel %vm646_vm5, %v2791_v58, %v2790_v18  ;;  %v2802_v0 = vsel %vm640_vm3, %v2801_v19, %v8334_v29  ;;  %v2813_v57 = vrot.slane %v8363_v53, 1 }
 0x305   : > { %v2815_v17 = vrot.slane %v8372_v12, 7  ;;  %v2794_v21 = vsel %vm649_vm6, %v2793_v3, %v2792_v43  ;;  %v2804_v48 = vsel %vm643_vm4, %v2803_v7, %v2802_v0  ;;  %v2817_v11 = vrot.slane %v8376_v26, 6 }
 0x306   : > { %v2819_v33 = vrot.slane %v8381_v30, 5  ;;  %v2796_v39 = vsel %vm652_vm7, %v2795_v20, %v2794_v21  ;;  %v2806_v2 = vsel %vm646_vm5, %v2805_v15, %v2804_v48  ;;  %v2821_v29 = vrot.slane %v8385_v5, 4 }
 0x307   : > { %v2816_v58 = vsel %vm640_vm3, %v2815_v17, %v8368_v4  ;;  %v2798_v53 = vsel %vm655_vm8, %v2797_v44, %v2796_v39  ;;  %v2808_v12 = vsel %vm649_vm6, %v2807_v47, %v2806_v2  ;;  %v2823_v7 = vrot.slane %v8389_v13, 3  ;;  %v11299_v2 = vld [vmem:[#allocation126_spill] sm:$0xff] }
 0x308   : > { %v2818_v59 = vsel %vm643_vm4, %v2817_v11, %v2816_v58  ;;  %v8594_v26 = vsel %vm658_vm9, %v2799_v63, %v2798_v53  ;;  %v2810_v20 = vsel %vm652_vm7, %v2809_v61, %v2808_v12  ;;  %v2825_v3 = vrot.slane %v8393_v10, 2  ;;  %v11297_v11 = vld [vmem:[#allocation124_spill] sm:$0xff]  ;;  %v11301_v12 = vld [vmem:[#allocation130_spill] sm:$0xff] }
 0x309   : > { %v2820_v30 = vsel %vm646_vm5, %v2819_v33, %v2818_v59  ;;  %v2812_v4 = vsel %vm655_vm8, %v2811_v14, %v2810_v20  ;;  %v2827_v44 = vrot.slane %v8397_v8, 1  ;;  %v2829_v16 = vrot.slane %v8405_v22, 7 }
 0x30a   : > { %v2822_v5 = vsel %vm649_vm6, %v2821_v29, %v2820_v30  ;;  %v8604_v19 = vsel %vm658_vm9, %v2813_v57, %v2812_v4  ;;  %v2831_v13 = vrot.slane %v8409_v27, 6  ;;  %v2833_v15 = vrot.slane %v8413_v37, 5  ;;  %v11300_v29 = vld [vmem:[#allocation127_spill] sm:$0xff] }
 0x30b   : > { %v2824_v63 = vsel %vm652_vm7, %v2823_v7, %v2822_v5  ;;  %v2830_v10 = vsel %vm640_vm3, %v2829_v16, %v8401_v24  ;;  %v2835_v47 = vrot.slane %v8417_v28, 4  ;;  %v2837_v8 = vrot.slane %v8421_v32, 3  ;;  %v11302_v7 = vld [vmem:[#allocation128_spill] sm:$0xff]  ;;  %v11303_v5 = vld [vmem:[#allocation131_spill] sm:$0xff] }
 0x30c   : > { %v2826_v18 = vsel %vm655_vm8, %v2825_v3, %v2824_v63  ;;  %v2832_v61 = vsel %vm643_vm4, %v2831_v13, %v2830_v10  ;;  %v2839_v14 = vrot.slane %v8425_v62, 2  ;;  %v2841_v27 = vrot.slane %v8429_v9, 1  ;;  %v11304_v13 = vld [vmem:[#allocation129_spill] sm:$0xff] }
 0x30d   : > { %v8615_v22 = vsel %vm658_vm9, %v2827_v44, %v2826_v18  ;;  %v2834_v37 = vsel %vm646_vm5, %v2833_v15, %v2832_v61  ;;  %v2843_v43 = vrot.slane %v8437_v35, 7  ;;  %v2845_v0 = vrot.slane %v8441_v38, 6  ;;  %v11305_v18 = vld [vmem:[#allocation132_spill] sm:$0xff]  ;;  %v11306_v61 = vld [vmem:[#allocation133_spill] sm:$0xff] }
 0x30e   : > { %v2847_v24 = vrot.slane %v8445_v50, 5  ;;  %v2836_v28 = vsel %vm649_vm6, %v2835_v47, %v2834_v37  ;;  %v2849_v32 = vrot.slane %v8449_v51, 4  ;;  %v2851_v57 = vrot.slane %v8453_v36, 3 }
 0x30f   : > { %v2853_v17 = vrot.slane %v8457_v1, 2  ;;  %v2838_v62 = vsel %vm652_vm7, %v2837_v8, %v2836_v28  ;;  %v2844_v9 = vsel %vm640_vm3, %v2843_v43, %v8433_v25  ;;  %v2855_v21 = vrot.slane %v8461_v42, 1  ;;  %v11298_v25 = vld [vmem:[#allocation125_spill] sm:$0xff] }
 0x310   : > { %v2857_v35 = vrot.slane %v8469_v52, 7  ;;  %v2840_v38 = vsel %vm655_vm8, %v2839_v14, %v2838_v62  ;;  %v2846_v50 = vsel %vm643_vm4, %v2845_v0, %v2844_v9  ;;  %v2859_v48 = vrot.slane %v8473_v49, 6 }
 0x311   : > { %v2861_v51 = vrot.slane %v8477_v60, 5  ;;  %v2842_v36 = vsel %vm658_vm9, %v2841_v27, %v2840_v38  ;;  %v2848_v1 = vsel %vm646_vm5, %v2847_v24, %v2846_v50  ;;  %v2863_v39 = vrot.slane %v11298_v25, 4  ;;  %v11307_v27 = vld [vmem:[#allocation79_spill] sm:$0xff] }
 0x312   : > { %v2858_v33 = vsel %vm640_vm3, %v2857_v35, %v11297_v11  ;;  %v2850_v42 = vsel %vm649_vm6, %v2849_v32, %v2848_v1  ;;  %v2865_v58 = vrot.slane %v11299_v2, 3  ;;  %v2867_v53 = vrot.slane %v11300_v29, 2 }
 0x313   : > { %v2860_v52 = vsel %vm643_vm4, %v2859_v48, %v2858_v33  ;;  %v2852_v49 = vsel %vm652_vm7, %v2851_v57, %v2850_v42  ;;  %v2869_v59 = vrot.slane %v11301_v12, 1  ;;  %v2871_v20 = vrot.slane %v11302_v7, 7 }
 0x314   : > { %v2862_v60 = vsel %vm646_vm5, %v2861_v51, %v2860_v52  ;;  %v2854_v30 = vsel %vm655_vm8, %v2853_v17, %v2852_v49  ;;  %v2873_v4 = vrot.slane %v8505_v54, 6  ;;  %v2875_v44 = vrot.slane %v11303_v5, 5 }
 0x315   : > { %v2864_v3 = vsel %vm649_vm6, %v2863_v39, %v2862_v60  ;;  %v2856_v16 = vsel %vm658_vm9, %v2855_v21, %v2854_v30  ;;  %v2872_v15 = vsel %vm640_vm3, %v2871_v20, %v11304_v13  ;;  %v2877_v10 = vrot.slane %v11305_v18, 4 }
 0x316   : > { %v2866_v63 = vsel %vm652_vm7, %v2865_v58, %v2864_v3  ;;  %v2874_v8 = vsel %vm643_vm4, %v2873_v4, %v2872_v15  ;;  %v2879_v14 = vrot.slane %v11306_v61, 3  ;;  %v2881_v37 = vrot.slane %v11307_v27, 2 }
 0x317   : > { %v2868_v47 = vsel %vm655_vm8, %v2867_v53, %v2866_v63  ;;  %v2876_v43 = vsel %vm646_vm5, %v2875_v44, %v2874_v8  ;;  %v2883_v0 = vrot.slane %v8525_v40, 1  ;;  %v2885_v24 = vrot.slane %v8533_v46, 7 }
 0x318   : > { %v2870_v54 = vsel %vm658_vm9, %v2869_v59, %v2868_v47  ;;  %v2878_v28 = vsel %vm649_vm6, %v2877_v10, %v2876_v43  ;;  %v2887_v32 = vrot.slane %v8537_v56, 6  ;;  %v2889_v57 = vrot.slane %v8541_v55, 5 }
 0x319   : > { %v2891_v17 = vrot.slane %v8545_v45, 4  ;;  %v2880_v62 = vsel %vm652_vm7, %v2879_v14, %v2878_v28  ;;  %v2886_v9 = vsel %vm640_vm3, %v2885_v24, %v8529_v31  ;;  %v2893_v21 = vrot.slane %v8549_v41, 3  ;;  %v11308_v28 = vld [vmem:[#allocation23_spill] sm:$0xff] }
 0x31a   : > { %v2895_v35 = vrot.slane %v8553_v34, 2  ;;  %v2882_v40 = vsel %vm655_vm8, %v2881_v37, %v2880_v62  ;;  %v2888_v46 = vsel %vm643_vm4, %v2887_v32, %v2886_v9  ;;  %v2897_v38 = vrot.slane %v8557_v23, 1  ;;  %v11309_v32 = vld [vmem:[#allocation37_spill] sm:$0xff] }
 0x31b   : > { %v2907_v55 = vsel %vm535_vm2, %v8594_v26, 0.0  ;;  %v2884_v45 = vsel %vm658_vm9, %v2883_v0, %v2882_v40  ;;  %v2890_v56 = vsel %vm646_vm5, %v2889_v57, %v2888_v46  ;;  %v2914_v31 = vsel %vm535_vm2, %v8604_v19, 0.0 }
 0x31c   : > { %v2908_v50 = vrot.slane %v2907_v55, 4  ;;  %v2892_v41 = vsel %vm649_vm6, %v2891_v17, %v2890_v56  ;;  %v2915_v34 = vrot.slane %v2914_v31, 4  ;;  %v2921_v48 = vsel %vm535_vm2, %v8615_v22, 0.0 }
 0x31d   : > { %v2928_v51 = vsel %vm535_vm2, %v2842_v36, 0.0  ;;  %v2894_v23 = vsel %vm652_vm7, %v2893_v21, %v2892_v41  ;;  %v2922_v26 = vrot.slane %v2921_v48, 4  ;;  %v2935_v39 = vsel %vm535_vm2, %v2856_v16, 0.0 }
 0x31e   : > { %v2909_v1 = vadd.f32 %v2908_v50, %v2907_v55  ;;  %v2929_v11 = vrot.slane %v2928_v51, 4  ;;  %v2896_v33 = vsel %vm655_vm8, %v2895_v35, %v2894_v23  ;;  %v2916_v25 = vadd.f32 %v2915_v34, %v2914_v31  ;;  %v11311_v55 = vld [vmem:[#allocation61_spill] sm:$0xff]  ;;  %v11313_v23 = vld [vmem:[#allocation31_spill] sm:$0xff] }
 0x31f   : > { %v2942_v19 = vsel %vm535_vm2, %v2870_v54, 0.0  ;;  %v2898_v42 = vsel %vm658_vm9, %v2897_v38, %v2896_v33  ;;  %v2923_v2 = vadd.f32 %v2922_v26, %v2921_v48  ;;  %v2936_v29 = vrot.slane %v2935_v39, 4  ;;  %v11310_v38 = vld [vmem:[#allocation57_spill] sm:$0xff]  ;;  %v11314_v26 = vld [vmem:[#allocation14_spill] sm:$0xff] }
 0x320   : > { %v2910_v52 = vrot.slane %v2909_v1, 2  ;;  %v2930_v58 = vadd.f32 %v2929_v11, %v2928_v51  ;;  %v2917_v22 = vrot.slane %v2916_v25, 2  ;;  %v2943_v36 = vrot.slane %v2942_v19, 4  ;;  %v11312_v51 = vld [vmem:[#allocation56_spill] sm:$0xff]  ;;  %v11315_v11 = vld [vmem:[#allocation33_spill] sm:$0xff] }
 0x321   : > { %v2949_v53 = vsel %vm535_vm2, %v2884_v45, 0.0  ;;  %v2924_v60 = vrot.slane %v2923_v2, 2  ;;  %v2937_v20 = vadd.f32 %v2936_v29, %v2935_v39  ;;  %v2956_v3 = vsel %vm535_vm2, %v2898_v42, 0.0  ;;  %v11318_v29 = vld [vmem:[#allocation70_spill] sm:$0xff] }
 0x322   : > { %v2911_v49 = vadd.f32 %v2910_v52, %v2909_v1  ;;  %v2931_v12 = vrot.slane %v2930_v58, 2  ;;  %v2950_v59 = vrot.slane %v2949_v53, 4  ;;  %v2918_v7 = vadd.f32 %v2917_v22, %v2916_v25 }
 0x323   : > { %v2944_v30 = vadd.f32 %v2943_v36, %v2942_v19  ;;  %v2925_v5 = vadd.f32 %v2924_v60, %v2923_v2  ;;  %v2938_v13 = vrot.slane %v2937_v20, 2  ;;  %v2957_v18 = vrot.slane %v2956_v3, 4  ;;  %v11316_v2 = vld [vmem:[#allocation52_spill] sm:$0xff]  ;;  %v11319_v36 = vld [vmem:[#allocation53_spill] sm:$0xff] }
 0x324   : > { %v2912_v4 = vrot.slane %v2911_v49, 1  ;;  %v2932_v44 = vadd.f32 %v2931_v12, %v2930_v58  ;;  %v2951_v16 = vadd.f32 %v2950_v59, %v2949_v53  ;;  %v2919_v63 = vrot.slane %v2918_v7, 1  ;;  %v11317_v58 = vld [vmem:[#allocation44_spill] sm:$0xff] }
 0x325   : > { %v2945_v15 = vrot.slane %v2944_v30, 2  ;;  %v2926_v47 = vrot.slane %v2925_v5, 1  ;;  %v2939_v27 = vadd.f32 %v2938_v13, %v2937_v20  ;;  %v2958_v54 = vadd.f32 %v2957_v18, %v2956_v3  ;;  %v11321_v60 = vld [vmem:[#allocation36_spill] sm:$0xff]  ;;  %v11322_v20 = vld [vmem:[#allocation39_spill] sm:$0xff]  ;;  %v11326_v13 = vld [vmem:[#allocation2_spill] sm:$0xff] }
 0x326   : > { %v2913_v10 = vadd.f32 %v2912_v4, %v2911_v49  ;;  %v2933_v8 = vrot.slane %v2932_v44, 1  ;;  %v2952_v61 = vrot.slane %v2951_v16, 2  ;;  %v2920_v14 = vadd.f32 %v2919_v63, %v2918_v7  ;;  %v11320_v49 = vld [vmem:[#allocation26_spill] sm:$0xff]  ;;  %v11327_v18 = vld [vmem:[#allocation64_spill] sm:$0xff] }
 0x327   : > { %v2946_v37 = vadd.f32 %v2945_v15, %v2944_v30  ;;  %v2927_v43 = vadd.f32 %v2926_v47, %v2925_v5  ;;  %v8698_v57 = vmul.f32 %v11309_v32, %v11308_v28  ;;  %v2940_v17 = vrot.slane %v2939_v27, 1  ;;  %v11323_v30 = vld [vmem:[#allocation45_spill] sm:$0xff]  ;;  %v11324_v4 = vld [vmem:[#allocation58_spill] sm:$0xff] }
 0x328   : > { %v2934_v0 = vadd.f32 %v2933_v8, %v2932_v44  ;;  %v2953_v24 = vadd.f32 %v2952_v61, %v2951_v16  ;;  %v2959_v9 = vrot.slane %v2958_v54, 2  ;;  %v4639_v21 = vrot.slane %v2920_v14, 7  ;;  %v11325_v16 = vld [vmem:[#allocation62_spill] sm:$0xff]  ;;  %v11328_v61 = vld [vmem:[#allocation68_spill] sm:$0xff]  ;;  %v11370_v28 = vld [vmem:[#allocation109_spill] sm:$0xff] }
 0x329   : > { %v2947_v62 = vrot.slane %v2946_v37, 1  ;;  %v4641_v40 = vrot.slane %v2927_v43, 6  ;;  %v8702_v45 = vmul.f32 %v11311_v55, %v11310_v38  ;;  %v2941_v56 = vadd.f32 %v2940_v17, %v2939_v27  ;;  %v11329_v27 = vld [vmem:[#allocation69_spill] sm:$0xff]  ;;  %v11332_v17 = vld [vmem:[#allocation28_spill] sm:$0xff] }
 0x32a   : > { %v2954_v35 = vrot.slane %v2953_v24, 1  ;;  %v4643_v46 = vrot.slane %v2934_v0, 5  ;;  %v2960_v31 = vadd.f32 %v2959_v9, %v2958_v54  ;;  %v4640_v41 = vsel %vm640_vm3, %v4639_v21, %v2913_v10  ;;  %v11330_v54 = vld [vmem:[#allocation65_spill] sm:$0xff]  ;;  %v11331_v0 = vld [vmem:[#allocation66_spill] sm:$0xff]  ;;  %v11333_v9 = vld [vmem:[#allocation7_spill] sm:$0xff] }
 0x32b   : > { %v2948_v50 = vadd.f32 %v2947_v62, %v2946_v37  ;;  %v4642_v48 = vsel %vm643_vm4, %v4641_v40, %v4640_v41  ;;  %v8708_v1 = vmul.f32 %v11313_v23, %v11312_v51  ;;  %v8712_v33 = vmul.f32 %v11315_v11, %v11314_v26  ;;  %v11334_v40 = vld [vmem:[#allocation42_spill] sm:$0xff]  ;;  %v11364_v26 = vld [vmem:[#allocation107_spill] sm:$0xff]  ;;  %v11366_v51 = vld [vmem:[#allocation108_spill] sm:$0xff] }
 0x32c   : > { %v2955_v34 = vadd.f32 %v2954_v35, %v2953_v24  ;;  %v2961_v25 = vrot.slane %v2960_v31, 1  ;;  %v4644_v39 = vsel %vm646_vm5, %v4643_v46, %v4642_v48  ;;  %v4645_v19 = vrot.slane %v2941_v56, 4  ;;  %v11335_v56 = vld [vmem:[#allocation10_spill] sm:$0xff]  ;;  %v11368_v38 = vld [vmem:[#allocation72_spill] sm:$0xff] }
 0x32d   : > { %v4647_v42 = vrot.slane %v2948_v50, 3  ;;  %v8717_v22 = vmul.f32 %v11317_v58, %v11316_v2  ;;  %v8721_v53 = vmul.f32 %v11319_v36, %v11318_v29  ;;  %v8725_v12 = vmul.f32 %v11321_v60, %v11320_v49  ;;  %v11360_v49 = vld [vmem:[#allocation104_spill] sm:$0xff]  ;;  %v11361_v29 = vld [vmem:[#allocation105_spill] sm:$0xff]  ;;  %v11362_v2 = vld [vmem:[#allocation106_spill] sm:$0xff] }
 0x32e   : > { %v4649_v52 = vrot.slane %v2955_v34, 2  ;;  %v2962_v59 = vadd.f32 %v2961_v25, %v2960_v31  ;;  %v4646_v7 = vsel %vm649_vm6, %v4645_v19, %v4644_v39  ;;  %v8730_v3 = vmul.f32 %v11323_v30, %v11322_v20  ;;  %v11336_v31 = vld [vmem:[#allocation46_spill] sm:$0xff]  ;;  %v11337_v34 = vld [vmem:[#allocation60_spill] sm:$0xff]  ;;  %v11339_v19 = vld [vmem:[#allocation71_spill] sm:$0xff] }
 0x32f   : > { %v8734_v5 = vmul.f32 %v11309_v32, %v11324_v4  ;;  %v4648_v44 = vsel %vm652_vm7, %v4647_v42, %v4646_v7  ;;  %v8739_v63 = vmul.f32 %v11311_v55, %v11325_v16  ;;  %v8743_v15 = vmul.f32 %v11313_v23, %v11326_v13  ;;  %v11338_v25 = vld [vmem:[#allocation4_spill] sm:$0xff]  ;;  %v11341_v7 = vld [vmem:[#allocation73_spill] sm:$0xff]  ;;  %v11355_v13 = vld [vmem:[#allocation67_spill] sm:$0xff] }
 0x330   : > { %v8747_v10 = vmul.f32 %v11315_v11, %v11327_v18  ;;  %v4650_v47 = vsel %vm655_vm8, %v4649_v52, %v4648_v44  ;;  %v4651_v8 = vrot.slane %v2962_v59, 1  ;;  %v8752_v14 = vmul.f32 %v11317_v58, %v11328_v61  ;;  %v11340_v52 = vld [vmem:[#allocation54_spill] sm:$0xff]  ;;  %v11353_v61 = vld [vmem:[#allocation93_spill] sm:$0xff]  ;;  %v11356_v16 = vld [vmem:[#allocation8_spill] sm:$0xff] }
 0x331   : > { %v8756_v37 = vmul.f32 %v11319_v36, %v11329_v27  ;;  %v8760_v43 = vmul.f32 %v11321_v60, %v11330_v54  ;;  %v8764_v24 = vmul.f32 %v11323_v30, %v11331_v0  ;;  %v8768_v62 = vmul.f32 %v11309_v32, %v11332_v17  ;;  %v11349_v17 = vld [vmem:[#allocation82_spill] sm:$0xff]  ;;  %v11350_v0 = vld [vmem:[#allocation89_spill] sm:$0xff]  ;;  %v11352_v27 = vld [vmem:[#allocation91_spill] sm:$0xff] }
 0x332   : > { %v8772_v21 = vmul.f32 %v11311_v55, %v11333_v9  ;;  %v4652_v35 = vsel %vm658_vm9, %v4651_v8, %v4650_v47  ;;  %v8777_v46 = vmul.f32 %v11313_v23, %v11334_v40  ;;  %v8781_v50 = vmul.f32 %v11315_v11, %v11335_v56  ;;  %v11342_v47 = vld [vmem:[#allocation74_spill] sm:$0xff]  ;;  %v11347_v40 = vld [vmem:[#allocation81_spill] sm:$0xff]  ;;  %v11359_v20 = vld [vmem:[#allocation103_spill] sm:$0xff] }
 0x333   : > { %v8785_v41 = vmul.f32 %v11317_v58, %v11336_v31  ;;  %4992 = vmatpush.xpose.msk.msra.mxu1 %vm535_vm2, %v4652_v35  ;;  %v8790_v48 = vmul.f32 %v11319_v36, %v11337_v34  ;;  %v8794_v39 = vmul.f32 %v11321_v60, %v11338_v25  ;;  %v8798_v42 = vmul.f32 %v11323_v30, %v11339_v19  ;;  %v11343_v35 = vld [vmem:[#allocation75_spill] sm:$0xff]  ;;  %v11344_v34 = vld [vmem:[#allocation76_spill] sm:$0xff]  ;;  %v11345_v31 = vld [vmem:[#allocation77_spill] sm:$0xff] }
 0x334   : > { %v8802_v59 = vmul.f32 %v11309_v32, %v11340_v52  ;;  %v8806_v44 = vmul.f32 %v11311_v55, %v11341_v7  ;;  %v8810_v8 = vmul.f32 %v11313_v23, %v11342_v47  ;;  %v8814_v25 = vmul.f32 %v11315_v11, %v11343_v35  ;;  %v11346_v56 = vld [vmem:[#allocation78_spill] sm:$0xff]  ;;  %v11348_v9 = vld [vmem:[#allocation49_spill] sm:$0xff] }
 0x335   : > { %v8818_v19 = vmul.f32 %v11317_v58, %v11344_v34  ;;  %v8822_v52 = vmul.f32 %v11319_v36, %v11345_v31  ;;  %v8826_v7 = vmul.f32 %v11321_v60, %v11346_v56  ;;  %v8830_v47 = vmul.f32 %v11323_v30, %v11347_v40  ;;  %v11351_v54 = vld [vmem:[#allocation90_spill] sm:$0xff]  ;;  %v11358_v4 = vld [vmem:[#allocation21_spill] sm:$0xff] }
 0x336   : > { %v8834_v35 = vmul.f32 %v11309_v32, %v11348_v9  ;;  %v8838_v34 = vmul.f32 %v11311_v55, %v11349_v17  ;;  %v8842_v31 = vmul.f32 %v11313_v23, %v11350_v0  ;;  %v8846_v56 = vmul.f32 %v11315_v11, %v11351_v54  ;;  %v11354_v18 = vld [vmem:[#allocation94_spill] sm:$0xff] }
 0x337   : > { %v8850_v40 = vmul.f32 %v11317_v58, %v11352_v27  ;;  %v8854_v9 = vmul.f32 %v11319_v36, %v11353_v61  ;;  %v8858_v17 = vmul.f32 %v11321_v60, %v11354_v18  ;;  %v8862_v0 = vmul.f32 %v11323_v30, %v11355_v13 }
 0x338   : > { %v8866_v54 = vmul.f32 %v11309_v32, %v11356_v16  ;;  %v8870_v27 = vmul.f32 %v11311_v55, %v11358_v4  ;;  %v8874_v61 = vmul.f32 %v11313_v23, %v11359_v20  ;;  %v8878_v18 = vmul.f32 %v11315_v11, %v11360_v49 }
 0x339   : > { %v8882_v13 = vmul.f32 %v11317_v58, %v11361_v29  ;;  %v8886_v16 = vmul.f32 %v11319_v36, %v11362_v2  ;;  %v8890_v4 = vmul.f32 %v11321_v60, %v11364_v26  ;;  %v8894_v20 = vmul.f32 %v11323_v30, %v11366_v51 }
 0x33a   : > { %11357 = vst [vmem:[#allocation80_spill] sm:$0xff] %v8866_v54  ;;  %v8898_v49 = vmul.f32 %v11309_v32, %v11368_v38  ;;  %v8902_v29 = vmul.f32 %v11311_v55, %v11370_v28  ;;  %v11372_v54 = vld [vmem:[#allocation110_spill] sm:$0xff] }
 0x33b   : > { %11363 = vst [vmem:[#allocation83_spill] sm:$0xff] %v8886_v16  ;;  %v8906_v2 = vmul.f32 %v11313_v23, %v11372_v54  ;;  %v11374_v16 = vld [vmem:[#allocation111_spill] sm:$0xff] }
 0x33c   : > { %11365 = vst [vmem:[#allocation84_spill] sm:$0xff] %v8890_v4  ;;  %v8910_v26 = vmul.f32 %v11315_v11, %v11374_v16  ;;  %v11376_v4 = vld [vmem:[#allocation113_spill] sm:$0xff] }
 0x33d   : > { %11367 = vst [vmem:[#allocation85_spill] sm:$0xff] %v8894_v20  ;;  %v8914_v51 = vmul.f32 %v11317_v58, %v11376_v4  ;;  %v11378_v20 = vld [vmem:[#allocation114_spill] sm:$0xff] }
 0x33e   : > { %11369 = vst [vmem:[#allocation86_spill] sm:$0xff] %v8898_v49  ;;  %v8918_v38 = vmul.f32 %v11319_v36, %v11378_v20  ;;  %v11380_v49 = vld [vmem:[#allocation115_spill] sm:$0xff] }
 0x33f   : > { %11371 = vst [vmem:[#allocation87_spill] sm:$0xff] %v8902_v29  ;;  %v8922_v28 = vmul.f32 %v11321_v60, %v11380_v49  ;;  %v11382_v29 = vld [vmem:[#allocation116_spill] sm:$0xff] }
 0x340   : > { %11373 = vst [vmem:[#allocation88_spill] sm:$0xff] %v8906_v2  ;;  %v8926_v54 = vmul.f32 %v11323_v30, %v11382_v29  ;;  %v11384_v2 = vld [vmem:[#allocation92_spill] sm:$0xff] }
 0x341   : > { %11375 = vst [vmem:[#allocation134_spill] sm:$0xff] %v8910_v26  ;;  %v8930_v16 = vmul.f32 %v11309_v32, %v11384_v2  ;;  %v11385_v26 = vld [vmem:[#allocation117_spill] sm:$0xff] }
 0x342   : > { %11377 = vst [vmem:[#allocation135_spill] sm:$0xff] %v8914_v51  ;;  %v8934_v4 = vmul.f32 %v11311_v55, %v11385_v26  ;;  %v11386_v51 = vld [vmem:[#allocation118_spill] sm:$0xff]  ;;  %v8954_v55 = vmul.f32 %v11321_v60, %v11295_v6  ;;  %v11390_v26 = vld [vmem:[#allocation123_spill] sm:$0xff]  ;;  %v2337_v60 = vrot.slane %v8725_v12, 2  ;;  %v2339_v6 = vrot.slane %v8730_v3, 1 }
 0x343   : > { %11379 = vst [vmem:[#allocation112_spill] sm:$0xff] %v8918_v38  ;;  %v8938_v20 = vmul.f32 %v11313_v23, %v11386_v51  ;;  %v11387_v38 = vld [vmem:[#allocation119_spill] sm:$0xff]  ;;  %v8958_v23 = vmul.f32 %v11323_v30, %v11390_v26  ;;  %v2327_v51 = vrot.slane %v8702_v45, 7  ;;  %v2341_v30 = vrot.slane %v8739_v63, 7 }
 0x344   : > { %11381 = vst [vmem:[#allocation95_spill] sm:$0xff] %v8922_v28  ;;  %v8942_v49 = vmul.f32 %v11315_v11, %v11387_v38  ;;  %v11388_v28 = vld [vmem:[#allocation120_spill] sm:$0xff]  ;;  %v2329_v11 = vrot.slane %v8708_v1, 6  ;;  %v2331_v38 = vrot.slane %v8712_v33, 5  ;;  %v2343_v45 = vrot.slane %v8743_v15, 6 }
 0x345   : > { %11383 = vst [vmem:[#allocation97_spill] sm:$0xff] %v8926_v54  ;;  %v8946_v29 = vmul.f32 %v11317_v58, %v11388_v28  ;;  %v11389_v54 = vld [vmem:[#allocation121_spill] sm:$0xff]  ;;  %v2333_v58 = vrot.slane %v8717_v22, 4  ;;  %v2335_v28 = vrot.slane %v8721_v53, 3  ;;  %v2345_v1 = vrot.slane %v8747_v10, 5 }
 0x346   : > { %v8950_v32 = vmul.f32 %v11319_v36, %v11389_v54  ;;  %v2328_v36 = vsel %vm640_vm3, %v2327_v51, %v8698_v57  ;;  %v2347_v33 = vrot.slane %v8752_v14, 4  ;;  %v2342_v53 = vsel %vm640_vm3, %v2341_v30, %v8734_v5 }
 0x347   : > { %v2330_v26 = vsel %vm643_vm4, %v2329_v11, %v2328_v36  ;;  %v2349_v57 = vrot.slane %v8756_v37, 3  ;;  %v2351_v51 = vrot.slane %v8760_v43, 2  ;;  %v2344_v3 = vsel %vm643_vm4, %v2343_v45, %v2342_v53 }
 0x348   : > { %v2332_v22 = vsel %vm646_vm5, %v2331_v38, %v2330_v26  ;;  %v2353_v63 = vrot.slane %v8764_v24, 1  ;;  %v2355_v15 = vrot.slane %v8772_v21, 7  ;;  %v2346_v14 = vsel %vm646_vm5, %v2345_v1, %v2344_v3 }
 0x349   : > { %v2334_v12 = vsel %vm649_vm6, %v2333_v58, %v2332_v22  ;;  %v2357_v38 = vrot.slane %v8777_v46, 6  ;;  %v2359_v26 = vrot.slane %v8781_v50, 5  ;;  %v2348_v37 = vsel %vm649_vm6, %v2347_v33, %v2346_v14 }
 0x34a   : > { %v2336_v10 = vsel %vm652_vm7, %v2335_v28, %v2334_v12  ;;  %v2356_v43 = vsel %vm640_vm3, %v2355_v15, %v8768_v62  ;;  %v2361_v11 = vrot.slane %v8785_v41, 4  ;;  %v2350_v28 = vsel %vm652_vm7, %v2349_v57, %v2348_v37 }
 0x34b   : > { %v2338_v5 = vsel %vm655_vm8, %v2337_v60, %v2336_v10  ;;  %v2358_v21 = vsel %vm643_vm4, %v2357_v38, %v2356_v43  ;;  %v2363_v46 = vrot.slane %v8790_v48, 3  ;;  %v2352_v50 = vsel %vm655_vm8, %v2351_v51, %v2350_v28  ;;  %v11391_v10 = vld [vmem:[#allocation80_spill] sm:$0xff]  ;;  %v11392_v38 = vld [vmem:[#allocation83_spill] sm:$0xff]  ;;  %v11394_v43 = vld [vmem:[#allocation85_spill] sm:$0xff] }
 0x34c   : > { %v8993_v24 = vsel %vm658_vm9, %v2339_v6, %v2338_v5  ;;  %v2360_v58 = vsel %vm646_vm5, %v2359_v26, %v2358_v21  ;;  %v2365_v36 = vrot.slane %v8794_v39, 2  ;;  %v2367_v60 = vrot.slane %v8798_v42, 1  ;;  %v11393_v5 = vld [vmem:[#allocation84_spill] sm:$0xff]  ;;  %v11395_v28 = vld [vmem:[#allocation87_spill] sm:$0xff] }
 0x34d   : > { %v9003_v62 = vsel %vm658_vm9, %v2353_v63, %v2352_v50  ;;  %v2362_v6 = vsel %vm649_vm6, %v2361_v11, %v2360_v58  ;;  %v2369_v41 = vrot.slane %v8806_v44, 7  ;;  %v2371_v30 = vrot.slane %v8810_v8, 6 }
 0x34e   : > { %v2364_v45 = vsel %vm652_vm7, %v2363_v46, %v2362_v6  ;;  %v2373_v48 = vrot.slane %v8814_v25, 5  ;;  %v2375_v1 = vrot.slane %v8818_v19, 4  ;;  %v2377_v33 = vrot.slane %v8822_v52, 3  ;;  %v11396_v46 = vld [vmem:[#allocation88_spill] sm:$0xff] }
 0x34f   : > { %v2366_v39 = vsel %vm655_vm8, %v2365_v36, %v2364_v45  ;;  %v2370_v42 = vsel %vm640_vm3, %v2369_v41, %v8802_v59  ;;  %v2379_v22 = vrot.slane %v8826_v7, 2  ;;  %v2381_v53 = vrot.slane %v8830_v47, 1  ;;  %v11398_v41 = vld [vmem:[#allocation135_spill] sm:$0xff] }
 0x350   : > { %v9018_v44 = vsel %vm658_vm9, %v2367_v60, %v2366_v39  ;;  %v2372_v8 = vsel %vm643_vm4, %v2371_v30, %v2370_v42  ;;  %v2383_v25 = vrot.slane %v8838_v34, 7  ;;  %v2385_v19 = vrot.slane %v8842_v31, 6  ;;  %v11397_v60 = vld [vmem:[#allocation134_spill] sm:$0xff]  ;;  %v11401_v42 = vld [vmem:[#allocation95_spill] sm:$0xff] }
 0x351   : > { %v2374_v52 = vsel %vm646_vm5, %v2373_v48, %v2372_v8  ;;  %v2387_v57 = vrot.slane %v8846_v56, 5  ;;  %v2389_v51 = vrot.slane %v8850_v40, 4  ;;  %v2391_v59 = vrot.slane %v8854_v9, 3  ;;  %v11399_v48 = vld [vmem:[#allocation86_spill] sm:$0xff] }
 0x352   : > { %v2376_v7 = vsel %vm649_vm6, %v2375_v1, %v2374_v52  ;;  %v2384_v47 = vsel %vm640_vm3, %v2383_v25, %v8834_v35  ;;  %v2393_v12 = vrot.slane %v8858_v17, 2  ;;  %v2395_v3 = vrot.slane %v8862_v0, 1  ;;  %v11402_v25 = vld [vmem:[#allocation97_spill] sm:$0xff] }
 0x353   : > { %v2378_v34 = vsel %vm652_vm7, %v2377_v33, %v2376_v7  ;;  %v2386_v31 = vsel %vm643_vm4, %v2385_v19, %v2384_v47  ;;  %v2397_v63 = vrot.slane %v8870_v27, 7  ;;  %v2399_v56 = vrot.slane %v8874_v61, 6  ;;  %v11400_v33 = vld [vmem:[#allocation112_spill] sm:$0xff] }
 0x354   : > { %v2380_v40 = vsel %vm655_vm8, %v2379_v22, %v2378_v34  ;;  %v2388_v9 = vsel %vm646_vm5, %v2387_v57, %v2386_v31  ;;  %v2401_v15 = vrot.slane %v8878_v18, 5  ;;  %v2403_v35 = vrot.slane %v8882_v13, 4 }
 0x355   : > { %v2382_v17 = vsel %vm658_vm9, %v2381_v53, %v2380_v40  ;;  %v2390_v0 = vsel %vm649_vm6, %v2389_v51, %v2388_v9  ;;  %v2398_v14 = vsel %vm640_vm3, %v2397_v63, %v11391_v10  ;;  %v2405_v26 = vrot.slane %v11392_v38, 3 }
 0x356   : > { %v2392_v27 = vsel %vm652_vm7, %v2391_v59, %v2390_v0  ;;  %v2400_v61 = vsel %vm643_vm4, %v2399_v56, %v2398_v14  ;;  %v2407_v37 = vrot.slane %v11393_v5, 2  ;;  %v2409_v11 = vrot.slane %v11394_v43, 1 }
 0x357   : > { %v2394_v18 = vsel %vm655_vm8, %v2393_v12, %v2392_v27  ;;  %v2402_v13 = vsel %vm646_vm5, %v2401_v15, %v2400_v61  ;;  %v2411_v21 = vrot.slane %v11395_v28, 7  ;;  %v2413_v50 = vrot.slane %v11396_v46, 6 }
 0x358   : > { %v2396_v58 = vsel %vm658_vm9, %v2395_v3, %v2394_v18  ;;  %v2404_v36 = vsel %vm649_vm6, %v2403_v35, %v2402_v13  ;;  %v2415_v6 = vrot.slane %v11397_v60, 5  ;;  %v2417_v30 = vrot.slane %v11398_v41, 4 }
 0x359   : > { %v2406_v45 = vsel %vm652_vm7, %v2405_v26, %v2404_v36  ;;  %v2412_v1 = vsel %vm640_vm3, %v2411_v21, %v11399_v48  ;;  %v2419_v39 = vrot.slane %v11400_v33, 3  ;;  %v2421_v22 = vrot.slane %v11401_v42, 2 }
 0x35a   : > { %v2408_v53 = vsel %vm655_vm8, %v2407_v37, %v2406_v45  ;;  %v2414_v8 = vsel %vm643_vm4, %v2413_v50, %v2412_v1  ;;  %v2423_v19 = vrot.slane %v11402_v25, 1  ;;  %v2425_v52 = vrot.slane %v8934_v4, 7 }
 0x35b   : > { %v2410_v57 = vsel %vm658_vm9, %v2409_v11, %v2408_v53  ;;  %v2416_v51 = vsel %vm646_vm5, %v2415_v6, %v2414_v8  ;;  %v2427_v59 = vrot.slane %v8938_v20, 6  ;;  %v2429_v7 = vrot.slane %v8942_v49, 5 }
 0x35c   : > { %v2418_v47 = vsel %vm649_vm6, %v2417_v30, %v2416_v51  ;;  %v2426_v12 = vsel %vm640_vm3, %v2425_v52, %v8930_v16  ;;  %v2431_v3 = vrot.slane %v8946_v29, 4  ;;  %v2433_v34 = vrot.slane %v8950_v32, 3 }
 0x35d   : > { %v2420_v31 = vsel %vm652_vm7, %v2419_v39, %v2418_v47  ;;  %v2428_v4 = vsel %vm643_vm4, %v2427_v59, %v2426_v12  ;;  %v2435_v63 = vrot.slane %v8954_v55, 2  ;;  %v2437_v56 = vrot.slane %v8958_v23, 1  ;;  %v11403_v12 = vld [vmem:[#allocation23_spill] sm:$0xff] }
 0x35e   : > { %v2422_v20 = vsel %vm655_vm8, %v2421_v22, %v2420_v31  ;;  %v2430_v49 = vsel %vm646_vm5, %v2429_v7, %v2428_v4  ;;  %v2447_v40 = vsel %vm535_vm2, %v8993_v24, 0.0  ;;  %v2454_v29 = vsel %vm535_vm2, %v9003_v62, 0.0 }
 0x35f   : > { %v2424_v16 = vsel %vm658_vm9, %v2423_v19, %v2422_v20  ;;  %v2432_v32 = vsel %vm649_vm6, %v2431_v3, %v2430_v49  ;;  %v2448_v9 = vrot.slane %v2447_v40, 4  ;;  %v2455_v15 = vrot.slane %v2454_v29, 4  ;;  %v11404_v3 = vld [vmem:[#allocation12_spill] sm:$0xff] }
 0x360   : > { %v2434_v55 = vsel %vm652_vm7, %v2433_v34, %v2432_v32  ;;  %v2461_v23 = vsel %vm535_vm2, %v9018_v44, 0.0  ;;  %v2468_v35 = vsel %vm535_vm2, %v2382_v17, 0.0  ;;  %v2475_v0 = vsel %vm535_vm2, %v2396_v58, 0.0 }
 0x361   : > { %v2436_v24 = vsel %vm655_vm8, %v2435_v63, %v2434_v55  ;;  %v2449_v10 = vadd.f32 %v2448_v9, %v2447_v40  ;;  %v2456_v14 = vadd.f32 %v2455_v15, %v2454_v29  ;;  %v2462_v62 = vrot.slane %v2461_v23, 4  ;;  %v11405_v29 = vld [vmem:[#allocation57_spill] sm:$0xff] }
 0x362   : > { %v2438_v38 = vsel %vm658_vm9, %v2437_v56, %v2436_v24  ;;  %v2469_v26 = vrot.slane %v2468_v35, 4  ;;  %v2476_v27 = vrot.slane %v2475_v0, 4  ;;  %v2482_v61 = vsel %vm535_vm2, %v2410_v57, 0.0  ;;  %v11407_v24 = vld [vmem:[#allocation56_spill] sm:$0xff] }
 0x363   : > { %v2450_v5 = vrot.slane %v2449_v10, 2  ;;  %v2457_v37 = vrot.slane %v2456_v14, 2  ;;  %v2463_v43 = vadd.f32 %v2462_v62, %v2461_v23  ;;  %v2483_v11 = vrot.slane %v2482_v61, 4  ;;  %v11409_v62 = vld [vmem:[#allocation14_spill] sm:$0xff] }
 0x364   : > { %v2470_v44 = vadd.f32 %v2469_v26, %v2468_v35  ;;  %v2477_v18 = vadd.f32 %v2476_v27, %v2475_v0  ;;  %v2489_v17 = vsel %vm535_vm2, %v2424_v16, 0.0  ;;  %v2496_v13 = vsel %vm535_vm2, %v2438_v38, 0.0  ;;  %v11406_v16 = vld [vmem:[#allocation22_spill] sm:$0xff]  ;;  %v11410_v38 = vld [vmem:[#allocation25_spill] sm:$0xff] }
 0x365   : > { %v2451_v28 = vadd.f32 %v2450_v5, %v2449_v10  ;;  %v2458_v21 = vadd.f32 %v2457_v37, %v2456_v14  ;;  %v2464_v46 = vrot.slane %v2463_v43, 2  ;;  %v2484_v50 = vadd.f32 %v2483_v11, %v2482_v61  ;;  %v11408_v10 = vld [vmem:[#allocation24_spill] sm:$0xff] }
 0x366   : > { %v2471_v58 = vrot.slane %v2470_v44, 2  ;;  %v2478_v36 = vrot.slane %v2477_v18, 2  ;;  %v2490_v60 = vrot.slane %v2489_v17, 4  ;;  %v2497_v6 = vrot.slane %v2496_v13, 4  ;;  %v11411_v37 = vld [vmem:[#allocation52_spill] sm:$0xff] }
 0x367   : > { %v2452_v41 = vrot.slane %v2451_v28, 1  ;;  %v2459_v30 = vrot.slane %v2458_v21, 1  ;;  %v2465_v45 = vadd.f32 %v2464_v46, %v2463_v43  ;;  %v2485_v48 = vrot.slane %v2484_v50, 2  ;;  %v11412_v43 = vld [vmem:[#allocation35_spill] sm:$0xff] }
 0x368   : > { %v2472_v1 = vadd.f32 %v2471_v58, %v2470_v44  ;;  %v2479_v33 = vadd.f32 %v2478_v36, %v2477_v18  ;;  %v2491_v39 = vadd.f32 %v2490_v60, %v2489_v17  ;;  %v2498_v42 = vadd.f32 %v2497_v6, %v2496_v13  ;;  %v11413_v18 = vld [vmem:[#allocation70_spill] sm:$0xff]  ;;  %v11414_v17 = vld [vmem:[#allocation55_spill] sm:$0xff] }
 0x369   : > { %v2453_v22 = vadd.f32 %v2452_v41, %v2451_v28  ;;  %v2460_v53 = vadd.f32 %v2459_v30, %v2458_v21  ;;  %v2466_v8 = vrot.slane %v2465_v45, 1  ;;  %v2486_v25 = vadd.f32 %v2485_v48, %v2484_v50  ;;  %v11415_v28 = vld [vmem:[#allocation26_spill] sm:$0xff]  ;;  %v11416_v21 = vld [vmem:[#allocation41_spill] sm:$0xff]  ;;  %v11417_v50 = vld [vmem:[#allocation39_spill] sm:$0xff] }
 0x36a   : > { %v2473_v19 = vrot.slane %v2472_v1, 1  ;;  %v2480_v52 = vrot.slane %v2479_v33, 1  ;;  %v2492_v57 = vrot.slane %v2491_v39, 2  ;;  %v2499_v51 = vrot.slane %v2498_v42, 2  ;;  %v11418_v58 = vld [vmem:[#allocation51_spill] sm:$0xff]  ;;  %v11419_v30 = vld [vmem:[#allocation58_spill] sm:$0xff] }
 0x36b   : > { %v2467_v59 = vadd.f32 %v2466_v8, %v2465_v45  ;;  %v2487_v7 = vrot.slane %v2486_v25, 1  ;;  %v4617_v47 = vrot.slane %v2460_v53, 7  ;;  %v9099_v34 = vmul.f32 %v11404_v3, %v11403_v12  ;;  %v11420_v48 = vld [vmem:[#allocation62_spill] sm:$0xff]  ;;  %v11423_v53 = vld [vmem:[#allocation68_spill] sm:$0xff] }
 0x36c   : > { %v2474_v31 = vadd.f32 %v2473_v19, %v2472_v1  ;;  %v2481_v4 = vadd.f32 %v2480_v52, %v2479_v33  ;;  %v2493_v63 = vadd.f32 %v2492_v57, %v2491_v39  ;;  %v2500_v56 = vadd.f32 %v2499_v51, %v2498_v42  ;;  %v11421_v33 = vld [vmem:[#allocation2_spill] sm:$0xff]  ;;  %v11422_v42 = vld [vmem:[#allocation64_spill] sm:$0xff]  ;;  %v11424_v19 = vld [vmem:[#allocation69_spill] sm:$0xff] }
 0x36d   : > { %v2488_v20 = vadd.f32 %v2487_v7, %v2486_v25  ;;  %v4618_v49 = vsel %vm640_vm3, %v4617_v47, %v2453_v22  ;;  %v4619_v40 = vrot.slane %v2467_v59, 6  ;;  %v9104_v32 = vmul.f32 %v11406_v16, %v11405_v29  ;;  %v11425_v57 = vld [vmem:[#allocation65_spill] sm:$0xff]  ;;  %v11426_v59 = vld [vmem:[#allocation66_spill] sm:$0xff]  ;;  %v11462_v29 = vld [vmem:[#allocation108_spill] sm:$0xff] }
 0x36e   : > { %v2494_v9 = vrot.slane %v2493_v63, 1  ;;  %v2501_v15 = vrot.slane %v2500_v56, 1  ;;  %v4621_v55 = vrot.slane %v2474_v31, 5  ;;  %v4623_v23 = vrot.slane %v2481_v4, 4  ;;  %v11427_v31 = vld [vmem:[#allocation28_spill] sm:$0xff] }
 0x36f   : > { %v4620_v35 = vsel %vm643_vm4, %v4619_v40, %v4618_v49  ;;  %v4625_v0 = vrot.slane %v2488_v20, 3  ;;  %v9109_v14 = vmul.f32 %v11408_v10, %v11407_v24  ;;  %v9113_v26 = vmul.f32 %v11410_v38, %v11409_v62  ;;  %v11429_v20 = vld [vmem:[#allocation42_spill] sm:$0xff]  ;;  %v11460_v24 = vld [vmem:[#allocation107_spill] sm:$0xff]  ;;  %v11464_v12 = vld [vmem:[#allocation72_spill] sm:$0xff] }
 0x370   : > { %v2495_v27 = vadd.f32 %v2494_v9, %v2493_v63  ;;  %v2502_v61 = vadd.f32 %v2501_v15, %v2500_v56  ;;  %v4622_v5 = vsel %vm646_vm5, %v4621_v55, %v4620_v35  ;;  %v9118_v11 = vmul.f32 %v11412_v43, %v11411_v37  ;;  %v11428_v63 = vld [vmem:[#allocation7_spill] sm:$0xff]  ;;  %v11430_v40 = vld [vmem:[#allocation10_spill] sm:$0xff]  ;;  %v11456_v37 = vld [vmem:[#allocation105_spill] sm:$0xff] }
 0x371   : > { %v4624_v44 = vsel %vm649_vm6, %v4623_v23, %v4622_v5  ;;  %v9123_v13 = vmul.f32 %v11414_v17, %v11413_v18  ;;  %v9127_v46 = vmul.f32 %v11416_v21, %v11415_v28  ;;  %v9131_v36 = vmul.f32 %v11418_v58, %v11417_v50  ;;  %v11431_v15 = vld [vmem:[#allocation46_spill] sm:$0xff]  ;;  %v11432_v23 = vld [vmem:[#allocation60_spill] sm:$0xff]  ;;  %v11453_v50 = vld [vmem:[#allocation21_spill] sm:$0xff] }
 0x372   : > { %v4626_v60 = vsel %vm652_vm7, %v4625_v0, %v4624_v44  ;;  %v4627_v6 = vrot.slane %v2495_v27, 2  ;;  %v4629_v41 = vrot.slane %v2502_v61, 1  ;;  %v9136_v45 = vmul.f32 %v11404_v3, %v11419_v30  ;;  %v11433_v0 = vld [vmem:[#allocation4_spill] sm:$0xff]  ;;  %v11434_v61 = vld [vmem:[#allocation71_spill] sm:$0xff]  ;;  %v11435_v44 = vld [vmem:[#allocation54_spill] sm:$0xff] }
 0x373   : > { %v9140_v1 = vmul.f32 %v11406_v16, %v11420_v48  ;;  %v9144_v39 = vmul.f32 %v11408_v10, %v11421_v33  ;;  %v9148_v22 = vmul.f32 %v11410_v38, %v11422_v42  ;;  %v9152_v8 = vmul.f32 %v11412_v43, %v11423_v53  ;;  %v11447_v53 = vld [vmem:[#allocation91_spill] sm:$0xff]  ;;  %v11448_v42 = vld [vmem:[#allocation93_spill] sm:$0xff]  ;;  %v11449_v33 = vld [vmem:[#allocation94_spill] sm:$0xff] }
 0x374   : > { %v4628_v25 = vsel %vm655_vm8, %v4627_v6, %v4626_v60  ;;  %v9157_v52 = vmul.f32 %v11414_v17, %v11424_v19  ;;  %v9161_v51 = vmul.f32 %v11416_v21, %v11425_v57  ;;  %v9165_v7 = vmul.f32 %v11418_v58, %v11426_v59  ;;  %v11436_v6 = vld [vmem:[#allocation73_spill] sm:$0xff]  ;;  %v11444_v59 = vld [vmem:[#allocation82_spill] sm:$0xff]  ;;  %v11450_v48 = vld [vmem:[#allocation67_spill] sm:$0xff] }
 0x375   : > { %v4630_v47 = vsel %vm658_vm9, %v4629_v41, %v4628_v25  ;;  %v9170_v4 = vmul.f32 %v11404_v3, %v11427_v31  ;;  %v9174_v56 = vmul.f32 %v11406_v16, %v11428_v63  ;;  %v9178_v49 = vmul.f32 %v11408_v10, %v11429_v20  ;;  %v11437_v25 = vld [vmem:[#allocation74_spill] sm:$0xff]  ;;  %v11442_v63 = vld [vmem:[#allocation81_spill] sm:$0xff]  ;;  %v11451_v30 = vld [vmem:[#allocation8_spill] sm:$0xff] }
 0x376   : > { %4993 = vmatpush.xpose.msk.msra.mxu1 %vm535_vm2, %v4630_v47  ;;  %v9183_v9 = vmul.f32 %v11410_v38, %v11430_v40  ;;  %v9187_v55 = vmul.f32 %v11412_v43, %v11431_v15  ;;  %v9191_v35 = vmul.f32 %v11414_v17, %v11432_v23  ;;  %v9195_v27 = vmul.f32 %v11416_v21, %v11433_v0  ;;  %v11438_v23 = vld [vmem:[#allocation75_spill] sm:$0xff]  ;;  %v11439_v15 = vld [vmem:[#allocation76_spill] sm:$0xff]  ;;  %v11440_v40 = vld [vmem:[#allocation77_spill] sm:$0xff] }
 0x377   : > { %v9199_v5 = vmul.f32 %v11418_v58, %v11434_v61  ;;  %v9203_v60 = vmul.f32 %v11404_v3, %v11435_v44  ;;  %v9207_v41 = vmul.f32 %v11406_v16, %v11436_v6  ;;  %v9211_v47 = vmul.f32 %v11408_v10, %v11437_v25  ;;  %v11441_v20 = vld [vmem:[#allocation78_spill] sm:$0xff]  ;;  %v11443_v31 = vld [vmem:[#allocation49_spill] sm:$0xff]  ;;  %v11454_v28 = vld [vmem:[#allocation103_spill] sm:$0xff] }
 0x378   : > { %v9215_v0 = vmul.f32 %v11410_v38, %v11438_v23  ;;  %v9219_v61 = vmul.f32 %v11412_v43, %v11439_v15  ;;  %v9223_v44 = vmul.f32 %v11414_v17, %v11440_v40  ;;  %v9227_v6 = vmul.f32 %v11416_v21, %v11441_v20  ;;  %v11445_v57 = vld [vmem:[#allocation89_spill] sm:$0xff]  ;;  %v11446_v19 = vld [vmem:[#allocation90_spill] sm:$0xff]  ;;  %v11455_v18 = vld [vmem:[#allocation104_spill] sm:$0xff] }
 0x379   : > { %v9231_v25 = vmul.f32 %v11418_v58, %v11442_v63  ;;  %v9235_v23 = vmul.f32 %v11404_v3, %v11443_v31  ;;  %v9239_v15 = vmul.f32 %v11406_v16, %v11444_v59  ;;  %v9243_v40 = vmul.f32 %v11408_v10, %v11445_v57  ;;  %v11458_v62 = vld [vmem:[#allocation106_spill] sm:$0xff] }
 0x37a   : > { %v9247_v20 = vmul.f32 %v11410_v38, %v11446_v19  ;;  %v9251_v63 = vmul.f32 %v11412_v43, %v11447_v53  ;;  %v9255_v31 = vmul.f32 %v11414_v17, %v11448_v42  ;;  %v9259_v59 = vmul.f32 %v11416_v21, %v11449_v33 }
 0x37b   : > { %v9263_v57 = vmul.f32 %v11418_v58, %v11450_v48  ;;  %v9267_v19 = vmul.f32 %v11404_v3, %v11451_v30  ;;  %v9271_v53 = vmul.f32 %v11406_v16, %v11453_v50  ;;  %v9275_v42 = vmul.f32 %v11408_v10, %v11454_v28 }
 0x37c   : > { %v9279_v33 = vmul.f32 %v11410_v38, %v11455_v18  ;;  %v9283_v48 = vmul.f32 %v11412_v43, %v11456_v37  ;;  %v9287_v30 = vmul.f32 %v11414_v17, %v11458_v62  ;;  %v9291_v50 = vmul.f32 %v11416_v21, %v11460_v24 }
 0x37d   : > { %11452 = vst [vmem:[#allocation98_spill] sm:$0xff] %v9267_v19  ;;  %v9295_v28 = vmul.f32 %v11418_v58, %v11462_v29  ;;  %v9299_v18 = vmul.f32 %v11404_v3, %v11464_v12  ;;  %v11466_v19 = vld [vmem:[#allocation109_spill] sm:$0xff] }
 0x37e   : > { %11457 = vst [vmem:[#allocation99_spill] sm:$0xff] %v9283_v48  ;;  %v9303_v37 = vmul.f32 %v11406_v16, %v11466_v19  ;;  %v11468_v48 = vld [vmem:[#allocation110_spill] sm:$0xff] }
 0x37f   : > { %11459 = vst [vmem:[#allocation100_spill] sm:$0xff] %v9287_v30  ;;  %v9307_v62 = vmul.f32 %v11408_v10, %v11468_v48  ;;  %v11469_v30 = vld [vmem:[#allocation111_spill] sm:$0xff] }
 0x380   : > { %11461 = vst [vmem:[#allocation96_spill] sm:$0xff] %v9291_v50  ;;  %v9311_v24 = vmul.f32 %v11410_v38, %v11469_v30  ;;  %v11471_v50 = vld [vmem:[#allocation113_spill] sm:$0xff]  ;;  %v9331_v30 = vmul.f32 %v11404_v3, %v11384_v2  ;;  %v9351_v3 = vmul.f32 %v11414_v17, %v11389_v54  ;;  %v11482_v2 = vld [vmem:[#allocation122_spill] sm:$0xff]  ;;  %v1879_v54 = vrot.slane %v9131_v36, 1 }
 0x381   : > { %11463 = vst [vmem:[#allocation101_spill] sm:$0xff] %v9295_v28  ;;  %v9315_v29 = vmul.f32 %v11412_v43, %v11471_v50  ;;  %v11473_v28 = vld [vmem:[#allocation114_spill] sm:$0xff] }
 0x382   : > { %11465 = vst [vmem:[#allocation102_spill] sm:$0xff] %v9299_v18  ;;  %v9319_v12 = vmul.f32 %v11414_v17, %v11473_v28  ;;  %v11475_v18 = vld [vmem:[#allocation115_spill] sm:$0xff]  ;;  %v1877_v17 = vrot.slane %v9127_v46, 2 }
 0x383   : > { %11467 = vst [vmem:[#allocation19_spill] sm:$0xff] %v9303_v37  ;;  %v9323_v19 = vmul.f32 %v11416_v21, %v11475_v18  ;;  %v11477_v37 = vld [vmem:[#allocation116_spill] sm:$0xff] }
 0x384   : > { %11470 = vst [vmem:[#allocation63_spill] sm:$0xff] %v9311_v24  ;;  %v9327_v48 = vmul.f32 %v11418_v58, %v11477_v37  ;;  %v11478_v24 = vld [vmem:[#allocation117_spill] sm:$0xff] }
 0x385   : > { %11472 = vst [vmem:[#allocation47_spill] sm:$0xff] %v9315_v29  ;;  %v9335_v50 = vmul.f32 %v11406_v16, %v11478_v24  ;;  %v11479_v29 = vld [vmem:[#allocation118_spill] sm:$0xff]  ;;  %v9355_v16 = vmul.f32 %v11416_v21, %v11482_v2  ;;  %v11483_v24 = vld [vmem:[#allocation123_spill] sm:$0xff] }
 0x386   : > { %11474 = vst [vmem:[#allocation48_spill] sm:$0xff] %v9319_v12  ;;  %v9339_v28 = vmul.f32 %v11408_v10, %v11479_v29  ;;  %v11480_v12 = vld [vmem:[#allocation119_spill] sm:$0xff]  ;;  %v9359_v10 = vmul.f32 %v11418_v58, %v11483_v24  ;;  %v1867_v29 = vrot.slane %v9104_v32, 7  ;;  %v1881_v58 = vrot.slane %v9140_v1, 7 }
 0x387   : > { %11476 = vst [vmem:[#allocation20_spill] sm:$0xff] %v9323_v19  ;;  %v9343_v18 = vmul.f32 %v11410_v38, %v11480_v12  ;;  %v11481_v19 = vld [vmem:[#allocation120_spill] sm:$0xff]  ;;  %v1869_v38 = vrot.slane %v9109_v14, 6  ;;  %v1871_v12 = vrot.slane %v9113_v26, 5  ;;  %v1883_v24 = vrot.slane %v9144_v39, 6 }
 0x388   : > { %v9347_v37 = vmul.f32 %v11412_v43, %v11481_v19  ;;  %v1873_v43 = vrot.slane %v9118_v11, 4  ;;  %v1875_v19 = vrot.slane %v9123_v13, 3  ;;  %v1868_v21 = vsel %vm640_vm3, %v1867_v29, %v9099_v34 }
 0x389   : > { %v1885_v32 = vrot.slane %v9148_v22, 5  ;;  %v1870_v14 = vsel %vm643_vm4, %v1869_v38, %v1868_v21  ;;  %v1887_v26 = vrot.slane %v9152_v8, 4  ;;  %v1889_v11 = vrot.slane %v9157_v52, 3 }
 0x38a   : > { %v1891_v13 = vrot.slane %v9161_v51, 2  ;;  %v1872_v46 = vsel %vm646_vm5, %v1871_v12, %v1870_v14  ;;  %v1882_v36 = vsel %vm640_vm3, %v1881_v58, %v9136_v45  ;;  %v1893_v34 = vrot.slane %v9165_v7, 1 }
 0x38b   : > { %v1895_v29 = vrot.slane %v9174_v56, 7  ;;  %v1874_v1 = vsel %vm649_vm6, %v1873_v43, %v1872_v46  ;;  %v1884_v39 = vsel %vm643_vm4, %v1883_v24, %v1882_v36  ;;  %v1897_v22 = vrot.slane %v9178_v49, 6 }
 0x38c   : > { %v1899_v8 = vrot.slane %v9183_v9, 5  ;;  %v1876_v52 = vsel %vm652_vm7, %v1875_v19, %v1874_v1  ;;  %v1886_v51 = vsel %vm646_vm5, %v1885_v32, %v1884_v39  ;;  %v1901_v45 = vrot.slane %v9187_v55, 4 }
 0x38d   : > { %v1896_v12 = vsel %vm640_vm3, %v1895_v29, %v9170_v4  ;;  %v1878_v7 = vsel %vm655_vm8, %v1877_v17, %v1876_v52  ;;  %v1888_v56 = vsel %vm649_vm6, %v1887_v26, %v1886_v51  ;;  %v1903_v24 = vrot.slane %v9191_v35, 3  ;;  %v11486_v51 = vld [vmem:[#allocation100_spill] sm:$0xff] }
 0x38e   : > { %v1898_v38 = vsel %vm643_vm4, %v1897_v22, %v1896_v12  ;;  %v9396_v49 = vsel %vm658_vm9, %v1879_v54, %v1878_v7  ;;  %v1890_v19 = vsel %vm652_vm7, %v1889_v11, %v1888_v56  ;;  %v1905_v43 = vrot.slane %v9195_v27, 2  ;;  %v11484_v22 = vld [vmem:[#allocation98_spill] sm:$0xff]  ;;  %v11488_v56 = vld [vmem:[#allocation101_spill] sm:$0xff] }
 0x38f   : > { %v1900_v9 = vsel %vm646_vm5, %v1899_v8, %v1898_v38  ;;  %v1892_v4 = vsel %vm655_vm8, %v1891_v13, %v1890_v19  ;;  %v1907_v17 = vrot.slane %v9199_v5, 1  ;;  %v1909_v21 = vrot.slane %v9207_v41, 7 }
 0x390   : > { %v1902_v55 = vsel %vm649_vm6, %v1901_v45, %v1900_v9  ;;  %v9406_v58 = vsel %vm658_vm9, %v1893_v34, %v1892_v4  ;;  %v1911_v35 = vrot.slane %v9211_v47, 6  ;;  %v1913_v32 = vrot.slane %v9215_v0, 5  ;;  %v11487_v45 = vld [vmem:[#allocation96_spill] sm:$0xff] }
 0x391   : > { %v1904_v54 = vsel %vm652_vm7, %v1903_v24, %v1902_v55  ;;  %v1910_v27 = vsel %vm640_vm3, %v1909_v21, %v9203_v60  ;;  %v1915_v26 = vrot.slane %v9219_v61, 4  ;;  %v1917_v5 = vrot.slane %v9223_v44, 3  ;;  %v11489_v24 = vld [vmem:[#allocation19_spill] sm:$0xff] }
 0x392   : > { %v1906_v14 = vsel %vm655_vm8, %v1905_v43, %v1904_v54  ;;  %v1912_v11 = vsel %vm643_vm4, %v1911_v35, %v1910_v27  ;;  %v1919_v13 = vrot.slane %v9227_v6, 2  ;;  %v1921_v47 = vrot.slane %v9231_v25, 1  ;;  %v11490_v55 = vld [vmem:[#allocation63_spill] sm:$0xff]  ;;  %v11491_v35 = vld [vmem:[#allocation102_spill] sm:$0xff] }
 0x393   : > { %v9417_v41 = vsel %vm658_vm9, %v1907_v17, %v1906_v14  ;;  %v1914_v0 = vsel %vm646_vm5, %v1913_v32, %v1912_v11  ;;  %v1923_v46 = vrot.slane %v9239_v15, 7  ;;  %v1925_v36 = vrot.slane %v9243_v40, 6  ;;  %v11492_v14 = vld [vmem:[#allocation47_spill] sm:$0xff]  ;;  %v11493_v11 = vld [vmem:[#allocation48_spill] sm:$0xff] }
 0x394   : > { %v1927_v60 = vrot.slane %v9247_v20, 5  ;;  %v1916_v61 = vsel %vm649_vm6, %v1915_v26, %v1914_v0  ;;  %v1929_v44 = vrot.slane %v9251_v63, 4  ;;  %v1931_v34 = vrot.slane %v9255_v31, 3 }
 0x395   : > { %v1933_v29 = vrot.slane %v9259_v59, 2  ;;  %v1918_v6 = vsel %vm652_vm7, %v1917_v5, %v1916_v61  ;;  %v1924_v25 = vsel %vm640_vm3, %v1923_v46, %v9235_v23  ;;  %v1935_v1 = vrot.slane %v9263_v57, 1  ;;  %v11485_v23 = vld [vmem:[#allocation99_spill] sm:$0xff] }
 0x396   : > { %v1937_v15 = vrot.slane %v9271_v53, 7  ;;  %v1920_v40 = vsel %vm655_vm8, %v1919_v13, %v1918_v6  ;;  %v1926_v20 = vsel %vm643_vm4, %v1925_v36, %v1924_v25  ;;  %v1939_v39 = vrot.slane %v9275_v42, 6 }
 0x397   : > { %v1941_v63 = vrot.slane %v9279_v33, 5  ;;  %v1922_v31 = vsel %vm658_vm9, %v1921_v47, %v1920_v40  ;;  %v1928_v59 = vsel %vm646_vm5, %v1927_v60, %v1926_v20  ;;  %v1943_v52 = vrot.slane %v11485_v23, 4  ;;  %v11494_v47 = vld [vmem:[#allocation20_spill] sm:$0xff] }
 0x398   : > { %v1938_v8 = vsel %vm640_vm3, %v1937_v15, %v11484_v22  ;;  %v1930_v57 = vsel %vm649_vm6, %v1929_v44, %v1928_v59  ;;  %v1945_v12 = vrot.slane %v11486_v51, 3  ;;  %v1947_v7 = vrot.slane %v11487_v45, 2 }
 0x399   : > { %v1940_v53 = vsel %vm643_vm4, %v1939_v39, %v1938_v8  ;;  %v1932_v42 = vsel %vm652_vm7, %v1931_v34, %v1930_v57  ;;  %v1949_v38 = vrot.slane %v11488_v56, 1  ;;  %v1951_v19 = vrot.slane %v11489_v24, 7 }
 0x39a   : > { %v1942_v33 = vsel %vm646_vm5, %v1941_v63, %v1940_v53  ;;  %v1934_v9 = vsel %vm655_vm8, %v1933_v29, %v1932_v42  ;;  %v1953_v4 = vrot.slane %v9307_v62, 6  ;;  %v1955_v17 = vrot.slane %v11490_v55, 5 }
 0x39b   : > { %v1944_v43 = vsel %vm649_vm6, %v1943_v52, %v1942_v33  ;;  %v1936_v21 = vsel %vm658_vm9, %v1935_v1, %v1934_v9  ;;  %v1952_v32 = vsel %vm640_vm3, %v1951_v19, %v11491_v35  ;;  %v1957_v27 = vrot.slane %v11492_v14, 4 }
 0x39c   : > { %v1946_v54 = vsel %vm652_vm7, %v1945_v12, %v1944_v43  ;;  %v1954_v5 = vsel %vm643_vm4, %v1953_v4, %v1952_v32  ;;  %v1959_v13 = vrot.slane %v11493_v11, 3  ;;  %v1961_v0 = vrot.slane %v11494_v47, 2 }
 0x39d   : > { %v1948_v26 = vsel %vm655_vm8, %v1947_v7, %v1946_v54  ;;  %v1956_v46 = vsel %vm646_vm5, %v1955_v17, %v1954_v5  ;;  %v1963_v36 = vrot.slane %v9327_v48, 1  ;;  %v1965_v60 = vrot.slane %v9335_v50, 7 }
 0x39e   : > { %v1950_v62 = vsel %vm658_vm9, %v1949_v38, %v1948_v26  ;;  %v1958_v61 = vsel %vm649_vm6, %v1957_v27, %v1956_v46  ;;  %v1967_v44 = vrot.slane %v9339_v28, 6  ;;  %v1969_v34 = vrot.slane %v9343_v18, 5 }
 0x39f   : > { %v1971_v29 = vrot.slane %v9347_v37, 4  ;;  %v1960_v6 = vsel %vm652_vm7, %v1959_v13, %v1958_v61  ;;  %v1966_v25 = vsel %vm640_vm3, %v1965_v60, %v9331_v30  ;;  %v1973_v1 = vrot.slane %v9351_v3, 3  ;;  %v11495_v61 = vld [vmem:[#allocation23_spill] sm:$0xff] }
 0x3a0   : > { %v1975_v15 = vrot.slane %v9355_v16, 2  ;;  %v1962_v48 = vsel %vm655_vm8, %v1961_v0, %v1960_v6  ;;  %v1968_v50 = vsel %vm643_vm4, %v1967_v44, %v1966_v25  ;;  %v1977_v40 = vrot.slane %v9359_v10, 1  ;;  %v11496_v44 = vld [vmem:[#allocation32_spill] sm:$0xff] }
 0x3a1   : > { %v1987_v18 = vsel %vm535_vm2, %v9396_v49, 0.0  ;;  %v1964_v37 = vsel %vm658_vm9, %v1963_v36, %v1962_v48  ;;  %v1970_v28 = vsel %vm646_vm5, %v1969_v34, %v1968_v50  ;;  %v1994_v30 = vsel %vm535_vm2, %v9406_v58, 0.0 }
 0x3a2   : > { %v1988_v20 = vrot.slane %v1987_v18, 4  ;;  %v1972_v3 = vsel %vm649_vm6, %v1971_v29, %v1970_v28  ;;  %v1995_v16 = vrot.slane %v1994_v30, 4  ;;  %v2001_v39 = vsel %vm535_vm2, %v9417_v41, 0.0 }
 0x3a3   : > { %v2008_v63 = vsel %vm535_vm2, %v1922_v31, 0.0  ;;  %v1974_v10 = vsel %vm652_vm7, %v1973_v1, %v1972_v3  ;;  %v2002_v49 = vrot.slane %v2001_v39, 4  ;;  %v2015_v52 = vsel %vm535_vm2, %v1936_v21, 0.0 }
 0x3a4   : > { %v1989_v59 = vadd.f32 %v1988_v20, %v1987_v18  ;;  %v2009_v22 = vrot.slane %v2008_v63, 4  ;;  %v1976_v8 = vsel %vm655_vm8, %v1975_v15, %v1974_v10  ;;  %v1996_v23 = vadd.f32 %v1995_v16, %v1994_v30  ;;  %v11498_v18 = vld [vmem:[#allocation27_spill] sm:$0xff]  ;;  %v11500_v10 = vld [vmem:[#allocation9_spill] sm:$0xff] }
 0x3a5   : > { %v2022_v58 = vsel %vm535_vm2, %v1950_v62, 0.0  ;;  %v1978_v57 = vsel %vm658_vm9, %v1977_v40, %v1976_v8  ;;  %v2003_v51 = vadd.f32 %v2002_v49, %v2001_v39  ;;  %v2016_v45 = vrot.slane %v2015_v52, 4  ;;  %v11497_v40 = vld [vmem:[#allocation57_spill] sm:$0xff]  ;;  %v11501_v49 = vld [vmem:[#allocation14_spill] sm:$0xff] }
 0x3a6   : > { %v1990_v53 = vrot.slane %v1989_v59, 2  ;;  %v2010_v12 = vadd.f32 %v2009_v22, %v2008_v63  ;;  %v1997_v41 = vrot.slane %v1996_v23, 2  ;;  %v2023_v31 = vrot.slane %v2022_v58, 4  ;;  %v11499_v63 = vld [vmem:[#allocation56_spill] sm:$0xff]  ;;  %v11502_v22 = vld [vmem:[#allocation17_spill] sm:$0xff] }
 0x3a7   : > { %v2029_v7 = vsel %vm535_vm2, %v1964_v37, 0.0  ;;  %v2004_v33 = vrot.slane %v2003_v51, 2  ;;  %v2017_v19 = vadd.f32 %v2016_v45, %v2015_v52  ;;  %v2036_v43 = vsel %vm535_vm2, %v1978_v57, 0.0  ;;  %v11505_v45 = vld [vmem:[#allocation70_spill] sm:$0xff] }
 0x3a8   : > { %v1991_v42 = vadd.f32 %v1990_v53, %v1989_v59  ;;  %v2011_v56 = vrot.slane %v2010_v12, 2  ;;  %v2030_v38 = vrot.slane %v2029_v7, 4  ;;  %v1998_v24 = vadd.f32 %v1997_v41, %v1996_v23 }
 0x3a9   : > { %v2024_v9 = vadd.f32 %v2023_v31, %v2022_v58  ;;  %v2005_v55 = vadd.f32 %v2004_v33, %v2003_v51  ;;  %v2018_v35 = vrot.slane %v2017_v19, 2  ;;  %v2037_v14 = vrot.slane %v2036_v43, 4  ;;  %v11503_v51 = vld [vmem:[#allocation52_spill] sm:$0xff]  ;;  %v11506_v31 = vld [vmem:[#allocation5_spill] sm:$0xff]  ;;  %v11508_v33 = vld [vmem:[#allocation11_spill] sm:$0xff] }
 0x3aa   : > { %v1992_v4 = vrot.slane %v1991_v42, 1  ;;  %v2012_v17 = vadd.f32 %v2011_v56, %v2010_v12  ;;  %v2031_v21 = vadd.f32 %v2030_v38, %v2029_v7  ;;  %v1999_v54 = vrot.slane %v1998_v24, 1  ;;  %v11504_v12 = vld [vmem:[#allocation40_spill] sm:$0xff] }
 0x3ab   : > { %v2025_v32 = vrot.slane %v2024_v9, 2  ;;  %v2006_v26 = vrot.slane %v2005_v55, 1  ;;  %v2019_v47 = vadd.f32 %v2018_v35, %v2017_v19  ;;  %v2038_v62 = vadd.f32 %v2037_v14, %v2036_v43  ;;  %v11509_v19 = vld [vmem:[#allocation39_spill] sm:$0xff]  ;;  %v11513_v35 = vld [vmem:[#allocation2_spill] sm:$0xff]  ;;  %v11514_v14 = vld [vmem:[#allocation64_spill] sm:$0xff] }
 0x3ac   : > { %v1993_v27 = vadd.f32 %v1992_v4, %v1991_v42  ;;  %v2013_v5 = vrot.slane %v2012_v17, 1  ;;  %v2032_v11 = vrot.slane %v2031_v21, 2  ;;  %v2000_v13 = vadd.f32 %v1999_v54, %v1998_v24  ;;  %v11507_v42 = vld [vmem:[#allocation26_spill] sm:$0xff] }
 0x3ad   : > { %v2026_v0 = vadd.f32 %v2025_v32, %v2024_v9  ;;  %v2007_v46 = vadd.f32 %v2006_v26, %v2005_v55  ;;  %v9500_v34 = vmul.f32 %v11496_v44, %v11495_v61  ;;  %v2020_v29 = vrot.slane %v2019_v47, 1  ;;  %v11510_v9 = vld [vmem:[#allocation18_spill] sm:$0xff]  ;;  %v11557_v61 = vld [vmem:[#allocation109_spill] sm:$0xff] }
 0x3ae   : > { %v2014_v36 = vadd.f32 %v2013_v5, %v2012_v17  ;;  %v2033_v60 = vadd.f32 %v2032_v11, %v2031_v21  ;;  %v2039_v25 = vrot.slane %v2038_v62, 2  ;;  %v4595_v1 = vrot.slane %v2000_v13, 7  ;;  %v11511_v4 = vld [vmem:[#allocation58_spill] sm:$0xff]  ;;  %v11515_v11 = vld [vmem:[#allocation68_spill] sm:$0xff] }
 0x3af   : > { %v2027_v6 = vrot.slane %v2026_v0, 1  ;;  %v4597_v48 = vrot.slane %v2007_v46, 6  ;;  %v9504_v37 = vmul.f32 %v11498_v18, %v11497_v40  ;;  %v2021_v28 = vadd.f32 %v2020_v29, %v2019_v47  ;;  %v11512_v21 = vld [vmem:[#allocation62_spill] sm:$0xff]  ;;  %v11516_v47 = vld [vmem:[#allocation69_spill] sm:$0xff]  ;;  %v11519_v29 = vld [vmem:[#allocation28_spill] sm:$0xff] }
 0x3b0   : > { %v2034_v15 = vrot.slane %v2033_v60, 1  ;;  %v4599_v50 = vrot.slane %v2014_v36, 5  ;;  %v2040_v30 = vadd.f32 %v2039_v25, %v2038_v62  ;;  %v4596_v3 = vsel %vm640_vm3, %v4595_v1, %v1993_v27  ;;  %v11517_v62 = vld [vmem:[#allocation65_spill] sm:$0xff]  ;;  %v11518_v36 = vld [vmem:[#allocation66_spill] sm:$0xff]  ;;  %v11520_v25 = vld [vmem:[#allocation7_spill] sm:$0xff] }
 0x3b1   : > { %v2028_v20 = vadd.f32 %v2027_v6, %v2026_v0  ;;  %v4598_v39 = vsel %vm643_vm4, %v4597_v48, %v4596_v3  ;;  %v9510_v59 = vmul.f32 %v11500_v10, %v11499_v63  ;;  %v9514_v8 = vmul.f32 %v11502_v22, %v11501_v49  ;;  %v11521_v48 = vld [vmem:[#allocation42_spill] sm:$0xff]  ;;  %v11551_v49 = vld [vmem:[#allocation107_spill] sm:$0xff]  ;;  %v11553_v63 = vld [vmem:[#allocation108_spill] sm:$0xff] }
 0x3b2   : > { %v2035_v16 = vadd.f32 %v2034_v15, %v2033_v60  ;;  %v2041_v23 = vrot.slane %v2040_v30, 1  ;;  %v4600_v52 = vsel %vm646_vm5, %v4599_v50, %v4598_v39  ;;  %v4601_v58 = vrot.slane %v2021_v28, 4  ;;  %v11522_v28 = vld [vmem:[#allocation10_spill] sm:$0xff]  ;;  %v11555_v40 = vld [vmem:[#allocation72_spill] sm:$0xff] }
 0x3b3   : > { %v4603_v57 = vrot.slane %v2028_v20, 3  ;;  %v9519_v41 = vmul.f32 %v11504_v12, %v11503_v51  ;;  %v9523_v7 = vmul.f32 %v11506_v31, %v11505_v45  ;;  %v9527_v56 = vmul.f32 %v11508_v33, %v11507_v42  ;;  %v11547_v42 = vld [vmem:[#allocation104_spill] sm:$0xff]  ;;  %v11548_v45 = vld [vmem:[#allocation105_spill] sm:$0xff]  ;;  %v11549_v51 = vld [vmem:[#allocation106_spill] sm:$0xff] }
 0x3b4   : > { %v4605_v53 = vrot.slane %v2035_v16, 2  ;;  %v2042_v38 = vadd.f32 %v2041_v23, %v2040_v30  ;;  %v4602_v24 = vsel %vm649_vm6, %v4601_v58, %v4600_v52  ;;  %v9532_v43 = vmul.f32 %v11510_v9, %v11509_v19  ;;  %v11523_v30 = vld [vmem:[#allocation46_spill] sm:$0xff]  ;;  %v11524_v16 = vld [vmem:[#allocation60_spill] sm:$0xff]  ;;  %v11526_v58 = vld [vmem:[#allocation71_spill] sm:$0xff] }
 0x3b5   : > { %v9536_v55 = vmul.f32 %v11496_v44, %v11511_v4  ;;  %v4604_v17 = vsel %vm652_vm7, %v4603_v57, %v4602_v24  ;;  %v9541_v54 = vmul.f32 %v11498_v18, %v11512_v21  ;;  %v9545_v32 = vmul.f32 %v11500_v10, %v11513_v35  ;;  %v11525_v23 = vld [vmem:[#allocation4_spill] sm:$0xff]  ;;  %v11528_v24 = vld [vmem:[#allocation73_spill] sm:$0xff]  ;;  %v11542_v35 = vld [vmem:[#allocation67_spill] sm:$0xff] }
 0x3b6   : > { %v9549_v27 = vmul.f32 %v11502_v22, %v11514_v14  ;;  %v4606_v26 = vsel %vm655_vm8, %v4605_v53, %v4604_v17  ;;  %v4607_v5 = vrot.slane %v2042_v38, 1  ;;  %v9554_v13 = vmul.f32 %v11504_v12, %v11515_v11  ;;  %v11527_v53 = vld [vmem:[#allocation54_spill] sm:$0xff]  ;;  %v11540_v11 = vld [vmem:[#allocation93_spill] sm:$0xff]  ;;  %v11543_v21 = vld [vmem:[#allocation8_spill] sm:$0xff] }
 0x3b7   : > { %v9558_v0 = vmul.f32 %v11506_v31, %v11516_v47  ;;  %v9562_v46 = vmul.f32 %v11508_v33, %v11517_v62  ;;  %v9566_v60 = vmul.f32 %v11510_v9, %v11518_v36  ;;  %v9570_v6 = vmul.f32 %v11496_v44, %v11519_v29  ;;  %v11536_v29 = vld [vmem:[#allocation82_spill] sm:$0xff]  ;;  %v11537_v36 = vld [vmem:[#allocation89_spill] sm:$0xff]  ;;  %v11539_v47 = vld [vmem:[#allocation91_spill] sm:$0xff] }
 0x3b8   : > { %v9574_v1 = vmul.f32 %v11498_v18, %v11520_v25  ;;  %v4608_v15 = vsel %vm658_vm9, %v4607_v5, %v4606_v26  ;;  %v9579_v50 = vmul.f32 %v11500_v10, %v11521_v48  ;;  %v9583_v20 = vmul.f32 %v11502_v22, %v11522_v28  ;;  %v11529_v26 = vld [vmem:[#allocation74_spill] sm:$0xff]  ;;  %v11534_v48 = vld [vmem:[#allocation81_spill] sm:$0xff]  ;;  %v11546_v19 = vld [vmem:[#allocation103_spill] sm:$0xff] }
 0x3b9   : > { %v9587_v3 = vmul.f32 %v11504_v12, %v11523_v30  ;;  %4994 = vmatpush.xpose.msk.msra.mxu1 %vm535_vm2, %v4608_v15  ;;  %v9592_v39 = vmul.f32 %v11506_v31, %v11524_v16  ;;  %v9596_v52 = vmul.f32 %v11508_v33, %v11525_v23  ;;  %v9600_v57 = vmul.f32 %v11510_v9, %v11526_v58  ;;  %v11530_v15 = vld [vmem:[#allocation75_spill] sm:$0xff]  ;;  %v11531_v16 = vld [vmem:[#allocation76_spill] sm:$0xff]  ;;  %v11532_v30 = vld [vmem:[#allocation77_spill] sm:$0xff] }
 0x3ba   : > { %v9604_v38 = vmul.f32 %v11496_v44, %v11527_v53  ;;  %v9608_v17 = vmul.f32 %v11498_v18, %v11528_v24  ;;  %v9612_v5 = vmul.f32 %v11500_v10, %v11529_v26  ;;  %v9616_v23 = vmul.f32 %v11502_v22, %v11530_v15  ;;  %v11533_v28 = vld [vmem:[#allocation78_spill] sm:$0xff]  ;;  %v11535_v25 = vld [vmem:[#allocation49_spill] sm:$0xff] }
 0x3bb   : > { %v9620_v58 = vmul.f32 %v11504_v12, %v11531_v16  ;;  %v9624_v53 = vmul.f32 %v11506_v31, %v11532_v30  ;;  %v9628_v24 = vmul.f32 %v11508_v33, %v11533_v28  ;;  %v9632_v26 = vmul.f32 %v11510_v9, %v11534_v48  ;;  %v11538_v62 = vld [vmem:[#allocation90_spill] sm:$0xff]  ;;  %v11545_v4 = vld [vmem:[#allocation21_spill] sm:$0xff] }
 0x3bc   : > { %v9636_v15 = vmul.f32 %v11496_v44, %v11535_v25  ;;  %v9640_v16 = vmul.f32 %v11498_v18, %v11536_v29  ;;  %v9644_v30 = vmul.f32 %v11500_v10, %v11537_v36  ;;  %v9648_v28 = vmul.f32 %v11502_v22, %v11538_v62  ;;  %v11541_v14 = vld [vmem:[#allocation94_spill] sm:$0xff] }
 0x3bd   : > { %v9652_v48 = vmul.f32 %v11504_v12, %v11539_v47  ;;  %v9656_v25 = vmul.f32 %v11506_v31, %v11540_v11  ;;  %v9660_v29 = vmul.f32 %v11508_v33, %v11541_v14  ;;  %v9664_v36 = vmul.f32 %v11510_v9, %v11542_v35 }
 0x3be   : > { %v9668_v62 = vmul.f32 %v11496_v44, %v11543_v21  ;;  %v9672_v47 = vmul.f32 %v11498_v18, %v11545_v4  ;;  %v9676_v11 = vmul.f32 %v11500_v10, %v11546_v19  ;;  %v9680_v14 = vmul.f32 %v11502_v22, %v11547_v42 }
 0x3bf   : > { %v9684_v35 = vmul.f32 %v11504_v12, %v11548_v45  ;;  %v9688_v21 = vmul.f32 %v11506_v31, %v11549_v51  ;;  %v9692_v4 = vmul.f32 %v11508_v33, %v11551_v49  ;;  %v9696_v19 = vmul.f32 %v11510_v9, %v11553_v63 }
 0x3c0   : > { %11544 = vst [vmem:[#allocation59_spill] sm:$0xff] %v9668_v62  ;;  %v9700_v42 = vmul.f32 %v11496_v44, %v11555_v40  ;;  %v9704_v45 = vmul.f32 %v11498_v18, %v11557_v61  ;;  %v11559_v62 = vld [vmem:[#allocation110_spill] sm:$0xff] }
 0x3c1   : > { %11550 = vst [vmem:[#allocation6_spill] sm:$0xff] %v9688_v21  ;;  %v9708_v51 = vmul.f32 %v11500_v10, %v11559_v62  ;;  %v11561_v21 = vld [vmem:[#allocation111_spill] sm:$0xff] }
 0x3c2   : > { %11552 = vst [vmem:[#allocation34_spill] sm:$0xff] %v9692_v4  ;;  %v9712_v49 = vmul.f32 %v11502_v22, %v11561_v21  ;;  %v11563_v4 = vld [vmem:[#allocation113_spill] sm:$0xff] }
 0x3c3   : > { %11554 = vst [vmem:[#allocation50_spill] sm:$0xff] %v9696_v19  ;;  %v9716_v63 = vmul.f32 %v11504_v12, %v11563_v4  ;;  %v11565_v19 = vld [vmem:[#allocation114_spill] sm:$0xff] }
 0x3c4   : > { %11556 = vst [vmem:[#allocation124_spill] sm:$0xff] %v9700_v42  ;;  %v9720_v40 = vmul.f32 %v11506_v31, %v11565_v19  ;;  %v11567_v42 = vld [vmem:[#allocation115_spill] sm:$0xff] }
 0x3c5   : > { %11558 = vst [vmem:[#allocation125_spill] sm:$0xff] %v9704_v45  ;;  %v9724_v61 = vmul.f32 %v11508_v33, %v11567_v42  ;;  %v11569_v45 = vld [vmem:[#allocation116_spill] sm:$0xff] }
 0x3c6   : > { %11560 = vst [vmem:[#allocation126_spill] sm:$0xff] %v9708_v51  ;;  %v9728_v62 = vmul.f32 %v11510_v9, %v11569_v45  ;;  %v11571_v51 = vld [vmem:[#allocation92_spill] sm:$0xff] }
 0x3c7   : > { %11562 = vst [vmem:[#allocation127_spill] sm:$0xff] %v9712_v49  ;;  %v9732_v21 = vmul.f32 %v11496_v44, %v11571_v51  ;;  %v11572_v49 = vld [vmem:[#allocation117_spill] sm:$0xff] }
 0x3c8   : > { %11564 = vst [vmem:[#allocation130_spill] sm:$0xff] %v9716_v63  ;;  %v9736_v4 = vmul.f32 %v11498_v18, %v11572_v49  ;;  %v11573_v63 = vld [vmem:[#allocation118_spill] sm:$0xff]  ;;  %v9756_v18 = vmul.f32 %v11508_v33, %v11482_v2  ;;  %v11577_v49 = vld [vmem:[#allocation123_spill] sm:$0xff]  ;;  %v1417_v33 = vrot.slane %v9527_v56, 2  ;;  %v1419_v2 = vrot.slane %v9532_v43, 1 }
 0x3c9   : > { %11566 = vst [vmem:[#allocation128_spill] sm:$0xff] %v9720_v40  ;;  %v9740_v19 = vmul.f32 %v11500_v10, %v11573_v63  ;;  %v11574_v40 = vld [vmem:[#allocation119_spill] sm:$0xff]  ;;  %v9760_v10 = vmul.f32 %v11510_v9, %v11577_v49  ;;  %v1407_v63 = vrot.slane %v9504_v37, 7  ;;  %v1421_v9 = vrot.slane %v9541_v54, 7 }
 0x3ca   : > { %11568 = vst [vmem:[#allocation131_spill] sm:$0xff] %v9724_v61  ;;  %v9744_v42 = vmul.f32 %v11502_v22, %v11574_v40  ;;  %v11575_v61 = vld [vmem:[#allocation120_spill] sm:$0xff]  ;;  %v1409_v22 = vrot.slane %v9510_v59, 6  ;;  %v1411_v40 = vrot.slane %v9514_v8, 5  ;;  %v1423_v37 = vrot.slane %v9545_v32, 6 }
 0x3cb   : > { %11570 = vst [vmem:[#allocation129_spill] sm:$0xff] %v9728_v62  ;;  %v9748_v45 = vmul.f32 %v11504_v12, %v11575_v61  ;;  %v11576_v62 = vld [vmem:[#allocation121_spill] sm:$0xff]  ;;  %v1413_v12 = vrot.slane %v9519_v41, 4  ;;  %v1415_v61 = vrot.slane %v9523_v7, 3  ;;  %v1425_v59 = vrot.slane %v9549_v27, 5 }
 0x3cc   : > { %v9752_v44 = vmul.f32 %v11506_v31, %v11576_v62  ;;  %v1408_v31 = vsel %vm640_vm3, %v1407_v63, %v9500_v34  ;;  %v1427_v8 = vrot.slane %v9554_v13, 4  ;;  %v1422_v7 = vsel %vm640_vm3, %v1421_v9, %v9536_v55 }
 0x3cd   : > { %v1410_v49 = vsel %vm643_vm4, %v1409_v22, %v1408_v31  ;;  %v1429_v34 = vrot.slane %v9558_v0, 3  ;;  %v1431_v63 = vrot.slane %v9562_v46, 2  ;;  %v1424_v43 = vsel %vm643_vm4, %v1423_v37, %v1422_v7 }
 0x3ce   : > { %v1412_v41 = vsel %vm646_vm5, %v1411_v40, %v1410_v49  ;;  %v1433_v54 = vrot.slane %v9566_v60, 1  ;;  %v1435_v32 = vrot.slane %v9574_v1, 7  ;;  %v1426_v13 = vsel %vm646_vm5, %v1425_v59, %v1424_v43 }
 0x3cf   : > { %v1414_v56 = vsel %vm649_vm6, %v1413_v12, %v1412_v41  ;;  %v1437_v40 = vrot.slane %v9579_v50, 6  ;;  %v1439_v49 = vrot.slane %v9583_v20, 5  ;;  %v1428_v0 = vsel %vm649_vm6, %v1427_v8, %v1426_v13 }
 0x3d0   : > { %v1416_v27 = vsel %vm652_vm7, %v1415_v61, %v1414_v56  ;;  %v1436_v46 = vsel %vm640_vm3, %v1435_v32, %v9570_v6  ;;  %v1441_v22 = vrot.slane %v9587_v3, 4  ;;  %v1430_v61 = vsel %vm652_vm7, %v1429_v34, %v1428_v0 }
 0x3d1   : > { %v1418_v55 = vsel %vm655_vm8, %v1417_v33, %v1416_v27  ;;  %v1438_v1 = vsel %vm643_vm4, %v1437_v40, %v1436_v46  ;;  %v1443_v50 = vrot.slane %v9592_v39, 3  ;;  %v1432_v20 = vsel %vm655_vm8, %v1431_v63, %v1430_v61  ;;  %v11578_v27 = vld [vmem:[#allocation59_spill] sm:$0xff]  ;;  %v11579_v40 = vld [vmem:[#allocation6_spill] sm:$0xff]  ;;  %v11582_v61 = vld [vmem:[#allocation125_spill] sm:$0xff] }
 0x3d2   : > { %v9795_v60 = vsel %vm658_vm9, %v1419_v2, %v1418_v55  ;;  %v1440_v12 = vsel %vm646_vm5, %v1439_v49, %v1438_v1  ;;  %v1445_v31 = vrot.slane %v9596_v52, 2  ;;  %v1447_v33 = vrot.slane %v9600_v57, 1  ;;  %v11580_v55 = vld [vmem:[#allocation34_spill] sm:$0xff] }
 0x3d3   : > { %v9805_v6 = vsel %vm658_vm9, %v1433_v54, %v1432_v20  ;;  %v1442_v2 = vsel %vm649_vm6, %v1441_v22, %v1440_v12  ;;  %v1449_v3 = vrot.slane %v9608_v17, 7  ;;  %v1451_v9 = vrot.slane %v9612_v5, 6  ;;  %v11581_v46 = vld [vmem:[#allocation50_spill] sm:$0xff] }
 0x3d4   : > { %v1444_v37 = vsel %vm652_vm7, %v1443_v50, %v1442_v2  ;;  %v1453_v39 = vrot.slane %v9616_v23, 5  ;;  %v1455_v59 = vrot.slane %v9620_v58, 4  ;;  %v1457_v8 = vrot.slane %v9624_v53, 3  ;;  %v11583_v50 = vld [vmem:[#allocation126_spill] sm:$0xff] }
 0x3d5   : > { %v1446_v52 = vsel %vm655_vm8, %v1445_v31, %v1444_v37  ;;  %v1450_v57 = vsel %vm640_vm3, %v1449_v3, %v9604_v38  ;;  %v1459_v41 = vrot.slane %v9628_v24, 2  ;;  %v1461_v7 = vrot.slane %v9632_v26, 1  ;;  %v11585_v3 = vld [vmem:[#allocation130_spill] sm:$0xff] }
 0x3d6   : > { %v9820_v17 = vsel %vm658_vm9, %v1447_v33, %v1446_v52  ;;  %v1452_v5 = vsel %vm643_vm4, %v1451_v9, %v1450_v57  ;;  %v1463_v23 = vrot.slane %v9640_v16, 7  ;;  %v1465_v58 = vrot.slane %v9644_v30, 6  ;;  %v11584_v33 = vld [vmem:[#allocation127_spill] sm:$0xff] }
 0x3d7   : > { %v1454_v53 = vsel %vm646_vm5, %v1453_v39, %v1452_v5  ;;  %v1467_v34 = vrot.slane %v9648_v28, 5  ;;  %v1469_v63 = vrot.slane %v9652_v48, 4  ;;  %v1471_v38 = vrot.slane %v9656_v25, 3  ;;  %v11586_v39 = vld [vmem:[#allocation124_spill] sm:$0xff]  ;;  %v11588_v57 = vld [vmem:[#allocation131_spill] sm:$0xff] }
 0x3d8   : > { %v1456_v24 = vsel %vm649_vm6, %v1455_v59, %v1454_v53  ;;  %v1464_v26 = vsel %vm640_vm3, %v1463_v23, %v9636_v15  ;;  %v1473_v56 = vrot.slane %v9660_v29, 2  ;;  %v1475_v43 = vrot.slane %v9664_v36, 1  ;;  %v11589_v23 = vld [vmem:[#allocation129_spill] sm:$0xff] }
 0x3d9   : > { %v1458_v16 = vsel %vm652_vm7, %v1457_v8, %v1456_v24  ;;  %v1466_v30 = vsel %vm643_vm4, %v1465_v58, %v1464_v26  ;;  %v1477_v54 = vrot.slane %v9672_v47, 7  ;;  %v1479_v28 = vrot.slane %v9676_v11, 6  ;;  %v11587_v8 = vld [vmem:[#allocation128_spill] sm:$0xff] }
 0x3da   : > { %v1460_v48 = vsel %vm655_vm8, %v1459_v41, %v1458_v16  ;;  %v1468_v25 = vsel %vm646_vm5, %v1467_v34, %v1466_v30  ;;  %v1481_v32 = vrot.slane %v9680_v14, 5  ;;  %v1483_v15 = vrot.slane %v9684_v35, 4 }
 0x3db   : > { %v1462_v29 = vsel %vm658_vm9, %v1461_v7, %v1460_v48  ;;  %v1470_v36 = vsel %vm649_vm6, %v1469_v63, %v1468_v25  ;;  %v1478_v13 = vsel %vm640_vm3, %v1477_v54, %v11578_v27  ;;  %v1485_v49 = vrot.slane %v11579_v40, 3 }
 0x3dc   : > { %v1472_v47 = vsel %vm652_vm7, %v1471_v38, %v1470_v36  ;;  %v1480_v11 = vsel %vm643_vm4, %v1479_v28, %v1478_v13  ;;  %v1487_v0 = vrot.slane %v11580_v55, 2  ;;  %v1489_v22 = vrot.slane %v11581_v46, 1 }
 0x3dd   : > { %v1474_v14 = vsel %vm655_vm8, %v1473_v56, %v1472_v47  ;;  %v1482_v35 = vsel %vm646_vm5, %v1481_v32, %v1480_v11  ;;  %v1491_v1 = vrot.slane %v11582_v61, 7  ;;  %v1493_v20 = vrot.slane %v11583_v50, 6 }
 0x3de   : > { %v1476_v12 = vsel %vm658_vm9, %v1475_v43, %v1474_v14  ;;  %v1484_v31 = vsel %vm649_vm6, %v1483_v15, %v1482_v35  ;;  %v1495_v2 = vrot.slane %v11584_v33, 5  ;;  %v1497_v9 = vrot.slane %v11585_v3, 4 }
 0x3df   : > { %v1486_v37 = vsel %vm652_vm7, %v1485_v49, %v1484_v31  ;;  %v1492_v59 = vsel %vm640_vm3, %v1491_v1, %v11586_v39  ;;  %v1499_v52 = vrot.slane %v11587_v8, 3  ;;  %v1501_v41 = vrot.slane %v11588_v57, 2 }
 0x3e0   : > { %v1488_v7 = vsel %vm655_vm8, %v1487_v0, %v1486_v37  ;;  %v1494_v5 = vsel %vm643_vm4, %v1493_v20, %v1492_v59  ;;  %v1503_v58 = vrot.slane %v11589_v23, 1  ;;  %v1505_v53 = vrot.slane %v9736_v4, 7 }
 0x3e1   : > { %v1490_v34 = vsel %vm658_vm9, %v1489_v22, %v1488_v7  ;;  %v1496_v63 = vsel %vm646_vm5, %v1495_v2, %v1494_v5  ;;  %v1507_v38 = vrot.slane %v9740_v19, 6  ;;  %v1509_v24 = vrot.slane %v9744_v42, 5 }
 0x3e2   : > { %v1498_v26 = vsel %vm649_vm6, %v1497_v9, %v1496_v63  ;;  %v1506_v56 = vsel %vm640_vm3, %v1505_v53, %v9732_v21  ;;  %v1511_v43 = vrot.slane %v9748_v45, 4  ;;  %v1513_v16 = vrot.slane %v9752_v44, 3 }
 0x3e3   : > { %v1500_v30 = vsel %vm652_vm7, %v1499_v52, %v1498_v26  ;;  %v1508_v4 = vsel %vm643_vm4, %v1507_v38, %v1506_v56  ;;  %v1515_v54 = vrot.slane %v9756_v18, 2  ;;  %v1517_v28 = vrot.slane %v9760_v10, 1  ;;  %v11590_v56 = vld [vmem:[#allocation23_spill] sm:$0xff] }
 0x3e4   : > { %v1502_v19 = vsel %vm655_vm8, %v1501_v41, %v1500_v30  ;;  %v1510_v42 = vsel %vm646_vm5, %v1509_v24, %v1508_v4  ;;  %v1527_v48 = vsel %vm535_vm2, %v9795_v60, 0.0  ;;  %v1534_v45 = vsel %vm535_vm2, %v9805_v6, 0.0 }
 0x3e5   : > { %v1504_v21 = vsel %vm658_vm9, %v1503_v58, %v1502_v19  ;;  %v1512_v44 = vsel %vm649_vm6, %v1511_v43, %v1510_v42  ;;  %v1528_v25 = vrot.slane %v1527_v48, 4  ;;  %v1535_v32 = vrot.slane %v1534_v45, 4  ;;  %v11591_v43 = vld [vmem:[#allocation15_spill] sm:$0xff] }
 0x3e6   : > { %v1514_v18 = vsel %vm652_vm7, %v1513_v16, %v1512_v44  ;;  %v1541_v10 = vsel %vm535_vm2, %v9820_v17, 0.0  ;;  %v1548_v15 = vsel %vm535_vm2, %v1462_v29, 0.0  ;;  %v1555_v36 = vsel %vm535_vm2, %v1476_v12, 0.0 }
 0x3e7   : > { %v1516_v60 = vsel %vm655_vm8, %v1515_v54, %v1514_v18  ;;  %v1529_v27 = vadd.f32 %v1528_v25, %v1527_v48  ;;  %v1536_v13 = vadd.f32 %v1535_v32, %v1534_v45  ;;  %v1542_v6 = vrot.slane %v1541_v10, 4  ;;  %v11592_v45 = vld [vmem:[#allocation38_spill] sm:$0xff] }
 0x3e8   : > { %v1518_v40 = vsel %vm658_vm9, %v1517_v28, %v1516_v60  ;;  %v1549_v49 = vrot.slane %v1548_v15, 4  ;;  %v1556_v47 = vrot.slane %v1555_v36, 4  ;;  %v1562_v11 = vsel %vm535_vm2, %v1490_v34, 0.0  ;;  %v11594_v60 = vld [vmem:[#allocation3_spill] sm:$0xff] }
 0x3e9   : > { %v1530_v55 = vrot.slane %v1529_v27, 2  ;;  %v1537_v0 = vrot.slane %v1536_v13, 2  ;;  %v1543_v46 = vadd.f32 %v1542_v6, %v1541_v10  ;;  %v1563_v22 = vrot.slane %v1562_v11, 4  ;;  %v11596_v6 = vld [vmem:[#allocation29_spill] sm:$0xff] }
 0x3ea   : > { %v1550_v17 = vadd.f32 %v1549_v49, %v1548_v15  ;;  %v1557_v14 = vadd.f32 %v1556_v47, %v1555_v36  ;;  %v1569_v29 = vsel %vm535_vm2, %v1504_v21, 0.0  ;;  %v1576_v35 = vsel %vm535_vm2, %v1518_v40, 0.0  ;;  %v11593_v21 = vld [vmem:[#allocation57_spill] sm:$0xff]  ;;  %v11597_v40 = vld [vmem:[#allocation14_spill] sm:$0xff] }
 0x3eb   : > { %v1531_v61 = vadd.f32 %v1530_v55, %v1529_v27  ;;  %v1538_v1 = vadd.f32 %v1537_v0, %v1536_v13  ;;  %v1544_v50 = vrot.slane %v1543_v46, 2  ;;  %v1564_v20 = vadd.f32 %v1563_v22, %v1562_v11  ;;  %v11595_v27 = vld [vmem:[#allocation56_spill] sm:$0xff]  ;;  %v11598_v0 = vld [vmem:[#allocation13_spill] sm:$0xff] }
 0x3ec   : > { %v1551_v12 = vrot.slane %v1550_v17, 2  ;;  %v1558_v31 = vrot.slane %v1557_v14, 2  ;;  %v1570_v33 = vrot.slane %v1569_v29, 4  ;;  %v1577_v2 = vrot.slane %v1576_v35, 4 }
 0x3ed   : > { %v1532_v3 = vrot.slane %v1531_v61, 1  ;;  %v1539_v9 = vrot.slane %v1538_v1, 1  ;;  %v1545_v37 = vadd.f32 %v1544_v50, %v1543_v46  ;;  %v1565_v39 = vrot.slane %v1564_v20, 2  ;;  %v11599_v46 = vld [vmem:[#allocation52_spill] sm:$0xff] }
 0x3ee   : > { %v1552_v59 = vadd.f32 %v1551_v12, %v1550_v17  ;;  %v1559_v8 = vadd.f32 %v1558_v31, %v1557_v14  ;;  %v1571_v52 = vadd.f32 %v1570_v33, %v1569_v29  ;;  %v1578_v57 = vadd.f32 %v1577_v2, %v1576_v35  ;;  %v11600_v14 = vld [vmem:[#allocation43_spill] sm:$0xff]  ;;  %v11601_v29 = vld [vmem:[#allocation70_spill] sm:$0xff] }
 0x3ef   : > { %v1533_v41 = vadd.f32 %v1532_v3, %v1531_v61  ;;  %v1540_v7 = vadd.f32 %v1539_v9, %v1538_v1  ;;  %v1546_v5 = vrot.slane %v1545_v37, 1  ;;  %v1566_v23 = vadd.f32 %v1565_v39, %v1564_v20  ;;  %v11602_v61 = vld [vmem:[#allocation30_spill] sm:$0xff]  ;;  %v11604_v20 = vld [vmem:[#allocation16_spill] sm:$0xff]  ;;  %v11605_v12 = vld [vmem:[#allocation39_spill] sm:$0xff] }
 0x3f0   : > { %v1553_v58 = vrot.slane %v1552_v59, 1  ;;  %v1560_v53 = vrot.slane %v1559_v8, 1  ;;  %v1572_v34 = vrot.slane %v1571_v52, 2  ;;  %v1579_v63 = vrot.slane %v1578_v57, 2  ;;  %v11603_v1 = vld [vmem:[#allocation26_spill] sm:$0xff] }
 0x3f1   : > { %v1547_v38 = vadd.f32 %v1546_v5, %v1545_v37  ;;  %v1567_v24 = vrot.slane %v1566_v23, 1  ;;  %v4573_v26 = vrot.slane %v1540_v7, 7  ;;  %v9901_v16 = vmul.f32 %v11591_v43, %v11590_v56  ;;  %v11606_v9 = vld [vmem:[#allocation58_spill] sm:$0xff]  ;;  %v11610_v7 = vld [vmem:[#allocation68_spill] sm:$0xff] }
 0x3f2   : > { %v1554_v30 = vadd.f32 %v1553_v58, %v1552_v59  ;;  %v1561_v4 = vadd.f32 %v1560_v53, %v1559_v8  ;;  %v1573_v54 = vadd.f32 %v1572_v34, %v1571_v52  ;;  %v1580_v28 = vadd.f32 %v1579_v63, %v1578_v57  ;;  %v11607_v39 = vld [vmem:[#allocation62_spill] sm:$0xff]  ;;  %v11609_v57 = vld [vmem:[#allocation64_spill] sm:$0xff]  ;;  %v11611_v58 = vld [vmem:[#allocation69_spill] sm:$0xff] }
 0x3f3   : > { %v1568_v19 = vadd.f32 %v1567_v24, %v1566_v23  ;;  %v4574_v42 = vsel %vm640_vm3, %v4573_v26, %v1533_v41  ;;  %v4575_v48 = vrot.slane %v1547_v38, 6  ;;  %v9906_v44 = vmul.f32 %v11593_v21, %v11592_v45  ;;  %v11608_v8 = vld [vmem:[#allocation2_spill] sm:$0xff]  ;;  %v11612_v34 = vld [vmem:[#allocation65_spill] sm:$0xff]  ;;  %v11614_v56 = vld [vmem:[#allocation28_spill] sm:$0xff] }
 0x3f4   : > { %v1574_v25 = vrot.slane %v1573_v54, 1  ;;  %v1581_v32 = vrot.slane %v1580_v28, 1  ;;  %v4577_v18 = vrot.slane %v1554_v30, 5  ;;  %v4579_v10 = vrot.slane %v1561_v4, 4  ;;  %v11613_v38 = vld [vmem:[#allocation66_spill] sm:$0xff]  ;;  %v11615_v4 = vld [vmem:[#allocation7_spill] sm:$0xff] }
 0x3f5   : > { %v4576_v15 = vsel %vm643_vm4, %v4575_v48, %v4574_v42  ;;  %v4581_v36 = vrot.slane %v1568_v19, 3  ;;  %v9911_v13 = vmul.f32 %v11595_v27, %v11594_v60  ;;  %v9915_v49 = vmul.f32 %v11597_v40, %v11596_v6  ;;  %v11617_v42 = vld [vmem:[#allocation10_spill] sm:$0xff] }
 0x3f6   : > { %v1575_v47 = vadd.f32 %v1574_v25, %v1573_v54  ;;  %v1582_v11 = vadd.f32 %v1581_v32, %v1580_v28  ;;  %v4578_v55 = vsel %vm646_vm5, %v4577_v18, %v4576_v15  ;;  %v9920_v22 = vmul.f32 %v11599_v46, %v11598_v0  ;;  %v11616_v28 = vld [vmem:[#allocation42_spill] sm:$0xff]  ;;  %v11619_v32 = vld [vmem:[#allocation60_spill] sm:$0xff] }
 0x3f7   : > { %v4580_v17 = vsel %vm649_vm6, %v4579_v10, %v4578_v55  ;;  %v9925_v35 = vmul.f32 %v11601_v29, %v11600_v14  ;;  %v9929_v50 = vmul.f32 %v11603_v1, %v11602_v61  ;;  %v9933_v31 = vmul.f32 %v11605_v12, %v11604_v20  ;;  %v11618_v21 = vld [vmem:[#allocation46_spill] sm:$0xff]  ;;  %v11620_v10 = vld [vmem:[#allocation4_spill] sm:$0xff]  ;;  %v11625_v29 = vld [vmem:[#allocation75_spill] sm:$0xff] }
 0x3f8   : > { %v4582_v33 = vsel %vm652_vm7, %v4581_v36, %v4580_v17  ;;  %v4583_v2 = vrot.slane %v1575_v47, 2  ;;  %v4585_v3 = vrot.slane %v1582_v11, 1  ;;  %v9938_v37 = vmul.f32 %v11591_v43, %v11606_v9  ;;  %v11621_v36 = vld [vmem:[#allocation71_spill] sm:$0xff]  ;;  %v11622_v40 = vld [vmem:[#allocation54_spill] sm:$0xff]  ;;  %v11623_v11 = vld [vmem:[#allocation73_spill] sm:$0xff] }
 0x3f9   : > { %v9942_v59 = vmul.f32 %v11607_v39, %v11592_v45  ;;  %v9946_v52 = vmul.f32 %v11608_v8, %v11594_v60  ;;  %v9950_v41 = vmul.f32 %v11609_v57, %v11596_v6  ;;  %v9954_v5 = vmul.f32 %v11610_v7, %v11598_v0  ;;  %v11624_v46 = vld [vmem:[#allocation74_spill] sm:$0xff]  ;;  %v11626_v12 = vld [vmem:[#allocation76_spill] sm:$0xff]  ;;  %v11629_v8 = vld [vmem:[#allocation81_spill] sm:$0xff] }
 0x3fa   : > { %v4584_v23 = vsel %vm655_vm8, %v4583_v2, %v4582_v33  ;;  %v9959_v53 = vmul.f32 %v11611_v58, %v11600_v14  ;;  %v9963_v63 = vmul.f32 %v11612_v34, %v11602_v61  ;;  %v9967_v24 = vmul.f32 %v11613_v38, %v11604_v20  ;;  %v11627_v2 = vld [vmem:[#allocation77_spill] sm:$0xff]  ;;  %v11628_v9 = vld [vmem:[#allocation78_spill] sm:$0xff] }
 0x3fb   : > { %v4586_v26 = vsel %vm658_vm9, %v4585_v3, %v4584_v23  ;;  %v9972_v30 = vmul.f32 %v11591_v43, %v11614_v56  ;;  %v9976_v54 = vmul.f32 %v11615_v4, %v11592_v45  ;;  %v9980_v19 = vmul.f32 %v11616_v28, %v11594_v60  ;;  %v11630_v7 = vld [vmem:[#allocation49_spill] sm:$0xff]  ;;  %v11631_v58 = vld [vmem:[#allocation82_spill] sm:$0xff]  ;;  %v11634_v28 = vld [vmem:[#allocation91_spill] sm:$0xff] }
 0x3fc   : > { %4995 = vmatpush.xpose.msk.msra.mxu1 %vm535_vm2, %v4586_v26  ;;  %v9985_v48 = vmul.f32 %v11617_v42, %v11596_v6  ;;  %v9989_v25 = vmul.f32 %v11618_v21, %v11598_v0  ;;  %v9993_v18 = vmul.f32 %v11619_v32, %v11600_v14  ;;  %v9997_v15 = vmul.f32 %v11620_v10, %v11602_v61  ;;  %v11632_v38 = vld [vmem:[#allocation89_spill] sm:$0xff]  ;;  %v11633_v56 = vld [vmem:[#allocation90_spill] sm:$0xff] }
 0x3fd   : > { %v10001_v27 = vmul.f32 %v11621_v36, %v11604_v20  ;;  %v10005_v47 = vmul.f32 %v11591_v43, %v11622_v40  ;;  %v10009_v55 = vmul.f32 %v11623_v11, %v11592_v45  ;;  %v10013_v17 = vmul.f32 %v11624_v46, %v11594_v60  ;;  %v11635_v21 = vld [vmem:[#allocation93_spill] sm:$0xff]  ;;  %v11636_v10 = vld [vmem:[#allocation94_spill] sm:$0xff]  ;;  %v11637_v40 = vld [vmem:[#allocation67_spill] sm:$0xff] }
 0x3fe   : > { %v10017_v1 = vmul.f32 %v11625_v29, %v11596_v6  ;;  %v10021_v33 = vmul.f32 %v11626_v12, %v11598_v0  ;;  %v10025_v3 = vmul.f32 %v11627_v2, %v11600_v14  ;;  %v10029_v39 = vmul.f32 %v11628_v9, %v11602_v61  ;;  %v11638_v46 = vld [vmem:[#allocation8_spill] sm:$0xff]  ;;  %v11640_v12 = vld [vmem:[#allocation21_spill] sm:$0xff]  ;;  %v11641_v9 = vld [vmem:[#allocation103_spill] sm:$0xff] }
 0x3ff   : > { %v10033_v57 = vmul.f32 %v11629_v8, %v11604_v20  ;;  %v10037_v23 = vmul.f32 %v11591_v43, %v11630_v7  ;;  %v10041_v34 = vmul.f32 %v11631_v58, %v11592_v45  ;;  %v10045_v26 = vmul.f32 %v11632_v38, %v11594_v60  ;;  %v11642_v7 = vld [vmem:[#allocation104_spill] sm:$0xff]  ;;  %v11643_v38 = vld [vmem:[#allocation105_spill] sm:$0xff] }
 0x400   : > { %v10049_v4 = vmul.f32 %v11633_v56, %v11596_v6  ;;  %v10053_v42 = vmul.f32 %v11634_v28, %v11598_v0  ;;  %v10057_v32 = vmul.f32 %v11635_v21, %v11600_v14  ;;  %v10061_v36 = vmul.f32 %v11636_v10, %v11602_v61  ;;  %v11645_v28 = vld [vmem:[#allocation106_spill] sm:$0xff]  ;;  %v11647_v10 = vld [vmem:[#allocation107_spill] sm:$0xff] }
 0x401   : > { %v10065_v11 = vmul.f32 %v11637_v40, %v11604_v20  ;;  %v10069_v29 = vmul.f32 %v11591_v43, %v11638_v46  ;;  %v10073_v2 = vmul.f32 %v11640_v12, %v11592_v45  ;;  %v10077_v8 = vmul.f32 %v11641_v9, %v11594_v60  ;;  %v11649_v46 = vld [vmem:[#allocation108_spill] sm:$0xff] }
 0x402   : > { %v10081_v58 = vmul.f32 %v11642_v7, %v11596_v6  ;;  %v10085_v56 = vmul.f32 %v11643_v38, %v11598_v0  ;;  %v10089_v21 = vmul.f32 %v11645_v28, %v11600_v14  ;;  %v10093_v40 = vmul.f32 %v11647_v10, %v11602_v61  ;;  %v11651_v9 = vld [vmem:[#allocation72_spill] sm:$0xff] }
 0x403   : > { %11639 = vst [vmem:[#allocation132_spill] sm:$0xff] %v10069_v29  ;;  %v10097_v12 = vmul.f32 %v11649_v46, %v11604_v20  ;;  %v10101_v7 = vmul.f32 %v11591_v43, %v11651_v9  ;;  %v11653_v29 = vld [vmem:[#allocation109_spill] sm:$0xff] }
 0x404   : > { %11644 = vst [vmem:[#allocation133_spill] sm:$0xff] %v10085_v56  ;;  %v10105_v38 = vmul.f32 %v11653_v29, %v11592_v45  ;;  %v11655_v56 = vld [vmem:[#allocation110_spill] sm:$0xff] }
 0x405   : > { %11646 = vst [vmem:[#allocation79_spill] sm:$0xff] %v10089_v21  ;;  %v10109_v28 = vmul.f32 %v11655_v56, %v11594_v60  ;;  %v11656_v21 = vld [vmem:[#allocation111_spill] sm:$0xff] }
 0x406   : > { %11648 = vst [vmem:[#allocation37_spill] sm:$0xff] %v10093_v40  ;;  %v10113_v10 = vmul.f32 %v11656_v21, %v11596_v6  ;;  %v11658_v40 = vld [vmem:[#allocation113_spill] sm:$0xff]  ;;  %v10133_v21 = vmul.f32 %v11591_v43, %v11571_v51  ;;  %v10153_v51 = vmul.f32 %v11576_v62, %v11600_v14  ;;  %v11669_v43 = vld [vmem:[#allocation122_spill] sm:$0xff]  ;;  %v957_v62 = vrot.slane %v9929_v50, 2 }
 0x407   : > { %11650 = vst [vmem:[#allocation61_spill] sm:$0xff] %v10097_v12  ;;  %v10117_v46 = vmul.f32 %v11658_v40, %v11598_v0  ;;  %v11660_v12 = vld [vmem:[#allocation114_spill] sm:$0xff] }
 0x408   : > { %11652 = vst [vmem:[#allocation31_spill] sm:$0xff] %v10101_v7  ;;  %v10121_v9 = vmul.f32 %v11660_v12, %v11600_v14  ;;  %v11662_v7 = vld [vmem:[#allocation115_spill] sm:$0xff]  ;;  %v959_v14 = vrot.slane %v9933_v31, 1 }
 0x409   : > { %11654 = vst [vmem:[#allocation33_spill] sm:$0xff] %v10105_v38  ;;  %v10125_v29 = vmul.f32 %v11662_v7, %v11602_v61  ;;  %v11664_v38 = vld [vmem:[#allocation116_spill] sm:$0xff] }
 0x40a   : > { %11657 = vst [vmem:[#allocation44_spill] sm:$0xff] %v10113_v10  ;;  %v10129_v56 = vmul.f32 %v11664_v38, %v11604_v20  ;;  %v11665_v10 = vld [vmem:[#allocation117_spill] sm:$0xff] }
 0x40b   : > { %11659 = vst [vmem:[#allocation53_spill] sm:$0xff] %v10117_v46  ;;  %v10137_v40 = vmul.f32 %v11665_v10, %v11592_v45  ;;  %v11666_v46 = vld [vmem:[#allocation118_spill] sm:$0xff]  ;;  %v10157_v45 = vmul.f32 %v11669_v43, %v11602_v61  ;;  %v11670_v10 = vld [vmem:[#allocation123_spill] sm:$0xff]  ;;  %v963_v43 = vrot.slane %v9946_v52, 6 }
 0x40c   : > { %11661 = vst [vmem:[#allocation36_spill] sm:$0xff] %v10121_v9  ;;  %v10141_v12 = vmul.f32 %v11666_v46, %v11594_v60  ;;  %v11667_v9 = vld [vmem:[#allocation119_spill] sm:$0xff]  ;;  %v10161_v60 = vmul.f32 %v11670_v10, %v11604_v20  ;;  %v947_v46 = vrot.slane %v9906_v44, 7  ;;  %v961_v20 = vrot.slane %v9942_v59, 7 }
 0x40d   : > { %11663 = vst [vmem:[#allocation45_spill] sm:$0xff] %v10125_v29  ;;  %v10145_v7 = vmul.f32 %v11667_v9, %v11596_v6  ;;  %v11668_v29 = vld [vmem:[#allocation120_spill] sm:$0xff]  ;;  %v949_v6 = vrot.slane %v9911_v13, 6  ;;  %v951_v9 = vrot.slane %v9915_v49, 5  ;;  %v965_v44 = vrot.slane %v9950_v41, 5 }
 0x40e   : > { %v10149_v38 = vmul.f32 %v11668_v29, %v11598_v0  ;;  %v953_v0 = vrot.slane %v9920_v22, 4  ;;  %v955_v29 = vrot.slane %v9925_v35, 3  ;;  %v948_v61 = vsel %vm640_vm3, %v947_v46, %v9901_v16 }
 0x40f   : > { %v950_v13 = vsel %vm643_vm4, %v949_v6, %v948_v61  ;;  %v967_v49 = vrot.slane %v9954_v5, 4  ;;  %v969_v22 = vrot.slane %v9959_v53, 3  ;;  %v971_v35 = vrot.slane %v9963_v63, 2 }
 0x410   : > { %v952_v50 = vsel %vm646_vm5, %v951_v9, %v950_v13  ;;  %v962_v31 = vsel %vm640_vm3, %v961_v20, %v9938_v37  ;;  %v973_v16 = vrot.slane %v9967_v24, 1  ;;  %v975_v59 = vrot.slane %v9976_v54, 7 }
 0x411   : > { %v954_v52 = vsel %vm649_vm6, %v953_v0, %v952_v50  ;;  %v964_v41 = vsel %vm643_vm4, %v963_v43, %v962_v31  ;;  %v977_v10 = vrot.slane %v9980_v19, 6  ;;  %v979_v5 = vrot.slane %v9985_v48, 5 }
 0x412   : > { %v956_v53 = vsel %vm652_vm7, %v955_v29, %v954_v52  ;;  %v966_v63 = vsel %vm646_vm5, %v965_v44, %v964_v41  ;;  %v976_v46 = vsel %vm640_vm3, %v975_v59, %v9972_v30  ;;  %v981_v37 = vrot.slane %v9989_v25, 4  ;;  %v11671_v41 = vld [vmem:[#allocation132_spill] sm:$0xff] }
 0x413   : > { %v958_v24 = vsel %vm655_vm8, %v957_v62, %v956_v53  ;;  %v968_v54 = vsel %vm649_vm6, %v967_v49, %v966_v63  ;;  %v978_v6 = vsel %vm643_vm4, %v977_v10, %v976_v46  ;;  %v983_v9 = vrot.slane %v9993_v18, 3  ;;  %v11673_v53 = vld [vmem:[#allocation79_spill] sm:$0xff]  ;;  %v11674_v46 = vld [vmem:[#allocation37_spill] sm:$0xff] }
 0x414   : > { %v10198_v19 = vsel %vm658_vm9, %v959_v14, %v958_v24  ;;  %v970_v48 = vsel %vm652_vm7, %v969_v22, %v968_v54  ;;  %v980_v0 = vsel %vm646_vm5, %v979_v5, %v978_v6  ;;  %v985_v29 = vrot.slane %v9997_v15, 2  ;;  %v11675_v24 = vld [vmem:[#allocation61_spill] sm:$0xff] }
 0x415   : > { %v972_v30 = vsel %vm655_vm8, %v971_v35, %v970_v48  ;;  %v982_v25 = vsel %vm649_vm6, %v981_v37, %v980_v0  ;;  %v987_v62 = vrot.slane %v10001_v27, 1  ;;  %v989_v61 = vrot.slane %v10009_v55, 7  ;;  %v11676_v6 = vld [vmem:[#allocation33_spill] sm:$0xff] }
 0x416   : > { %v10208_v20 = vsel %vm658_vm9, %v973_v16, %v972_v30  ;;  %v984_v18 = vsel %vm652_vm7, %v983_v9, %v982_v25  ;;  %v991_v14 = vrot.slane %v10013_v17, 6  ;;  %v993_v43 = vrot.slane %v10017_v1, 5  ;;  %v11677_v30 = vld [vmem:[#allocation44_spill] sm:$0xff] }
 0x417   : > { %v986_v44 = vsel %vm655_vm8, %v985_v29, %v984_v18  ;;  %v990_v15 = vsel %vm640_vm3, %v989_v61, %v10005_v47  ;;  %v995_v13 = vrot.slane %v10021_v33, 4  ;;  %v997_v27 = vrot.slane %v10025_v3, 3  ;;  %v11678_v18 = vld [vmem:[#allocation31_spill] sm:$0xff] }
 0x418   : > { %v10219_v55 = vsel %vm658_vm9, %v987_v62, %v986_v44  ;;  %v992_v49 = vsel %vm643_vm4, %v991_v14, %v990_v15  ;;  %v999_v22 = vrot.slane %v10029_v39, 2  ;;  %v1001_v17 = vrot.slane %v10033_v57, 1 }
 0x419   : > { %v994_v1 = vsel %vm646_vm5, %v993_v43, %v992_v49  ;;  %v1003_v35 = vrot.slane %v10041_v34, 7  ;;  %v1005_v50 = vrot.slane %v10045_v26, 6  ;;  %v1007_v47 = vrot.slane %v10049_v4, 5  ;;  %v11679_v43 = vld [vmem:[#allocation53_spill] sm:$0xff] }
 0x41a   : > { %v996_v33 = vsel %vm649_vm6, %v995_v13, %v994_v1  ;;  %v1009_v3 = vrot.slane %v10053_v42, 4  ;;  %v1011_v31 = vrot.slane %v10057_v32, 3  ;;  %v1013_v16 = vrot.slane %v10061_v36, 2 }
 0x41b   : > { %v998_v39 = vsel %vm652_vm7, %v997_v27, %v996_v33  ;;  %v1004_v57 = vsel %vm640_vm3, %v1003_v35, %v10037_v23  ;;  %v1015_v59 = vrot.slane %v10065_v11, 1  ;;  %v1017_v34 = vrot.slane %v10073_v2, 7  ;;  %v11672_v23 = vld [vmem:[#allocation133_spill] sm:$0xff]  ;;  %v11680_v27 = vld [vmem:[#allocation36_spill] sm:$0xff] }
 0x41c   : > { %v1000_v26 = vsel %vm655_vm8, %v999_v22, %v998_v39  ;;  %v1006_v4 = vsel %vm643_vm4, %v1005_v50, %v1004_v57  ;;  %v1019_v52 = vrot.slane %v10077_v8, 6  ;;  %v1021_v42 = vrot.slane %v10081_v58, 5  ;;  %v11681_v22 = vld [vmem:[#allocation45_spill] sm:$0xff] }
 0x41d   : > { %v1002_v32 = vsel %vm658_vm9, %v1001_v17, %v1000_v26  ;;  %v1008_v36 = vsel %vm646_vm5, %v1007_v47, %v1006_v4  ;;  %v1018_v10 = vsel %vm640_vm3, %v1017_v34, %v11671_v41  ;;  %v1023_v5 = vrot.slane %v11672_v23, 4 }
 0x41e   : > { %v1010_v11 = vsel %vm649_vm6, %v1009_v3, %v1008_v36  ;;  %v1020_v2 = vsel %vm643_vm4, %v1019_v52, %v1018_v10  ;;  %v1025_v63 = vrot.slane %v11673_v53, 3  ;;  %v1027_v37 = vrot.slane %v11674_v46, 2 }
 0x41f   : > { %v1012_v8 = vsel %vm652_vm7, %v1011_v31, %v1010_v11  ;;  %v1022_v58 = vsel %vm646_vm5, %v1021_v42, %v1020_v2  ;;  %v1029_v54 = vrot.slane %v11675_v24, 1  ;;  %v1031_v9 = vrot.slane %v11676_v6, 7 }
 0x420   : > { %v1014_v48 = vsel %vm655_vm8, %v1013_v16, %v1012_v8  ;;  %v1024_v0 = vsel %vm649_vm6, %v1023_v5, %v1022_v58  ;;  %v1033_v29 = vrot.slane %v10109_v28, 6  ;;  %v1035_v25 = vrot.slane %v11677_v30, 5 }
 0x421   : > { %v1016_v62 = vsel %vm658_vm9, %v1015_v59, %v1014_v48  ;;  %v1026_v61 = vsel %vm652_vm7, %v1025_v63, %v1024_v0  ;;  %v1032_v14 = vsel %vm640_vm3, %v1031_v9, %v11678_v18  ;;  %v1037_v44 = vrot.slane %v11679_v43, 4 }
 0x422   : > { %v1028_v15 = vsel %vm655_vm8, %v1027_v37, %v1026_v61  ;;  %v1034_v13 = vsel %vm643_vm4, %v1033_v29, %v1032_v14  ;;  %v1039_v49 = vrot.slane %v11680_v27, 3  ;;  %v1041_v17 = vrot.slane %v11681_v22, 2 }
 0x423   : > { %v1030_v28 = vsel %vm658_vm9, %v1029_v54, %v1028_v15  ;;  %v1036_v1 = vsel %vm646_vm5, %v1035_v25, %v1034_v13  ;;  %v1043_v35 = vrot.slane %v10129_v56, 1  ;;  %v1045_v50 = vrot.slane %v10137_v40, 7 }
 0x424   : > { %v1038_v47 = vsel %vm649_vm6, %v1037_v44, %v1036_v1  ;;  %v1047_v33 = vrot.slane %v10141_v12, 6  ;;  %v1049_v3 = vrot.slane %v10145_v7, 5  ;;  %v1051_v31 = vrot.slane %v10149_v38, 4  ;;  %v4725_v1 = vld [vmem:[%s10353_s3 + $0x10] sm:$0xff] }
 0x425   : > { %v1040_v16 = vsel %vm652_vm7, %v1039_v49, %v1038_v47  ;;  %v1046_v39 = vsel %vm640_vm3, %v1045_v50, %v10133_v21  ;;  %v1053_v57 = vrot.slane %v10153_v51, 3  ;;  %v1055_v59 = vrot.slane %v10157_v45, 2 }
 0x426   : > { %v1042_v56 = vsel %vm655_vm8, %v1041_v17, %v1040_v16  ;;  %v1048_v40 = vsel %vm643_vm4, %v1047_v33, %v1046_v39  ;;  %v1057_v34 = vrot.slane %v10161_v60, 1  ;;  %v1067_v12 = vsel %vm535_vm2, %v10198_v19, 0.0 }
 0x427   : > { %v1044_v7 = vsel %vm658_vm9, %v1043_v35, %v1042_v56  ;;  %v1050_v38 = vsel %vm646_vm5, %v1049_v3, %v1048_v40  ;;  %v1068_v26 = vrot.slane %v1067_v12, 4  ;;  %v1074_v21 = vsel %vm535_vm2, %v10208_v20, 0.0 }
 0x428   : > { %v1052_v51 = vsel %vm649_vm6, %v1051_v31, %v1050_v38  ;;  %v1075_v45 = vrot.slane %v1074_v21, 4  ;;  %v1081_v4 = vsel %vm535_vm2, %v10219_v55, 0.0  ;;  %v1088_v52 = vsel %vm535_vm2, %v1002_v32, 0.0 }
 0x429   : > { %v1054_v60 = vsel %vm652_vm7, %v1053_v57, %v1052_v51  ;;  %v1069_v42 = vadd.f32 %v1068_v26, %v1067_v12  ;;  %v1082_v19 = vrot.slane %v1081_v4, 4  ;;  %v1089_v36 = vrot.slane %v1088_v52, 4 }
 0x42a   : > { %v1056_v41 = vsel %vm655_vm8, %v1055_v59, %v1054_v60  ;;  %v1076_v10 = vadd.f32 %v1075_v45, %v1074_v21  ;;  %v1095_v23 = vsel %vm535_vm2, %v1016_v62, 0.0  ;;  %v1102_v20 = vsel %vm535_vm2, %v1030_v28, 0.0  ;;  %v4723_v28 = vld [vmem:[%s10353_s3] sm:$0xff] }
 0x42b   : > { %v1058_v5 = vsel %vm658_vm9, %v1057_v34, %v1056_v41  ;;  %v1070_v11 = vrot.slane %v1069_v42, 2  ;;  %v1083_v2 = vadd.f32 %v1082_v19, %v1081_v4  ;;  %v1090_v53 = vadd.f32 %v1089_v36, %v1088_v52  ;;  %v4724_v19 = vld [vmem:[%s10353_s3 + $0x8] sm:$0xff]  ;;  %v4726_v36 = vld [vmem:[%s10353_s3 + $0x18] sm:$0xff] }
 0x42c   : > { %v1077_v55 = vrot.slane %v1076_v10, 2  ;;  %v1096_v63 = vrot.slane %v1095_v23, 4  ;;  %v1103_v32 = vrot.slane %v1102_v20, 4  ;;  %v1109_v46 = vsel %vm535_vm2, %v1044_v7, 0.0 }
 0x42d   : > { %v1071_v37 = vadd.f32 %v1070_v11, %v1069_v42  ;;  %v1084_v8 = vrot.slane %v1083_v2, 2  ;;  %v1091_v58 = vrot.slane %v1090_v53, 2  ;;  %v1110_v24 = vrot.slane %v1109_v46, 4  ;;  %v4720_v11 = vld [vmem:[%s10352_s2 + $0x8] sm:$0xff] }
 0x42e   : > { %v1078_v54 = vadd.f32 %v1077_v55, %v1076_v10  ;;  %v1097_v6 = vadd.f32 %v1096_v63, %v1095_v23  ;;  %v1104_v9 = vadd.f32 %v1103_v32, %v1102_v20  ;;  %v1116_v48 = vsel %vm535_vm2, %v1058_v5, 0.0  ;;  %v4719_v5 = vld [vmem:[%s10352_s2] sm:$0xff] }
 0x42f   : > { %v1072_v0 = vrot.slane %v1071_v37, 1  ;;  %v1085_v29 = vadd.f32 %v1084_v8, %v1083_v2  ;;  %v1092_v30 = vadd.f32 %v1091_v58, %v1090_v53  ;;  %v1111_v25 = vadd.f32 %v1110_v24, %v1109_v46  ;;  %v4721_v2 = vld [vmem:[%s10352_s2 + $0x10] sm:$0xff]  ;;  %v4722_v53 = vld [vmem:[%s10352_s2 + $0x18] sm:$0xff]  ;;  %v4804_v32 = vld [vmem:[%s308_s17] sm:$0xff] }
 0x430   : > { %v1079_v62 = vrot.slane %v1078_v54, 1  ;;  %v1098_v61 = vrot.slane %v1097_v6, 2  ;;  %v1105_v18 = vrot.slane %v1104_v9, 2  ;;  %v1117_v14 = vrot.slane %v1116_v48, 4  ;;  %v4805_v24 = vld [vmem:[%s308_s17 + $0x8] sm:$0xff] }
 0x431   : > { %v1073_v43 = vadd.f32 %v1072_v0, %v1071_v37  ;;  %v1086_v44 = vrot.slane %v1085_v29, 1  ;;  %v1093_v15 = vrot.slane %v1092_v30, 1  ;;  %v1112_v13 = vrot.slane %v1111_v25, 2  ;;  %v4806_v0 = vld [vmem:[%s308_s17 + $0x10] sm:$0xff] }
 0x432   : > { %v1080_v27 = vadd.f32 %v1079_v62, %v1078_v54  ;;  %v1099_v49 = vadd.f32 %v1098_v61, %v1097_v6  ;;  %v1106_v22 = vadd.f32 %v1105_v18, %v1104_v9  ;;  %v1118_v17 = vadd.f32 %v1117_v14, %v1116_v48  ;;  %v4807_v61 = vld [vmem:[%s308_s17 + $0x18] sm:$0xff] }
 0x433   : > { %v1087_v35 = vadd.f32 %v1086_v44, %v1085_v29  ;;  %v1094_v50 = vadd.f32 %v1093_v15, %v1092_v30  ;;  %v1113_v47 = vadd.f32 %v1112_v13, %v1111_v25  ;;  %v5197_v39 = vmov 0  }
 0x434   : > { %v1100_v33 = vrot.slane %v1099_v49, 1  ;;  %v1107_v3 = vrot.slane %v1106_v22, 1  ;;  %v1119_v31 = vrot.slane %v1118_v17, 2  ;;  %v4551_v16 = vrot.slane %v1080_v27, 7  ;;  %5043 = vset.pattern.permute.xlu0 %v5197_v39  ;;  %5044 = vset.pattern.permute.xlu1 %v5197_v39 }
 0x435   : > { %v1114_v57 = vrot.slane %v1113_v47, 1  ;;  %v4553_v59 = vrot.slane %v1087_v35, 6  ;;  %v4555_v56 = vrot.slane %v1094_v50, 5  ;;  %4729 = vperm.xlu0 %5043, %v4723_v28   ;;  %4739 = vperm.xlu1 %5044, %v4725_v1  }
 0x436   : > { %v1101_v40 = vadd.f32 %v1100_v33, %v1099_v49  ;;  %v1108_v34 = vadd.f32 %v1107_v3, %v1106_v22  ;;  %v1120_v12 = vadd.f32 %v1119_v31, %v1118_v17  ;;  %v4552_v7 = vsel %vm640_vm3, %v4551_v16, %v1073_v43 }
 0x437   : > { %v1115_v38 = vadd.f32 %v1114_v57, %v1113_v47  ;;  %v4554_v26 = vsel %vm643_vm4, %v4553_v59, %v4552_v7  ;;  %vm4812_vm3 = vcmask 523264  }
 0x438   : > { %v1121_v21 = vrot.slane %v1120_v12, 1  ;;  %v4556_v51 = vsel %vm646_vm5, %v4555_v56, %v4554_v26  ;;  %v4557_v45 = vrot.slane %v1101_v40, 4  ;;  %v4559_v4 = vrot.slane %v1108_v34, 3 }
 0x439   : > { %v4561_v42 = vrot.slane %v1115_v38, 2 }
 0x43a   : > { %v1122_v52 = vadd.f32 %v1121_v21, %v1120_v12  ;;  %v4558_v60 = vsel %vm649_vm6, %v4557_v45, %v4556_v51 }
 0x43b   : > { %v4560_v41 = vsel %vm652_vm7, %v4559_v4, %v4558_v60 }
 0x43c   : > { %v4562_v10 = vsel %vm655_vm8, %v4561_v42, %v4560_v41  ;;  %v4563_v23 = vrot.slane %v1122_v52, 1 }
 0x43d   : > { %4734 = vperm.xlu0 %5043, %v4724_v19   ;;  %4744 = vperm.xlu1 %5044, %v4726_v36  }
 0x43e   : > { %v4564_v20 = vsel %vm658_vm9, %v4563_v23, %v4562_v10 }
 0x43f   : > { %4996 = vmatpush.xpose.msk.msra.mxu1 %vm535_vm2, %v4564_v20 }
 0x442   : > { %4997 = vmatmul.msk.f32.vlgmr.msra.gmra.mxu1 %vm535_vm2, %v4719_v5 }
 0x44a   : > { %4998 = vmatmul.msk.f32.gmra.mxu1 %vm535_vm2, %v4720_v11 }
 0x452   : > { %4999 = vmatmul.msk.f32.gmra.mxu1 %vm535_vm2, %v4721_v2 }
 0x45a   : > { %5000 = vmatmul.msk.f32.gmra.mxu1 %vm535_vm2, %v4722_v53 }
 0x4a7   : > { %v4730_v55 = vpop.permute.xlu0 %4729  ;;  %v4740_v9 = vpop.permute.xlu1 %4739 }
 0x4af   : > { %v4735_v8 = vpop.permute.xlu0 %4734  ;;  %v4745_v25 = vpop.permute.xlu1 %4744 }
 0x4bf   : > { %v4792_v63 = vpop.f32.mrf.mxu1 }
 0x4c0   : > { %v4793_v46 = vadd.f32 %v4792_v63, %v4730_v55 }
 0x4c2   : > { %v4808_v37 = vadd.f32 %v4804_v32, %v4793_v46 }
 0x4c4   : > { %4813 = vst.msk [vmem:[%s313_s20] sm:$0xff] %vm4812_vm3, %v4808_v37 }
 0x4c7   : > { %v4795_v58 = vpop.f32.mrf.mxu1 }
 0x4c8   : > { %v4796_v54 = vadd.f32 %v4795_v58, %v4735_v8 }
 0x4ca   : > { %v4809_v6 = vadd.f32 %v4805_v24, %v4796_v54 }
 0x4cc   : > { %4814 = vst.msk [vmem:[%s313_s20 + $0x8] sm:$0xff] %vm4812_vm3, %v4809_v6 }
 0x4cf   : > { %v4798_v48 = vpop.f32.mrf.mxu1 }
 0x4d0   : > { %v4799_v29 = vadd.f32 %v4798_v48, %v4740_v9 }
 0x4d2   : > { %v4810_v30 = vadd.f32 %v4806_v0, %v4799_v29 }
 0x4d4   : > { %4815 = vst.msk [vmem:[%s313_s20 + $0x10] sm:$0xff] %vm4812_vm3, %v4810_v30 }
 0x4d7   : > { %v4801_v62 = vpop.f32.mrf.mxu1 }
 0x4d8   : > { %v4802_v18 = vadd.f32 %v4801_v62, %v4745_v25 }
 0x4da   : > { %v4811_v14 = vadd.f32 %v4807_v61, %v4802_v18 }
 0x4dc   : > { %4816 = vst.msk [vmem:[%s313_s20 + $0x18] sm:$0xff] %vm4812_vm3, %v4811_v14 }
 0x4dd PF: > { %s18_s24 = sadd.s32 1, %s5195_s24  }
 0x4de   : > { %p15_p4 = scmp.ge.s32.totalorder %s18_s24, 4  }
 0x4e0   :  { %17 = sbr.rel (!%p15_p4) target bundleno = 1 (0x1), region = 97 }

</bundles_post_ra>
